<compile_context>
chip_gen: v7x
topology: tpu7x:2x2x1
jax: 0.10.0
libtpu: 0.0.40
codegen_flags: <defaults>
</compile_context>

<pallas_src>
import functools

import jax
import jax.numpy as jnp
from jax.experimental import pallas as pl
from jax.experimental.pallas import tpu as pltpu


def _hand_hmr_kernel(n_iter,
                     feat_ref, pose0_ref,
                     w1_ref, b1_ref, w2_ref, b2_ref, w3_ref, b3_ref,
                     wrf_ref, wrs_ref, br1_ref, wr2_ref, br2_ref,
                     wdec_ref, bdec_ref,
                     init_out, final_out, rot_out):
    f32 = jnp.float32
    bf16 = jnp.bfloat16

    feat = feat_ref[...]                      # (Bp, C) f32
    feat_b = feat.astype(bf16)                # bf16 only at matmul boundaries

    # ---- cam_init MLP: Linear(C,512) -> ReLU -> Linear(512,512) -> ReLU -> Linear(512,3) ----
    # Final Linear is zero-padded to 128 output lanes (cam in lanes 106..108), so its result
    # is already a lane-dense state-slab contribution.
    h = jnp.dot(feat_b, w1_ref[...], preferred_element_type=f32) + b1_ref[...]
    h = jnp.maximum(h, 0.0)
    h = jnp.dot(h.astype(bf16), w2_ref[...], preferred_element_type=f32) + b2_ref[...]
    h = jnp.maximum(h, 0.0)
    cam_slab = jnp.dot(h.astype(bf16), w3_ref[...], preferred_element_type=f32) + b3_ref[...]

    # Packed state slab (Bp, 128): [pose_6d planar 96 | shape 10 | cam 3 | pad 19]
    state = pose0_ref[...] + cam_slab          # broadcast (1,128) + (Bp,128)
    init_out[...] = state                      # one unmasked 128-lane store (cam_t.wp.init)

    # feat contribution to the refine first layer is loop-invariant -> hoist out of the loop.
    feat_contrib = jnp.dot(feat_b, wrf_ref[...], preferred_element_type=f32) + br1_ref[...]

    # ---- HMRLayer iterative refinement (Dropout = identity at inference) ----
    for _ in range(n_iter):                    # n_iter is a small static constant
        h = feat_contrib + jnp.dot(state.astype(bf16), wrs_ref[...],
                                   preferred_element_type=f32)
        h = jnp.maximum(h, 0.0)
        h = jnp.dot(h.astype(bf16), wr2_ref[...], preferred_element_type=f32) + br2_ref[...]
        h = jnp.maximum(h, 0.0)
        state = state + jnp.dot(h.astype(bf16), wdec_ref[...],
                                preferred_element_type=f32) + bdec_ref[...]

    final_out[...] = state                     # one unmasked 128-lane store

    # ---- rotation_6d_to_matrix epilogue, fused, pose already resident in registers ----
    # Planar pose layout: lanes [a1x(16) | a1y | a1z | a2x | a2y | a2z]; all slices 16 lanes.
    a1x = state[:, 0:16];  a1y = state[:, 16:32]; a1z = state[:, 32:48]
    a2x = state[:, 48:64]; a2y = state[:, 64:80]; a2z = state[:, 80:96]
    eps = 1e-12                                # F.normalize semantics: x / max(||x||, eps)
    n1 = jnp.sqrt(a1x * a1x + a1y * a1y + a1z * a1z)
    inv1 = 1.0 / jnp.maximum(n1, eps)
    b1x = a1x * inv1; b1y = a1y * inv1; b1z = a1z * inv1
    d = b1x * a2x + b1y * a2y + b1z * a2z
    u2x = a2x - d * b1x; u2y = a2y - d * b1y; u2z = a2z - d * b1z
    n2 = jnp.sqrt(u2x * u2x + u2y * u2y + u2z * u2z)
    inv2 = 1.0 / jnp.maximum(n2, eps)
    b2x = u2x * inv2; b2y = u2y * inv2; b2z = u2z * inv2
    b3x = b1y * b2z - b1z * b2y                # b3 = b1 x b2
    b3y = b1z * b2x - b1x * b2z
    b3z = b1x * b2y - b1y * b2x

    # Packed rotation slab (Bp, 256): lanes [b1x|b1y|b1z|b2x|b2y|b2z|b3x|b3y|b3z|pad].
    rot_out[...] = jnp.zeros_like(rot_out)
    rot_out[:, 0:16] = b1x;    rot_out[:, 16:32] = b1y;    rot_out[:, 32:48] = b1z
    rot_out[:, 48:64] = b2x;   rot_out[:, 64:80] = b2y;    rot_out[:, 80:96] = b2z
    rot_out[:, 96:112] = b3x;  rot_out[:, 112:128] = b3y;  rot_out[:, 128:144] = b3z


def init_params(key, feat_dim):
    """Deterministic synthetic parameters matching HandHMR's layer shapes (f32 storage)."""
    ks = jax.random.split(key, 8)
    f32 = jnp.float32

    def lin(k, fan_in, fan_out, scale=0.02):
        return scale * jax.random.normal(k, (fan_in, fan_out), f32)

    hmr_dim = feat_dim + 96 + 10 + 3   # feat + pose_6d + shape + cam_t/wp
    return dict(
        # cam_init: Linear(feat,512) ReLU Linear(512,512) ReLU Linear(512,3)
        w1=lin(ks[0], feat_dim, 512), b1=jnp.zeros((1, 512), f32),
        w2=lin(ks[1], 512, 512),      b2=jnp.zeros((1, 512), f32),
        w3=lin(ks[2], 512, 3),        b3=jnp.zeros((1, 3), f32),
        # HMRLayer refine: Linear(hmr_dim,1024) ReLU Drop Linear(1024,1024) ReLU Drop
        wr1=lin(ks[3], hmr_dim, 1024), br1=jnp.zeros((1, 1024), f32),
        wr2=lin(ks[4], 1024, 1024),    br2=jnp.zeros((1, 1024), f32),
        # decoders (xavier gain=0.01 in torch -> tiny random here)
        wdp=lin(ks[5], 1024, 96, 0.001), bdp=jnp.zeros((1, 96), f32),
        wdc=lin(ks[6], 1024, 3, 0.001),  bdc=jnp.zeros((1, 3), f32),
        wds=lin(ks[7], 1024, 10, 0.001), bds=jnp.zeros((1, 10), f32),
    )


def _planar_perm():
    # planar position p = comp*16 + joint  <-  original interleaved index 6*joint + comp
    p = jnp.arange(96)
    joint = p % 16
    comp = p // 16
    return 6 * joint + comp


def hand_hmr_forward(features_nchw, params, n_iter=3):
    f32 = jnp.float32
    bf16 = jnp.bfloat16
    B, C, H, W = features_nchw.shape

    # AdaptiveAvgPool2d(1) + flatten, done in XLA directly on NCHW -> (B, C)
    feat = jnp.mean(features_nchw, axis=(2, 3))

    # Pad batch to a sublane multiple (8).
    Bp = ((B + 7) // 8) * 8
    if Bp != B:
        feat = jnp.pad(feat, ((0, Bp - B), (0, 0)))

    perm = _planar_perm()
    mid = params["wr1"].shape[1]   # 1024

    # --- pack / permute weights once, outside the kernel ---
    # HMRLayer concat order is [feat | pose_6d | shape | cam_t/wp]
    # (state dict insertion order in init_vector_dict).
    wr1 = params["wr1"]
    wr1f = wr1[:C]                              # (C, 1024)
    wr1p = wr1[C:C + 96][perm]                  # pose rows, planar order
    wr1s = wr1[C + 96:C + 106]
    wr1c = wr1[C + 106:C + 109]
    wrs = jnp.concatenate([wr1p, wr1s, wr1c, jnp.zeros((19, mid), f32)], axis=0)   # (128, 1024)

    wdec = jnp.concatenate([params["wdp"][:, perm], params["wds"], params["wdc"],
                            jnp.zeros((mid, 19), f32)], axis=1)                    # (1024, 128)
    bdec = jnp.concatenate([params["bdp"][:, perm], params["bds"], params["bdc"],
                            jnp.zeros((1, 19), f32)], axis=1)                      # (1, 128)

    w3_pad = jnp.concatenate([jnp.zeros((512, 106), f32), params["w3"],
                              jnp.zeros((512, 19), f32)], axis=1)                  # (512, 128)
    b3_pad = jnp.concatenate([jnp.zeros((1, 106), f32), params["b3"],
                              jnp.zeros((1, 19), f32)], axis=1)                    # (1, 128)

    # Identity-rotation 6D init, planar layout: a1x = 1 (lanes 0..15), a2y = 1 (lanes 64..79).
    pose0 = jnp.zeros((1, 128), f32).at[0, 0:16].set(1.0).at[0, 64:80].set(1.0)

    vmem = pl.BlockSpec(memory_space=pltpu.MemorySpace.VMEM)
    init_slab, final_slab, rot_slab = pl.pallas_call(
        functools.partial(_hand_hmr_kernel, n_iter),
        out_shape=(jax.ShapeDtypeStruct((Bp, 128), f32),
                   jax.ShapeDtypeStruct((Bp, 128), f32),
                   jax.ShapeDtypeStruct((Bp, 256), f32)),
        in_specs=[vmem] * 15,
        out_specs=(vmem, vmem, vmem),
        compiler_params=pltpu.CompilerParams(vmem_limit_bytes=32 * 1024 * 1024),
    )(feat,
      pose0,
      params["w1"].astype(bf16), params["b1"],
      params["w2"].astype(bf16), params["b2"],
      w3_pad.astype(bf16), b3_pad,
      wr1f.astype(bf16), wrs.astype(bf16), params["br1"],
      params["wr2"].astype(bf16), params["br2"],
      wdec.astype(bf16), bdec)

    init_slab = init_slab[:B]
    final_slab = final_slab[:B]
    rot_slab = rot_slab[:B]

    # Un-pack the lane-dense slabs (cheap XLA slices/reshapes).
    pose_planar = final_slab[:, :96]
    pose_6d = pose_planar.reshape(B, 6, 16).transpose(0, 2, 1).reshape(B, 96)
    shape = final_slab[:, 96:106]
    cam_t = final_slab[:, 106:109]
    cam_init = init_slab[:, 106:109]
    pose = rot_slab[:, :144].reshape(B, 9, 16).transpose(0, 2, 1).reshape(B, 16, 3, 3)

    # xdict.replace_keys('/', '.') emulated with plain dict keys.
    return {
        "pose_6d": pose_6d,
        "shape": shape,
        "cam_t.wp": cam_t,
        "pose": pose,
        "cam_t.wp.init": cam_init,
    }


if __name__ == "__main__":
    key = jax.random.PRNGKey(0)
    k_feat, k_par = jax.random.split(key)

    # Small but representative shapes: feat_dim (=C) = 256, 8x8 spatial, batch 2.
    B, C, H, W = 2, 256, 8, 8
    features = jax.random.normal(k_feat, (B, C, H, W), jnp.float32)
    params = init_params(k_par, C)

    out = hand_hmr_forward(features, params, n_iter=3)
    out = jax.block_until_ready(out)

    # shape sanity
    assert out["pose_6d"].shape == (B, 96)
    assert out["shape"].shape == (B, 10)
    assert out["cam_t.wp"].shape == (B, 3)
    assert out["cam_t.wp.init"].shape == (B, 3)
    assert out["pose"].shape == (B, 16, 3, 3)

    # rotation matrices from Gram-Schmidt must be orthonormal: R @ R^T ≈ I
    R = out["pose"].reshape(B * 16, 3, 3)
    gram = jnp.einsum("nij,nkj->nik", R, R)
    eye = jnp.broadcast_to(jnp.eye(3, dtype=jnp.float32), gram.shape)
    assert bool(jnp.allclose(gram, eye, atol=1e-4)), "rotation matrices not orthonormal"

    print("KERNEL_OK")
</pallas_src>

<mosaic_0001>
module attributes {stable_mosaic.version = 11 : i64} {
  func.func @_hand_hmr_kernel(%arg0: memref<8x256xf32, #tpu.memory_space<vmem>>, %arg1: memref<1x128xf32, #tpu.memory_space<vmem>>, %arg2: memref<256x512xbf16, #tpu.memory_space<vmem>>, %arg3: memref<1x512xf32, #tpu.memory_space<vmem>>, %arg4: memref<512x512xbf16, #tpu.memory_space<vmem>>, %arg5: memref<1x512xf32, #tpu.memory_space<vmem>>, %arg6: memref<512x128xbf16, #tpu.memory_space<vmem>>, %arg7: memref<1x128xf32, #tpu.memory_space<vmem>>, %arg8: memref<256x1024xbf16, #tpu.memory_space<vmem>>, %arg9: memref<128x1024xbf16, #tpu.memory_space<vmem>>, %arg10: memref<1x1024xf32, #tpu.memory_space<vmem>>, %arg11: memref<1024x1024xbf16, #tpu.memory_space<vmem>>, %arg12: memref<1x1024xf32, #tpu.memory_space<vmem>>, %arg13: memref<1024x128xbf16, #tpu.memory_space<vmem>>, %arg14: memref<1x128xf32, #tpu.memory_space<vmem>>, %arg15: memref<8x128xf32, #tpu.memory_space<vmem>>, %arg16: memref<8x128xf32, #tpu.memory_space<vmem>>, %arg17: memref<8x256xf32, #tpu.memory_space<vmem>>) attributes {dimension_semantics = [], scalar_prefetch = 0 : i64, scratch_operands = 0 : i64, tpu.core_type = #tpu.core_type<tc>} {
    %c0 = arith.constant 0 : index
    %c0_0 = arith.constant 0 : index
    %0 = vector.load %arg0[%c0, %c0_0] : memref<8x256xf32, #tpu.memory_space<vmem>>, vector<8x256xf32>
    %1 = arith.truncf %0 : vector<8x256xf32> to vector<8x256xbf16>
    %c0_1 = arith.constant 0 : index
    %c0_2 = arith.constant 0 : index
    %2 = vector.load %arg2[%c0_1, %c0_2] : memref<256x512xbf16, #tpu.memory_space<vmem>>, vector<256x512xbf16>
    %cst = arith.constant dense<0.000000e+00> : vector<8x512xf32>
    %3 = tpu.matmul %1, %2, %cst {dimension_numbers = #tpu.dot_dimension_numbers<[1], [0], [0], [1], [0, 0, 1, 1], [], []>} : vector<8x256xbf16>, vector<256x512xbf16>, vector<8x512xf32> -> vector<8x512xf32>
    %c0_3 = arith.constant 0 : index
    %c0_4 = arith.constant 0 : index
    %4 = vector.load %arg3[%c0_3, %c0_4] : memref<1x512xf32, #tpu.memory_space<vmem>>, vector<1x512xf32>
    %5 = vector.broadcast %4 : vector<1x512xf32> to vector<8x512xf32>
    %6 = arith.addf %3, %5 : vector<8x512xf32>
    %cst_5 = arith.constant 0.000000e+00 : f32
    %7 = vector.broadcast %cst_5 : f32 to vector<8x512xf32>
    %8 = arith.maximumf %6, %7 : vector<8x512xf32>
    %9 = arith.truncf %8 : vector<8x512xf32> to vector<8x512xbf16>
    %c0_6 = arith.constant 0 : index
    %c0_7 = arith.constant 0 : index
    %10 = vector.load %arg4[%c0_6, %c0_7] : memref<512x512xbf16, #tpu.memory_space<vmem>>, vector<512x512xbf16>
    %cst_8 = arith.constant dense<0.000000e+00> : vector<8x512xf32>
    %11 = tpu.matmul %9, %10, %cst_8 {dimension_numbers = #tpu.dot_dimension_numbers<[1], [0], [0], [1], [0, 0, 1, 1], [], []>} : vector<8x512xbf16>, vector<512x512xbf16>, vector<8x512xf32> -> vector<8x512xf32>
    %c0_9 = arith.constant 0 : index
    %c0_10 = arith.constant 0 : index
    %12 = vector.load %arg5[%c0_9, %c0_10] : memref<1x512xf32, #tpu.memory_space<vmem>>, vector<1x512xf32>
    %13 = vector.broadcast %12 : vector<1x512xf32> to vector<8x512xf32>
    %14 = arith.addf %11, %13 : vector<8x512xf32>
    %cst_11 = arith.constant 0.000000e+00 : f32
    %15 = vector.broadcast %cst_11 : f32 to vector<8x512xf32>
    %16 = arith.maximumf %14, %15 : vector<8x512xf32>
    %17 = arith.truncf %16 : vector<8x512xf32> to vector<8x512xbf16>
    %c0_12 = arith.constant 0 : index
    %c0_13 = arith.constant 0 : index
    %18 = vector.load %arg6[%c0_12, %c0_13] : memref<512x128xbf16, #tpu.memory_space<vmem>>, vector<512x128xbf16>
    %cst_14 = arith.constant dense<0.000000e+00> : vector<8x128xf32>
    %19 = tpu.matmul %17, %18, %cst_14 {dimension_numbers = #tpu.dot_dimension_numbers<[1], [0], [0], [1], [0, 0, 1, 1], [], []>} : vector<8x512xbf16>, vector<512x128xbf16>, vector<8x128xf32> -> vector<8x128xf32>
    %c0_15 = arith.constant 0 : index
    %c0_16 = arith.constant 0 : index
    %20 = vector.load %arg7[%c0_15, %c0_16] : memref<1x128xf32, #tpu.memory_space<vmem>>, vector<1x128xf32>
    %21 = vector.broadcast %20 : vector<1x128xf32> to vector<8x128xf32>
    %22 = arith.addf %19, %21 : vector<8x128xf32>
    %c0_17 = arith.constant 0 : index
    %c0_18 = arith.constant 0 : index
    %23 = vector.load %arg1[%c0_17, %c0_18] : memref<1x128xf32, #tpu.memory_space<vmem>>, vector<1x128xf32>
    %24 = vector.broadcast %23 : vector<1x128xf32> to vector<8x128xf32>
    %25 = arith.addf %24, %22 : vector<8x128xf32>
    %c0_19 = arith.constant 0 : index
    %c0_20 = arith.constant 0 : index
    %26 = vector.load %arg15[%c0_19, %c0_20] : memref<8x128xf32, #tpu.memory_space<vmem>>, vector<8x128xf32>
    tpu.vector_store %arg15[%c0_19, %c0_20], %25 {strides = array<i32>} : memref<8x128xf32, #tpu.memory_space<vmem>>, vector<8x128xf32>,
    %c0_21 = arith.constant 0 : index
    %c0_22 = arith.constant 0 : index
    %27 = vector.load %arg8[%c0_21, %c0_22] : memref<256x1024xbf16, #tpu.memory_space<vmem>>, vector<256x1024xbf16>
    %cst_23 = arith.constant dense<0.000000e+00> : vector<8x1024xf32>
    %28 = tpu.matmul %1, %27, %cst_23 {dimension_numbers = #tpu.dot_dimension_numbers<[1], [0], [0], [1], [0, 0, 1, 1], [], []>} : vector<8x256xbf16>, vector<256x1024xbf16>, vector<8x1024xf32> -> vector<8x1024xf32>
    %c0_24 = arith.constant 0 : index
    %c0_25 = arith.constant 0 : index
    %29 = vector.load %arg10[%c0_24, %c0_25] : memref<1x1024xf32, #tpu.memory_space<vmem>>, vector<1x1024xf32>
    %30 = vector.broadcast %29 : vector<1x1024xf32> to vector<8x1024xf32>
    %31 = arith.addf %28, %30 : vector<8x1024xf32>
    %32 = arith.truncf %25 : vector<8x128xf32> to vector<8x128xbf16>
    %c0_26 = arith.constant 0 : index
    %c0_27 = arith.constant 0 : index
    %33 = vector.load %arg9[%c0_26, %c0_27] : memref<128x1024xbf16, #tpu.memory_space<vmem>>, vector<128x1024xbf16>
    %cst_28 = arith.constant dense<0.000000e+00> : vector<8x1024xf32>
    %34 = tpu.matmul %32, %33, %cst_28 {dimension_numbers = #tpu.dot_dimension_numbers<[1], [0], [0], [1], [0, 0, 1, 1], [], []>} : vector<8x128xbf16>, vector<128x1024xbf16>, vector<8x1024xf32> -> vector<8x1024xf32>
    %35 = arith.addf %31, %34 : vector<8x1024xf32>
    %cst_29 = arith.constant 0.000000e+00 : f32
    %36 = vector.broadcast %cst_29 : f32 to vector<8x1024xf32>
    %37 = arith.maximumf %35, %36 : vector<8x1024xf32>
    %38 = arith.truncf %37 : vector<8x1024xf32> to vector<8x1024xbf16>
    %c0_30 = arith.constant 0 : index
    %c0_31 = arith.constant 0 : index
    %39 = vector.load %arg11[%c0_30, %c0_31] : memref<1024x1024xbf16, #tpu.memory_space<vmem>>, vector<1024x1024xbf16>
    %cst_32 = arith.constant dense<0.000000e+00> : vector<8x1024xf32>
    %40 = tpu.matmul %38, %39, %cst_32 {dimension_numbers = #tpu.dot_dimension_numbers<[1], [0], [0], [1], [0, 0, 1, 1], [], []>} : vector<8x1024xbf16>, vector<1024x1024xbf16>, vector<8x1024xf32> -> vector<8x1024xf32>
    %c0_33 = arith.constant 0 : index
    %c0_34 = arith.constant 0 : index
    %41 = vector.load %arg12[%c0_33, %c0_34] : memref<1x1024xf32, #tpu.memory_space<vmem>>, vector<1x1024xf32>
    %42 = vector.broadcast %41 : vector<1x1024xf32> to vector<8x1024xf32>
    %43 = arith.addf %40, %42 : vector<8x1024xf32>
    %cst_35 = arith.constant 0.000000e+00 : f32
    %44 = vector.broadcast %cst_35 : f32 to vector<8x1024xf32>
    %45 = arith.maximumf %43, %44 : vector<8x1024xf32>
    %46 = arith.truncf %45 : vector<8x1024xf32> to vector<8x1024xbf16>
    %c0_36 = arith.constant 0 : index
    %c0_37 = arith.constant 0 : index
    %47 = vector.load %arg13[%c0_36, %c0_37] : memref<1024x128xbf16, #tpu.memory_space<vmem>>, vector<1024x128xbf16>
    %cst_38 = arith.constant dense<0.000000e+00> : vector<8x128xf32>
    %48 = tpu.matmul %46, %47, %cst_38 {dimension_numbers = #tpu.dot_dimension_numbers<[1], [0], [0], [1], [0, 0, 1, 1], [], []>} : vector<8x1024xbf16>, vector<1024x128xbf16>, vector<8x128xf32> -> vector<8x128xf32>
    %49 = arith.addf %25, %48 : vector<8x128xf32>
    %c0_39 = arith.constant 0 : index
    %c0_40 = arith.constant 0 : index
    %50 = vector.load %arg14[%c0_39, %c0_40] : memref<1x128xf32, #tpu.memory_space<vmem>>, vector<1x128xf32>
    %51 = vector.broadcast %50 : vector<1x128xf32> to vector<8x128xf32>
    %52 = arith.addf %49, %51 : vector<8x128xf32>
    %53 = arith.truncf %52 : vector<8x128xf32> to vector<8x128xbf16>
    %c0_41 = arith.constant 0 : index
    %c0_42 = arith.constant 0 : index
    %54 = vector.load %arg9[%c0_41, %c0_42] : memref<128x1024xbf16, #tpu.memory_space<vmem>>, vector<128x1024xbf16>
    %cst_43 = arith.constant dense<0.000000e+00> : vector<8x1024xf32>
    %55 = tpu.matmul %53, %54, %cst_43 {dimension_numbers = #tpu.dot_dimension_numbers<[1], [0], [0], [1], [0, 0, 1, 1], [], []>} : vector<8x128xbf16>, vector<128x1024xbf16>, vector<8x1024xf32> -> vector<8x1024xf32>
    %56 = arith.addf %31, %55 : vector<8x1024xf32>
    %cst_44 = arith.constant 0.000000e+00 : f32
    %57 = vector.broadcast %cst_44 : f32 to vector<8x1024xf32>
    %58 = arith.maximumf %56, %57 : vector<8x1024xf32>
    %59 = arith.truncf %58 : vector<8x1024xf32> to vector<8x1024xbf16>
    %c0_45 = arith.constant 0 : index
    %c0_46 = arith.constant 0 : index
    %60 = vector.load %arg11[%c0_45, %c0_46] : memref<1024x1024xbf16, #tpu.memory_space<vmem>>, vector<1024x1024xbf16>
    %cst_47 = arith.constant dense<0.000000e+00> : vector<8x1024xf32>
    %61 = tpu.matmul %59, %60, %cst_47 {dimension_numbers = #tpu.dot_dimension_numbers<[1], [0], [0], [1], [0, 0, 1, 1], [], []>} : vector<8x1024xbf16>, vector<1024x1024xbf16>, vector<8x1024xf32> -> vector<8x1024xf32>
    %c0_48 = arith.constant 0 : index
    %c0_49 = arith.constant 0 : index
    %62 = vector.load %arg12[%c0_48, %c0_49] : memref<1x1024xf32, #tpu.memory_space<vmem>>, vector<1x1024xf32>
    %63 = vector.broadcast %62 : vector<1x1024xf32> to vector<8x1024xf32>
    %64 = arith.addf %61, %63 : vector<8x1024xf32>
    %cst_50 = arith.constant 0.000000e+00 : f32
    %65 = vector.broadcast %cst_50 : f32 to vector<8x1024xf32>
    %66 = arith.maximumf %64, %65 : vector<8x1024xf32>
    %67 = arith.truncf %66 : vector<8x1024xf32> to vector<8x1024xbf16>
    %c0_51 = arith.constant 0 : index
    %c0_52 = arith.constant 0 : index
    %68 = vector.load %arg13[%c0_51, %c0_52] : memref<1024x128xbf16, #tpu.memory_space<vmem>>, vector<1024x128xbf16>
    %cst_53 = arith.constant dense<0.000000e+00> : vector<8x128xf32>
    %69 = tpu.matmul %67, %68, %cst_53 {dimension_numbers = #tpu.dot_dimension_numbers<[1], [0], [0], [1], [0, 0, 1, 1], [], []>} : vector<8x1024xbf16>, vector<1024x128xbf16>, vector<8x128xf32> -> vector<8x128xf32>
    %70 = arith.addf %52, %69 : vector<8x128xf32>
    %c0_54 = arith.constant 0 : index
    %c0_55 = arith.constant 0 : index
    %71 = vector.load %arg14[%c0_54, %c0_55] : memref<1x128xf32, #tpu.memory_space<vmem>>, vector<1x128xf32>
    %72 = vector.broadcast %71 : vector<1x128xf32> to vector<8x128xf32>
    %73 = arith.addf %70, %72 : vector<8x128xf32>
    %74 = arith.truncf %73 : vector<8x128xf32> to vector<8x128xbf16>
    %c0_56 = arith.constant 0 : index
    %c0_57 = arith.constant 0 : index
    %75 = vector.load %arg9[%c0_56, %c0_57] : memref<128x1024xbf16, #tpu.memory_space<vmem>>, vector<128x1024xbf16>
    %cst_58 = arith.constant dense<0.000000e+00> : vector<8x1024xf32>
    %76 = tpu.matmul %74, %75, %cst_58 {dimension_numbers = #tpu.dot_dimension_numbers<[1], [0], [0], [1], [0, 0, 1, 1], [], []>} : vector<8x128xbf16>, vector<128x1024xbf16>, vector<8x1024xf32> -> vector<8x1024xf32>
    %77 = arith.addf %31, %76 : vector<8x1024xf32>
    %cst_59 = arith.constant 0.000000e+00 : f32
    %78 = vector.broadcast %cst_59 : f32 to vector<8x1024xf32>
    %79 = arith.maximumf %77, %78 : vector<8x1024xf32>
    %80 = arith.truncf %79 : vector<8x1024xf32> to vector<8x1024xbf16>
    %c0_60 = arith.constant 0 : index
    %c0_61 = arith.constant 0 : index
    %81 = vector.load %arg11[%c0_60, %c0_61] : memref<1024x1024xbf16, #tpu.memory_space<vmem>>, vector<1024x1024xbf16>
    %cst_62 = arith.constant dense<0.000000e+00> : vector<8x1024xf32>
    %82 = tpu.matmul %80, %81, %cst_62 {dimension_numbers = #tpu.dot_dimension_numbers<[1], [0], [0], [1], [0, 0, 1, 1], [], []>} : vector<8x1024xbf16>, vector<1024x1024xbf16>, vector<8x1024xf32> -> vector<8x1024xf32>
    %c0_63 = arith.constant 0 : index
    %c0_64 = arith.constant 0 : index
    %83 = vector.load %arg12[%c0_63, %c0_64] : memref<1x1024xf32, #tpu.memory_space<vmem>>, vector<1x1024xf32>
    %84 = vector.broadcast %83 : vector<1x1024xf32> to vector<8x1024xf32>
    %85 = arith.addf %82, %84 : vector<8x1024xf32>
    %cst_65 = arith.constant 0.000000e+00 : f32
    %86 = vector.broadcast %cst_65 : f32 to vector<8x1024xf32>
    %87 = arith.maximumf %85, %86 : vector<8x1024xf32>
    %88 = arith.truncf %87 : vector<8x1024xf32> to vector<8x1024xbf16>
    %c0_66 = arith.constant 0 : index
    %c0_67 = arith.constant 0 : index
    %89 = vector.load %arg13[%c0_66, %c0_67] : memref<1024x128xbf16, #tpu.memory_space<vmem>>, vector<1024x128xbf16>
    %cst_68 = arith.constant dense<0.000000e+00> : vector<8x128xf32>
    %90 = tpu.matmul %88, %89, %cst_68 {dimension_numbers = #tpu.dot_dimension_numbers<[1], [0], [0], [1], [0, 0, 1, 1], [], []>} : vector<8x1024xbf16>, vector<1024x128xbf16>, vector<8x128xf32> -> vector<8x128xf32>
    %91 = arith.addf %73, %90 : vector<8x128xf32>
    %c0_69 = arith.constant 0 : index
    %c0_70 = arith.constant 0 : index
    %92 = vector.load %arg14[%c0_69, %c0_70] : memref<1x128xf32, #tpu.memory_space<vmem>>, vector<1x128xf32>
    %93 = vector.broadcast %92 : vector<1x128xf32> to vector<8x128xf32>
    %94 = arith.addf %91, %93 : vector<8x128xf32>
    %c0_71 = arith.constant 0 : index
    %c0_72 = arith.constant 0 : index
    %95 = vector.load %arg16[%c0_71, %c0_72] : memref<8x128xf32, #tpu.memory_space<vmem>>, vector<8x128xf32>
    tpu.vector_store %arg16[%c0_71, %c0_72], %94 {strides = array<i32>} : memref<8x128xf32, #tpu.memory_space<vmem>>, vector<8x128xf32>,
    %96 = vector.extract_strided_slice %94 {offsets = [0, 0], sizes = [8, 16], strides = [1, 1]} : vector<8x128xf32> to vector<8x16xf32>
    %97 = vector.extract_strided_slice %94 {offsets = [0, 16], sizes = [8, 16], strides = [1, 1]} : vector<8x128xf32> to vector<8x16xf32>
    %98 = vector.extract_strided_slice %94 {offsets = [0, 32], sizes = [8, 16], strides = [1, 1]} : vector<8x128xf32> to vector<8x16xf32>
    %99 = vector.extract_strided_slice %94 {offsets = [0, 48], sizes = [8, 16], strides = [1, 1]} : vector<8x128xf32> to vector<8x16xf32>
    %100 = vector.extract_strided_slice %94 {offsets = [0, 64], sizes = [8, 16], strides = [1, 1]} : vector<8x128xf32> to vector<8x16xf32>
    %101 = vector.extract_strided_slice %94 {offsets = [0, 80], sizes = [8, 16], strides = [1, 1]} : vector<8x128xf32> to vector<8x16xf32>
    %102 = arith.mulf %96, %96 : vector<8x16xf32>
    %103 = arith.mulf %97, %97 : vector<8x16xf32>
    %104 = arith.addf %102, %103 : vector<8x16xf32>
    %105 = arith.mulf %98, %98 : vector<8x16xf32>
    %106 = arith.addf %104, %105 : vector<8x16xf32>
    %107 = math.sqrt %106 : vector<8x16xf32>
    %cst_73 = arith.constant 9.99999996E-13 : f32
    %108 = vector.broadcast %cst_73 : f32 to vector<8x16xf32>
    %109 = arith.maximumf %107, %108 : vector<8x16xf32>
    %cst_74 = arith.constant 1.000000e+00 : f32
    %110 = vector.broadcast %cst_74 : f32 to vector<8x16xf32>
    %111 = arith.divf %110, %109 : vector<8x16xf32>
    %112 = arith.mulf %96, %111 : vector<8x16xf32>
    %113 = arith.mulf %97, %111 : vector<8x16xf32>
    %114 = arith.mulf %98, %111 : vector<8x16xf32>
    %115 = arith.mulf %112, %99 : vector<8x16xf32>
    %116 = arith.mulf %113, %100 : vector<8x16xf32>
    %117 = arith.addf %115, %116 : vector<8x16xf32>
    %118 = arith.mulf %114, %101 : vector<8x16xf32>
    %119 = arith.addf %117, %118 : vector<8x16xf32>
    %120 = arith.mulf %119, %112 : vector<8x16xf32>
    %121 = arith.subf %99, %120 : vector<8x16xf32>
    %122 = arith.mulf %119, %113 : vector<8x16xf32>
    %123 = arith.subf %100, %122 : vector<8x16xf32>
    %124 = arith.mulf %119, %114 : vector<8x16xf32>
    %125 = arith.subf %101, %124 : vector<8x16xf32>
    %126 = arith.mulf %121, %121 : vector<8x16xf32>
    %127 = arith.mulf %123, %123 : vector<8x16xf32>
    %128 = arith.addf %126, %127 : vector<8x16xf32>
    %129 = arith.mulf %125, %125 : vector<8x16xf32>
    %130 = arith.addf %128, %129 : vector<8x16xf32>
    %131 = math.sqrt %130 : vector<8x16xf32>
    %cst_75 = arith.constant 9.99999996E-13 : f32
    %132 = vector.broadcast %cst_75 : f32 to vector<8x16xf32>
    %133 = arith.maximumf %131, %132 : vector<8x16xf32>
    %cst_76 = arith.constant 1.000000e+00 : f32
    %134 = vector.broadcast %cst_76 : f32 to vector<8x16xf32>
    %135 = arith.divf %134, %133 : vector<8x16xf32>
    %136 = arith.mulf %121, %135 : vector<8x16xf32>
    %137 = arith.mulf %123, %135 : vector<8x16xf32>
    %138 = arith.mulf %125, %135 : vector<8x16xf32>
    %139 = arith.mulf %113, %138 : vector<8x16xf32>
    %140 = arith.mulf %114, %137 : vector<8x16xf32>
    %141 = arith.subf %139, %140 : vector<8x16xf32>
    %142 = arith.mulf %114, %136 : vector<8x16xf32>
    %143 = arith.mulf %112, %138 : vector<8x16xf32>
    %144 = arith.subf %142, %143 : vector<8x16xf32>
    %145 = arith.mulf %112, %137 : vector<8x16xf32>
    %146 = arith.mulf %113, %136 : vector<8x16xf32>
    %147 = arith.subf %145, %146 : vector<8x16xf32>
    %cst_77 = arith.constant 0.000000e+00 : f32
    %148 = vector.broadcast %cst_77 : f32 to vector<8x256xf32>
    %c0_78 = arith.constant 0 : index
    %c0_79 = arith.constant 0 : index
    %149 = vector.load %arg17[%c0_78, %c0_79] : memref<8x256xf32, #tpu.memory_space<vmem>>, vector<8x256xf32>
    tpu.vector_store %arg17[%c0_78, %c0_79], %148 {strides = array<i32>} : memref<8x256xf32, #tpu.memory_space<vmem>>, vector<8x256xf32>,
    %c0_80 = arith.constant 0 : index
    %c0_81 = arith.constant 0 : index
    %150 = vector.load %arg17[%c0_80, %c0_81] : memref<8x256xf32, #tpu.memory_space<vmem>>, vector<8x16xf32>
    tpu.vector_store %arg17[%c0_80, %c0_81], %112 {strides = array<i32>} : memref<8x256xf32, #tpu.memory_space<vmem>>, vector<8x16xf32>,
    %c0_82 = arith.constant 0 : index
    %c16 = arith.constant 16 : index
    %151 = vector.load %arg17[%c0_82, %c16] : memref<8x256xf32, #tpu.memory_space<vmem>>, vector<8x16xf32>
    tpu.vector_store %arg17[%c0_82, %c16], %113 {strides = array<i32>} : memref<8x256xf32, #tpu.memory_space<vmem>>, vector<8x16xf32>,
    %c0_83 = arith.constant 0 : index
    %c32 = arith.constant 32 : index
    %152 = vector.load %arg17[%c0_83, %c32] : memref<8x256xf32, #tpu.memory_space<vmem>>, vector<8x16xf32>
    tpu.vector_store %arg17[%c0_83, %c32], %114 {strides = array<i32>} : memref<8x256xf32, #tpu.memory_space<vmem>>, vector<8x16xf32>,
    %c0_84 = arith.constant 0 : index
    %c48 = arith.constant 48 : index
    %153 = vector.load %arg17[%c0_84, %c48] : memref<8x256xf32, #tpu.memory_space<vmem>>, vector<8x16xf32>
    tpu.vector_store %arg17[%c0_84, %c48], %136 {strides = array<i32>} : memref<8x256xf32, #tpu.memory_space<vmem>>, vector<8x16xf32>,
    %c0_85 = arith.constant 0 : index
    %c64 = arith.constant 64 : index
    %154 = vector.load %arg17[%c0_85, %c64] : memref<8x256xf32, #tpu.memory_space<vmem>>, vector<8x16xf32>
    tpu.vector_store %arg17[%c0_85, %c64], %137 {strides = array<i32>} : memref<8x256xf32, #tpu.memory_space<vmem>>, vector<8x16xf32>,
    %c0_86 = arith.constant 0 : index
    %c80 = arith.constant 80 : index
    %155 = vector.load %arg17[%c0_86, %c80] : memref<8x256xf32, #tpu.memory_space<vmem>>, vector<8x16xf32>
    tpu.vector_store %arg17[%c0_86, %c80], %138 {strides = array<i32>} : memref<8x256xf32, #tpu.memory_space<vmem>>, vector<8x16xf32>,
    %c0_87 = arith.constant 0 : index
    %c96 = arith.constant 96 : index
    %156 = vector.load %arg17[%c0_87, %c96] : memref<8x256xf32, #tpu.memory_space<vmem>>, vector<8x16xf32>
    tpu.vector_store %arg17[%c0_87, %c96], %141 {strides = array<i32>} : memref<8x256xf32, #tpu.memory_space<vmem>>, vector<8x16xf32>,
    %c0_88 = arith.constant 0 : index
    %c112 = arith.constant 112 : index
    %157 = vector.load %arg17[%c0_88, %c112] : memref<8x256xf32, #tpu.memory_space<vmem>>, vector<8x16xf32>
    tpu.vector_store %arg17[%c0_88, %c112], %144 {strides = array<i32>} : memref<8x256xf32, #tpu.memory_space<vmem>>, vector<8x16xf32>,
    %c0_89 = arith.constant 0 : index
    %c128 = arith.constant 128 : index
    %158 = vector.load %arg17[%c0_89, %c128] : memref<8x256xf32, #tpu.memory_space<vmem>>, vector<8x16xf32>
    tpu.vector_store %arg17[%c0_89, %c128], %147 {strides = array<i32>} : memref<8x256xf32, #tpu.memory_space<vmem>>, vector<8x16xf32>,
    return
  }
}

</mosaic_0001>

<bundles_post_ra>
// kernel: tpu_custom_call.1
= control target key start
LH: loop header
LB: loop body
LE: loop exit
PB: predicated region body
PF: predicated region fallthrough
CT: control target
= control target key end

     0   :  { %s16546_s0 = inlined_call_operand.hbm [shape: f32[8,256], index: 0, kind: input, shape index: {}]   ;;  %s16547_s1 = inlined_call_operand.hbm [shape: f32[1,128], index: 1, kind: input, shape index: {}]   ;;  %s16548_s2 = inlined_call_operand.hbm [shape: bf16[256,512], index: 2, kind: input, shape index: {}]   ;;  %s16549_s3 = inlined_call_operand.hbm [shape: f32[1,512], index: 3, kind: input, shape index: {}]   ;;  %s16550_s4 = inlined_call_operand.hbm [shape: bf16[512,512], index: 4, kind: input, shape index: {}]   ;;  %s16551_s5 = inlined_call_operand.hbm [shape: f32[1,512], index: 5, kind: input, shape index: {}]   ;;  %s16552_s6 = inlined_call_operand.hbm [shape: bf16[512,128], index: 6, kind: input, shape index: {}]   ;;  %s16553_s7 = inlined_call_operand.hbm [shape: f32[1,128], index: 7, kind: input, shape index: {}]   ;;  %s16554_s8 = inlined_call_operand.hbm [shape: bf16[256,1024], index: 8, kind: input, shape index: {}]   ;;  %s16555_s9 = inlined_call_operand.hbm [shape: bf16[128,1024], index: 9, kind: input, shape index: {}]   ;;  %s16556_s10 = inlined_call_operand.hbm [shape: f32[1,1024], index: 10, kind: input, shape index: {}]   ;;  %s16557_s11 = inlined_call_operand.hbm [shape: bf16[1024,1024], index: 11, kind: input, shape index: {}]   ;;  %s16558_s12 = inlined_call_operand.hbm [shape: f32[1,1024], index: 12, kind: input, shape index: {}]   ;;  %s16559_s13 = inlined_call_operand.hbm [shape: bf16[1024,128], index: 13, kind: input, shape index: {}]   ;;  %s16560_s14 = inlined_call_operand.hbm [shape: f32[1,128], index: 14, kind: input, shape index: {}]   ;;  %s16561_s15 = inlined_call_operand.hbm [shape: f32[8,128], index: 15, kind: output, shape index: {0}]   ;;  %s16562_s16 = inlined_call_operand.hbm [shape: f32[8,128], index: 16, kind: output, shape index: {1}]   ;;  %s16563_s17 = inlined_call_operand.hbm [shape: f32[8,256], index: 17, kind: output, shape index: {2}]  }
   0x1   :  { %17682 = sst [smem:[#allocation608_spill]] %s16546_s0 }
   0x2   :  { %17683 = sst [smem:[#allocation609_spill]] %s16547_s1 }
   0x3   :  { %23 = vsyncpa [#allocation3], 0 }
   0x4   :  { %24 = vsyncpa [#allocation6], 0 }
   0x5   :  { %25 = vsyncpa [#allocation9], 0 }
   0x6   :  { %26 = vsyncpa [#allocation12], 0 }
   0x7   :  { %27 = vsyncpa [#allocation15], 0 }
   0x8   :  { %28 = vsyncpa [#allocation18], 0 }
   0x9   :  { %29 = vsyncpa [#allocation21], 0 }
   0xa   :  { %30 = vsyncpa [#allocation24], 0 }
   0xb   :  { %31 = vsyncpa [#allocation4], 0 }
   0xc   :  { %32 = vsyncpa [#allocation28], 0  ;;  %s12795_s24 = smov [#allocation5]   ;;  %s12796_s26 = smov [#allocation8]  }
   0xd   :  { %s49_s25 = sshll.u32 %s12795_s24, 4  ;;  %s71_s27 = sshll.u32 %s12796_s26, 4  ;;  %s50_s25 = int_to_ptr.vmem [resolvable:$true] %s49_s25  ;;  %s72_s27 = int_to_ptr.vmem [resolvable:$true] %s71_s27 }
   0xe   :  { %s17684_s0 = sld [smem:[#allocation609_spill]] }
  0x14   :  { %s12379_s30 = scalar_lea.hbm %s17684_s0, 16 }
  0x15   :  { %p12380_p0 = scmp.ne.s32.totalorder %s17684_s0, %s12379_s30  ;;  %p12383_p1 = scmp.lt.u32.totalorder %s12379_s30, %s17684_s0 }
  0x17   :  { %p12385_p2 = pnand %p12383_p1, %p12380_p0 }
  0x19   :  { %12388 = shalt.err (!%p12385_p2)
}
  0x1a   :  { %s12389_s21 = scalar_lea.vmem %s50_s25, 16  ;;  %s12393_s22 = scalar_lea.vmem %s50_s25, 32 }
  0x1b   :  { %p12390_p3 = scmp.ne.s32.totalorder %s50_s25, %s12389_s21  ;;  %p12394_p4 = scmp.lt.s32.totalorder %s50_s25, %s50_s25 }
  0x1c   :  { %p12395_p5 = scmp.lt.s32.totalorder %s12393_s22, %s12389_s21 }
  0x1e   :  { %p12396_p6 = por %p12395_p5, %p12394_p4 }
  0x20   :  { %p12397_p7 = pnand %p12396_p6, %p12390_p3 }
  0x22   :  { %12400 = shalt.err (!%p12397_p7)
}
  0x23   :  { %52 = dma.hbm_to_vmem [thread:$0]  %s17684_s0, 16, %s50_s25, [#allocation6]  }
  0x24   :  { %s12401_s29 = scalar_lea.hbm %s16549_s3, 64 }
  0x25   :  { %p12402_p8 = scmp.ne.s32.totalorder %s16549_s3, %s12401_s29  ;;  %p12405_p9 = scmp.lt.u32.totalorder %s12401_s29, %s16549_s3 }
  0x27   :  { %p12407_p10 = pnand %p12405_p9, %p12402_p8 }
  0x29   :  { %12410 = shalt.err (!%p12407_p10)
}
  0x2a   :  { %s12411_s20 = scalar_lea.vmem %s72_s27, 64  ;;  %p12416_p12 = scmp.lt.s32.totalorder %s72_s27, %s72_s27 }
  0x2b   :  { %p12412_p11 = scmp.ne.s32.totalorder %s72_s27, %s12411_s20  ;;  %p12417_p13 = scmp.lt.s32.totalorder %s12411_s20, %s12411_s20 }
  0x2d   :  { %p12418_p0 = por %p12417_p13, %p12416_p12 }
  0x2f   :  { %p12419_p1 = pnand %p12418_p0, %p12412_p11 }
  0x31   :  { %12422 = shalt.err (!%p12419_p1)
}
  0x32   :  { %74 = dma.hbm_to_vmem [thread:$0]  %s16549_s3, 64, %s72_s27, [#allocation9]  }
  0x33   :  { %s12797_s21 = smov [#allocation11]   ;;  %s12798_s23 = smov [#allocation14]  }
  0x34   :  { %s93_s22 = sshll.u32 %s12797_s21, 4  ;;  %s115_s24 = sshll.u32 %s12798_s23, 4  ;;  %s94_s22 = int_to_ptr.vmem [resolvable:$true] %s93_s22  ;;  %s116_s24 = int_to_ptr.vmem [resolvable:$true] %s115_s24 }
  0x35   :  { %s12423_s29 = scalar_lea.hbm %s16551_s5, 64 }
  0x36   :  { %p12424_p2 = scmp.ne.s32.totalorder %s16551_s5, %s12423_s29  ;;  %p12427_p3 = scmp.lt.u32.totalorder %s12423_s29, %s16551_s5 }
  0x38   :  { %p12429_p4 = pnand %p12427_p3, %p12424_p2 }
  0x3a   :  { %12432 = shalt.err (!%p12429_p4)
}
  0x3b   :  { %s12433_s3 = scalar_lea.vmem %s94_s22, 64  ;;  %p12438_p6 = scmp.lt.s32.totalorder %s94_s22, %s94_s22 }
  0x3c   :  { %p12434_p5 = scmp.ne.s32.totalorder %s94_s22, %s12433_s3  ;;  %p12439_p7 = scmp.lt.s32.totalorder %s12433_s3, %s12433_s3 }
  0x3e   :  { %p12440_p8 = por %p12439_p7, %p12438_p6 }
  0x40   :  { %p12441_p9 = pnand %p12440_p8, %p12434_p5 }
  0x42   :  { %12444 = shalt.err (!%p12441_p9)
}
  0x43   :  { %96 = dma.hbm_to_vmem [thread:$0]  %s16551_s5, 64, %s94_s22, [#allocation12]  }
  0x44   :  { %s12445_s21 = scalar_lea.hbm %s16553_s7, 16 }
  0x45   :  { %p12446_p10 = scmp.ne.s32.totalorder %s16553_s7, %s12445_s21  ;;  %p12449_p11 = scmp.lt.u32.totalorder %s12445_s21, %s16553_s7 }
  0x47   :  { %p12451_p12 = pnand %p12449_p11, %p12446_p10 }
  0x49   :  { %12454 = shalt.err (!%p12451_p12)
}
  0x4a   :  { %s12455_s18 = scalar_lea.vmem %s116_s24, 16  ;;  %s12459_s30 = scalar_lea.vmem %s116_s24, 32 }
  0x4b   :  { %p12456_p13 = scmp.ne.s32.totalorder %s116_s24, %s12455_s18  ;;  %p12460_p0 = scmp.lt.s32.totalorder %s116_s24, %s116_s24 }
  0x4c   :  { %p12461_p1 = scmp.lt.s32.totalorder %s12459_s30, %s12455_s18 }
  0x4e   :  { %p12462_p2 = por %p12461_p1, %p12460_p0 }
  0x50   :  { %p12463_p3 = pnand %p12462_p2, %p12456_p13 }
  0x52   :  { %12466 = shalt.err (!%p12463_p3)
}
  0x53   :  { %118 = dma.hbm_to_vmem [thread:$0]  %s16553_s7, 16, %s116_s24, [#allocation15]  }
  0x54   :  { %s12799_s19 = smov [#allocation17]   ;;  %s12800_s3 = smov [#allocation20]  }
  0x55   :  { %s136_s1 = sshll.u32 %s12799_s19, 4  ;;  %s158_s27 = sshll.u32 %s12800_s3, 4  ;;  %s137_s1 = int_to_ptr.vmem [resolvable:$true] %s136_s1  ;;  %s12963_s27 = int_to_ptr.vmem [resolvable:$true] %s158_s27 }
  0x56   :  { %s12467_s0 = scalar_lea.hbm %s16555_s9, 8192 }
  0x57   :  { %p12468_p4 = scmp.ne.s32.totalorder %s16555_s9, %s12467_s0  ;;  %p12471_p5 = scmp.lt.u32.totalorder %s12467_s0, %s16555_s9 }
  0x59   :  { %p12473_p6 = pnand %p12471_p5, %p12468_p4 }
  0x5b   :  { %12476 = shalt.err (!%p12473_p6)
}
  0x5c   :  { %s12477_s7 = scalar_lea.vmem %s137_s1, 8192  ;;  %p12482_p8 = scmp.lt.s32.totalorder %s137_s1, %s137_s1 }
  0x5d   :  { %p12478_p7 = scmp.ne.s32.totalorder %s137_s1, %s12477_s7  ;;  %p12483_p9 = scmp.lt.s32.totalorder %s12477_s7, %s12477_s7 }
  0x5f   :  { %p12484_p10 = por %p12483_p9, %p12482_p8 }
  0x61   :  { %p12485_p11 = pnand %p12484_p10, %p12478_p7 }
  0x63   :  { %12488 = shalt.err (!%p12485_p11)
}
  0x64   :  { %s12801_s24 = smov 512   ;;  %s12802_s29 = smov 32  }
  0x65   :  { %142 = dma.hbm_to_vmem [thread:$0]  %s16555_s9, 8192, %s137_s1, [#allocation18], %s12801_s24, %s12801_s24, %s12802_s29  }
  0x66   :  { %s12489_s19 = scalar_lea.hbm %s16557_s11, 65536 }
  0x67   :  { %p12490_p12 = scmp.ne.s32.totalorder %s16557_s11, %s12489_s19  ;;  %p12493_p13 = scmp.lt.u32.totalorder %s12489_s19, %s16557_s11 }
  0x69   :  { %p12495_p0 = pnand %p12493_p13, %p12490_p12 }
  0x6b   :  { %12498 = shalt.err (!%p12495_p0)
}
  0x6c   :  { %s12499_s21 = scalar_lea.vmem %s12963_s27, 65536  ;;  %p12504_p2 = scmp.lt.s32.totalorder %s12963_s27, %s12963_s27 }
  0x6d   :  { %p12500_p1 = scmp.ne.s32.totalorder %s12963_s27, %s12499_s21  ;;  %p12505_p3 = scmp.lt.s32.totalorder %s12499_s21, %s12499_s21 }
  0x6f   :  { %p12506_p4 = por %p12505_p3, %p12504_p2 }
  0x71   :  { %p12507_p5 = pnand %p12506_p4, %p12500_p1 }
  0x73   :  { %12510 = shalt.err (!%p12507_p5)
}
  0x74   :  { %164 = dma.hbm_to_vmem [thread:$0]  %s16557_s11, 65536, %s12963_s27, [#allocation21], %s12801_s24, %s12801_s24, %s12802_s29  }
  0x75   :  { %s12803_s23 = smov [#allocation23]   ;;  %s12804_s28 = smov [#allocation2]  }
  0x76   :  { %s180_s26 = sshll.u32 %s12803_s23, 4  ;;  %s39_s7 = sshll.u32 %s12804_s28, 4  ;;  %s181_s26 = int_to_ptr.vmem [resolvable:$true] %s180_s26  ;;  %s40_s7 = int_to_ptr.vmem [resolvable:$true] %s39_s7 }
  0x77   :  { %s12511_s5 = scalar_lea.hbm %s16559_s13, 8192 }
  0x78   :  { %p12512_p6 = scmp.ne.s32.totalorder %s16559_s13, %s12511_s5  ;;  %p12515_p7 = scmp.lt.u32.totalorder %s12511_s5, %s16559_s13 }
  0x7a   :  { %p12517_p8 = pnand %p12515_p7, %p12512_p6 }
  0x7c   :  { %12520 = shalt.err (!%p12517_p8)
}
  0x7d   :  { %s12521_s11 = scalar_lea.vmem %s181_s26, 8192  ;;  %p12526_p10 = scmp.lt.s32.totalorder %s181_s26, %s181_s26 }
  0x7e   :  { %p12522_p9 = scmp.ne.s32.totalorder %s181_s26, %s12521_s11  ;;  %p12527_p11 = scmp.lt.s32.totalorder %s12521_s11, %s12521_s11 }
  0x80   :  { %p12528_p12 = por %p12527_p11, %p12526_p10 }
  0x82   :  { %p12529_p13 = pnand %p12528_p12, %p12522_p9 }
  0x84   :  { %12532 = shalt.err (!%p12529_p13)
}
  0x85   :  { %s12805_s27 = smov 64   ;;  %s12806_s25 = smov 4  }
  0x86   :  { %186 = dma.hbm_to_vmem [thread:$0]  %s16559_s13, 8192, %s181_s26, [#allocation24], %s12805_s27, %s12805_s27, %s12806_s25  }
  0x87   :  { %s17685_s23 = sld [smem:[#allocation608_spill]] }
  0x8d   :  { %s12533_s28 = scalar_lea.hbm %s17685_s23, 256 }
  0x8e   :  { %p12534_p0 = scmp.ne.s32.totalorder %s17685_s23, %s12533_s28  ;;  %p12537_p1 = scmp.lt.u32.totalorder %s12533_s28, %s17685_s23 }
  0x90   :  { %p12539_p2 = pnand %p12537_p1, %p12534_p0 }
  0x92   :  { %12542 = shalt.err (!%p12539_p2)
}
  0x93   :  { %s12543_s19 = scalar_lea.vmem %s40_s7, 256  ;;  %p12548_p4 = scmp.lt.s32.totalorder %s40_s7, %s40_s7 }
  0x94   :  { %p12544_p3 = scmp.ne.s32.totalorder %s40_s7, %s12543_s19  ;;  %p12549_p5 = scmp.lt.s32.totalorder %s12543_s19, %s12543_s19 }
  0x96   :  { %p12550_p6 = por %p12549_p5, %p12548_p4 }
  0x98   :  { %p12551_p7 = pnand %p12550_p6, %p12544_p3 }
  0x9a   :  { %12554 = shalt.err (!%p12551_p7)
}
  0x9b   :  { %42 = dma.hbm_to_vmem [thread:$0]  %s17685_s23, 256, %s40_s7, [#allocation3]  }
  0x9c   :  { %s12807_s3 = smov [#allocation7]   ;;  %s12555_s21 = scalar_lea.hbm %s16548_s2, 8192 }
  0x9d   :  { %s58_s20 = sshll.u32 %s12807_s3, 4  ;;  %p12556_p8 = scmp.ne.s32.totalorder %s16548_s2, %s12555_s21  ;;  %s59_s20 = int_to_ptr.vmem [resolvable:$true] %s58_s20 }
  0x9e   :  { %p12559_p9 = scmp.lt.u32.totalorder %s12555_s21, %s16548_s2 }
  0xa0   :  { %p12561_p10 = pnand %p12559_p9, %p12556_p8 }
  0xa2   :  { %12564 = shalt.err (!%p12561_p10)
}
  0xa3   :  { %s12565_s30 = scalar_lea.vmem %s59_s20, 8192  ;;  %p12570_p12 = scmp.lt.s32.totalorder %s59_s20, %s59_s20 }
  0xa4   :  { %p12566_p11 = scmp.ne.s32.totalorder %s59_s20, %s12565_s30  ;;  %p12571_p13 = scmp.lt.s32.totalorder %s12565_s30, %s12565_s30 }
  0xa6   :  { %p12572_p0 = por %p12571_p13, %p12570_p12 }
  0xa8   :  { %p12573_p1 = pnand %p12572_p0, %p12566_p11 }
  0xaa   :  { %12576 = shalt.err (!%p12573_p1)
}
  0xab   :  { %s12808_s7 = smov 256   ;;  %s12809_s23 = smov 16  }
  0xac   :  { %64 = dma.hbm_to_vmem [thread:$0]  %s16548_s2, 8192, %s59_s20, [#allocation6], %s12808_s7, %s12808_s7, %s12809_s23  }
  0xad   :  { %s12810_s19 = smov [#allocation10]   ;;  %s12811_s26 = smov [#allocation13]  }
  0xae   :  { %s80_s13 = sshll.u32 %s12810_s19, 4  ;;  %s102_s3 = sshll.u32 %s12811_s26, 4  ;;  %s81_s13 = int_to_ptr.vmem [resolvable:$true] %s80_s13  ;;  %s103_s3 = int_to_ptr.vmem [resolvable:$true] %s102_s3 }
  0xaf   :  { %s12577_s21 = scalar_lea.hbm %s16550_s4, 16384 }
  0xb0   :  { %p12578_p2 = scmp.ne.s32.totalorder %s16550_s4, %s12577_s21  ;;  %p12581_p3 = scmp.lt.u32.totalorder %s12577_s21, %s16550_s4 }
  0xb2   :  { %p12583_p4 = pnand %p12581_p3, %p12578_p2 }
  0xb4   :  { %12586 = shalt.err (!%p12583_p4)
}
  0xb5   :  { %s12587_s2 = scalar_lea.vmem %s81_s13, 16384  ;;  %p12592_p6 = scmp.lt.s32.totalorder %s81_s13, %s81_s13 }
  0xb6   :  { %p12588_p5 = scmp.ne.s32.totalorder %s81_s13, %s12587_s2  ;;  %p12593_p7 = scmp.lt.s32.totalorder %s12587_s2, %s12587_s2 }
  0xb8   :  { %p12594_p8 = por %p12593_p7, %p12592_p6 }
  0xba   :  { %p12595_p9 = pnand %p12594_p8, %p12588_p5 }
  0xbc   :  { %12598 = shalt.err (!%p12595_p9)
}
  0xbd   :  { %86 = dma.hbm_to_vmem [thread:$0]  %s16550_s4, 16384, %s81_s13, [#allocation9], %s12808_s7, %s12808_s7, %s12809_s23  }
  0xbe   :  { %s12599_s19 = scalar_lea.hbm %s16552_s6, 4096 }
  0xbf   :  { %p12600_p10 = scmp.ne.s32.totalorder %s16552_s6, %s12599_s19  ;;  %p12603_p11 = scmp.lt.u32.totalorder %s12599_s19, %s16552_s6 }
  0xc1   :  { %p12605_p12 = pnand %p12603_p11, %p12600_p10 }
  0xc3   :  { %12608 = shalt.err (!%p12605_p12)
}
  0xc4   :  { %s12609_s9 = scalar_lea.vmem %s103_s3, 4096  ;;  %p12614_p0 = scmp.lt.s32.totalorder %s103_s3, %s103_s3 }
  0xc5   :  { %p12610_p13 = scmp.ne.s32.totalorder %s103_s3, %s12609_s9  ;;  %p12615_p1 = scmp.lt.s32.totalorder %s12609_s9, %s12609_s9 }
  0xc7   :  { %p12616_p2 = por %p12615_p1, %p12614_p0 }
  0xc9   :  { %p12617_p3 = pnand %p12616_p2, %p12610_p13 }
  0xcb   :  { %12620 = shalt.err (!%p12617_p3)
}
  0xcc   :  { %108 = dma.hbm_to_vmem [thread:$0]  %s16552_s6, 4096, %s103_s3, [#allocation12], %s12805_s27, %s12805_s27, %s12806_s25  }
  0xcd   :  { %s12812_s13 = smov [#allocation16]   ;;  %s12813_s28 = smov [#allocation19]  }
  0xce   :  { %s124_s1 = sshll.u32 %s12812_s13, 4  ;;  %s149_s18 = sshll.u32 %s12813_s28, 4  ;;  %s125_s1 = int_to_ptr.vmem [resolvable:$true] %s124_s1  ;;  %s150_s18 = int_to_ptr.vmem [resolvable:$true] %s149_s18 }
  0xcf   :  { %s12621_s30 = scalar_lea.hbm %s16554_s8, 16384 }
  0xd0   :  { %p12622_p4 = scmp.ne.s32.totalorder %s16554_s8, %s12621_s30  ;;  %p12625_p5 = scmp.lt.u32.totalorder %s12621_s30, %s16554_s8 }
  0xd2   :  { %p12627_p6 = pnand %p12625_p5, %p12622_p4 }
  0xd4   :  { %12630 = shalt.err (!%p12627_p6)
}
  0xd5   :  { %s12631_s6 = scalar_lea.vmem %s125_s1, 16384  ;;  %p12636_p8 = scmp.lt.s32.totalorder %s125_s1, %s125_s1 }
  0xd6   :  { %p12632_p7 = scmp.ne.s32.totalorder %s125_s1, %s12631_s6  ;;  %p12637_p9 = scmp.lt.s32.totalorder %s12631_s6, %s12631_s6 }
  0xd8   :  { %p12638_p10 = por %p12637_p9, %p12636_p8 }
  0xda   :  { %p12639_p11 = pnand %p12638_p10, %p12632_p7 }
  0xdc   :  { %12642 = shalt.err (!%p12639_p11)
}
  0xdd   :  { %130 = dma.hbm_to_vmem [thread:$0]  %s16554_s8, 16384, %s125_s1, [#allocation15], %s12801_s24, %s12801_s24, %s12802_s29  }
  0xde   :  { %s12643_s21 = scalar_lea.hbm %s16556_s10, 128 }
  0xdf   :  { %p12644_p12 = scmp.ne.s32.totalorder %s16556_s10, %s12643_s21  ;;  %p12647_p13 = scmp.lt.u32.totalorder %s12643_s21, %s16556_s10 }
  0xe1   :  { %p12649_p0 = pnand %p12647_p13, %p12644_p12 }
  0xe3   :  { %12652 = shalt.err (!%p12649_p0)
}
  0xe4   :  { %s12653_s28 = scalar_lea.vmem %s150_s18, 128  ;;  %p12658_p2 = scmp.lt.s32.totalorder %s150_s18, %s150_s18 }
  0xe5   :  { %p12654_p1 = scmp.ne.s32.totalorder %s150_s18, %s12653_s28  ;;  %p12659_p3 = scmp.lt.s32.totalorder %s12653_s28, %s12653_s28 }
  0xe7   :  { %p12660_p4 = por %p12659_p3, %p12658_p2 }
  0xe9   :  { %p12661_p5 = pnand %p12660_p4, %p12654_p1 }
  0xeb   :  { %12664 = shalt.err (!%p12661_p5)
}
  0xec   :  { %152 = dma.hbm_to_vmem [thread:$0]  %s16556_s10, 128, %s150_s18, [#allocation18]  }
  0xed   :  { %s12814_s1 = smov [#allocation22]   ;;  %s12815_s20 = smov [#allocation25]  }
  0xee   :  { %s171_s2 = sshll.u32 %s12814_s1, 4  ;;  %s193_s30 = sshll.u32 %s12815_s20, 4  ;;  %s172_s2 = int_to_ptr.vmem [resolvable:$true] %s171_s2  ;;  %s194_s30 = int_to_ptr.vmem [resolvable:$true] %s193_s30 }
  0xef   :  { %s12665_s19 = scalar_lea.hbm %s16558_s12, 128 }
  0xf0   :  { %p12666_p6 = scmp.ne.s32.totalorder %s16558_s12, %s12665_s19  ;;  %p12669_p7 = scmp.lt.u32.totalorder %s12665_s19, %s16558_s12 }
  0xf2   :  { %p12671_p8 = pnand %p12669_p7, %p12666_p6 }
  0xf4   :  { %12674 = shalt.err (!%p12671_p8)
}
  0xf5   :  { %s12675_s10 = scalar_lea.vmem %s172_s2, 128  ;;  %p12680_p10 = scmp.lt.s32.totalorder %s172_s2, %s172_s2 }
  0xf6   :  { %p12676_p9 = scmp.ne.s32.totalorder %s172_s2, %s12675_s10  ;;  %p12681_p11 = scmp.lt.s32.totalorder %s12675_s10, %s12675_s10 }
  0xf8   :  { %p12682_p12 = por %p12681_p11, %p12680_p10 }
  0xfa   :  { %p12683_p13 = pnand %p12682_p12, %p12676_p9 }
  0xfc   :  { %12686 = shalt.err (!%p12683_p13)
}
  0xfd   :  { %174 = dma.hbm_to_vmem [thread:$0]  %s16558_s12, 128, %s172_s2, [#allocation21]  }
  0xfe   :  { %s12687_s9 = scalar_lea.hbm %s16560_s14, 16 }
  0xff   :  { %p12688_p0 = scmp.ne.s32.totalorder %s16560_s14, %s12687_s9  ;;  %p12691_p1 = scmp.lt.u32.totalorder %s12687_s9, %s16560_s14 }
 0x101   :  { %p12693_p2 = pnand %p12691_p1, %p12688_p0 }
 0x103   :  { %12696 = shalt.err (!%p12693_p2)
}
 0x104   :  { %s12697_s8 = scalar_lea.vmem %s194_s30, 16  ;;  %s12701_s24 = scalar_lea.vmem %s194_s30, 32 }
 0x105   :  { %p12698_p3 = scmp.ne.s32.totalorder %s194_s30, %s12697_s8  ;;  %p12702_p4 = scmp.lt.s32.totalorder %s194_s30, %s194_s30 }
 0x106   :  { %p12703_p5 = scmp.lt.s32.totalorder %s12701_s24, %s12697_s8 }
 0x108   :  { %p12704_p6 = por %p12703_p5, %p12702_p4 }
 0x10a   :  { %p12705_p7 = pnand %p12704_p6, %p12698_p3 }
 0x10c   :  { %12708 = shalt.err (!%p12705_p7)
}
 0x10d   :  { %196 = dma.hbm_to_vmem [thread:$0]  %s16560_s14, 16, %s194_s30, [#allocation24]  }
 0x10e   :  { %12775 = dma.done.wait [#allocation3], 256  }
 0x10f   :  { %12776 = vsyncadd [#allocation3], 4294967040 }
 0x110   :  { %12777 = dma.done.wait [#allocation6], 8208  }
 0x111   :  { %12778 = vsyncadd [#allocation6], 4294959088 }
 0x112   :  { %12779 = dma.done.wait [#allocation9], 16448  }
 0x113   :  { %12780 = vsyncadd [#allocation9], 4294950848 }
 0x114   :  { %12781 = dma.done.wait [#allocation12], 4160  }
 0x115   :  { %12782 = vsyncadd [#allocation12], 4294963136 }
 0x116   :  { %12783 = dma.done.wait [#allocation15], 16400  }
 0x117   :  { %12784 = vsyncadd [#allocation15], 4294950896 }
 0x118   :  { %12785 = dma.done.wait [#allocation18], 8320  }
 0x119   :  { %12786 = vsyncadd [#allocation18], 4294958976 }
 0x11a   :  { %12787 = dma.done.wait [#allocation21], 65664  }
 0x11b   :  { %12788 = vsyncadd [#allocation21], 4294901632 }
 0x11c   :  { %12789 = dma.done.wait [#allocation24], 8208  }
 0x11d   :  { %12790 = vsyncadd [#allocation24], 4294959088  ;;  %v11855_v0 = vld [vmem:[#allocation7 + $0x4] ss:$16 sps:$4 sm:$0xff]   ;;  %v11857_v1 = vld [vmem:[#allocation7] ss:$16 sps:$4 sm:$0xff]  }
 0x11e   :  { %653 = vmatprep.subr.bf16.mxu0 %v11855_v0  ;;  %v11858_v2 = vld [vmem:[#allocation7 + $0x24] ss:$16 sps:$4 sm:$0xff]   ;;  %v11860_v3 = vld [vmem:[#allocation7 + $0x20] ss:$16 sps:$4 sm:$0xff]   ;;  %v11902_v13 = vld [vmem:[#allocation7 + $0xc] ss:$16 sps:$4 sm:$0xff]  }
 0x11f   :  { %654 = vmatpush1.bf16.msra.mxu0 %v11857_v1  ;;  %v11861_v4 = vld [vmem:[#allocation7 + $0x44] ss:$16 sps:$4 sm:$0xff]   ;;  %v11863_v5 = vld [vmem:[#allocation7 + $0x40] ss:$16 sps:$4 sm:$0xff]   ;;  %v11905_v15 = vld [vmem:[#allocation7 + $0x8] ss:$16 sps:$4 sm:$0xff]   ;;  %694 = vmatprep.subr.bf16.mxu1 %v11902_v13 }
 0x120   :  { %655 = vmatprep.subr.bf16.mxu0 %v11858_v2  ;;  %v11864_v6 = vld [vmem:[#allocation7 + $0x64] ss:$16 sps:$4 sm:$0xff]   ;;  %v11866_v7 = vld [vmem:[#allocation7 + $0x60] ss:$16 sps:$4 sm:$0xff]   ;;  %695 = vmatpush1.bf16.msra.mxu1 %v11905_v15  ;;  %v11906_v19 = vld [vmem:[#allocation7 + $0x2c] ss:$16 sps:$4 sm:$0xff]  }
 0x121   :  { %v11867_v8 = vld [vmem:[#allocation7 + $0x84] ss:$16 sps:$4 sm:$0xff]   ;;  %v11869_v9 = vld [vmem:[#allocation7 + $0x80] ss:$16 sps:$4 sm:$0xff]   ;;  %v11908_v20 = vld [vmem:[#allocation7 + $0x28] ss:$16 sps:$4 sm:$0xff]   ;;  %696 = vmatprep.subr.bf16.mxu1 %v11906_v19 }
 0x122   :  { %v11870_v10 = vld [vmem:[#allocation7 + $0xa4] ss:$16 sps:$4 sm:$0xff]   ;;  %v11872_v11 = vld [vmem:[#allocation7 + $0xa0] ss:$16 sps:$4 sm:$0xff]   ;;  %v11909_v21 = vld [vmem:[#allocation7 + $0x4c] ss:$16 sps:$4 sm:$0xff]  }
 0x123   :  { %656 = vmatpush1.bf16.msra.mxu0 %v11860_v3  ;;  %v11873_v12 = vld [vmem:[#allocation7 + $0xc4] ss:$16 sps:$4 sm:$0xff]   ;;  %v11875_v14 = vld [vmem:[#allocation7 + $0xc0] ss:$16 sps:$4 sm:$0xff]   ;;  %v11911_v24 = vld [vmem:[#allocation7 + $0x48] ss:$16 sps:$4 sm:$0xff]  }
 0x124   :  { %657 = vmatprep.subr.bf16.mxu0 %v11861_v4  ;;  %v244_v16 = vld [vmem:[#allocation2 + $0x8] sm:$0xff]  ;;  %v11878_v22 = vld [vmem:[#allocation7 + $0xe0] ss:$16 sps:$4 sm:$0xff]   ;;  %697 = vmatpush1.bf16.msra.mxu1 %v11908_v20  ;;  %s12817_s14 = smov 112   ;;  %s12818_s2 = smov 96   ;;  %vm10268_vm2 = vcmask 130048  }
 0x125   :  { %v11876_v17 = vld [vmem:[#allocation7 + $0xe4] ss:$16 sps:$4 sm:$0xff]   ;;  %v13119_v18 = vpack.c.bf16 %v244_v16, %v244_v16  ;;  %698 = vmatprep.subr.bf16.mxu1 %v11909_v21  ;;  %v11912_v25 = vld [vmem:[#allocation7 + $0x6c] ss:$16 sps:$4 sm:$0xff]   ;;  %v11881_v26 = vld [vmem:[#allocation7 + $0x100] ss:$16 sps:$4 sm:$0xff]  }
 0x126   :  { %v11879_v23 = vld [vmem:[#allocation7 + $0x104] ss:$16 sps:$4 sm:$0xff]   ;;  %v11914_v28 = vld [vmem:[#allocation7 + $0x68] ss:$16 sps:$4 sm:$0xff]   ;;  %v11915_v29 = vld [vmem:[#allocation7 + $0x8c] ss:$16 sps:$4 sm:$0xff]  }
 0x127   :  { %658 = vmatpush1.bf16.msra.mxu0 %v11863_v5  ;;  %685 = vmatprep.mubr.bf16.mxu0 %v13119_v18  ;;  %v11882_v27 = vld [vmem:[#allocation7 + $0x124] ss:$16 sps:$4 sm:$0xff]   ;;  %v11884_v30 = vld [vmem:[#allocation7 + $0x120] ss:$16 sps:$4 sm:$0xff]   ;;  %v11917_v32 = vld [vmem:[#allocation7 + $0x88] ss:$16 sps:$4 sm:$0xff]  }
 0x128   :  { %659 = vmatprep.subr.bf16.mxu0 %v11864_v6  ;;  %726 = vmatprep.mubr.bf16.mxu1 %v13119_v18  ;;  %v11885_v31 = vld [vmem:[#allocation7 + $0x144] ss:$16 sps:$4 sm:$0xff]   ;;  %v11918_v33 = vld [vmem:[#allocation7 + $0xac] ss:$16 sps:$4 sm:$0xff]   ;;  %v11887_v34 = vld [vmem:[#allocation7 + $0x140] ss:$16 sps:$4 sm:$0xff]  }
 0x129   :  { %699 = vmatpush1.bf16.msra.mxu1 %v11911_v24  ;;  %v11888_v35 = vld [vmem:[#allocation7 + $0x164] ss:$16 sps:$4 sm:$0xff]   ;;  %v11920_v36 = vld [vmem:[#allocation7 + $0xa8] ss:$16 sps:$4 sm:$0xff]   ;;  %v11921_v37 = vld [vmem:[#allocation7 + $0xcc] ss:$16 sps:$4 sm:$0xff]  }
 0x12a   :  { %700 = vmatprep.subr.bf16.mxu1 %v11912_v25  ;;  %v11890_v38 = vld [vmem:[#allocation7 + $0x160] ss:$16 sps:$4 sm:$0xff]   ;;  %v11891_v39 = vld [vmem:[#allocation7 + $0x184] ss:$16 sps:$4 sm:$0xff]   ;;  %v11923_v40 = vld [vmem:[#allocation7 + $0xc8] ss:$16 sps:$4 sm:$0xff]  }
 0x12b   :  { %660 = vmatpush1.bf16.msra.mxu0 %v11866_v7  ;;  %v11924_v41 = vld [vmem:[#allocation7 + $0xec] ss:$16 sps:$4 sm:$0xff]   ;;  %v11893_v42 = vld [vmem:[#allocation7 + $0x180] ss:$16 sps:$4 sm:$0xff]   ;;  %v11894_v43 = vld [vmem:[#allocation7 + $0x1a4] ss:$16 sps:$4 sm:$0xff]  }
 0x12c   :  { %661 = vmatprep.subr.bf16.mxu0 %v11867_v8  ;;  %v11926_v44 = vld [vmem:[#allocation7 + $0xe8] ss:$16 sps:$4 sm:$0xff]   ;;  %v11927_v45 = vld [vmem:[#allocation7 + $0x10c] ss:$16 sps:$4 sm:$0xff]   ;;  %v11896_v46 = vld [vmem:[#allocation7 + $0x1a0] ss:$16 sps:$4 sm:$0xff]  }
 0x12d   :  { %701 = vmatpush1.bf16.msra.mxu1 %v11914_v28  ;;  %v11897_v47 = vld [vmem:[#allocation7 + $0x1c4] ss:$16 sps:$4 sm:$0xff]   ;;  %v11929_v48 = vld [vmem:[#allocation7 + $0x108] ss:$16 sps:$4 sm:$0xff]   ;;  %v11930_v49 = vld [vmem:[#allocation7 + $0x12c] ss:$16 sps:$4 sm:$0xff]  }
 0x12e   :  { %702 = vmatprep.subr.bf16.mxu1 %v11915_v29  ;;  %v11899_v50 = vld [vmem:[#allocation7 + $0x1c0] ss:$16 sps:$4 sm:$0xff]   ;;  %v11900_v51 = vld [vmem:[#allocation7 + $0x1e4] ss:$16 sps:$4 sm:$0xff]   ;;  %v11932_v52 = vld [vmem:[#allocation7 + $0x128] ss:$16 sps:$4 sm:$0xff]  }
 0x12f   :  { %662 = vmatpush1.bf16.msra.mxu0 %v11869_v9  ;;  %v11933_v53 = vld [vmem:[#allocation7 + $0x14c] ss:$16 sps:$4 sm:$0xff]   ;;  %v11904_v54 = vld [vmem:[#allocation7 + $0x1e0] ss:$16 sps:$4 sm:$0xff]   ;;  %v11935_v56 = vld [vmem:[#allocation7 + $0x148] ss:$16 sps:$4 sm:$0xff]  }
 0x130   :  { %663 = vmatprep.subr.bf16.mxu0 %v11870_v10  ;;  %v243_v55 = vld [vmem:[#allocation2] sm:$0xff]  ;;  %v11953_v57 = vld [vmem:[#allocation10 + $0x4] ss:$16 sps:$4 sm:$0xff]   ;;  %s12819_s20 = smov 80   ;;  %vm10270_vm3 = vcmask 261248   ;;  %vm10272_vm4 = vcmask 392448  }
 0x131   :  { %703 = vmatpush1.bf16.msra.mxu1 %v11917_v32  ;;  %v11936_v58 = vld [vmem:[#allocation7 + $0x16c] ss:$16 sps:$4 sm:$0xff]   ;;  %v13123_v59 = vpack.c.bf16 %v243_v55, %v243_v55  ;;  %v11951_v60 = vld [vmem:[#allocation10] ss:$16 sps:$4 sm:$0xff]   ;;  %v11938_v61 = vld [vmem:[#allocation7 + $0x168] ss:$16 sps:$4 sm:$0xff]  }
 0x132   :  { %704 = vmatprep.subr.bf16.mxu1 %v11918_v33  ;;  %v11959_v62 = vld [vmem:[#allocation10 + $0x24] ss:$16 sps:$4 sm:$0xff]   ;;  %v11939_v63 = vld [vmem:[#allocation7 + $0x18c] ss:$16 sps:$4 sm:$0xff]   ;;  %v11957_v0 = vld [vmem:[#allocation10 + $0x20] ss:$16 sps:$4 sm:$0xff]  }
 0x133   :  { %664 = vmatpush1.bf16.msra.mxu0 %v11872_v11  ;;  %v11941_v1 = vld [vmem:[#allocation7 + $0x188] ss:$16 sps:$4 sm:$0xff]   ;;  %v11942_v3 = vld [vmem:[#allocation7 + $0x1ac] ss:$16 sps:$4 sm:$0xff]   ;;  %v11963_v4 = vld [vmem:[#allocation10 + $0x40] ss:$16 sps:$4 sm:$0xff]  }
 0x134   :  { %665 = vmatprep.subr.bf16.mxu0 %v11873_v12  ;;  %v11965_v2 = vld [vmem:[#allocation10 + $0x44] ss:$16 sps:$4 sm:$0xff]   ;;  %v11945_v7 = vld [vmem:[#allocation7 + $0x1cc] ss:$16 sps:$4 sm:$0xff]   ;;  %v11969_v8 = vld [vmem:[#allocation10 + $0x60] ss:$16 sps:$4 sm:$0xff]  }
 0x135   :  { %705 = vmatpush1.bf16.msra.mxu1 %v11920_v36  ;;  %v11944_v5 = vld [vmem:[#allocation7 + $0x1a8] ss:$16 sps:$4 sm:$0xff]   ;;  %v11948_v11 = vld [vmem:[#allocation7 + $0x1ec] ss:$16 sps:$4 sm:$0xff]   ;;  %v11975_v12 = vld [vmem:[#allocation10 + $0x80] ss:$16 sps:$4 sm:$0xff]  }
 0x136   :  { %706 = vmatprep.subr.bf16.mxu1 %v11921_v37  ;;  %v11971_v6 = vld [vmem:[#allocation10 + $0x64] ss:$16 sps:$4 sm:$0xff]   ;;  %v11981_v16 = vld [vmem:[#allocation10 + $0xa0] ss:$16 sps:$4 sm:$0xff]   ;;  %v11962_v20 = vld [vmem:[#allocation10 + $0x2c] ss:$16 sps:$4 sm:$0xff]  }
 0x137   :  { %666 = vmatpush1.bf16.msra.mxu0 %v11875_v14  ;;  %v11947_v9 = vld [vmem:[#allocation7 + $0x1c8] ss:$16 sps:$4 sm:$0xff]   ;;  %v11956_v14 = vld [vmem:[#allocation10 + $0xc] ss:$16 sps:$4 sm:$0xff]   ;;  %v11987_v21 = vld [vmem:[#allocation10 + $0xc0] ss:$16 sps:$4 sm:$0xff]  }
 0x138   :  { %667 = vmatprep.subr.bf16.mxu0 %v11876_v17  ;;  %v11977_v10 = vld [vmem:[#allocation10 + $0x84] ss:$16 sps:$4 sm:$0xff]   ;;  %v11954_v17 = vld [vmem:[#allocation10 + $0x8] ss:$16 sps:$4 sm:$0xff]   ;;  %v11968_v24 = vld [vmem:[#allocation10 + $0x4c] ss:$16 sps:$4 sm:$0xff]  }
 0x139   :  { %707 = vmatpush1.bf16.msra.mxu1 %v11923_v40  ;;  %v11950_v13 = vld [vmem:[#allocation7 + $0x1e8] ss:$16 sps:$4 sm:$0xff]   ;;  %v11993_v25 = vld [vmem:[#allocation10 + $0xe0] ss:$16 sps:$4 sm:$0xff]   ;;  %v11974_v28 = vld [vmem:[#allocation10 + $0x6c] ss:$16 sps:$4 sm:$0xff]  }
 0x13a   :  { %708 = vmatprep.subr.bf16.mxu1 %v11924_v41  ;;  %v11983_v15 = vld [vmem:[#allocation10 + $0xa4] ss:$16 sps:$4 sm:$0xff]   ;;  %v11999_v29 = vld [vmem:[#allocation10 + $0x100] ss:$16 sps:$4 sm:$0xff]   ;;  %v11980_v32 = vld [vmem:[#allocation10 + $0x8c] ss:$16 sps:$4 sm:$0xff]  }
 0x13b   :  { %668 = vmatpush1.bf16.msra.mxu0 %v11878_v22  ;;  %v11989_v19 = vld [vmem:[#allocation10 + $0xc4] ss:$16 sps:$4 sm:$0xff]   ;;  %v11960_v22 = vld [vmem:[#allocation10 + $0x28] ss:$16 sps:$4 sm:$0xff]   ;;  %v12005_v33 = vld [vmem:[#allocation10 + $0x120] ss:$16 sps:$4 sm:$0xff]  }
 0x13c   :  { %669 = vmatprep.subr.bf16.mxu0 %v11879_v23  ;;  %v11995_v23 = vld [vmem:[#allocation10 + $0xe4] ss:$16 sps:$4 sm:$0xff]   ;;  %v11986_v36 = vld [vmem:[#allocation10 + $0xac] ss:$16 sps:$4 sm:$0xff]   ;;  %v12011_v37 = vld [vmem:[#allocation10 + $0x140] ss:$16 sps:$4 sm:$0xff]  }
 0x13d   :  { %709 = vmatpush1.bf16.msra.mxu1 %v11926_v44  ;;  %v11992_v40 = vld [vmem:[#allocation10 + $0xcc] ss:$16 sps:$4 sm:$0xff]   ;;  %v12017_v41 = vld [vmem:[#allocation10 + $0x160] ss:$16 sps:$4 sm:$0xff]   ;;  %s12821_s30 = smov 48   ;;  %vm10274_vm7 = vcmask 523648  }
 0x13e   :  { %710 = vmatprep.subr.bf16.mxu1 %v11927_v45  ;;  %v11998_v44 = vld [vmem:[#allocation10 + $0xec] ss:$16 sps:$4 sm:$0xff]   ;;  %v12023_v45 = vld [vmem:[#allocation10 + $0x180] ss:$16 sps:$4 sm:$0xff]   ;;  %vm10276_vm8 = vcmask 654848   ;;  %vm10278_vm9 = vcmask 786048  }
 0x13f   :  { %670 = vmatpush1.bf16.msra.mxu0 %v11881_v26  ;;  %v11966_v26 = vld [vmem:[#allocation10 + $0x48] ss:$16 sps:$4 sm:$0xff]   ;;  %v12022_v55 = vld [vmem:[#allocation10 + $0x16c] ss:$16 sps:$4 sm:$0xff]   ;;  %s12823_s22 = smov [#allocation26]  }
 0x140   :  { %671 = vmatprep.subr.bf16.mxu0 %v11882_v27  ;;  %v12001_v27 = vld [vmem:[#allocation10 + $0x104] ss:$16 sps:$4 sm:$0xff]   ;;  %s10299_s19 = sshll.u32 %s12823_s22, 4  ;;  %s10300_s19 = int_to_ptr.vmem [resolvable:$true] %s10299_s19 }
 0x141   :  { %711 = vmatpush1.bf16.msra.mxu1 %v11929_v48  ;;  %v12004_v48 = vld [vmem:[#allocation10 + $0x10c] ss:$16 sps:$4 sm:$0xff]  }
 0x142   :  { %712 = vmatprep.subr.bf16.mxu1 %v11930_v49  ;;  %v12029_v49 = vld [vmem:[#allocation10 + $0x1a0] ss:$16 sps:$4 sm:$0xff]  }
 0x143   :  { %672 = vmatpush1.bf16.msra.mxu0 %v11884_v30  ;;  %v11972_v30 = vld [vmem:[#allocation10 + $0x68] ss:$16 sps:$4 sm:$0xff]  }
 0x144   :  { %673 = vmatprep.subr.bf16.mxu0 %v11885_v31  ;;  %v12007_v31 = vld [vmem:[#allocation10 + $0x124] ss:$16 sps:$4 sm:$0xff]  }
 0x145   :  { %713 = vmatpush1.bf16.msra.mxu1 %v11932_v52  ;;  %v12008_v52 = vld [vmem:[#allocation10 + $0x128] ss:$16 sps:$4 sm:$0xff]  }
 0x146   :  { %714 = vmatprep.subr.bf16.mxu1 %v11933_v53  ;;  %v12016_v53 = vld [vmem:[#allocation10 + $0x14c] ss:$16 sps:$4 sm:$0xff]  }
 0x147   :  { %674 = vmatpush1.bf16.msra.mxu0 %v11887_v34  ;;  %v11978_v34 = vld [vmem:[#allocation10 + $0x88] ss:$16 sps:$4 sm:$0xff]  }
 0x148   :  { %675 = vmatprep.subr.bf16.mxu0 %v11888_v35  ;;  %v12013_v35 = vld [vmem:[#allocation10 + $0x144] ss:$16 sps:$4 sm:$0xff]  }
 0x149   :  { %715 = vmatpush1.bf16.msra.mxu1 %v11935_v56  ;;  %v12020_v56 = vld [vmem:[#allocation10 + $0x168] ss:$16 sps:$4 sm:$0xff]  }
 0x14a   :  { %716 = vmatprep.subr.bf16.mxu1 %v11936_v58  ;;  %v12026_v58 = vld [vmem:[#allocation10 + $0x188] ss:$16 sps:$4 sm:$0xff]  }
 0x14b   :  { %676 = vmatpush1.bf16.msra.mxu0 %v11890_v38  ;;  %v11984_v38 = vld [vmem:[#allocation10 + $0xa8] ss:$16 sps:$4 sm:$0xff]  }
 0x14c   :  { %677 = vmatprep.subr.bf16.mxu0 %v11891_v39  ;;  %v12019_v39 = vld [vmem:[#allocation10 + $0x164] ss:$16 sps:$4 sm:$0xff]  }
 0x14d   :  { %717 = vmatpush1.bf16.msra.mxu1 %v11938_v61  ;;  %v12032_v61 = vld [vmem:[#allocation10 + $0x1a8] ss:$16 sps:$4 sm:$0xff]  }
 0x14e   :  { %718 = vmatprep.subr.bf16.mxu1 %v11939_v63  ;;  %v12040_v63 = vld [vmem:[#allocation10 + $0x1cc] ss:$16 sps:$4 sm:$0xff]  }
 0x14f   :  { %678 = vmatpush1.bf16.msra.mxu0 %v11893_v42  ;;  %v11990_v42 = vld [vmem:[#allocation10 + $0xc8] ss:$16 sps:$4 sm:$0xff]  }
 0x150   :  { %679 = vmatprep.subr.bf16.mxu0 %v11894_v43  ;;  %v12025_v43 = vld [vmem:[#allocation10 + $0x184] ss:$16 sps:$4 sm:$0xff]  }
 0x151   :  { %719 = vmatpush1.bf16.msra.mxu1 %v11941_v1  ;;  %v12038_v1 = vld [vmem:[#allocation10 + $0x1c8] ss:$16 sps:$4 sm:$0xff]  }
 0x152   :  { %720 = vmatprep.subr.bf16.mxu1 %v11942_v3  ;;  %v12046_v3 = vld [vmem:[#allocation10 + $0x1ec] ss:$16 sps:$4 sm:$0xff]  }
 0x153   :  { %680 = vmatpush1.bf16.msra.mxu0 %v11896_v46  ;;  %v11996_v46 = vld [vmem:[#allocation10 + $0xe8] ss:$16 sps:$4 sm:$0xff]  }
 0x154   :  { %681 = vmatprep.subr.bf16.mxu0 %v11897_v47  ;;  %v12031_v47 = vld [vmem:[#allocation10 + $0x1a4] ss:$16 sps:$4 sm:$0xff]  }
 0x155   :  { %721 = vmatpush1.bf16.msra.mxu1 %v11944_v5  ;;  %v12044_v5 = vld [vmem:[#allocation10 + $0x1e8] ss:$16 sps:$4 sm:$0xff]  }
 0x156   :  { %722 = vmatprep.subr.bf16.mxu1 %v11945_v7  ;;  %v12052_v7 = vld [vmem:[#allocation10 + $0x20c] ss:$16 sps:$4 sm:$0xff]  }
 0x157   :  { %682 = vmatpush1.bf16.msra.mxu0 %v11899_v50  ;;  %v12002_v50 = vld [vmem:[#allocation10 + $0x108] ss:$16 sps:$4 sm:$0xff]  }
 0x158   :  { %683 = vmatprep.subr.bf16.mxu0 %v11900_v51  ;;  %v12010_v51 = vld [vmem:[#allocation10 + $0x12c] ss:$16 sps:$4 sm:$0xff]  }
 0x159   :  { %723 = vmatpush1.bf16.msra.mxu1 %v11947_v9 }
 0x15a   :  { %724 = vmatprep.subr.bf16.mxu1 %v11948_v11  ;;  %v13132_v11 = vld [vmem:[#allocation8] sm:$0xf] }
 0x15b   :  { %684 = vmatpush1.bf16.msra.mxu0 %v11904_v54  ;;  %v12014_v54 = vld [vmem:[#allocation10 + $0x148] ss:$16 sps:$4 sm:$0xff]  }
 0x15c   :  { %1533 = vmatprep.subr.bf16.mxu0 %v11953_v57  ;;  %v12028_v57 = vld [vmem:[#allocation10 + $0x18c] ss:$16 sps:$4 sm:$0xff]  }
 0x15d   :  { %725 = vmatpush1.bf16.msra.mxu1 %v11950_v13 }
 0x15e   :  { %686 = vmatmul.mubr.bf16.vlgmr.msra.gmra.mrb[0].mxu0 %v13123_v59  ;;  %1615 = vmatprep.subr.bf16.mxu1 %v11956_v14 }
 0x15f   :  { %1534 = vmatpush1.bf16.msra.mxu0 %v11951_v60  ;;  %v12034_v60 = vld [vmem:[#allocation10 + $0x1ac] ss:$16 sps:$4 sm:$0xff]  }
 0x160   :  { %1535 = vmatprep.subr.bf16.mxu0 %v11959_v62  ;;  %727 = vmatmul.mubr.bf16.vlgmr.msra.gmra.mrb[0].mxu1 %v13123_v59  ;;  %v12037_v62 = vld [vmem:[#allocation10 + $0x1c4] ss:$16 sps:$4 sm:$0xff]  }
 0x161   :  { %1616 = vmatpush1.bf16.msra.mxu1 %v11954_v17 }
 0x162   :  { %1617 = vmatprep.subr.bf16.mxu1 %v11962_v20 }
 0x163   :  { %1536 = vmatpush1.bf16.msra.mxu0 %v11957_v0  ;;  %v12035_v0 = vld [vmem:[#allocation10 + $0x1c0] ss:$16 sps:$4 sm:$0xff]  }
 0x164   :  { %1537 = vmatprep.subr.bf16.mxu0 %v11965_v2  ;;  %v12043_v2 = vld [vmem:[#allocation10 + $0x1e4] ss:$16 sps:$4 sm:$0xff]  }
 0x165   :  { %1618 = vmatpush1.bf16.msra.mxu1 %v11960_v22 }
 0x166   :  { %1619 = vmatprep.subr.bf16.mxu1 %v11968_v24 }
 0x167   :  { %1538 = vmatpush1.bf16.msra.mxu0 %v11963_v4  ;;  %v12041_v4 = vld [vmem:[#allocation10 + $0x1e0] ss:$16 sps:$4 sm:$0xff]  }
 0x168   :  { %1539 = vmatprep.subr.bf16.mxu0 %v11971_v6  ;;  %v12049_v6 = vld [vmem:[#allocation10 + $0x204] ss:$16 sps:$4 sm:$0xff]  }
 0x169   :  { %1620 = vmatpush1.bf16.msra.mxu1 %v11966_v26  ;;  %v12050_v26 = vld [vmem:[#allocation10 + $0x208] ss:$16 sps:$4 sm:$0xff]  }
 0x16a   :  { %1621 = vmatprep.subr.bf16.mxu1 %v11974_v28  ;;  %v12055_v28 = vld [vmem:[#allocation10 + $0x224] ss:$16 sps:$4 sm:$0xff]  }
 0x16b   :  { %1540 = vmatpush1.bf16.msra.mxu0 %v11969_v8  ;;  %v313_v8 = vlaneseq }
 0x16c   :  { %1541 = vmatprep.subr.bf16.mxu0 %v11977_v10 }
 0x16d   :  { %1622 = vmatpush1.bf16.msra.mxu1 %v11972_v30  ;;  %v13127_v9 = vshrl.u32 %v313_v8, 7  ;;  %v12053_v30 = vld [vmem:[#allocation10 + $0x220] ss:$16 sps:$4 sm:$0xff]  }
 0x16e   :  { %1623 = vmatprep.subr.bf16.mxu1 %v11980_v32  ;;  %v12061_v32 = vld [vmem:[#allocation10 + $0x244] ss:$16 sps:$4 sm:$0xff]   ;;  %v12101_v8 = vld [vmem:[#allocation10 + $0x320] ss:$16 sps:$4 sm:$0xff]  }
 0x16f   :  { %1542 = vmatpush1.bf16.msra.mxu0 %v11975_v12  ;;  %v13130_v10 = vsub.s32 0, %v13127_v9  ;;  %v13135_v12 = vsub.s32 1, %v13127_v9 }
 0x170   :  { %1543 = vmatprep.subr.bf16.mxu0 %v11983_v15 }
 0x171   :  { %1624 = vmatpush1.bf16.msra.mxu1 %v11978_v34  ;;  %v316_v13 = vrot.slane %v13132_v11, %v13130_v10  ;;  %v320_v14 = vrot.slane %v13132_v11, %v13135_v12  ;;  %v12059_v34 = vld [vmem:[#allocation10 + $0x240] ss:$16 sps:$4 sm:$0xff]  }
 0x172   :  { %1625 = vmatprep.subr.bf16.mxu1 %v11986_v36  ;;  %v12067_v36 = vld [vmem:[#allocation10 + $0x264] ss:$16 sps:$4 sm:$0xff]  }
 0x173   :  { %1544 = vmatpush1.bf16.msra.mxu0 %v11981_v16 }
 0x174   :  { %1545 = vmatprep.subr.bf16.mxu0 %v11989_v19 }
 0x175   :  { %1626 = vmatpush1.bf16.msra.mxu1 %v11984_v38  ;;  %v13142_v38 = vsub.s32 3, %v13127_v9 }
 0x176   :  { %1627 = vmatprep.subr.bf16.mxu1 %v11992_v40  ;;  %v12068_v40 = vld [vmem:[#allocation10 + $0x268] ss:$16 sps:$4 sm:$0xff]  }
 0x177   :  { %1546 = vmatpush1.bf16.msra.mxu0 %v11987_v21 }
 0x178   :  { %1547 = vmatprep.subr.bf16.mxu0 %v11995_v23 }
 0x179   :  { %1628 = vmatpush1.bf16.msra.mxu1 %v11990_v42  ;;  %v12076_v42 = vld [vmem:[#allocation10 + $0x28c] ss:$16 sps:$4 sm:$0xff]  }
 0x17a   :  { %1629 = vmatprep.subr.bf16.mxu1 %v11998_v44 }
 0x17b   :  { %1548 = vmatpush1.bf16.msra.mxu0 %v11993_v25  ;;  %v12047_v25 = vld [vmem:[#allocation10 + $0x200] ss:$16 sps:$4 sm:$0xff]  }
 0x17c   :  { %1549 = vmatprep.subr.bf16.mxu0 %v12001_v27 }
 0x17d   :  { %1630 = vmatpush1.bf16.msra.mxu1 %v11996_v46  ;;  %v12074_v46 = vld [vmem:[#allocation10 + $0x288] ss:$16 sps:$4 sm:$0xff]  }
 0x17e   :  { %1631 = vmatprep.subr.bf16.mxu1 %v12004_v48  ;;  %v12079_v48 = vld [vmem:[#allocation10 + $0x2a4] ss:$16 sps:$4 sm:$0xff]  }
 0x17f   :  { %1550 = vmatpush1.bf16.msra.mxu0 %v11999_v29  ;;  %v12058_v29 = vld [vmem:[#allocation10 + $0x22c] ss:$16 sps:$4 sm:$0xff]  }
 0x180   :  { %1551 = vmatprep.subr.bf16.mxu0 %v12007_v31  ;;  %v12056_v31 = vld [vmem:[#allocation10 + $0x228] ss:$16 sps:$4 sm:$0xff]  }
 0x181   :  { %1632 = vmatpush1.bf16.msra.mxu1 %v12002_v50 }
 0x182   :  { %1633 = vmatprep.subr.bf16.mxu1 %v12010_v51 }
 0x183   :  { %1552 = vmatpush1.bf16.msra.mxu0 %v12005_v33  ;;  %v12064_v33 = vld [vmem:[#allocation10 + $0x24c] ss:$16 sps:$4 sm:$0xff]  }
 0x184   :  { %1553 = vmatprep.subr.bf16.mxu0 %v12013_v35  ;;  %v12062_v35 = vld [vmem:[#allocation10 + $0x248] ss:$16 sps:$4 sm:$0xff]  }
 0x185   :  { %1634 = vmatpush1.bf16.msra.mxu1 %v12008_v52 }
 0x186   :  { %1635 = vmatprep.subr.bf16.mxu1 %v12016_v53 }
 0x187   :  { %1554 = vmatpush1.bf16.msra.mxu0 %v12011_v37  ;;  %v12070_v37 = vld [vmem:[#allocation10 + $0x26c] ss:$16 sps:$4 sm:$0xff]  }
 0x188   :  { %1555 = vmatprep.subr.bf16.mxu0 %v12019_v39  ;;  %v12065_v39 = vld [vmem:[#allocation10 + $0x260] ss:$16 sps:$4 sm:$0xff]  }
 0x189   :  { %1636 = vmatpush1.bf16.msra.mxu1 %v12014_v54  ;;  %v12077_v54 = vld [vmem:[#allocation10 + $0x2a0] ss:$16 sps:$4 sm:$0xff]  }
 0x18a   :  { %1637 = vmatprep.subr.bf16.mxu1 %v12022_v55  ;;  %v12080_v55 = vld [vmem:[#allocation10 + $0x2a8] ss:$16 sps:$4 sm:$0xff]  }
 0x18b   :  { %1556 = vmatpush1.bf16.msra.mxu0 %v12017_v41  ;;  %v12073_v41 = vld [vmem:[#allocation10 + $0x284] ss:$16 sps:$4 sm:$0xff]  }
 0x18c   :  { %1557 = vmatprep.subr.bf16.mxu0 %v12025_v43  ;;  %v328_v43 = vrot.slane %v13132_v11, %v13142_v38 }
 0x18d   :  { %1638 = vmatpush1.bf16.msra.mxu1 %v12020_v56  ;;  %v12085_v56 = vld [vmem:[#allocation10 + $0x2c4] ss:$16 sps:$4 sm:$0xff]  }
 0x18e   :  { %1639 = vmatprep.subr.bf16.mxu1 %v12028_v57  ;;  %v12088_v57 = vld [vmem:[#allocation10 + $0x2cc] ss:$16 sps:$4 sm:$0xff]  }
 0x18f   :  { %1558 = vmatpush1.bf16.msra.mxu0 %v12023_v45  ;;  %v12071_v45 = vld [vmem:[#allocation10 + $0x280] ss:$16 sps:$4 sm:$0xff]  }
 0x190   :  { %1559 = vmatprep.subr.bf16.mxu0 %v12031_v47 }
 0x191   :  { %1640 = vmatpush1.bf16.msra.mxu1 %v12026_v58 }
 0x192   :  { %1641 = vmatprep.subr.bf16.mxu1 %v12034_v60  ;;  %v12083_v60 = vld [vmem:[#allocation10 + $0x2c0] ss:$16 sps:$4 sm:$0xff]  }
 0x193   :  { %1560 = vmatpush1.bf16.msra.mxu0 %v12029_v49  ;;  %v12082_v49 = vld [vmem:[#allocation10 + $0x2ac] ss:$16 sps:$4 sm:$0xff]  }
 0x194   :  { %1561 = vmatprep.subr.bf16.mxu0 %v12037_v62  ;;  %v12091_v62 = vld [vmem:[#allocation10 + $0x2e4] ss:$16 sps:$4 sm:$0xff]  }
 0x195   :  { %1642 = vmatpush1.bf16.msra.mxu1 %v12032_v61  ;;  %v12086_v61 = vld [vmem:[#allocation10 + $0x2c8] ss:$16 sps:$4 sm:$0xff]  }
 0x196   :  { %1643 = vmatprep.subr.bf16.mxu1 %v12040_v63  ;;  %v12094_v63 = vld [vmem:[#allocation10 + $0x2ec] ss:$16 sps:$4 sm:$0xff]  }
 0x197   :  { %1562 = vmatpush1.bf16.msra.mxu0 %v12035_v0  ;;  %v12089_v0 = vld [vmem:[#allocation10 + $0x2e0] ss:$16 sps:$4 sm:$0xff]  }
 0x198   :  { %1563 = vmatprep.subr.bf16.mxu0 %v12043_v2  ;;  %v12097_v2 = vld [vmem:[#allocation10 + $0x304] ss:$16 sps:$4 sm:$0xff]  }
 0x199   :  { %1644 = vmatpush1.bf16.msra.mxu1 %v12038_v1  ;;  %v12092_v1 = vld [vmem:[#allocation10 + $0x2e8] ss:$16 sps:$4 sm:$0xff]  }
 0x19a   :  { %1645 = vmatprep.subr.bf16.mxu1 %v12046_v3  ;;  %v12100_v3 = vld [vmem:[#allocation10 + $0x30c] ss:$16 sps:$4 sm:$0xff]  }
 0x19b   :  { %1564 = vmatpush1.bf16.msra.mxu0 %v12041_v4  ;;  %v12095_v4 = vld [vmem:[#allocation10 + $0x300] ss:$16 sps:$4 sm:$0xff]  }
 0x19c   :  { %1574 = vmatprep.subr.bf16.mxu0 %v12049_v6  ;;  %v12103_v6 = vld [vmem:[#allocation10 + $0x324] ss:$16 sps:$4 sm:$0xff]  }
 0x19d   :  { %1646 = vmatpush1.bf16.msra.mxu1 %v12044_v5  ;;  %v12098_v5 = vld [vmem:[#allocation10 + $0x308] ss:$16 sps:$4 sm:$0xff]  }
 0x19e   :  { %1656 = vmatprep.subr.bf16.mxu1 %v12052_v7  ;;  %v12106_v7 = vld [vmem:[#allocation10 + $0x32c] ss:$16 sps:$4 sm:$0xff]  }
 0x231   :  { %v687_v15 = vpop.f32.mrb[0].mxu0 }
 0x232   :  { %v688_v16 = vadd.f32 %v687_v15, %v316_v13  ;;  %v689_v17 = vpop.f32.mrb[1].mxu0  ;;  %v12104_v13 = vld [vmem:[#allocation10 + $0x328] ss:$16 sps:$4 sm:$0xff]   ;;  %v12112_v15 = vld [vmem:[#allocation10 + $0x34c] ss:$16 sps:$4 sm:$0xff]  }
 0x233   :  { %v690_v19 = vadd.f32 %v689_v17, %v320_v14  ;;  %v691_v20 = vpop.f32.mrb[2].mxu0  ;;  %v13146_v44 = vpop.f32.mrb[0].mxu1  ;;  %v12109_v14 = vld [vmem:[#allocation10 + $0x344] ss:$16 sps:$4 sm:$0xff]   ;;  %v12110_v17 = vld [vmem:[#allocation10 + $0x348] ss:$16 sps:$4 sm:$0xff]  }
 0x234   :  { %v735_v21 = vmax.f32 %v688_v16, 0.0  ;;  %v692_v22 = vpop.f32.mrb[3].mxu0  ;;  %v730_v47 = vpop.f32.mrb[1].mxu1  ;;  %v12107_v16 = vld [vmem:[#allocation10 + $0x340] ss:$16 sps:$4 sm:$0xff]  }
 0x235   :  { %v736_v23 = vmax.f32 %v690_v19, 0.0  ;;  %v731_v50 = vadd.f32 %v730_v47, %v328_v43  ;;  %v732_v51 = vpop.f32.mrb[2].mxu1  ;;  %v12115_v19 = vld [vmem:[#allocation10 + $0x364] ss:$16 sps:$4 sm:$0xff]   ;;  %v12118_v20 = vld [vmem:[#allocation10 + $0x36c] ss:$16 sps:$4 sm:$0xff]  }
 0x236   :  { %v739_v27 = vpack.c.bf16 %v735_v21, %v735_v21  ;;  %v733_v52 = vpop.f32.mrb[3].mxu1  ;;  %v12113_v21 = vld [vmem:[#allocation10 + $0x360] ss:$16 sps:$4 sm:$0xff]   ;;  %v12116_v22 = vld [vmem:[#allocation10 + $0x368] ss:$16 sps:$4 sm:$0xff]  }
 0x237   :  { %v740_v24 = vpack.c.bf16 %v736_v23, %v736_v23  ;;  %v738_v53 = vmax.f32 %v731_v50, 0.0  ;;  %v12121_v23 = vld [vmem:[#allocation10 + $0x384] ss:$16 sps:$4 sm:$0xff]   ;;  %v12149_v50 = vld [vmem:[#allocation13 + $0x8] sm:$0xff]  }
 0x238   :  { %v12146_v47 = vld [vmem:[#allocation13 + $0x80] sm:$0xff]   ;;  %v12150_v51 = vld [vmem:[#allocation13 + $0x88] sm:$0xff]   ;;  %v12151_v52 = vld [vmem:[#allocation13 + $0x50] sm:$0xff]  }
 0x239   :  { %1565 = vmatprep.mubr.bf16.mxu0 %v740_v24  ;;  %1647 = vmatprep.mubr.bf16.mxu1 %v740_v24  ;;  %v742_v58 = vpack.c.bf16 %v738_v53, %v738_v53  ;;  %v12124_v24 = vld [vmem:[#allocation10 + $0x38c] ss:$16 sps:$4 sm:$0xff]   ;;  %v12152_v53 = vld [vmem:[#allocation13 + $0xd0] sm:$0xff]  }
 0x23a   :  { %1566 = vmatmul.mubr.bf16.vlgmr.msra.gmra.mrb[4].mxu0 %v739_v27  ;;  %1648 = vmatmul.mubr.bf16.vlgmr.msra.gmra.mrb[4].mxu1 %v739_v27  ;;  %v13149_v27 = vsub.s32 2, %v13127_v9 }
 0x23b   :  { %1575 = vmatpush1.bf16.msra.mxu0 %v12047_v25  ;;  %1657 = vmatpush1.bf16.msra.mxu1 %v12050_v26  ;;  %v12119_v25 = vld [vmem:[#allocation10 + $0x380] ss:$16 sps:$4 sm:$0xff]   ;;  %v12122_v26 = vld [vmem:[#allocation10 + $0x388] ss:$16 sps:$4 sm:$0xff]  }
 0x23c   :  { %1576 = vmatprep.subr.bf16.mxu0 %v12055_v28  ;;  %1658 = vmatprep.subr.bf16.mxu1 %v12058_v29  ;;  %v12127_v28 = vld [vmem:[#allocation10 + $0x3a4] ss:$16 sps:$4 sm:$0xff]   ;;  %v12130_v29 = vld [vmem:[#allocation10 + $0x3ac] ss:$16 sps:$4 sm:$0xff]  }
 0x23d   :  { %1606 = vmatprep.mubr.bf16.mxu0 %v742_v58  ;;  %1688 = vmatprep.mubr.bf16.mxu1 %v742_v58  ;;  %v12157_v58 = vld [vmem:[#allocation13 + $0x18] sm:$0xff]  }
 0x23f   :  { %1577 = vmatpush1.bf16.msra.mxu0 %v12053_v30  ;;  %1659 = vmatpush1.bf16.msra.mxu1 %v12056_v31  ;;  %v12125_v30 = vld [vmem:[#allocation10 + $0x3a0] ss:$16 sps:$4 sm:$0xff]   ;;  %v12128_v31 = vld [vmem:[#allocation10 + $0x3a8] ss:$16 sps:$4 sm:$0xff]  }
 0x240   :  { %1578 = vmatprep.subr.bf16.mxu0 %v12061_v32  ;;  %1660 = vmatprep.subr.bf16.mxu1 %v12064_v33  ;;  %v324_v32 = vrot.slane %v13132_v11, %v13149_v27  ;;  %v12133_v33 = vld [vmem:[#allocation10 + $0x3c4] ss:$16 sps:$4 sm:$0xff]  }
 0x241   :  { %v12143_v11 = vld [vmem:[#allocation13 + $0x40] sm:$0xff]  }
 0x243   :  { %1579 = vmatpush1.bf16.msra.mxu0 %v12059_v34  ;;  %1661 = vmatpush1.bf16.msra.mxu1 %v12062_v35  ;;  %v12136_v34 = vld [vmem:[#allocation10 + $0x3cc] ss:$16 sps:$4 sm:$0xff]   ;;  %v12131_v35 = vld [vmem:[#allocation10 + $0x3c0] ss:$16 sps:$4 sm:$0xff]  }
 0x244   :  { %1580 = vmatprep.subr.bf16.mxu0 %v12067_v36  ;;  %1662 = vmatprep.subr.bf16.mxu1 %v12070_v37  ;;  %v12134_v36 = vld [vmem:[#allocation10 + $0x3c8] ss:$16 sps:$4 sm:$0xff]   ;;  %v729_v37 = vadd.f32 %v13146_v44, %v324_v32  ;;  %v12147_v44 = vld [vmem:[#allocation13 + $0x48] sm:$0xff]  }
 0x246   :  { %v737_v43 = vmax.f32 %v729_v37, 0.0 }
 0x247   :  { %1581 = vmatpush1.bf16.msra.mxu0 %v12065_v39  ;;  %1663 = vmatpush1.bf16.msra.mxu1 %v12068_v40  ;;  %v12139_v39 = vld [vmem:[#allocation10 + $0x3e4] ss:$16 sps:$4 sm:$0xff]   ;;  %v12142_v40 = vld [vmem:[#allocation10 + $0x3ec] ss:$16 sps:$4 sm:$0xff]  }
 0x248   :  { %1582 = vmatprep.subr.bf16.mxu0 %v12073_v41  ;;  %1664 = vmatprep.subr.bf16.mxu1 %v12076_v42  ;;  %v12137_v41 = vld [vmem:[#allocation10 + $0x3e0] ss:$16 sps:$4 sm:$0xff]   ;;  %v12140_v42 = vld [vmem:[#allocation10 + $0x3e8] ss:$16 sps:$4 sm:$0xff]  }
 0x24b   :  { %1583 = vmatpush1.bf16.msra.mxu0 %v12071_v45  ;;  %1665 = vmatpush1.bf16.msra.mxu1 %v12074_v46  ;;  %v12144_v45 = vld [vmem:[#allocation13 + $0xc0] sm:$0xff]  }
 0x24c   :  { %1584 = vmatprep.subr.bf16.mxu0 %v12079_v48  ;;  %1666 = vmatprep.subr.bf16.mxu1 %v12082_v49  ;;  %v12145_v46 = vld [vmem:[#allocation13] sm:$0xff]   ;;  %v741_v48 = vpack.c.bf16 %v737_v43, %v737_v43  ;;  %v12148_v49 = vld [vmem:[#allocation13 + $0xc8] sm:$0xff]  }
 0x24f   :  { %1585 = vmatpush1.bf16.msra.mxu0 %v12077_v54  ;;  %1667 = vmatpush1.bf16.msra.mxu1 %v12080_v55  ;;  %v12153_v54 = vld [vmem:[#allocation13 + $0x10] sm:$0xff]  }
 0x250   :  { %1586 = vmatprep.subr.bf16.mxu0 %v12085_v56  ;;  %1668 = vmatprep.subr.bf16.mxu1 %v12088_v57  ;;  %v12154_v55 = vld [vmem:[#allocation13 + $0x90] sm:$0xff]   ;;  %v12155_v56 = vld [vmem:[#allocation13 + $0x58] sm:$0xff]  }
 0x251   :  { %v12156_v57 = vld [vmem:[#allocation13 + $0xd8] sm:$0xff]  }
 0x253   :  { %1587 = vmatpush1.bf16.msra.mxu0 %v12083_v60  ;;  %1669 = vmatpush1.bf16.msra.mxu1 %v12086_v61  ;;  %v12158_v60 = vld [vmem:[#allocation13 + $0x98] sm:$0xff]   ;;  %v12159_v61 = vld [vmem:[#allocation13 + $0x60] sm:$0xff]  }
 0x254   :  { %1588 = vmatprep.subr.bf16.mxu0 %v12091_v62  ;;  %1670 = vmatprep.subr.bf16.mxu1 %v12094_v63  ;;  %v12160_v62 = vld [vmem:[#allocation13 + $0xe0] sm:$0xff]  }
 0x255   :  { %v12161_v63 = vld [vmem:[#allocation13 + $0x20] sm:$0xff]  }
 0x257   :  { %1589 = vmatpush1.bf16.msra.mxu0 %v12089_v0  ;;  %1671 = vmatpush1.bf16.msra.mxu1 %v12092_v1  ;;  %v12162_v0 = vld [vmem:[#allocation13 + $0xa0] sm:$0xff]   ;;  %v12163_v1 = vld [vmem:[#allocation13 + $0x68] sm:$0xff]  }
 0x258   :  { %1590 = vmatprep.subr.bf16.mxu0 %v12097_v2  ;;  %1672 = vmatprep.subr.bf16.mxu1 %v12100_v3  ;;  %v12164_v2 = vld [vmem:[#allocation13 + $0xe8] sm:$0xff]  }
 0x259   :  { %v12165_v3 = vld [vmem:[#allocation13 + $0x28] sm:$0xff]  }
 0x25b   :  { %1591 = vmatpush1.bf16.msra.mxu0 %v12095_v4  ;;  %1673 = vmatpush1.bf16.msra.mxu1 %v12098_v5  ;;  %v12166_v4 = vld [vmem:[#allocation13 + $0xa8] sm:$0xff]   ;;  %v12167_v5 = vld [vmem:[#allocation13 + $0x70] sm:$0xff]  }
 0x25c   :  { %1592 = vmatprep.subr.bf16.mxu0 %v12103_v6  ;;  %1674 = vmatprep.subr.bf16.mxu1 %v12106_v7  ;;  %v12168_v6 = vld [vmem:[#allocation13 + $0xf0] sm:$0xff]  }
 0x25d   :  { %v12169_v7 = vld [vmem:[#allocation13 + $0x30] sm:$0xff]  }
 0x25f   :  { %1593 = vmatpush1.bf16.msra.mxu0 %v12101_v8  ;;  %1675 = vmatpush1.bf16.msra.mxu1 %v12104_v13  ;;  %v12170_v8 = vld [vmem:[#allocation13 + $0xb0] sm:$0xff]   ;;  %v12171_v13 = vld [vmem:[#allocation13 + $0x78] sm:$0xff]  }
 0x260   :  { %1594 = vmatprep.subr.bf16.mxu0 %v12109_v14  ;;  %1676 = vmatprep.subr.bf16.mxu1 %v12112_v15  ;;  %v12172_v14 = vld [vmem:[#allocation13 + $0xf8] sm:$0xff]  }
 0x261   :  { %v12173_v15 = vld [vmem:[#allocation13 + $0x38] sm:$0xff]  }
 0x263   :  { %1595 = vmatpush1.bf16.msra.mxu0 %v12107_v16  ;;  %1677 = vmatpush1.bf16.msra.mxu1 %v12110_v17  ;;  %v12174_v16 = vld [vmem:[#allocation13 + $0xb8] sm:$0xff]   ;;  %v2057_v17 = vld [vmem:[#allocation16] sm:$0xff] }
 0x264   :  { %1596 = vmatprep.subr.bf16.mxu0 %v12115_v19  ;;  %1678 = vmatprep.subr.bf16.mxu1 %v12118_v20  ;;  %v2061_v19 = vld [vmem:[#allocation16 + $0x20] sm:$0xff] }
 0x265   :  { %v10568_v20 = vcombine.low %v2057_v17, %v2061_v19 }
 0x267   :  { %1597 = vmatpush1.bf16.msra.mxu0 %v12113_v21  ;;  %1679 = vmatpush1.bf16.msra.mxu1 %v12116_v22  ;;  %v10569_v21 = vcombine.high %v2057_v17, %v2061_v19  ;;  %v2058_v22 = vld [vmem:[#allocation16 + $0x8] sm:$0xff] }
 0x268   :  { %1598 = vmatprep.subr.bf16.mxu0 %v12121_v23  ;;  %1680 = vmatprep.subr.bf16.mxu1 %v12124_v24  ;;  %v2062_v23 = vld [vmem:[#allocation16 + $0x28] sm:$0xff] }
 0x269   :  { %v10570_v24 = vcombine.low %v2058_v22, %v2062_v23  ;;  %v2090_v17 = vld [vmem:[#allocation16 + $0x108] sm:$0xff] }
 0x26a   :  { %v2094_v19 = vld [vmem:[#allocation16 + $0x128] sm:$0xff] }
 0x26b   :  { %1599 = vmatpush1.bf16.msra.mxu0 %v12119_v25  ;;  %1681 = vmatpush1.bf16.msra.mxu1 %v12122_v26  ;;  %v10571_v25 = vcombine.high %v2058_v22, %v2062_v23  ;;  %v871_v26 = vld [vmem:[#allocation11] sm:$0xf]  ;;  %v10603_v23 = vcombine.high %v2090_v17, %v2094_v19 }
 0x26c   :  { %1600 = vmatprep.subr.bf16.mxu0 %v12127_v28  ;;  %1682 = vmatprep.subr.bf16.mxu1 %v12130_v29  ;;  %v876_v28 = vrot.slane %v871_v26, %v13130_v10  ;;  %v884_v29 = vrot.slane %v871_v26, %v13149_v27 }
 0x26f   :  { %1601 = vmatpush1.bf16.msra.mxu0 %v12125_v30  ;;  %1683 = vmatpush1.bf16.msra.mxu1 %v12128_v31  ;;  %v880_v30 = vrot.slane %v871_v26, %v13135_v12  ;;  %v888_v31 = vrot.slane %v871_v26, %v13142_v38  ;;  %v2098_v26 = vld [vmem:[#allocation16 + $0x148] sm:$0xff] }
 0x270   :  { %1602 = vmatprep.subr.bf16.mxu0 %v12133_v33  ;;  %1684 = vmatprep.subr.bf16.mxu1 %v12136_v34 }
 0x273   :  { %1603 = vmatpush1.bf16.msra.mxu0 %v12131_v35  ;;  %1685 = vmatpush1.bf16.msra.mxu1 %v12134_v36 }
 0x274   :  { %1604 = vmatprep.subr.bf16.mxu0 %v12139_v39  ;;  %1686 = vmatprep.subr.bf16.mxu1 %v12142_v40 }
 0x277   :  { %1605 = vmatpush1.bf16.msra.mxu0 %v12137_v41  ;;  %1687 = vmatpush1.bf16.msra.mxu1 %v12140_v42 }
 0x278   :  { %11337 = vmatprep.subr.bf16.mxu0 %v12143_v11  ;;  %11359 = vmatprep.subr.bf16.mxu1 %v12144_v45 }
 0x27a   :  { %1607 = vmatmul.mubr.bf16.vlgmr.msra.gmra.mrb[4].mxu0 %v741_v48  ;;  %1689 = vmatmul.mubr.bf16.vlgmr.msra.gmra.mrb[4].mxu1 %v741_v48 }
 0x27b   :  { %11338 = vmatpush3.bf16.msra.mxu0 %v12145_v46  ;;  %11360 = vmatpush3.bf16.msra.mxu1 %v12146_v47  ;;  %v2065_v47 = vld [vmem:[#allocation16 + $0x40] sm:$0xff] }
 0x27c   :  { %11339 = vmatprep.subr.bf16.mxu0 %v12147_v44  ;;  %11361 = vmatprep.subr.bf16.mxu1 %v12148_v49  ;;  %v2069_v49 = vld [vmem:[#allocation16 + $0x60] sm:$0xff] }
 0x27f   :  { %11340 = vmatpush3.bf16.msra.mxu0 %v12149_v50  ;;  %11362 = vmatpush3.bf16.msra.mxu1 %v12150_v51  ;;  %v2066_v50 = vld [vmem:[#allocation16 + $0x48] sm:$0xff] }
 0x280   :  { %11341 = vmatprep.subr.bf16.mxu0 %v12151_v52  ;;  %11363 = vmatprep.subr.bf16.mxu1 %v12152_v53  ;;  %v2070_v51 = vld [vmem:[#allocation16 + $0x68] sm:$0xff] }
 0x283   :  { %11342 = vmatpush3.bf16.msra.mxu0 %v12153_v54  ;;  %11364 = vmatpush3.bf16.msra.mxu1 %v12154_v55 }
 0x284   :  { %11343 = vmatprep.subr.bf16.mxu0 %v12155_v56  ;;  %11365 = vmatprep.subr.bf16.mxu1 %v12156_v57  ;;  %v10577_v56 = vcombine.high %v2065_v47, %v2069_v49  ;;  %v10579_v57 = vcombine.high %v2066_v50, %v2070_v51 }
 0x287   :  { %11344 = vmatpush3.bf16.msra.mxu0 %v12157_v58  ;;  %11366 = vmatpush3.bf16.msra.mxu1 %v12158_v60  ;;  %v2073_v58 = vld [vmem:[#allocation16 + $0x80] sm:$0xff] }
 0x288   :  { %11345 = vmatprep.subr.bf16.mxu0 %v12159_v61  ;;  %11367 = vmatprep.subr.bf16.mxu1 %v12160_v62  ;;  %v2077_v60 = vld [vmem:[#allocation16 + $0xa0] sm:$0xff]  ;;  %v2074_v61 = vld [vmem:[#allocation16 + $0x88] sm:$0xff] }
 0x289   :  { %v2078_v62 = vld [vmem:[#allocation16 + $0xa8] sm:$0xff] }
 0x28b   :  { %11346 = vmatpush3.bf16.msra.mxu0 %v12161_v63  ;;  %11368 = vmatpush3.bf16.msra.mxu1 %v12162_v0  ;;  %v10576_v63 = vcombine.low %v2065_v47, %v2069_v49  ;;  %v10578_v0 = vcombine.low %v2066_v50, %v2070_v51  ;;  %v2121_v49 = vld [vmem:[#allocation16 + $0x200] sm:$0xff]  ;;  %v2122_v51 = vld [vmem:[#allocation16 + $0x208] sm:$0xff] }
 0x28c   :  { %11347 = vmatprep.subr.bf16.mxu0 %v12163_v1  ;;  %11369 = vmatprep.subr.bf16.mxu1 %v12164_v2  ;;  %v10585_v1 = vcombine.high %v2073_v58, %v2077_v60  ;;  %v10587_v2 = vcombine.high %v2074_v61, %v2078_v62  ;;  %v2125_v50 = vld [vmem:[#allocation16 + $0x220] sm:$0xff] }
 0x28f   :  { %11348 = vmatpush3.bf16.msra.mxu0 %v12165_v3  ;;  %11370 = vmatpush3.bf16.msra.mxu1 %v12166_v4  ;;  %v2081_v3 = vld [vmem:[#allocation16 + $0xc0] sm:$0xff] }
 0x290   :  { %11349 = vmatprep.subr.bf16.mxu0 %v12167_v5  ;;  %11371 = vmatprep.subr.bf16.mxu1 %v12168_v6  ;;  %v2085_v4 = vld [vmem:[#allocation16 + $0xe0] sm:$0xff]  ;;  %v2082_v5 = vld [vmem:[#allocation16 + $0xc8] sm:$0xff] }
 0x291   :  { %v2086_v6 = vld [vmem:[#allocation16 + $0xe8] sm:$0xff] }
 0x293   :  { %11350 = vmatpush3.bf16.msra.mxu0 %v12169_v7  ;;  %11372 = vmatpush3.bf16.msra.mxu1 %v12170_v8  ;;  %v10584_v7 = vcombine.low %v2073_v58, %v2077_v60  ;;  %v10586_v8 = vcombine.low %v2074_v61, %v2078_v62  ;;  %v2133_v58 = vld [vmem:[#allocation16 + $0x260] sm:$0xff]  ;;  %v2130_v60 = vld [vmem:[#allocation16 + $0x248] sm:$0xff]  ;;  %v10632_v62 = vcombine.low %v2121_v49, %v2125_v50 }
 0x294   :  { %11351 = vmatprep.subr.bf16.mxu0 %v12171_v13  ;;  %11373 = vmatprep.subr.bf16.mxu1 %v12172_v14  ;;  %v10593_v13 = vcombine.high %v2081_v3, %v2085_v4  ;;  %v10595_v14 = vcombine.high %v2082_v5, %v2086_v6  ;;  %v2134_v61 = vld [vmem:[#allocation16 + $0x268] sm:$0xff] }
 0x297   :  { %11352 = vmatpush3.bf16.msra.mxu0 %v12173_v15  ;;  %11374 = vmatpush3.bf16.msra.mxu1 %v12174_v16  ;;  %v2089_v15 = vld [vmem:[#allocation16 + $0x100] sm:$0xff] }
 0x298   :  { %2867 = vmatprep.subr.bf16.mxu0 %v10569_v21  ;;  %2908 = vmatprep.subr.bf16.mxu1 %v10571_v25  ;;  %v2093_v16 = vld [vmem:[#allocation16 + $0x120] sm:$0xff]  ;;  %v10594_v21 = vcombine.low %v2082_v5, %v2086_v6  ;;  %v2142_v5 = vld [vmem:[#allocation16 + $0x2a8] sm:$0xff] }
 0x299   :  { %v10601_v22 = vcombine.high %v2089_v15, %v2093_v16  ;;  %v2101_v25 = vld [vmem:[#allocation16 + $0x160] sm:$0xff] }
 0x34d   :  { %v1608_v32 = vpop.f32.mrb[4].mxu0  ;;  %v1690_v33 = vpop.f32.mrb[4].mxu1 }
 0x34e   :  { %v11645_v34 = vadd.f32 %v1608_v32, %v876_v28  ;;  %v11647_v35 = vadd.f32 %v1690_v33, %v884_v29  ;;  %v1610_v36 = vpop.f32.mrb[5].mxu0  ;;  %v1692_v37 = vpop.f32.mrb[5].mxu1  ;;  %v2102_v28 = vld [vmem:[#allocation16 + $0x168] sm:$0xff]  ;;  %v10600_v29 = vcombine.low %v2089_v15, %v2093_v16  ;;  %v2105_v33 = vld [vmem:[#allocation16 + $0x180] sm:$0xff] }
 0x34f   :  { %v11646_v39 = vadd.f32 %v1610_v36, %v880_v30  ;;  %v11648_v40 = vadd.f32 %v1692_v37, %v888_v31  ;;  %v1612_v41 = vpop.f32.mrb[6].mxu0  ;;  %v1694_v42 = vpop.f32.mrb[6].mxu1  ;;  %v10602_v30 = vcombine.low %v2090_v17, %v2094_v19  ;;  %v10611_v32 = vcombine.high %v2098_v26, %v2102_v28  ;;  %v2110_v36 = vld [vmem:[#allocation16 + $0x1a8] sm:$0xff]  ;;  %v2149_v15 = vld [vmem:[#allocation16 + $0x2e0] sm:$0xff] }
 0x350   :  { %v1697_v43 = vmax.f32 %v11645_v34, 0.0  ;;  %v1699_v11 = vmax.f32 %v11647_v35, 0.0  ;;  %v1613_v45 = vpop.f32.mrb[7].mxu0  ;;  %v1695_v46 = vpop.f32.mrb[7].mxu1  ;;  %v2109_v34 = vld [vmem:[#allocation16 + $0x1a0] sm:$0xff]  ;;  %v2106_v35 = vld [vmem:[#allocation16 + $0x188] sm:$0xff] }
 0x351   :  { %v1698_v48 = vmax.f32 %v11646_v39, 0.0  ;;  %v1700_v44 = vmax.f32 %v11648_v40, 0.0  ;;  %v10610_v39 = vcombine.low %v2098_v26, %v2102_v28  ;;  %v10617_v40 = vcombine.high %v2105_v33, %v2109_v34  ;;  %v2113_v42 = vld [vmem:[#allocation16 + $0x1c0] sm:$0xff]  ;;  %v2118_v45 = vld [vmem:[#allocation16 + $0x1e8] sm:$0xff] }
 0x352   :  { %v1701_v54 = vpack.c.bf16 %v1697_v43, %v1697_v43  ;;  %v1703_v55 = vpack.c.bf16 %v1699_v11, %v1699_v11  ;;  %v10619_v41 = vcombine.high %v2106_v35, %v2110_v36  ;;  %v2117_v43 = vld [vmem:[#allocation16 + $0x1e0] sm:$0xff]  ;;  %v2114_v11 = vld [vmem:[#allocation16 + $0x1c8] sm:$0xff]  ;;  %v10616_v46 = vcombine.low %v2105_v33, %v2109_v34 }
 0x353   :  { %v1702_v52 = vpack.c.bf16 %v1698_v48, %v1698_v48  ;;  %v1704_v53 = vpack.c.bf16 %v1700_v44, %v1700_v44  ;;  %v10618_v47 = vcombine.low %v2106_v35, %v2110_v36  ;;  %v10625_v48 = vcombine.high %v2113_v42, %v2117_v43  ;;  %v2146_v16 = vld [vmem:[#allocation16 + $0x2c8] sm:$0xff]  ;;  %v2165_v33 = vld [vmem:[#allocation16 + $0x360] sm:$0xff] }
 0x354   :  { %v10627_v44 = vcombine.high %v2114_v11, %v2118_v45  ;;  %v2150_v17 = vld [vmem:[#allocation16 + $0x2e8] sm:$0xff] }
 0x355   :  { %2000 = vmatprep.mubr.bf16.mxu0 %v1702_v52  ;;  %2040 = vmatprep.mubr.bf16.mxu1 %v1704_v53  ;;  %v2126_v52 = vld [vmem:[#allocation16 + $0x228] sm:$0xff]  ;;  %v10624_v53 = vcombine.low %v2113_v42, %v2117_v43  ;;  %v2173_v42 = vld [vmem:[#allocation16 + $0x3a0] sm:$0xff] }
 0x356   :  { %2001 = vmatmul.mubr.bf16.vlgmr.msra.gmra.mrb[8].mxu0 %v1701_v54  ;;  %2041 = vmatmul.mubr.bf16.vlgmr.msra.gmra.mrb[8].mxu1 %v1703_v55  ;;  %v10626_v54 = vcombine.low %v2114_v11, %v2118_v45  ;;  %v10633_v55 = vcombine.high %v2121_v49, %v2125_v50  ;;  %v2158_v26 = vld [vmem:[#allocation16 + $0x328] sm:$0xff]  ;;  %v2181_v49 = vld [vmem:[#allocation16 + $0x3e0] sm:$0xff] }
 0x357   :  { %2868 = vmatpush1.bf16.msra.mxu0 %v10568_v20  ;;  %2909 = vmatpush1.bf16.msra.mxu1 %v10570_v24  ;;  %v10592_v20 = vcombine.low %v2081_v3, %v2085_v4  ;;  %v2097_v24 = vld [vmem:[#allocation16 + $0x140] sm:$0xff]  ;;  %v2138_v4 = vld [vmem:[#allocation16 + $0x288] sm:$0xff] }
 0x358   :  { %2869 = vmatprep.subr.bf16.mxu0 %v10577_v56  ;;  %2910 = vmatprep.subr.bf16.mxu1 %v10579_v57  ;;  %v10609_v31 = vcombine.high %v2097_v24, %v2101_v25  ;;  %v10608_v37 = vcombine.low %v2097_v24, %v2101_v25  ;;  %v10635_v56 = vcombine.high %v2122_v51, %v2126_v52  ;;  %v2129_v57 = vld [vmem:[#allocation16 + $0x240] sm:$0xff]  ;;  %v2154_v25 = vld [vmem:[#allocation16 + $0x308] sm:$0xff] }
 0x359   :  { %2899 = vmatprep.mubr.bf16.mxu0 %v13119_v18  ;;  %2940 = vmatprep.mubr.bf16.mxu1 %v13119_v18  ;;  %v2141_v3 = vld [vmem:[#allocation16 + $0x2a0] sm:$0xff]  ;;  %v10640_v6 = vcombine.low %v2129_v57, %v2133_v58  ;;  %v2162_v34 = vld [vmem:[#allocation16 + $0x348] sm:$0xff] }
 0x35a   :  { %v2157_v24 = vld [vmem:[#allocation16 + $0x320] sm:$0xff]  ;;  %v2166_v35 = vld [vmem:[#allocation16 + $0x368] sm:$0xff] }
 0x35b   :  { %2870 = vmatpush1.bf16.msra.mxu0 %v10576_v63  ;;  %2911 = vmatpush1.bf16.msra.mxu1 %v10578_v0  ;;  %v10634_v63 = vcombine.low %v2122_v51, %v2126_v52  ;;  %v10641_v0 = vcombine.high %v2129_v57, %v2133_v58  ;;  %v2170_v43 = vld [vmem:[#allocation16 + $0x388] sm:$0xff]  ;;  %v2063_v57 = vld [vmem:[#allocation16 + $0x30] sm:$0xff]  ;;  %v2060_v58 = vld [vmem:[#allocation16 + $0x18] sm:$0xff] }
 0x35c   :  { %2871 = vmatprep.subr.bf16.mxu0 %v10585_v1  ;;  %2912 = vmatprep.subr.bf16.mxu1 %v10587_v2  ;;  %v10643_v1 = vcombine.high %v2130_v60, %v2134_v61  ;;  %v2137_v2 = vld [vmem:[#allocation16 + $0x280] sm:$0xff]  ;;  %v2174_v11 = vld [vmem:[#allocation16 + $0x3a8] sm:$0xff] }
 0x35d   :  { %v10648_v19 = vcombine.low %v2137_v2, %v2141_v3  ;;  %v2178_v50 = vld [vmem:[#allocation16 + $0x3c8] sm:$0xff] }
 0x35e   :  { %v2182_v51 = vld [vmem:[#allocation16 + $0x3e8] sm:$0xff] }
 0x35f   :  { %2872 = vmatpush1.bf16.msra.mxu0 %v10584_v7  ;;  %2913 = vmatpush1.bf16.msra.mxu1 %v10586_v8  ;;  %v10642_v7 = vcombine.low %v2130_v60, %v2134_v61  ;;  %v10649_v8 = vcombine.high %v2137_v2, %v2141_v3  ;;  %v2064_v60 = vld [vmem:[#allocation16 + $0x38] sm:$0xff]  ;;  %v2071_v2 = vld [vmem:[#allocation16 + $0x70] sm:$0xff] }
 0x360   :  { %2873 = vmatprep.subr.bf16.mxu0 %v10593_v13  ;;  %2914 = vmatprep.subr.bf16.mxu1 %v10595_v14  ;;  %v10651_v13 = vcombine.high %v2138_v4, %v2142_v5  ;;  %v2145_v14 = vld [vmem:[#allocation16 + $0x2c0] sm:$0xff]  ;;  %v2068_v3 = vld [vmem:[#allocation16 + $0x58] sm:$0xff] }
 0x361   :  { %v10656_v28 = vcombine.low %v2145_v14, %v2149_v15 }
 0x363   :  { %2874 = vmatpush1.bf16.msra.mxu0 %v10592_v20  ;;  %2915 = vmatpush1.bf16.msra.mxu1 %v10594_v21  ;;  %v10650_v20 = vcombine.low %v2138_v4, %v2142_v5  ;;  %v10657_v21 = vcombine.high %v2145_v14, %v2149_v15  ;;  %v2072_v4 = vld [vmem:[#allocation16 + $0x78] sm:$0xff]  ;;  %v2079_v14 = vld [vmem:[#allocation16 + $0xb0] sm:$0xff] }
 0x364   :  { %2875 = vmatprep.subr.bf16.mxu0 %v10601_v22  ;;  %2916 = vmatprep.subr.bf16.mxu1 %v10603_v23  ;;  %v10659_v22 = vcombine.high %v2146_v16, %v2150_v17  ;;  %v2153_v23 = vld [vmem:[#allocation16 + $0x300] sm:$0xff]  ;;  %v2076_v15 = vld [vmem:[#allocation16 + $0x98] sm:$0xff] }
 0x365   :  { %v10664_v36 = vcombine.low %v2153_v23, %v2157_v24 }
 0x367   :  { %2876 = vmatpush1.bf16.msra.mxu0 %v10600_v29  ;;  %2917 = vmatpush1.bf16.msra.mxu1 %v10602_v30  ;;  %v10658_v29 = vcombine.low %v2146_v16, %v2150_v17  ;;  %v10665_v30 = vcombine.high %v2153_v23, %v2157_v24  ;;  %v2080_v16 = vld [vmem:[#allocation16 + $0xb8] sm:$0xff]  ;;  %v2087_v23 = vld [vmem:[#allocation16 + $0xf0] sm:$0xff] }
 0x368   :  { %2877 = vmatprep.subr.bf16.mxu0 %v10609_v31  ;;  %2918 = vmatprep.subr.bf16.mxu1 %v10611_v32  ;;  %v10667_v31 = vcombine.high %v2154_v25, %v2158_v26  ;;  %v2161_v32 = vld [vmem:[#allocation16 + $0x340] sm:$0xff]  ;;  %v2084_v24 = vld [vmem:[#allocation16 + $0xd8] sm:$0xff] }
 0x369   :  { %v10672_v45 = vcombine.low %v2161_v32, %v2165_v33 }
 0x36b   :  { %2878 = vmatpush1.bf16.msra.mxu0 %v10608_v37  ;;  %2919 = vmatpush1.bf16.msra.mxu1 %v10610_v39  ;;  %v10666_v37 = vcombine.low %v2154_v25, %v2158_v26  ;;  %v10673_v39 = vcombine.high %v2161_v32, %v2165_v33  ;;  %v2088_v25 = vld [vmem:[#allocation16 + $0xf8] sm:$0xff]  ;;  %v2095_v32 = vld [vmem:[#allocation16 + $0x130] sm:$0xff] }
 0x36c   :  { %2879 = vmatprep.subr.bf16.mxu0 %v10617_v40  ;;  %2920 = vmatprep.subr.bf16.mxu1 %v10619_v41  ;;  %v10675_v40 = vcombine.high %v2162_v34, %v2166_v35  ;;  %v2169_v41 = vld [vmem:[#allocation16 + $0x380] sm:$0xff]  ;;  %v2092_v33 = vld [vmem:[#allocation16 + $0x118] sm:$0xff] }
 0x36d   :  { %v10680_v52 = vcombine.low %v2169_v41, %v2173_v42 }
 0x36f   :  { %2880 = vmatpush1.bf16.msra.mxu0 %v10616_v46  ;;  %2921 = vmatpush1.bf16.msra.mxu1 %v10618_v47  ;;  %v10674_v46 = vcombine.low %v2162_v34, %v2166_v35  ;;  %v10681_v47 = vcombine.high %v2169_v41, %v2173_v42  ;;  %v2096_v34 = vld [vmem:[#allocation16 + $0x138] sm:$0xff] }
 0x370   :  { %2881 = vmatprep.subr.bf16.mxu0 %v10625_v48  ;;  %2922 = vmatprep.subr.bf16.mxu1 %v10627_v44  ;;  %v10683_v48 = vcombine.high %v2170_v43, %v2174_v11  ;;  %v2177_v44 = vld [vmem:[#allocation16 + $0x3c0] sm:$0xff]  ;;  %v2100_v41 = vld [vmem:[#allocation16 + $0x158] sm:$0xff] }
 0x371   :  { %v10688_v61 = vcombine.low %v2177_v44, %v2181_v49  ;;  %v2104_v42 = vld [vmem:[#allocation16 + $0x178] sm:$0xff] }
 0x373   :  { %2882 = vmatpush1.bf16.msra.mxu0 %v10624_v53  ;;  %2923 = vmatpush1.bf16.msra.mxu1 %v10626_v54  ;;  %v10682_v53 = vcombine.low %v2170_v43, %v2174_v11  ;;  %v10689_v54 = vcombine.high %v2177_v44, %v2181_v49  ;;  %v10606_v11 = vcombine.low %v2092_v33, %v2096_v34  ;;  %v2108_v44 = vld [vmem:[#allocation16 + $0x198] sm:$0xff] }
 0x374   :  { %2883 = vmatprep.subr.bf16.mxu0 %v10633_v55  ;;  %2924 = vmatprep.subr.bf16.mxu1 %v10635_v56  ;;  %v10691_v55 = vcombine.high %v2178_v50, %v2182_v51  ;;  %v2059_v56 = vld [vmem:[#allocation16 + $0x10] sm:$0xff]  ;;  %v2112_v49 = vld [vmem:[#allocation16 + $0x1b8] sm:$0xff] }
 0x375   :  { %v10572_v5 = vcombine.low %v2059_v56, %v2063_v57 }
 0x377   :  { %2884 = vmatpush1.bf16.msra.mxu0 %v10632_v62  ;;  %2925 = vmatpush1.bf16.msra.mxu1 %v10634_v63  ;;  %v10690_v62 = vcombine.low %v2178_v50, %v2182_v51  ;;  %v10573_v63 = vcombine.high %v2059_v56, %v2063_v57  ;;  %v10614_v51 = vcombine.low %v2100_v41, %v2104_v42  ;;  %v2116_v56 = vld [vmem:[#allocation16 + $0x1d8] sm:$0xff] }
 0x378   :  { %2885 = vmatprep.subr.bf16.mxu0 %v10641_v0  ;;  %2926 = vmatprep.subr.bf16.mxu1 %v10643_v1  ;;  %v10575_v0 = vcombine.high %v2060_v58, %v2064_v60  ;;  %v2067_v1 = vld [vmem:[#allocation16 + $0x50] sm:$0xff]  ;;  %v2120_v57 = vld [vmem:[#allocation16 + $0x1f8] sm:$0xff] }
 0x379   :  { %v10580_v17 = vcombine.low %v2067_v1, %v2071_v2 }
 0x37b   :  { %2886 = vmatpush1.bf16.msra.mxu0 %v10640_v6  ;;  %2927 = vmatpush1.bf16.msra.mxu1 %v10642_v7  ;;  %v10574_v6 = vcombine.low %v2060_v58, %v2064_v60  ;;  %v10581_v7 = vcombine.high %v2067_v1, %v2071_v2  ;;  %v10622_v60 = vcombine.low %v2108_v44, %v2112_v49  ;;  %v2124_v1 = vld [vmem:[#allocation16 + $0x218] sm:$0xff] }
 0x37c   :  { %2887 = vmatprep.subr.bf16.mxu0 %v10649_v8  ;;  %2928 = vmatprep.subr.bf16.mxu1 %v10651_v13  ;;  %v10583_v8 = vcombine.high %v2068_v3, %v2072_v4  ;;  %v2075_v13 = vld [vmem:[#allocation16 + $0x90] sm:$0xff]  ;;  %v2128_v2 = vld [vmem:[#allocation16 + $0x238] sm:$0xff] }
 0x37d   :  { %v10588_v26 = vcombine.low %v2075_v13, %v2079_v14 }
 0x37f   :  { %2888 = vmatpush1.bf16.msra.mxu0 %v10648_v19  ;;  %2929 = vmatpush1.bf16.msra.mxu1 %v10650_v20  ;;  %v10582_v19 = vcombine.low %v2068_v3, %v2072_v4  ;;  %v10589_v20 = vcombine.high %v2075_v13, %v2079_v14  ;;  %v10630_v4 = vcombine.low %v2116_v56, %v2120_v57  ;;  %v2132_v13 = vld [vmem:[#allocation16 + $0x258] sm:$0xff] }
 0x380   :  { %2889 = vmatprep.subr.bf16.mxu0 %v10657_v21  ;;  %2930 = vmatprep.subr.bf16.mxu1 %v10659_v22  ;;  %v10591_v21 = vcombine.high %v2076_v15, %v2080_v16  ;;  %v2083_v22 = vld [vmem:[#allocation16 + $0xd0] sm:$0xff]  ;;  %v2136_v14 = vld [vmem:[#allocation16 + $0x278] sm:$0xff] }
 0x381   :  { %v10596_v35 = vcombine.low %v2083_v22, %v2087_v23 }
 0x383   :  { %2890 = vmatpush1.bf16.msra.mxu0 %v10656_v28  ;;  %2931 = vmatpush1.bf16.msra.mxu1 %v10658_v29  ;;  %v10590_v28 = vcombine.low %v2076_v15, %v2080_v16  ;;  %v10597_v29 = vcombine.high %v2083_v22, %v2087_v23  ;;  %v13164_v15 = vld [vmem:[#allocation17 + $0x10] sm:$0xff] }
 0x384   :  { %2891 = vmatprep.subr.bf16.mxu0 %v10665_v30  ;;  %2932 = vmatprep.subr.bf16.mxu1 %v10667_v31  ;;  %v10599_v30 = vcombine.high %v2084_v24, %v2088_v25  ;;  %v2091_v31 = vld [vmem:[#allocation16 + $0x110] sm:$0xff] }
 0x385   :  { %v10604_v43 = vcombine.low %v2091_v31, %v2095_v32  ;;  %v13166_v16 = vld [vmem:[#allocation17 + $0x30] sm:$0xff] }
 0x386   :  { %v13174_v22 = vcombine.low %v13164_v15, %v13166_v16 }
 0x387   :  { %2892 = vmatpush1.bf16.msra.mxu0 %v10664_v36  ;;  %2933 = vmatpush1.bf16.msra.mxu1 %v10666_v37  ;;  %v10598_v36 = vcombine.low %v2084_v24, %v2088_v25  ;;  %v10605_v37 = vcombine.high %v2091_v31, %v2095_v32  ;;  %v10647_v25 = vcombine.high %v2132_v13, %v2136_v14 }
 0x388   :  { %2893 = vmatprep.subr.bf16.mxu0 %v10673_v39  ;;  %2934 = vmatprep.subr.bf16.mxu1 %v10675_v40  ;;  %v2099_v39 = vld [vmem:[#allocation16 + $0x150] sm:$0xff]  ;;  %17686 = vst [vmem:[#allocation40_spill] sm:$0xff] %v13174_v22  ;;  %v10646_v32 = vcombine.low %v2132_v13, %v2136_v14 }
 0x389   :  { %v2103_v40 = vld [vmem:[#allocation16 + $0x170] sm:$0xff] }
 0x38a   :  { %v10612_v50 = vcombine.low %v2099_v39, %v2103_v40 }
 0x38b   :  { %2894 = vmatpush1.bf16.msra.mxu0 %v10672_v45  ;;  %2935 = vmatpush1.bf16.msra.mxu1 %v10674_v46  ;;  %v10613_v45 = vcombine.high %v2099_v39, %v2103_v40  ;;  %v10615_v46 = vcombine.high %v2100_v41, %v2104_v42 }
 0x38c   :  { %2895 = vmatprep.subr.bf16.mxu0 %v10681_v47  ;;  %2936 = vmatprep.subr.bf16.mxu1 %v10683_v48  ;;  %v2107_v47 = vld [vmem:[#allocation16 + $0x190] sm:$0xff] }
 0x38d   :  { %v2111_v48 = vld [vmem:[#allocation16 + $0x1b0] sm:$0xff] }
 0x38e   :  { %v10620_v58 = vcombine.low %v2107_v47, %v2111_v48 }
 0x38f   :  { %2896 = vmatpush1.bf16.msra.mxu0 %v10680_v52  ;;  %2937 = vmatpush1.bf16.msra.mxu1 %v10682_v53  ;;  %v10621_v52 = vcombine.high %v2107_v47, %v2111_v48  ;;  %v10623_v53 = vcombine.high %v2108_v44, %v2112_v49 }
 0x390   :  { %2897 = vmatprep.subr.bf16.mxu0 %v10689_v54  ;;  %2938 = vmatprep.subr.bf16.mxu1 %v10691_v55  ;;  %v2115_v54 = vld [vmem:[#allocation16 + $0x1d0] sm:$0xff] }
 0x391   :  { %v2119_v55 = vld [vmem:[#allocation16 + $0x1f0] sm:$0xff] }
 0x392   :  { %v10628_v3 = vcombine.low %v2115_v54, %v2119_v55 }
 0x393   :  { %2898 = vmatpush1.bf16.msra.mxu0 %v10688_v61  ;;  %2939 = vmatpush1.bf16.msra.mxu1 %v10690_v62  ;;  %v10629_v61 = vcombine.high %v2115_v54, %v2119_v55  ;;  %v10631_v62 = vcombine.high %v2116_v56, %v2120_v57 }
 0x394   :  { %2949 = vmatprep.subr.bf16.mxu0 %v10573_v63  ;;  %2990 = vmatprep.subr.bf16.mxu1 %v10575_v0  ;;  %v2123_v63 = vld [vmem:[#allocation16 + $0x210] sm:$0xff] }
 0x395   :  { %v2127_v0 = vld [vmem:[#allocation16 + $0x230] sm:$0xff] }
 0x396   :  { %2900 = vmatmul.mubr.bf16.vlgmr.msra.gmra.mrb[12].mxu0 %v13123_v59  ;;  %2941 = vmatmul.mubr.bf16.vlgmr.msra.gmra.mrb[12].mxu1 %v13123_v59 }
 0x397   :  { %2950 = vmatpush1.bf16.msra.mxu0 %v10572_v5  ;;  %2991 = vmatpush1.bf16.msra.mxu1 %v10574_v6  ;;  %v2131_v5 = vld [vmem:[#allocation16 + $0x250] sm:$0xff]  ;;  %v10637_v6 = vcombine.high %v2123_v63, %v2127_v0 }
 0x398   :  { %2951 = vmatprep.subr.bf16.mxu0 %v10581_v7  ;;  %2992 = vmatprep.subr.bf16.mxu1 %v10583_v8  ;;  %v10639_v7 = vcombine.high %v2124_v1, %v2128_v2  ;;  %v2135_v8 = vld [vmem:[#allocation16 + $0x270] sm:$0xff] }
 0x399   :  { %2981 = vmatprep.mubr.bf16.mxu0 %v13119_v18  ;;  %3022 = vmatprep.mubr.bf16.mxu1 %v13119_v18  ;;  %v10607_v18 = vcombine.high %v2092_v33, %v2096_v34  ;;  %v10645_v24 = vcombine.high %v2131_v5, %v2135_v8  ;;  %v10644_v31 = vcombine.low %v2131_v5, %v2135_v8  ;;  %v2180_v5 = vld [vmem:[#allocation16 + $0x3d8] sm:$0xff] }
 0x39b   :  { %2952 = vmatpush1.bf16.msra.mxu0 %v10580_v17  ;;  %2993 = vmatpush1.bf16.msra.mxu1 %v10582_v19  ;;  %v13168_v17 = vld [vmem:[#allocation17 + $0x18] sm:$0xff]  ;;  %v10636_v19 = vcombine.low %v2123_v63, %v2127_v0 }
 0x39c   :  { %2953 = vmatprep.subr.bf16.mxu0 %v10589_v20  ;;  %2994 = vmatprep.subr.bf16.mxu1 %v10591_v21  ;;  %v13170_v20 = vld [vmem:[#allocation17 + $0x38] sm:$0xff]  ;;  %v10638_v21 = vcombine.low %v2124_v1, %v2128_v2 }
 0x39d   :  { %v13178_v23 = vcombine.low %v13168_v17, %v13170_v20 }
 0x39f   :  { %2954 = vmatpush1.bf16.msra.mxu0 %v10588_v26  ;;  %2995 = vmatpush1.bf16.msra.mxu1 %v10590_v28  ;;  %17687 = vst [vmem:[#allocation41_spill] sm:$0xff] %v13178_v23  ;;  %v2139_v26 = vld [vmem:[#allocation16 + $0x290] sm:$0xff] }
 0x3a0   :  { %2955 = vmatprep.subr.bf16.mxu0 %v10597_v29  ;;  %2996 = vmatprep.subr.bf16.mxu1 %v10599_v30  ;;  %v2143_v28 = vld [vmem:[#allocation16 + $0x2b0] sm:$0xff]  ;;  %v2140_v29 = vld [vmem:[#allocation16 + $0x298] sm:$0xff] }
 0x3a1   :  { %v2144_v30 = vld [vmem:[#allocation16 + $0x2b8] sm:$0xff]  ;;  %v10653_v33 = vcombine.high %v2139_v26, %v2143_v28  ;;  %v10652_v39 = vcombine.low %v2139_v26, %v2143_v28 }
 0x3a2   :  { %v10655_v34 = vcombine.high %v2140_v29, %v2144_v30  ;;  %v10654_v40 = vcombine.low %v2140_v29, %v2144_v30 }
 0x3a3   :  { %2956 = vmatpush1.bf16.msra.mxu0 %v10596_v35  ;;  %2997 = vmatpush1.bf16.msra.mxu1 %v10598_v36  ;;  %v2147_v35 = vld [vmem:[#allocation16 + $0x2d0] sm:$0xff] }
 0x3a4   :  { %2957 = vmatprep.subr.bf16.mxu0 %v10605_v37  ;;  %2998 = vmatprep.subr.bf16.mxu1 %v10607_v18  ;;  %v2151_v36 = vld [vmem:[#allocation16 + $0x2f0] sm:$0xff]  ;;  %v2148_v37 = vld [vmem:[#allocation16 + $0x2d8] sm:$0xff] }
 0x3a5   :  { %v2152_v18 = vld [vmem:[#allocation16 + $0x2f8] sm:$0xff]  ;;  %v10661_v41 = vcombine.high %v2147_v35, %v2151_v36  ;;  %v10660_v47 = vcombine.low %v2147_v35, %v2151_v36 }
 0x3a6   :  { %v10663_v42 = vcombine.high %v2148_v37, %v2152_v18  ;;  %v10662_v48 = vcombine.low %v2148_v37, %v2152_v18 }
 0x3a7   :  { %2958 = vmatpush1.bf16.msra.mxu0 %v10604_v43  ;;  %2999 = vmatpush1.bf16.msra.mxu1 %v10606_v11  ;;  %v2155_v43 = vld [vmem:[#allocation16 + $0x310] sm:$0xff] }
 0x3a8   :  { %2959 = vmatprep.subr.bf16.mxu0 %v10613_v45  ;;  %3000 = vmatprep.subr.bf16.mxu1 %v10615_v46  ;;  %v2159_v11 = vld [vmem:[#allocation16 + $0x330] sm:$0xff]  ;;  %v2156_v45 = vld [vmem:[#allocation16 + $0x318] sm:$0xff] }
 0x3a9   :  { %v2160_v46 = vld [vmem:[#allocation16 + $0x338] sm:$0xff]  ;;  %v10669_v44 = vcombine.high %v2155_v43, %v2159_v11  ;;  %v10668_v54 = vcombine.low %v2155_v43, %v2159_v11 }
 0x3aa   :  { %v10671_v49 = vcombine.high %v2156_v45, %v2160_v46  ;;  %v10670_v55 = vcombine.low %v2156_v45, %v2160_v46 }
 0x3ab   :  { %2960 = vmatpush1.bf16.msra.mxu0 %v10612_v50  ;;  %3001 = vmatpush1.bf16.msra.mxu1 %v10614_v51  ;;  %v2163_v50 = vld [vmem:[#allocation16 + $0x350] sm:$0xff] }
 0x3ac   :  { %2961 = vmatprep.subr.bf16.mxu0 %v10621_v52  ;;  %3002 = vmatprep.subr.bf16.mxu1 %v10623_v53  ;;  %v2167_v51 = vld [vmem:[#allocation16 + $0x370] sm:$0xff]  ;;  %v2164_v52 = vld [vmem:[#allocation16 + $0x358] sm:$0xff] }
 0x3ad   :  { %v2168_v53 = vld [vmem:[#allocation16 + $0x378] sm:$0xff]  ;;  %v10677_v56 = vcombine.high %v2163_v50, %v2167_v51  ;;  %v10676_v63 = vcombine.low %v2163_v50, %v2167_v51 }
 0x3ae   :  { %v10679_v57 = vcombine.high %v2164_v52, %v2168_v53  ;;  %v10678_v0 = vcombine.low %v2164_v52, %v2168_v53 }
 0x3af   :  { %2962 = vmatpush1.bf16.msra.mxu0 %v10620_v58  ;;  %3003 = vmatpush1.bf16.msra.mxu1 %v10622_v60  ;;  %v2171_v58 = vld [vmem:[#allocation16 + $0x390] sm:$0xff] }
 0x3b0   :  { %2963 = vmatprep.subr.bf16.mxu0 %v10629_v61  ;;  %3004 = vmatprep.subr.bf16.mxu1 %v10631_v62  ;;  %v2175_v60 = vld [vmem:[#allocation16 + $0x3b0] sm:$0xff]  ;;  %v2172_v61 = vld [vmem:[#allocation16 + $0x398] sm:$0xff] }
 0x3b1   :  { %v2176_v62 = vld [vmem:[#allocation16 + $0x3b8] sm:$0xff]  ;;  %v10685_v1 = vcombine.high %v2171_v58, %v2175_v60 }
 0x3b2   :  { %v10687_v2 = vcombine.high %v2172_v61, %v2176_v62  ;;  %v10686_v8 = vcombine.low %v2172_v61, %v2176_v62 }
 0x3b3   :  { %2964 = vmatpush1.bf16.msra.mxu0 %v10628_v3  ;;  %3005 = vmatpush1.bf16.msra.mxu1 %v10630_v4  ;;  %v2179_v3 = vld [vmem:[#allocation16 + $0x3d0] sm:$0xff] }
 0x3b4   :  { %2965 = vmatprep.subr.bf16.mxu0 %v10637_v6  ;;  %3006 = vmatprep.subr.bf16.mxu1 %v10639_v7  ;;  %v2183_v4 = vld [vmem:[#allocation16 + $0x3f0] sm:$0xff]  ;;  %v2184_v6 = vld [vmem:[#allocation16 + $0x3f8] sm:$0xff]  ;;  %v10684_v7 = vcombine.low %v2171_v58, %v2175_v60 }
 0x3b5   :  { %v10693_v13 = vcombine.high %v2179_v3, %v2183_v4  ;;  %v10695_v14 = vcombine.high %v2180_v5, %v2184_v6  ;;  %v10692_v26 = vcombine.low %v2179_v3, %v2183_v4  ;;  %v10694_v28 = vcombine.low %v2180_v5, %v2184_v6 }
 0x3b7   :  { %2966 = vmatpush1.bf16.msra.mxu0 %v10636_v19  ;;  %3007 = vmatpush1.bf16.msra.mxu1 %v10638_v21  ;;  %v3032_v19 = vld [vmem:[#allocation17] sm:$0xff] }
 0x3b8   :  { %2967 = vmatprep.subr.bf16.mxu0 %v10645_v24  ;;  %3008 = vmatprep.subr.bf16.mxu1 %v10647_v25  ;;  %v3036_v21 = vld [vmem:[#allocation17 + $0x20] sm:$0xff]  ;;  %v3033_v24 = vld [vmem:[#allocation17 + $0x8] sm:$0xff] }
 0x3b9   :  { %v3037_v25 = vld [vmem:[#allocation17 + $0x28] sm:$0xff]  ;;  %v13180_v29 = vcombine.high %v3032_v19, %v3036_v21  ;;  %v13184_v35 = vcombine.low %v3032_v19, %v3036_v21 }
 0x3ba   :  { %v13182_v30 = vcombine.high %v3033_v24, %v3037_v25  ;;  %v13186_v36 = vcombine.low %v3033_v24, %v3037_v25 }
 0x3bb   :  { %2968 = vmatpush1.bf16.msra.mxu0 %v10644_v31  ;;  %3009 = vmatpush1.bf16.msra.mxu1 %v10646_v32  ;;  %17688 = vst [vmem:[#allocation42_spill] sm:$0xff] %v13180_v29  ;;  %v3040_v31 = vld [vmem:[#allocation17 + $0x40] sm:$0xff] }
 0x3bc   :  { %2969 = vmatprep.subr.bf16.mxu0 %v10653_v33  ;;  %3010 = vmatprep.subr.bf16.mxu1 %v10655_v34  ;;  %17689 = vst [vmem:[#allocation43_spill] sm:$0xff] %v13182_v30  ;;  %v3044_v32 = vld [vmem:[#allocation17 + $0x60] sm:$0xff]  ;;  %v3041_v33 = vld [vmem:[#allocation17 + $0x48] sm:$0xff] }
 0x3bd   :  { %v3045_v34 = vld [vmem:[#allocation17 + $0x68] sm:$0xff]  ;;  %v13190_v37 = vcombine.high %v3040_v31, %v3044_v32  ;;  %v13198_v43 = vcombine.low %v3040_v31, %v3044_v32 }
 0x3be   :  { %v13192_v18 = vcombine.high %v3041_v33, %v3045_v34  ;;  %v13200_v11 = vcombine.low %v3041_v33, %v3045_v34  ;;  %v3089_v31 = vld [vmem:[#allocation17 + $0x1c8] sm:$0xff] }
 0x3bf   :  { %2970 = vmatpush1.bf16.msra.mxu0 %v10652_v39  ;;  %3011 = vmatpush1.bf16.msra.mxu1 %v10654_v40  ;;  %v3048_v39 = vld [vmem:[#allocation17 + $0x80] sm:$0xff]  ;;  %v3093_v32 = vld [vmem:[#allocation17 + $0x1e8] sm:$0xff] }
 0x3c0   :  { %2971 = vmatprep.subr.bf16.mxu0 %v10661_v41  ;;  %3012 = vmatprep.subr.bf16.mxu1 %v10663_v42  ;;  %v3052_v40 = vld [vmem:[#allocation17 + $0xa0] sm:$0xff]  ;;  %v3049_v41 = vld [vmem:[#allocation17 + $0x88] sm:$0xff] }
 0x3c1   :  { %v3053_v42 = vld [vmem:[#allocation17 + $0xa8] sm:$0xff]  ;;  %v13204_v45 = vcombine.high %v3048_v39, %v3052_v40  ;;  %v13212_v50 = vcombine.low %v3048_v39, %v3052_v40  ;;  %v13268_v40 = vcombine.high %v3089_v31, %v3093_v32 }
 0x3c2   :  { %v13206_v46 = vcombine.high %v3049_v41, %v3053_v42  ;;  %v13214_v51 = vcombine.low %v3049_v41, %v3053_v42  ;;  %v13274_v42 = vcombine.low %v3089_v31, %v3093_v32 }
 0x3c3   :  { %2972 = vmatpush1.bf16.msra.mxu0 %v10660_v47  ;;  %3013 = vmatpush1.bf16.msra.mxu1 %v10662_v48  ;;  %v3056_v47 = vld [vmem:[#allocation17 + $0xc0] sm:$0xff]  ;;  %17698 = vst [vmem:[#allocation52_spill] sm:$0xff] %v13268_v40 }
 0x3c4   :  { %2973 = vmatprep.subr.bf16.mxu0 %v10669_v44  ;;  %3014 = vmatprep.subr.bf16.mxu1 %v10671_v49  ;;  %v3060_v48 = vld [vmem:[#allocation17 + $0xe0] sm:$0xff]  ;;  %v3057_v44 = vld [vmem:[#allocation17 + $0xc8] sm:$0xff]  ;;  %v16566_v49 = vmov 0   ;;  %17700 = vst [vmem:[#allocation54_spill] sm:$0xff] %v13274_v42 }
 0x3c5   :  { %v13218_v52 = vcombine.high %v3056_v47, %v3060_v48  ;;  %v13224_v58 = vcombine.low %v3056_v47, %v3060_v48  ;;  %v13280_v47 = vcombine.high %v13164_v15, %v13166_v16  ;;  %v13284_v48 = vcombine.high %v13168_v17, %v13170_v20 }
 0x3c7   :  { %2974 = vmatpush1.bf16.msra.mxu0 %v10668_v54  ;;  %3015 = vmatpush1.bf16.msra.mxu1 %v10670_v55  ;;  %v3064_v54 = vld [vmem:[#allocation17 + $0x100] sm:$0xff]  ;;  %17701 = vst [vmem:[#allocation55_spill] sm:$0xff] %v13280_v47  ;;  %17702 = vst [vmem:[#allocation56_spill] sm:$0xff] %v13284_v48 }
 0x3c8   :  { %2975 = vmatprep.subr.bf16.mxu0 %v10677_v56  ;;  %3016 = vmatprep.subr.bf16.mxu1 %v10679_v57  ;;  %v3068_v55 = vld [vmem:[#allocation17 + $0x120] sm:$0xff]  ;;  %v3065_v56 = vld [vmem:[#allocation17 + $0x108] sm:$0xff] }
 0x3c9   :  { %v3069_v57 = vld [vmem:[#allocation17 + $0x128] sm:$0xff]  ;;  %v13230_v61 = vcombine.high %v3064_v54, %v3068_v55  ;;  %v13236_v3 = vcombine.low %v3064_v54, %v3068_v55  ;;  %v10534_v54 = vld [vmem:[#allocation14] ss:$0 sm:$0xff] }
 0x3ca   :  { %v13232_v62 = vcombine.high %v3065_v56, %v3069_v57  ;;  %v13238_v4 = vcombine.low %v3065_v56, %v3069_v57 }
 0x3cb   :  { %2976 = vmatpush1.bf16.msra.mxu0 %v10676_v63  ;;  %3017 = vmatpush1.bf16.msra.mxu1 %v10678_v0  ;;  %v3072_v63 = vld [vmem:[#allocation17 + $0x140] sm:$0xff] }
 0x3cc   :  { %2977 = vmatprep.subr.bf16.mxu0 %v10685_v1  ;;  %3018 = vmatprep.subr.bf16.mxu1 %v10687_v2  ;;  %v3076_v0 = vld [vmem:[#allocation17 + $0x160] sm:$0xff]  ;;  %v3073_v1 = vld [vmem:[#allocation17 + $0x148] sm:$0xff] }
 0x3cd   :  { %v3077_v2 = vld [vmem:[#allocation17 + $0x168] sm:$0xff]  ;;  %v13242_v5 = vcombine.high %v3072_v63, %v3076_v0  ;;  %v13248_v19 = vcombine.low %v3072_v63, %v3076_v0 }
 0x3ce   :  { %v13244_v6 = vcombine.high %v3073_v1, %v3077_v2  ;;  %v13250_v21 = vcombine.low %v3073_v1, %v3077_v2  ;;  %v10567_v1 = vld [vmem:[#allocation5] ss:$0 sm:$0xff] }
 0x3cf   :  { %2978 = vmatpush1.bf16.msra.mxu0 %v10684_v7  ;;  %3019 = vmatpush1.bf16.msra.mxu1 %v10686_v8  ;;  %v3080_v7 = vld [vmem:[#allocation17 + $0x180] sm:$0xff]  ;;  %17691 = vst [vmem:[#allocation45_spill] sm:$0xff] %v13248_v19 }
 0x3d0   :  { %2979 = vmatprep.subr.bf16.mxu0 %v10693_v13  ;;  %3020 = vmatprep.subr.bf16.mxu1 %v10695_v14  ;;  %17690 = vst [vmem:[#allocation44_spill] sm:$0xff] %v13244_v6  ;;  %v3084_v8 = vld [vmem:[#allocation17 + $0x1a0] sm:$0xff]  ;;  %v3081_v13 = vld [vmem:[#allocation17 + $0x188] sm:$0xff]  ;;  %17692 = vst [vmem:[#allocation46_spill] sm:$0xff] %v13250_v21 }
 0x3d1   :  { %v3085_v14 = vld [vmem:[#allocation17 + $0x1a8] sm:$0xff]  ;;  %v13254_v24 = vcombine.high %v3080_v7, %v3084_v8  ;;  %v13260_v33 = vcombine.low %v3080_v7, %v3084_v8  ;;  %v3042_v7 = vld [vmem:[#allocation17 + $0x50] sm:$0xff] }
 0x3d2   :  { %v13256_v25 = vcombine.high %v3081_v13, %v3085_v14  ;;  %v13262_v34 = vcombine.low %v3081_v13, %v3085_v14  ;;  %v3046_v8 = vld [vmem:[#allocation17 + $0x70] sm:$0xff]  ;;  %v3043_v13 = vld [vmem:[#allocation17 + $0x58] sm:$0xff] }
 0x3d3   :  { %2980 = vmatpush1.bf16.msra.mxu0 %v10692_v26  ;;  %3021 = vmatpush1.bf16.msra.mxu1 %v10694_v28  ;;  %17693 = vst [vmem:[#allocation47_spill] sm:$0xff] %v13254_v24  ;;  %v3088_v26 = vld [vmem:[#allocation17 + $0x1c0] sm:$0xff]  ;;  %17695 = vst [vmem:[#allocation49_spill] sm:$0xff] %v13260_v33  ;;  %v3047_v14 = vld [vmem:[#allocation17 + $0x78] sm:$0xff]  ;;  %v13292_v31 = vcombine.high %v3042_v7, %v3046_v8 }
 0x3d4   :  { %3416 = vmatprep.subr.bf16.mxu0 %v13180_v29  ;;  %3457 = vmatprep.subr.bf16.mxu1 %v13182_v30  ;;  %17694 = vst [vmem:[#allocation48_spill] sm:$0xff] %v13256_v25  ;;  %v3092_v28 = vld [vmem:[#allocation17 + $0x1e0] sm:$0xff]  ;;  %17696 = vst [vmem:[#allocation50_spill] sm:$0xff] %v13262_v34  ;;  %v13294_v32 = vcombine.high %v3043_v13, %v3047_v14 }
 0x3d5   :  { %v13266_v39 = vcombine.high %v3088_v26, %v3092_v28  ;;  %v13272_v41 = vcombine.low %v3088_v26, %v3092_v28  ;;  %17703 = vst [vmem:[#allocation57_spill] sm:$0xff] %v13292_v31 }
 0x3d6   :  { %2982 = vmatmul.mubr.bf16.vlgmr.msra.gmra.mrb[16].mxu0 %v13123_v59  ;;  %3023 = vmatmul.mubr.bf16.vlgmr.msra.gmra.mrb[16].mxu1 %v13123_v59  ;;  %v3061_v59 = vld [vmem:[#allocation17 + $0xe8] sm:$0xff]  ;;  %17704 = vst [vmem:[#allocation58_spill] sm:$0xff] %v13294_v32 }
 0x3d7   :  { %3417 = vmatpush1.bf16.msra.mxu0 %v13184_v35  ;;  %3458 = vmatpush1.bf16.msra.mxu1 %v13186_v36  ;;  %v13220_v53 = vcombine.high %v3057_v44, %v3061_v59  ;;  %v13226_v60 = vcombine.low %v3057_v44, %v3061_v59  ;;  %17697 = vst [vmem:[#allocation51_spill] sm:$0xff] %v13266_v39  ;;  %17699 = vst [vmem:[#allocation53_spill] sm:$0xff] %v13272_v41 }
 0x3d8   :  { %3418 = vmatprep.subr.bf16.mxu0 %v13190_v37  ;;  %3459 = vmatprep.subr.bf16.mxu1 %v13192_v18 }
 0x3d9   :  { %3448 = vmatprep.mubr.bf16.mxu0 %v16566_v49  ;;  %3489 = vmatprep.mubr.bf16.mxu1 %v16566_v49 }
 0x3db   :  { %3419 = vmatpush1.bf16.msra.mxu0 %v13198_v43  ;;  %3460 = vmatpush1.bf16.msra.mxu1 %v13200_v11 }
 0x3dc   :  { %3420 = vmatprep.subr.bf16.mxu0 %v13204_v45  ;;  %3461 = vmatprep.subr.bf16.mxu1 %v13206_v46 }
 0x3df   :  { %3421 = vmatpush1.bf16.msra.mxu0 %v13212_v50  ;;  %3462 = vmatpush1.bf16.msra.mxu1 %v13214_v51 }
 0x3e0   :  { %3422 = vmatprep.subr.bf16.mxu0 %v13218_v52  ;;  %3463 = vmatprep.subr.bf16.mxu1 %v13220_v53 }
 0x3e3   :  { %3423 = vmatpush1.bf16.msra.mxu0 %v13224_v58  ;;  %3464 = vmatpush1.bf16.msra.mxu1 %v13226_v60 }
 0x3e4   :  { %3424 = vmatprep.subr.bf16.mxu0 %v13230_v61  ;;  %3465 = vmatprep.subr.bf16.mxu1 %v13232_v62 }
 0x3e7   :  { %3425 = vmatpush1.bf16.msra.mxu0 %v13236_v3  ;;  %3466 = vmatpush1.bf16.msra.mxu1 %v13238_v4 }
 0x3e8   :  { %3426 = vmatprep.subr.bf16.mxu0 %v13242_v5  ;;  %3467 = vmatprep.subr.bf16.mxu1 %v13244_v6 }
 0x3eb   :  { %3427 = vmatpush1.bf16.msra.mxu0 %v13248_v19  ;;  %3468 = vmatpush1.bf16.msra.mxu1 %v13250_v21  ;;  %v3853_v21 = vld [vmem:[#allocation20 + $0x7c8] sm:$0xff] }
 0x3ec   :  { %3428 = vmatprep.subr.bf16.mxu0 %v13254_v24  ;;  %3469 = vmatprep.subr.bf16.mxu1 %v13256_v25  ;;  %v3805_v24 = vld [vmem:[#allocation20 + $0x648] sm:$0xff] }
 0x3ef   :  { %3429 = vmatpush1.bf16.msra.mxu0 %v13260_v33  ;;  %3470 = vmatpush1.bf16.msra.mxu1 %v13262_v34 }
 0x3f0   :  { %3430 = vmatprep.subr.bf16.mxu0 %v13266_v39  ;;  %3471 = vmatprep.subr.bf16.mxu1 %v13268_v40 }
 0x3f3   :  { %3431 = vmatpush1.bf16.msra.mxu0 %v13272_v41  ;;  %3472 = vmatpush1.bf16.msra.mxu1 %v13274_v42  ;;  %v3741_v42 = vld [vmem:[#allocation20 + $0x448] sm:$0xff] }
 0x3f4   :  { %3498 = vmatprep.subr.bf16.mxu0 %v13280_v47  ;;  %3539 = vmatprep.subr.bf16.mxu1 %v13284_v48  ;;  %v3673_v48 = vld [vmem:[#allocation20 + $0x228] sm:$0xff]  ;;  %v3740_v47 = vld [vmem:[#allocation20 + $0x440] sm:$0xff] }
 0x3f5   :  { %v3745_v41 = vld [vmem:[#allocation20 + $0x468] sm:$0xff] }
 0x429   :  { %v11353_v44 = vpop.f32.mrb[8].mxu0  ;;  %v11375_v59 = vpop.f32.mrb[8].mxu1 }
 0x42a   :  { %v11354_v55 = vpop.f32.mrb[9].mxu0  ;;  %v11376_v56 = vpop.f32.mrb[9].mxu1 }
 0x42b   :  { %v11355_v57 = vadd.f32 %v11354_v55, %v11353_v44  ;;  %v11377_v15 = vadd.f32 %v11376_v56, %v11375_v59  ;;  %v11356_v16 = vpop.f32.mrb[10].mxu0  ;;  %v11378_v63 = vpop.f32.mrb[10].mxu1  ;;  %v3050_v44 = vld [vmem:[#allocation17 + $0x90] sm:$0xff]  ;;  %v3051_v55 = vld [vmem:[#allocation17 + $0x98] sm:$0xff] }
 0x42c   :  { %v11357_v0 = vpop.f32.mrb[11].mxu0  ;;  %v11379_v17 = vpop.f32.mrb[11].mxu1  ;;  %v3054_v59 = vld [vmem:[#allocation17 + $0xb0] sm:$0xff]  ;;  %v3055_v56 = vld [vmem:[#allocation17 + $0xb8] sm:$0xff] }
 0x42d   :  { %v2003_v20 = vadd.f32 %v11355_v57, %v10534_v54  ;;  %v13300_v54 = vcombine.low %v3042_v7, %v3046_v8  ;;  %v13302_v57 = vcombine.low %v3043_v13, %v3047_v14  ;;  %v13308_v16 = vcombine.high %v3051_v55, %v3055_v56  ;;  %v3058_v63 = vld [vmem:[#allocation17 + $0xd0] sm:$0xff]  ;;  %v3059_v17 = vld [vmem:[#allocation17 + $0xd8] sm:$0xff] }
 0x42e   :  { %v3062_v0 = vld [vmem:[#allocation17 + $0xf0] sm:$0xff] }
 0x42f   :  { %v2043_v2 = vadd.f32 %v11377_v15, %v2003_v20  ;;  %17705 = vst [vmem:[#allocation59_spill] sm:$0xff] %v13300_v54  ;;  %17706 = vst [vmem:[#allocation60_spill] sm:$0xff] %v13302_v57  ;;  %v13306_v15 = vcombine.high %v3050_v44, %v3054_v59  ;;  %v3063_v20 = vld [vmem:[#allocation17 + $0xf8] sm:$0xff]  ;;  %v13320_v7 = vcombine.high %v3058_v63, %v3062_v0  ;;  %v3066_v13 = vld [vmem:[#allocation17 + $0x110] sm:$0xff] }
 0x430   :  { %17708 = vst [vmem:[#allocation62_spill] sm:$0xff] %v13308_v16  ;;  %v13322_v8 = vcombine.high %v3059_v17, %v3063_v20  ;;  %v3070_v14 = vld [vmem:[#allocation17 + $0x130] sm:$0xff] }
 0x431   :  { %v2055_v26 = vadd.f32 %v10567_v1, %v2043_v2  ;;  %17707 = vst [vmem:[#allocation61_spill] sm:$0xff] %v13306_v15  ;;  %v13314_v1 = vcombine.low %v3050_v44, %v3054_v59  ;;  %v13316_v2 = vcombine.low %v3051_v55, %v3055_v56  ;;  %17711 = vst [vmem:[#allocation65_spill] sm:$0xff] %v13320_v7 }
 0x432   :  { %17712 = vst [vmem:[#allocation66_spill] sm:$0xff] %v13322_v8  ;;  %v13326_v44 = vcombine.low %v3058_v63, %v3062_v0  ;;  %v13328_v59 = vcombine.low %v3059_v17, %v3063_v20  ;;  %v13332_v55 = vcombine.high %v3066_v13, %v3070_v14  ;;  %v13338_v63 = vcombine.low %v3066_v13, %v3070_v14 }
 0x433   :  { %2056 = vst [vmem:[#allocation26] sm:$0xff] %v2055_v26  ;;  %v13290_v28 = vpack.c.bf16 %v2055_v26, %v2055_v26  ;;  %17709 = vst [vmem:[#allocation63_spill] sm:$0xff] %v13314_v1  ;;  %v3067_v26 = vld [vmem:[#allocation17 + $0x118] sm:$0xff] }
 0x434   :  { %17710 = vst [vmem:[#allocation64_spill] sm:$0xff] %v13316_v2  ;;  %17713 = vst [vmem:[#allocation67_spill] sm:$0xff] %v13326_v44 }
 0x435   :  { %3449 = vmatmul.mubr.bf16.vlgmr.msra.gmra.mrb[20].mxu0 %v13290_v28  ;;  %3490 = vmatmul.mubr.bf16.vlgmr.msra.gmra.mrb[20].mxu1 %v13290_v28  ;;  %17714 = vst [vmem:[#allocation68_spill] sm:$0xff] %v13328_v59  ;;  %17715 = vst [vmem:[#allocation69_spill] sm:$0xff] %v13332_v55 }
 0x436   :  { %3499 = vmatpush1.bf16.msra.mxu0 %v13174_v22  ;;  %3540 = vmatpush1.bf16.msra.mxu1 %v13178_v23  ;;  %17717 = vst [vmem:[#allocation71_spill] sm:$0xff] %v13338_v63  ;;  %v3669_v22 = vld [vmem:[#allocation20 + $0x208] sm:$0xff] }
 0x437   :  { %3500 = vmatprep.subr.bf16.mxu0 %v13292_v31  ;;  %3541 = vmatprep.subr.bf16.mxu1 %v13294_v32  ;;  %v3668_v31 = vld [vmem:[#allocation20 + $0x200] sm:$0xff] }
 0x438   :  { %3530 = vmatprep.mubr.bf16.mxu0 %v16566_v49  ;;  %3571 = vmatprep.mubr.bf16.mxu1 %v16566_v49  ;;  %v3071_v49 = vld [vmem:[#allocation17 + $0x138] sm:$0xff] }
 0x439   :  { %v13334_v56 = vcombine.high %v3067_v26, %v3071_v49  ;;  %v13340_v0 = vcombine.low %v3067_v26, %v3071_v49 }
 0x43a   :  { %3501 = vmatpush1.bf16.msra.mxu0 %v13300_v54  ;;  %3542 = vmatpush1.bf16.msra.mxu1 %v13302_v57  ;;  %v3075_v57 = vld [vmem:[#allocation17 + $0x158] sm:$0xff] }
 0x43b   :  { %3502 = vmatprep.subr.bf16.mxu0 %v13306_v15  ;;  %3543 = vmatprep.subr.bf16.mxu1 %v13308_v16  ;;  %17716 = vst [vmem:[#allocation70_spill] sm:$0xff] %v13334_v56  ;;  %v3074_v16 = vld [vmem:[#allocation17 + $0x150] sm:$0xff]  ;;  %v3079_v54 = vld [vmem:[#allocation17 + $0x178] sm:$0xff]  ;;  %17718 = vst [vmem:[#allocation72_spill] sm:$0xff] %v13340_v0 }
 0x43c   :  { %v3078_v15 = vld [vmem:[#allocation17 + $0x170] sm:$0xff]  ;;  %v13346_v20 = vcombine.high %v3075_v57, %v3079_v54  ;;  %v13352_v49 = vcombine.low %v3075_v57, %v3079_v54 }
 0x43d   :  { %v13344_v17 = vcombine.high %v3074_v16, %v3078_v15  ;;  %v13350_v13 = vcombine.low %v3074_v16, %v3078_v15 }
 0x43e   :  { %3503 = vmatpush1.bf16.msra.mxu0 %v13314_v1  ;;  %3544 = vmatpush1.bf16.msra.mxu1 %v13316_v2  ;;  %17720 = vst [vmem:[#allocation74_spill] sm:$0xff] %v13346_v20  ;;  %v3083_v2 = vld [vmem:[#allocation17 + $0x198] sm:$0xff]  ;;  %17722 = vst [vmem:[#allocation76_spill] sm:$0xff] %v13352_v49 }
 0x43f   :  { %3504 = vmatprep.subr.bf16.mxu0 %v13320_v7  ;;  %3545 = vmatprep.subr.bf16.mxu1 %v13322_v8  ;;  %17719 = vst [vmem:[#allocation73_spill] sm:$0xff] %v13344_v17  ;;  %v3082_v8 = vld [vmem:[#allocation17 + $0x190] sm:$0xff]  ;;  %v3087_v1 = vld [vmem:[#allocation17 + $0x1b8] sm:$0xff]  ;;  %17721 = vst [vmem:[#allocation75_spill] sm:$0xff] %v13350_v13 }
 0x440   :  { %v3086_v7 = vld [vmem:[#allocation17 + $0x1b0] sm:$0xff]  ;;  %v13358_v26 = vcombine.high %v3083_v2, %v3087_v1  ;;  %v13364_v54 = vcombine.low %v3083_v2, %v3087_v1 }
 0x441   :  { %v13356_v14 = vcombine.high %v3082_v8, %v3086_v7  ;;  %v13362_v15 = vcombine.low %v3082_v8, %v3086_v7 }
 0x442   :  { %3505 = vmatpush1.bf16.msra.mxu0 %v13326_v44  ;;  %3546 = vmatpush1.bf16.msra.mxu1 %v13328_v59  ;;  %17724 = vst [vmem:[#allocation78_spill] sm:$0xff] %v13358_v26  ;;  %v3091_v59 = vld [vmem:[#allocation17 + $0x1d8] sm:$0xff]  ;;  %17726 = vst [vmem:[#allocation80_spill] sm:$0xff] %v13364_v54 }
 0x443   :  { %3506 = vmatprep.subr.bf16.mxu0 %v13332_v55  ;;  %3547 = vmatprep.subr.bf16.mxu1 %v13334_v56  ;;  %17723 = vst [vmem:[#allocation77_spill] sm:$0xff] %v13356_v14  ;;  %v3090_v56 = vld [vmem:[#allocation17 + $0x1d0] sm:$0xff]  ;;  %v3095_v44 = vld [vmem:[#allocation17 + $0x1f8] sm:$0xff]  ;;  %17725 = vst [vmem:[#allocation79_spill] sm:$0xff] %v13362_v15 }
 0x444   :  { %v3094_v55 = vld [vmem:[#allocation17 + $0x1f0] sm:$0xff]  ;;  %v13370_v16 = vcombine.high %v3091_v59, %v3095_v44  ;;  %v13376_v1 = vcombine.low %v3091_v59, %v3095_v44 }
 0x445   :  { %v13368_v57 = vcombine.high %v3090_v56, %v3094_v55  ;;  %v13374_v7 = vcombine.low %v3090_v56, %v3094_v55 }
 0x446   :  { %3507 = vmatpush1.bf16.msra.mxu0 %v13338_v63  ;;  %3548 = vmatpush1.bf16.msra.mxu1 %v13340_v0  ;;  %17728 = vst [vmem:[#allocation82_spill] sm:$0xff] %v13370_v16  ;;  %v3605_v0 = vld [vmem:[#allocation20 + $0x8] sm:$0xff]  ;;  %17730 = vst [vmem:[#allocation84_spill] sm:$0xff] %v13376_v1 }
 0x447   :  { %3508 = vmatprep.subr.bf16.mxu0 %v13344_v17  ;;  %3549 = vmatprep.subr.bf16.mxu1 %v13346_v20  ;;  %17727 = vst [vmem:[#allocation81_spill] sm:$0xff] %v13368_v57  ;;  %v3604_v20 = vld [vmem:[#allocation20] sm:$0xff]  ;;  %v3609_v63 = vld [vmem:[#allocation20 + $0x28] sm:$0xff]  ;;  %17729 = vst [vmem:[#allocation83_spill] sm:$0xff] %v13374_v7 }
 0x448   :  { %v3608_v17 = vld [vmem:[#allocation20 + $0x20] sm:$0xff]  ;;  %v13382_v8 = vcombine.high %v3605_v0, %v3609_v63  ;;  %v13388_v44 = vcombine.low %v3605_v0, %v3609_v63 }
 0x449   :  { %v13380_v2 = vcombine.high %v3604_v20, %v3608_v17  ;;  %v13386_v55 = vcombine.low %v3604_v20, %v3608_v17 }
 0x44a   :  { %3509 = vmatpush1.bf16.msra.mxu0 %v13350_v13  ;;  %3550 = vmatpush1.bf16.msra.mxu1 %v13352_v49  ;;  %17732 = vst [vmem:[#allocation86_spill] sm:$0xff] %v13382_v8  ;;  %v3613_v49 = vld [vmem:[#allocation20 + $0x48] sm:$0xff]  ;;  %17734 = vst [vmem:[#allocation88_spill] sm:$0xff] %v13388_v44 }
 0x44b   :  { %3510 = vmatprep.subr.bf16.mxu0 %v13356_v14  ;;  %3551 = vmatprep.subr.bf16.mxu1 %v13358_v26  ;;  %17731 = vst [vmem:[#allocation85_spill] sm:$0xff] %v13380_v2  ;;  %v3612_v26 = vld [vmem:[#allocation20 + $0x40] sm:$0xff]  ;;  %v3617_v13 = vld [vmem:[#allocation20 + $0x68] sm:$0xff]  ;;  %17733 = vst [vmem:[#allocation87_spill] sm:$0xff] %v13386_v55 }
 0x44c   :  { %v3616_v14 = vld [vmem:[#allocation20 + $0x60] sm:$0xff]  ;;  %v13394_v56 = vcombine.high %v3613_v49, %v3617_v13  ;;  %v13402_v0 = vcombine.low %v3613_v49, %v3617_v13 }
 0x44d   :  { %v13392_v59 = vcombine.high %v3612_v26, %v3616_v14  ;;  %v13400_v63 = vcombine.low %v3612_v26, %v3616_v14 }
 0x44e   :  { %3511 = vmatpush1.bf16.msra.mxu0 %v13362_v15  ;;  %3552 = vmatpush1.bf16.msra.mxu1 %v13364_v54  ;;  %17736 = vst [vmem:[#allocation90_spill] sm:$0xff] %v13394_v56  ;;  %v3621_v54 = vld [vmem:[#allocation20 + $0x88] sm:$0xff]  ;;  %17738 = vst [vmem:[#allocation92_spill] sm:$0xff] %v13402_v0 }
 0x44f   :  { %3512 = vmatprep.subr.bf16.mxu0 %v13368_v57  ;;  %3553 = vmatprep.subr.bf16.mxu1 %v13370_v16  ;;  %17735 = vst [vmem:[#allocation89_spill] sm:$0xff] %v13392_v59  ;;  %v3620_v16 = vld [vmem:[#allocation20 + $0x80] sm:$0xff]  ;;  %v3625_v15 = vld [vmem:[#allocation20 + $0xa8] sm:$0xff]  ;;  %17737 = vst [vmem:[#allocation91_spill] sm:$0xff] %v13400_v63 }
 0x450   :  { %v3624_v57 = vld [vmem:[#allocation20 + $0xa0] sm:$0xff]  ;;  %v13408_v20 = vcombine.high %v3621_v54, %v3625_v15  ;;  %v13414_v13 = vcombine.low %v3621_v54, %v3625_v15 }
 0x451   :  { %v13406_v17 = vcombine.high %v3620_v16, %v3624_v57  ;;  %v13412_v14 = vcombine.low %v3620_v16, %v3624_v57 }
 0x452   :  { %3513 = vmatpush1.bf16.msra.mxu0 %v13374_v7  ;;  %3554 = vmatpush1.bf16.msra.mxu1 %v13376_v1  ;;  %17740 = vst [vmem:[#allocation94_spill] sm:$0xff] %v13408_v20  ;;  %v3629_v1 = vld [vmem:[#allocation20 + $0xc8] sm:$0xff]  ;;  %17742 = vst [vmem:[#allocation96_spill] sm:$0xff] %v13414_v13 }
 0x453   :  { %6718 = vmatprep.subr.bf16.mxu0 %v13380_v2  ;;  %6882 = vmatprep.subr.bf16.mxu1 %v13382_v8  ;;  %17739 = vst [vmem:[#allocation93_spill] sm:$0xff] %v13406_v17  ;;  %v3628_v8 = vld [vmem:[#allocation20 + $0xc0] sm:$0xff]  ;;  %17741 = vst [vmem:[#allocation95_spill] sm:$0xff] %v13412_v14 }
 0x454   :  { %v3632_v2 = vld [vmem:[#allocation20 + $0xe0] sm:$0xff] }
 0x455   :  { %3531 = vmatmul.mubr.bf16.vlgmr.msra.gmra.mrb[24].mxu0 %v13290_v28  ;;  %3572 = vmatmul.mubr.bf16.vlgmr.msra.gmra.mrb[24].mxu1 %v13290_v28  ;;  %v3633_v28 = vld [vmem:[#allocation20 + $0xe8] sm:$0xff]  ;;  %v13418_v49 = vcombine.high %v3628_v8, %v3632_v2  ;;  %v13424_v57 = vcombine.low %v3628_v8, %v3632_v2 }
 0x456   :  { %6719 = vmatpush1.bf16.msra.mxu0 %v13386_v55  ;;  %6883 = vmatpush1.bf16.msra.mxu1 %v13388_v44  ;;  %v13420_v26 = vcombine.high %v3629_v1, %v3633_v28  ;;  %v3637_v44 = vld [vmem:[#allocation20 + $0x108] sm:$0xff]  ;;  %v13426_v15 = vcombine.low %v3629_v1, %v3633_v28 }
 0x457   :  { %6720 = vmatprep.subr.bf16.mxu0 %v13392_v59  ;;  %6884 = vmatprep.subr.bf16.mxu1 %v13394_v56  ;;  %17743 = vst [vmem:[#allocation97_spill] sm:$0xff] %v13418_v49  ;;  %v3636_v56 = vld [vmem:[#allocation20 + $0x100] sm:$0xff]  ;;  %v3641_v55 = vld [vmem:[#allocation20 + $0x128] sm:$0xff]  ;;  %17745 = vst [vmem:[#allocation99_spill] sm:$0xff] %v13424_v57 }
 0x458   :  { %17744 = vst [vmem:[#allocation98_spill] sm:$0xff] %v13420_v26  ;;  %v3640_v59 = vld [vmem:[#allocation20 + $0x120] sm:$0xff]  ;;  %17746 = vst [vmem:[#allocation100_spill] sm:$0xff] %v13426_v15  ;;  %v13432_v16 = vcombine.high %v3637_v44, %v3641_v55  ;;  %v13438_v1 = vcombine.low %v3637_v44, %v3641_v55 }
 0x459   :  { %v13430_v54 = vcombine.high %v3636_v56, %v3640_v59  ;;  %v13436_v2 = vcombine.low %v3636_v56, %v3640_v59 }
 0x45a   :  { %6721 = vmatpush1.bf16.msra.mxu0 %v13400_v63  ;;  %6885 = vmatpush1.bf16.msra.mxu1 %v13402_v0  ;;  %17748 = vst [vmem:[#allocation102_spill] sm:$0xff] %v13432_v16  ;;  %v3645_v0 = vld [vmem:[#allocation20 + $0x148] sm:$0xff]  ;;  %17750 = vst [vmem:[#allocation104_spill] sm:$0xff] %v13438_v1 }
 0x45b   :  { %6722 = vmatprep.subr.bf16.mxu0 %v13406_v17  ;;  %6886 = vmatprep.subr.bf16.mxu1 %v13408_v20  ;;  %17747 = vst [vmem:[#allocation101_spill] sm:$0xff] %v13430_v54  ;;  %v3644_v20 = vld [vmem:[#allocation20 + $0x140] sm:$0xff]  ;;  %v3649_v63 = vld [vmem:[#allocation20 + $0x168] sm:$0xff]  ;;  %17749 = vst [vmem:[#allocation103_spill] sm:$0xff] %v13436_v2 }
 0x45c   :  { %v3648_v17 = vld [vmem:[#allocation20 + $0x160] sm:$0xff]  ;;  %v13444_v28 = vcombine.high %v3645_v0, %v3649_v63  ;;  %v13450_v55 = vcombine.low %v3645_v0, %v3649_v63 }
 0x45d   :  { %v13442_v8 = vcombine.high %v3644_v20, %v3648_v17  ;;  %v13448_v59 = vcombine.low %v3644_v20, %v3648_v17 }
 0x45e   :  { %6723 = vmatpush1.bf16.msra.mxu0 %v13412_v14  ;;  %6887 = vmatpush1.bf16.msra.mxu1 %v13414_v13  ;;  %17752 = vst [vmem:[#allocation106_spill] sm:$0xff] %v13444_v28  ;;  %v3653_v13 = vld [vmem:[#allocation20 + $0x188] sm:$0xff]  ;;  %17754 = vst [vmem:[#allocation108_spill] sm:$0xff] %v13450_v55 }
 0x45f   :  { %6724 = vmatprep.subr.bf16.mxu0 %v13418_v49  ;;  %6888 = vmatprep.subr.bf16.mxu1 %v13420_v26  ;;  %17751 = vst [vmem:[#allocation105_spill] sm:$0xff] %v13442_v8  ;;  %v3652_v26 = vld [vmem:[#allocation20 + $0x180] sm:$0xff]  ;;  %v3657_v14 = vld [vmem:[#allocation20 + $0x1a8] sm:$0xff]  ;;  %17753 = vst [vmem:[#allocation107_spill] sm:$0xff] %v13448_v59 }
 0x460   :  { %v3656_v49 = vld [vmem:[#allocation20 + $0x1a0] sm:$0xff]  ;;  %v13456_v56 = vcombine.high %v3653_v13, %v3657_v14  ;;  %v13470_v20 = vcombine.low %v3653_v13, %v3657_v14 }
 0x461   :  { %v13454_v44 = vcombine.high %v3652_v26, %v3656_v49  ;;  %v13468_v0 = vcombine.low %v3652_v26, %v3656_v49  ;;  %v13488_v26 = vcombine.high %v3669_v22, %v3673_v48 }
 0x462   :  { %6725 = vmatpush1.bf16.msra.mxu0 %v13424_v57  ;;  %6889 = vmatpush1.bf16.msra.mxu1 %v13426_v15  ;;  %17756 = vst [vmem:[#allocation110_spill] sm:$0xff] %v13456_v56  ;;  %v3661_v15 = vld [vmem:[#allocation20 + $0x1c8] sm:$0xff]  ;;  %17758 = vst [vmem:[#allocation112_spill] sm:$0xff] %v13470_v20 }
 0x463   :  { %6726 = vmatprep.subr.bf16.mxu0 %v13430_v54  ;;  %6890 = vmatprep.subr.bf16.mxu1 %v13432_v16  ;;  %17755 = vst [vmem:[#allocation109_spill] sm:$0xff] %v13454_v44  ;;  %v3660_v16 = vld [vmem:[#allocation20 + $0x1c0] sm:$0xff]  ;;  %v3665_v57 = vld [vmem:[#allocation20 + $0x1e8] sm:$0xff]  ;;  %17757 = vst [vmem:[#allocation111_spill] sm:$0xff] %v13468_v0 }
 0x464   :  { %v3664_v54 = vld [vmem:[#allocation20 + $0x1e0] sm:$0xff]  ;;  %v13476_v32 = vcombine.high %v3661_v15, %v3665_v57  ;;  %v13482_v13 = vcombine.low %v3661_v15, %v3665_v57  ;;  %17764 = vst [vmem:[#allocation118_spill] sm:$0xff] %v13488_v26  ;;  %v13494_v57 = vcombine.low %v3669_v22, %v3673_v48 }
 0x465   :  { %v13480_v14 = vcombine.low %v3660_v16, %v3664_v54 }
 0x466   :  { %6727 = vmatpush1.bf16.msra.mxu0 %v13436_v2  ;;  %6891 = vmatpush1.bf16.msra.mxu1 %v13438_v1  ;;  %v13474_v1 = vcombine.high %v3660_v16, %v3664_v54  ;;  %17760 = vst [vmem:[#allocation114_spill] sm:$0xff] %v13476_v32  ;;  %17762 = vst [vmem:[#allocation116_spill] sm:$0xff] %v13482_v13 }
 0x467   :  { %6728 = vmatprep.subr.bf16.mxu0 %v13442_v8  ;;  %6892 = vmatprep.subr.bf16.mxu1 %v13444_v28  ;;  %17761 = vst [vmem:[#allocation115_spill] sm:$0xff] %v13480_v14  ;;  %17766 = vst [vmem:[#allocation120_spill] sm:$0xff] %v13494_v57 }
 0x468   :  { %17759 = vst [vmem:[#allocation113_spill] sm:$0xff] %v13474_v1 }
 0x469   :  { %v13458_v7 = vpop.f32.mrb[12].mxu0  ;;  %v13460_v2 = vpop.f32.mrb[12].mxu1 }
 0x46a   :  { %v13462_v17 = vpop.f32.mrb[13].mxu0  ;;  %6729 = vmatpush1.bf16.msra.mxu0 %v13448_v59  ;;  %6893 = vmatpush1.bf16.msra.mxu1 %v13450_v55  ;;  %v13466_v63 = vpop.f32.mrb[13].mxu1  ;;  %v3672_v55 = vld [vmem:[#allocation20 + $0x220] sm:$0xff] }
 0x46b   :  { %v2905_v28 = vpop.f32.mrb[14].mxu0  ;;  %v2946_v8 = vpop.f32.mrb[14].mxu1  ;;  %6730 = vmatprep.subr.bf16.mxu0 %v13454_v44  ;;  %6894 = vmatprep.subr.bf16.mxu1 %v13456_v56  ;;  %v13486_v49 = vcombine.high %v3668_v31, %v3672_v55  ;;  %v13492_v54 = vcombine.low %v3668_v31, %v3672_v55 }
 0x46c   :  { %v2906_v59 = vpop.f32.mrb[15].mxu0  ;;  %v2947_v23 = vpop.f32.mrb[15].mxu1  ;;  %v3680_v8 = vld [vmem:[#allocation20 + $0x260] sm:$0xff]  ;;  %v3677_v28 = vld [vmem:[#allocation20 + $0x248] sm:$0xff] }
 0x46d   :  { %17763 = vst [vmem:[#allocation117_spill] sm:$0xff] %v13486_v49  ;;  %v3676_v23 = vld [vmem:[#allocation20 + $0x240] sm:$0xff]  ;;  %v3681_v59 = vld [vmem:[#allocation20 + $0x268] sm:$0xff]  ;;  %17765 = vst [vmem:[#allocation119_spill] sm:$0xff] %v13492_v54 }
 0x46e   :  { %6731 = vmatpush1.bf16.msra.mxu0 %v13468_v0  ;;  %6895 = vmatpush1.bf16.msra.mxu1 %v13470_v20  ;;  %v13498_v15 = vcombine.high %v3676_v23, %v3680_v8  ;;  %v13500_v16 = vcombine.high %v3677_v28, %v3681_v59  ;;  %v3685_v20 = vld [vmem:[#allocation20 + $0x288] sm:$0xff]  ;;  %v13504_v31 = vcombine.low %v3676_v23, %v3680_v8 }
 0x46f   :  { %6732 = vmatprep.subr.bf16.mxu0 %v13474_v1  ;;  %6896 = vmatprep.subr.bf16.mxu1 %v13476_v32  ;;  %v3684_v32 = vld [vmem:[#allocation20 + $0x280] sm:$0xff]  ;;  %v3689_v0 = vld [vmem:[#allocation20 + $0x2a8] sm:$0xff]  ;;  %v13506_v22 = vcombine.low %v3677_v28, %v3681_v59 }
 0x470   :  { %17767 = vst [vmem:[#allocation121_spill] sm:$0xff] %v13498_v15  ;;  %17768 = vst [vmem:[#allocation122_spill] sm:$0xff] %v13500_v16  ;;  %v3688_v1 = vld [vmem:[#allocation20 + $0x2a0] sm:$0xff]  ;;  %v13512_v55 = vcombine.high %v3685_v20, %v3689_v0  ;;  %v13518_v8 = vcombine.low %v3685_v20, %v3689_v0 }
 0x471   :  { %17769 = vst [vmem:[#allocation123_spill] sm:$0xff] %v13504_v31  ;;  %17770 = vst [vmem:[#allocation124_spill] sm:$0xff] %v13506_v22  ;;  %v13510_v48 = vcombine.high %v3684_v32, %v3688_v1  ;;  %v13516_v23 = vcombine.low %v3684_v32, %v3688_v1 }
 0x472   :  { %6733 = vmatpush1.bf16.msra.mxu0 %v13480_v14  ;;  %6897 = vmatpush1.bf16.msra.mxu1 %v13482_v13  ;;  %17772 = vst [vmem:[#allocation126_spill] sm:$0xff] %v13512_v55  ;;  %v3693_v13 = vld [vmem:[#allocation20 + $0x2c8] sm:$0xff]  ;;  %17774 = vst [vmem:[#allocation128_spill] sm:$0xff] %v13518_v8 }
 0x473   :  { %6734 = vmatprep.subr.bf16.mxu0 %v13486_v49  ;;  %6898 = vmatprep.subr.bf16.mxu1 %v13488_v26  ;;  %17771 = vst [vmem:[#allocation125_spill] sm:$0xff] %v13510_v48  ;;  %v3692_v26 = vld [vmem:[#allocation20 + $0x2c0] sm:$0xff]  ;;  %v3697_v14 = vld [vmem:[#allocation20 + $0x2e8] sm:$0xff]  ;;  %17773 = vst [vmem:[#allocation127_spill] sm:$0xff] %v13516_v23 }
 0x474   :  { %v3696_v49 = vld [vmem:[#allocation20 + $0x2e0] sm:$0xff]  ;;  %v13524_v59 = vcombine.high %v3693_v13, %v3697_v14  ;;  %v13530_v1 = vcombine.low %v3693_v13, %v3697_v14 }
 0x475   :  { %v13522_v28 = vcombine.high %v3692_v26, %v3696_v49  ;;  %v13528_v32 = vcombine.low %v3692_v26, %v3696_v49 }
 0x476   :  { %6735 = vmatpush1.bf16.msra.mxu0 %v13492_v54  ;;  %6899 = vmatpush1.bf16.msra.mxu1 %v13494_v57  ;;  %17776 = vst [vmem:[#allocation130_spill] sm:$0xff] %v13524_v59  ;;  %v3701_v57 = vld [vmem:[#allocation20 + $0x308] sm:$0xff]  ;;  %17778 = vst [vmem:[#allocation132_spill] sm:$0xff] %v13530_v1 }
 0x477   :  { %6736 = vmatprep.subr.bf16.mxu0 %v13498_v15  ;;  %6900 = vmatprep.subr.bf16.mxu1 %v13500_v16  ;;  %17775 = vst [vmem:[#allocation129_spill] sm:$0xff] %v13522_v28  ;;  %v3700_v16 = vld [vmem:[#allocation20 + $0x300] sm:$0xff]  ;;  %v3705_v54 = vld [vmem:[#allocation20 + $0x328] sm:$0xff]  ;;  %17777 = vst [vmem:[#allocation131_spill] sm:$0xff] %v13528_v32 }
 0x478   :  { %v3704_v15 = vld [vmem:[#allocation20 + $0x320] sm:$0xff]  ;;  %v13536_v20 = vcombine.high %v3701_v57, %v3705_v54  ;;  %v13542_v14 = vcombine.low %v3701_v57, %v3705_v54  ;;  %v3717_v54 = vld [vmem:[#allocation20 + $0x388] sm:$0xff] }
 0x479   :  { %v13534_v0 = vcombine.high %v3700_v16, %v3704_v15  ;;  %v13540_v49 = vcombine.low %v3700_v16, %v3704_v15  ;;  %v3716_v15 = vld [vmem:[#allocation20 + $0x380] sm:$0xff] }
 0x47a   :  { %6737 = vmatpush1.bf16.msra.mxu0 %v13504_v31  ;;  %6901 = vmatpush1.bf16.msra.mxu1 %v13506_v22  ;;  %17780 = vst [vmem:[#allocation134_spill] sm:$0xff] %v13536_v20  ;;  %v3709_v22 = vld [vmem:[#allocation20 + $0x348] sm:$0xff]  ;;  %17782 = vst [vmem:[#allocation136_spill] sm:$0xff] %v13542_v14  ;;  %v3720_v16 = vld [vmem:[#allocation20 + $0x3a0] sm:$0xff] }
 0x47b   :  { %6738 = vmatprep.subr.bf16.mxu0 %v13510_v48  ;;  %6902 = vmatprep.subr.bf16.mxu1 %v13512_v55  ;;  %17779 = vst [vmem:[#allocation133_spill] sm:$0xff] %v13534_v0  ;;  %v3708_v55 = vld [vmem:[#allocation20 + $0x340] sm:$0xff]  ;;  %v3713_v31 = vld [vmem:[#allocation20 + $0x368] sm:$0xff]  ;;  %17781 = vst [vmem:[#allocation135_spill] sm:$0xff] %v13540_v49  ;;  %v13558_v57 = vcombine.high %v3716_v15, %v3720_v16 }
 0x47c   :  { %v3712_v48 = vld [vmem:[#allocation20 + $0x360] sm:$0xff]  ;;  %v13548_v26 = vcombine.high %v3709_v22, %v3713_v31 }
 0x47d   :  { %v13546_v13 = vcombine.high %v3708_v55, %v3712_v48  ;;  %17787 = vst [vmem:[#allocation141_spill] sm:$0xff] %v13558_v57 }
 0x47e   :  { %6739 = vmatpush1.bf16.msra.mxu0 %v13516_v23  ;;  %6903 = vmatpush1.bf16.msra.mxu1 %v13518_v8  ;;  %17784 = vst [vmem:[#allocation138_spill] sm:$0xff] %v13548_v26 }
 0x47f   :  { %6740 = vmatprep.subr.bf16.mxu0 %v13522_v28  ;;  %6904 = vmatprep.subr.bf16.mxu1 %v13524_v59  ;;  %17783 = vst [vmem:[#allocation137_spill] sm:$0xff] %v13546_v13  ;;  %v13552_v59 = vcombine.low %v3708_v55, %v3712_v48  ;;  %v13564_v48 = vcombine.low %v3716_v15, %v3720_v16  ;;  %v3728_v55 = vld [vmem:[#allocation20 + $0x3e0] sm:$0xff] }
 0x480   :  { %v3732_v16 = vld [vmem:[#allocation20 + $0x400] sm:$0xff] }
 0x481   :  { %17785 = vst [vmem:[#allocation139_spill] sm:$0xff] %v13552_v59  ;;  %17789 = vst [vmem:[#allocation143_spill] sm:$0xff] %v13564_v48 }
 0x482   :  { %6741 = vmatpush1.bf16.msra.mxu0 %v13528_v32  ;;  %6905 = vmatpush1.bf16.msra.mxu1 %v13530_v1  ;;  %v13554_v32 = vcombine.low %v3709_v22, %v3713_v31  ;;  %v3724_v22 = vld [vmem:[#allocation20 + $0x3c0] sm:$0xff] }
 0x483   :  { %6742 = vmatprep.subr.bf16.mxu0 %v13534_v0  ;;  %6906 = vmatprep.subr.bf16.mxu1 %v13536_v20  ;;  %v3721_v20 = vld [vmem:[#allocation20 + $0x3a8] sm:$0xff]  ;;  %v13576_v15 = vcombine.low %v3724_v22, %v3728_v55 }
 0x484   :  { %17786 = vst [vmem:[#allocation140_spill] sm:$0xff] %v13554_v32  ;;  %v13560_v0 = vcombine.high %v3717_v54, %v3721_v20  ;;  %v13566_v31 = vcombine.low %v3717_v54, %v3721_v20  ;;  %v3736_v54 = vld [vmem:[#allocation20 + $0x420] sm:$0xff] }
 0x485   :  { %17793 = vst [vmem:[#allocation147_spill] sm:$0xff] %v13576_v15 }
 0x486   :  { %6743 = vmatpush1.bf16.msra.mxu0 %v13540_v49  ;;  %6907 = vmatpush1.bf16.msra.mxu1 %v13542_v14  ;;  %17788 = vst [vmem:[#allocation142_spill] sm:$0xff] %v13560_v0  ;;  %17790 = vst [vmem:[#allocation144_spill] sm:$0xff] %v13566_v31  ;;  %v3725_v14 = vld [vmem:[#allocation20 + $0x3c8] sm:$0xff] }
 0x487   :  { %6744 = vmatprep.subr.bf16.mxu0 %v13546_v13  ;;  %6908 = vmatprep.subr.bf16.mxu1 %v13548_v26  ;;  %v13570_v26 = vcombine.high %v3724_v22, %v3728_v55  ;;  %v3729_v13 = vld [vmem:[#allocation20 + $0x3e8] sm:$0xff] }
 0x488   :  { %v13572_v49 = vcombine.high %v3725_v14, %v3729_v13  ;;  %v13578_v20 = vcombine.low %v3725_v14, %v3729_v13 }
 0x489   :  { %17791 = vst [vmem:[#allocation145_spill] sm:$0xff] %v13570_v26 }
 0x48a   :  { %6745 = vmatpush1.bf16.msra.mxu0 %v13552_v59  ;;  %6909 = vmatpush1.bf16.msra.mxu1 %v13554_v32  ;;  %17792 = vst [vmem:[#allocation146_spill] sm:$0xff] %v13572_v49  ;;  %17794 = vst [vmem:[#allocation148_spill] sm:$0xff] %v13578_v20  ;;  %v3733_v32 = vld [vmem:[#allocation20 + $0x408] sm:$0xff]  ;;  %v13584_v59 = vcombine.low %v3732_v16, %v3736_v54 }
 0x48b   :  { %6746 = vmatprep.subr.bf16.mxu0 %v13558_v57  ;;  %6910 = vmatprep.subr.bf16.mxu1 %v13560_v0  ;;  %v13582_v0 = vcombine.high %v3732_v16, %v3736_v54  ;;  %v3737_v57 = vld [vmem:[#allocation20 + $0x428] sm:$0xff] }
 0x48c   :  { %17796 = vst [vmem:[#allocation150_spill] sm:$0xff] %v13584_v59  ;;  %v13586_v1 = vcombine.low %v3733_v32, %v3737_v57 }
 0x48d   :  { %17795 = vst [vmem:[#allocation149_spill] sm:$0xff] %v13582_v0 }
 0x48e   :  { %6747 = vmatpush1.bf16.msra.mxu0 %v13564_v48  ;;  %6911 = vmatpush1.bf16.msra.mxu1 %v13566_v31  ;;  %17797 = vst [vmem:[#allocation151_spill] sm:$0xff] %v13586_v1  ;;  %v13588_v48 = vcombine.high %v3733_v32, %v3737_v57 }
 0x48f   :  { %6748 = vmatprep.subr.bf16.mxu0 %v13570_v26  ;;  %6912 = vmatprep.subr.bf16.mxu1 %v13572_v49  ;;  %v13602_v49 = vld [vmem:[#allocation19] sm:$0xff] }
 0x490   :  { %17798 = vst [vmem:[#allocation152_spill] sm:$0xff] %v13588_v48 }
 0x492   :  { %6749 = vmatpush1.bf16.msra.mxu0 %v13576_v15  ;;  %6913 = vmatpush1.bf16.msra.mxu1 %v13578_v20  ;;  %v2190_v20 = vrot.slane %v13602_v49, %v13130_v10 }
 0x493   :  { %6759 = vmatprep.subr.bf16.mxu0 %v13582_v0  ;;  %6923 = vmatprep.subr.bf16.mxu1 %v13588_v48  ;;  %v2194_v48 = vrot.slane %v13602_v49, %v13135_v12  ;;  %v2202_v0 = vrot.slane %v13602_v49, %v13142_v38 }
 0x494   :  { %v13611_v15 = vadd.f32 %v13458_v7, %v2190_v20 }
 0x495   :  { %v13614_v26 = vadd.f32 %v13462_v17, %v2194_v48 }
 0x496   :  { %17799 = vst [vmem:[#allocation153_spill] sm:$0xff] %v13611_v15 }
 0x497   :  { %17800 = vst [vmem:[#allocation154_spill] sm:$0xff] %v13614_v26 }
 0x4a9   :  { %v13594_v14 = vpop.f32.mrb[16].mxu0  ;;  %v13596_v13 = vpop.f32.mrb[16].mxu1 }
 0x4aa   :  { %v13598_v22 = vpop.f32.mrb[17].mxu0  ;;  %v13600_v55 = vpop.f32.mrb[17].mxu1 }
 0x4ab   :  { %v2987_v16 = vpop.f32.mrb[18].mxu0  ;;  %v3028_v54 = vpop.f32.mrb[18].mxu1 }
 0x4ac   :  { %v2988_v32 = vpop.f32.mrb[19].mxu0  ;;  %v3029_v57 = vpop.f32.mrb[19].mxu1  ;;  %v13617_v16 = vadd.f32 %v13466_v63, %v2202_v0  ;;  %v3744_v0 = vld [vmem:[#allocation20 + $0x460] sm:$0xff] }
 0x4ae   :  { %17801 = vst [vmem:[#allocation155_spill] sm:$0xff] %v13617_v16 }
 0x508   :  { %v3450_v54 = vpop.f32.mrb[20].mxu0  ;;  %v13619_v32 = vpop.f32.mrb[20].mxu1 }
 0x509   :  { %v3580_v57 = vadd.f32 %v3450_v54, %v13611_v15  ;;  %v3452_v31 = vpop.f32.mrb[21].mxu0  ;;  %v3493_v28 = vpop.f32.mrb[21].mxu1  ;;  %v3748_v15 = vld [vmem:[#allocation20 + $0x480] sm:$0xff] }
 0x50a   :  { %v3581_v8 = vadd.f32 %v3452_v31, %v13614_v26  ;;  %v3583_v23 = vadd.f32 %v3493_v28, %v13617_v16  ;;  %v3454_v56 = vpop.f32.mrb[22].mxu0  ;;  %v3495_v7 = vpop.f32.mrb[22].mxu1  ;;  %v13632_v28 = vcombine.high %v3741_v42, %v3745_v41  ;;  %v3753_v31 = vld [vmem:[#allocation20 + $0x4a8] sm:$0xff] }
 0x50b   :  { %v3588_v20 = vmax.f32 %v3580_v57, 0.0  ;;  %v3455_v44 = vpop.f32.mrb[23].mxu0  ;;  %v3496_v17 = vpop.f32.mrb[23].mxu1  ;;  %v13630_v56 = vcombine.high %v3740_v47, %v3744_v0  ;;  %v13640_v57 = vcombine.low %v3740_v47, %v3744_v0  ;;  %v13642_v7 = vcombine.low %v3741_v42, %v3745_v41  ;;  %v3765_v16 = vld [vmem:[#allocation20 + $0x508] sm:$0xff] }
 0x50c   :  { %v3589_v48 = vmax.f32 %v3581_v8, 0.0  ;;  %v3591_v63 = vmax.f32 %v3583_v23, 0.0  ;;  %17803 = vst [vmem:[#allocation157_spill] sm:$0xff] %v13632_v28  ;;  %v3752_v44 = vld [vmem:[#allocation20 + $0x4a0] sm:$0xff]  ;;  %v3749_v8 = vld [vmem:[#allocation20 + $0x488] sm:$0xff] }
 0x50d   :  { %v13626_v54 = vpack.c.bf16 %v3588_v20, %v3588_v20  ;;  %17802 = vst [vmem:[#allocation156_spill] sm:$0xff] %v13630_v56  ;;  %17804 = vst [vmem:[#allocation158_spill] sm:$0xff] %v13640_v57  ;;  %v13646_v20 = vcombine.high %v3748_v15, %v3752_v44  ;;  %v13648_v17 = vcombine.high %v3749_v8, %v3753_v31  ;;  %v3769_v26 = vld [vmem:[#allocation20 + $0x528] sm:$0xff] }
 0x50e   :  { %v13624_v40 = vpack.c.bf16 %v3589_v48, %v3589_v48  ;;  %v13634_v23 = vpack.c.bf16 %v3591_v63, %v3591_v63  ;;  %17805 = vst [vmem:[#allocation159_spill] sm:$0xff] %v13642_v7  ;;  %v3756_v48 = vld [vmem:[#allocation20 + $0x4c0] sm:$0xff]  ;;  %v13654_v41 = vcombine.low %v3748_v15, %v3752_v44  ;;  %v13656_v42 = vcombine.low %v3749_v8, %v3753_v31 }
 0x50f   :  { %17806 = vst [vmem:[#allocation160_spill] sm:$0xff] %v13646_v20  ;;  %17807 = vst [vmem:[#allocation161_spill] sm:$0xff] %v13648_v17  ;;  %v3760_v63 = vld [vmem:[#allocation20 + $0x4e0] sm:$0xff]  ;;  %v13674_v31 = vcombine.high %v3765_v16, %v3769_v26 }
 0x510   :  { %6750 = vmatprep.mubr.bf16.mxu0 %v13624_v40  ;;  %6914 = vmatprep.mubr.bf16.mxu1 %v13624_v40  ;;  %17808 = vst [vmem:[#allocation162_spill] sm:$0xff] %v13654_v41  ;;  %17809 = vst [vmem:[#allocation163_spill] sm:$0xff] %v13656_v42  ;;  %v13660_v47 = vcombine.high %v3756_v48, %v3760_v63  ;;  %v13666_v15 = vcombine.low %v3756_v48, %v3760_v63 }
 0x511   :  { %6751 = vmatmul.mubr.bf16.vlgmr.msra.gmra.mrb[28].mxu0 %v13626_v54  ;;  %6915 = vmatmul.mubr.bf16.vlgmr.msra.gmra.mrb[28].mxu1 %v13626_v54  ;;  %17815 = vst [vmem:[#allocation169_spill] sm:$0xff] %v13674_v31 }
 0x512   :  { %6760 = vmatpush1.bf16.msra.mxu0 %v13584_v59  ;;  %6924 = vmatpush1.bf16.msra.mxu1 %v13586_v1  ;;  %v3757_v59 = vld [vmem:[#allocation20 + $0x4c8] sm:$0xff]  ;;  %17810 = vst [vmem:[#allocation164_spill] sm:$0xff] %v13660_v47  ;;  %17812 = vst [vmem:[#allocation166_spill] sm:$0xff] %v13666_v15 }
 0x513   :  { %6791 = vmatprep.mubr.bf16.mxu0 %v13634_v23  ;;  %6955 = vmatprep.mubr.bf16.mxu1 %v13634_v23  ;;  %v3761_v1 = vld [vmem:[#allocation20 + $0x4e8] sm:$0xff] }
 0x514   :  { %6761 = vmatprep.subr.bf16.mxu0 %v13630_v56  ;;  %6925 = vmatprep.subr.bf16.mxu1 %v13632_v28  ;;  %v13662_v0 = vcombine.high %v3757_v59, %v3761_v1  ;;  %v3764_v28 = vld [vmem:[#allocation20 + $0x500] sm:$0xff]  ;;  %v13668_v44 = vcombine.low %v3757_v59, %v3761_v1  ;;  %v13680_v59 = vcombine.low %v3765_v16, %v3769_v26 }
 0x515   :  { %v3768_v56 = vld [vmem:[#allocation20 + $0x520] sm:$0xff] }
 0x516   :  { %6762 = vmatpush1.bf16.msra.mxu0 %v13640_v57  ;;  %6926 = vmatpush1.bf16.msra.mxu1 %v13642_v7  ;;  %17811 = vst [vmem:[#allocation165_spill] sm:$0xff] %v13662_v0  ;;  %17813 = vst [vmem:[#allocation167_spill] sm:$0xff] %v13668_v44  ;;  %v13672_v8 = vcombine.high %v3764_v28, %v3768_v56  ;;  %v3773_v7 = vld [vmem:[#allocation20 + $0x548] sm:$0xff]  ;;  %v13678_v48 = vcombine.low %v3764_v28, %v3768_v56 }
 0x517   :  { %6763 = vmatprep.subr.bf16.mxu0 %v13646_v20  ;;  %6927 = vmatprep.subr.bf16.mxu1 %v13648_v17  ;;  %v3772_v17 = vld [vmem:[#allocation20 + $0x540] sm:$0xff]  ;;  %v3777_v57 = vld [vmem:[#allocation20 + $0x568] sm:$0xff]  ;;  %17817 = vst [vmem:[#allocation171_spill] sm:$0xff] %v13680_v59 }
 0x518   :  { %17814 = vst [vmem:[#allocation168_spill] sm:$0xff] %v13672_v8  ;;  %v3776_v20 = vld [vmem:[#allocation20 + $0x560] sm:$0xff]  ;;  %17816 = vst [vmem:[#allocation170_spill] sm:$0xff] %v13678_v48  ;;  %v13686_v63 = vcombine.high %v3773_v7, %v3777_v57  ;;  %v13692_v26 = vcombine.low %v3773_v7, %v3777_v57 }
 0x519   :  { %v13684_v1 = vcombine.high %v3772_v17, %v3776_v20  ;;  %v13690_v56 = vcombine.low %v3772_v17, %v3776_v20 }
 0x51a   :  { %6764 = vmatpush1.bf16.msra.mxu0 %v13654_v41  ;;  %6928 = vmatpush1.bf16.msra.mxu1 %v13656_v42  ;;  %17819 = vst [vmem:[#allocation173_spill] sm:$0xff] %v13686_v63  ;;  %v3781_v42 = vld [vmem:[#allocation20 + $0x588] sm:$0xff]  ;;  %17821 = vst [vmem:[#allocation175_spill] sm:$0xff] %v13692_v26 }
 0x51b   :  { %6765 = vmatprep.subr.bf16.mxu0 %v13660_v47  ;;  %6929 = vmatprep.subr.bf16.mxu1 %v13662_v0  ;;  %17818 = vst [vmem:[#allocation172_spill] sm:$0xff] %v13684_v1  ;;  %v3780_v0 = vld [vmem:[#allocation20 + $0x580] sm:$0xff]  ;;  %v3785_v41 = vld [vmem:[#allocation20 + $0x5a8] sm:$0xff]  ;;  %17820 = vst [vmem:[#allocation174_spill] sm:$0xff] %v13690_v56 }
 0x51c   :  { %v3784_v47 = vld [vmem:[#allocation20 + $0x5a0] sm:$0xff]  ;;  %v13698_v28 = vcombine.high %v3781_v42, %v3785_v41  ;;  %v13704_v57 = vcombine.low %v3781_v42, %v3785_v41 }
 0x51d   :  { %v13696_v16 = vcombine.high %v3780_v0, %v3784_v47  ;;  %v13702_v20 = vcombine.low %v3780_v0, %v3784_v47 }
 0x51e   :  { %6766 = vmatpush1.bf16.msra.mxu0 %v13666_v15  ;;  %6930 = vmatpush1.bf16.msra.mxu1 %v13668_v44  ;;  %17823 = vst [vmem:[#allocation177_spill] sm:$0xff] %v13698_v28  ;;  %v3789_v44 = vld [vmem:[#allocation20 + $0x5c8] sm:$0xff]  ;;  %17825 = vst [vmem:[#allocation179_spill] sm:$0xff] %v13704_v57 }
 0x51f   :  { %6767 = vmatprep.subr.bf16.mxu0 %v13672_v8  ;;  %6931 = vmatprep.subr.bf16.mxu1 %v13674_v31  ;;  %17822 = vst [vmem:[#allocation176_spill] sm:$0xff] %v13696_v16  ;;  %v3788_v31 = vld [vmem:[#allocation20 + $0x5c0] sm:$0xff]  ;;  %v3793_v15 = vld [vmem:[#allocation20 + $0x5e8] sm:$0xff]  ;;  %17824 = vst [vmem:[#allocation178_spill] sm:$0xff] %v13702_v20 }
 0x520   :  { %v3792_v8 = vld [vmem:[#allocation20 + $0x5e0] sm:$0xff]  ;;  %v13710_v17 = vcombine.high %v3789_v44, %v3793_v15 }
 0x521   :  { %v13708_v7 = vcombine.high %v3788_v31, %v3792_v8 }
 0x522   :  { %6768 = vmatpush1.bf16.msra.mxu0 %v13678_v48  ;;  %6932 = vmatpush1.bf16.msra.mxu1 %v13680_v59  ;;  %17827 = vst [vmem:[#allocation181_spill] sm:$0xff] %v13710_v17  ;;  %v3797_v48 = vld [vmem:[#allocation20 + $0x608] sm:$0xff] }
 0x523   :  { %6769 = vmatprep.subr.bf16.mxu0 %v13684_v1  ;;  %6933 = vmatprep.subr.bf16.mxu1 %v13686_v63  ;;  %17826 = vst [vmem:[#allocation180_spill] sm:$0xff] %v13708_v7  ;;  %v3796_v63 = vld [vmem:[#allocation20 + $0x600] sm:$0xff] }
 0x526   :  { %6770 = vmatpush1.bf16.msra.mxu0 %v13690_v56  ;;  %6934 = vmatpush1.bf16.msra.mxu1 %v13692_v26  ;;  %v3800_v56 = vld [vmem:[#allocation20 + $0x620] sm:$0xff]  ;;  %v3801_v26 = vld [vmem:[#allocation20 + $0x628] sm:$0xff] }
 0x527   :  { %6771 = vmatprep.subr.bf16.mxu0 %v13696_v16  ;;  %6935 = vmatprep.subr.bf16.mxu1 %v13698_v28  ;;  %v13722_v28 = vcombine.low %v3788_v31, %v3792_v8  ;;  %v13724_v16 = vcombine.low %v3789_v44, %v3793_v15  ;;  %v13728_v33 = vcombine.high %v3796_v63, %v3800_v56  ;;  %v3812_v8 = vld [vmem:[#allocation20 + $0x680] sm:$0xff] }
 0x528   :  { %v13712_v1 = vpop.f32.mrb[24].mxu0  ;;  %v13714_v59 = vpop.f32.mrb[24].mxu1  ;;  %v13730_v25 = vcombine.high %v3797_v48, %v3801_v26  ;;  %v13734_v15 = vcombine.low %v3796_v63, %v3800_v56  ;;  %v3816_v31 = vld [vmem:[#allocation20 + $0x6a0] sm:$0xff] }
 0x529   :  { %v13716_v47 = vpop.f32.mrb[25].mxu0  ;;  %v13718_v41 = vpop.f32.mrb[25].mxu1  ;;  %17828 = vst [vmem:[#allocation182_spill] sm:$0xff] %v13722_v28  ;;  %17829 = vst [vmem:[#allocation183_spill] sm:$0xff] %v13724_v16  ;;  %v13752_v56 = vcombine.high %v3812_v8, %v3816_v31 }
 0x52a   :  { %v3536_v42 = vpop.f32.mrb[26].mxu0  ;;  %v3577_v0 = vpop.f32.mrb[26].mxu1  ;;  %6772 = vmatpush1.bf16.msra.mxu0 %v13702_v20  ;;  %6936 = vmatpush1.bf16.msra.mxu1 %v13704_v57  ;;  %17830 = vst [vmem:[#allocation184_spill] sm:$0xff] %v13728_v33  ;;  %17831 = vst [vmem:[#allocation185_spill] sm:$0xff] %v13730_v25  ;;  %v3809_v20 = vld [vmem:[#allocation20 + $0x668] sm:$0xff]  ;;  %v3856_v57 = vld [vmem:[#allocation20 + $0x7e0] sm:$0xff] }
 0x52b   :  { %v3537_v39 = vpop.f32.mrb[27].mxu0  ;;  %v3578_v34 = vpop.f32.mrb[27].mxu1  ;;  %6773 = vmatprep.subr.bf16.mxu0 %v13708_v7  ;;  %6937 = vmatprep.subr.bf16.mxu1 %v13710_v17  ;;  %v3804_v42 = vld [vmem:[#allocation20 + $0x640] sm:$0xff]  ;;  %17832 = vst [vmem:[#allocation186_spill] sm:$0xff] %v13734_v15  ;;  %v13742_v44 = vcombine.high %v3805_v24, %v3809_v20  ;;  %v3813_v17 = vld [vmem:[#allocation20 + $0x688] sm:$0xff]  ;;  %17838 = vst [vmem:[#allocation192_spill] sm:$0xff] %v13752_v56 }
 0x52c   :  { %v3808_v0 = vld [vmem:[#allocation20 + $0x660] sm:$0xff]  ;;  %v13736_v39 = vcombine.low %v3797_v48, %v3801_v26  ;;  %v3817_v7 = vld [vmem:[#allocation20 + $0x6a8] sm:$0xff]  ;;  %v13748_v48 = vcombine.low %v3805_v24, %v3809_v20 }
 0x52d   :  { %v13740_v34 = vcombine.high %v3804_v42, %v3808_v0  ;;  %17835 = vst [vmem:[#allocation189_spill] sm:$0xff] %v13742_v44  ;;  %v13746_v63 = vcombine.low %v3804_v42, %v3808_v0  ;;  %v13754_v26 = vcombine.high %v3813_v17, %v3817_v7  ;;  %v13758_v42 = vcombine.low %v3812_v8, %v3816_v31 }
 0x52e   :  { %6774 = vmatpush1.bf16.msra.mxu0 %v13722_v28  ;;  %6938 = vmatpush1.bf16.msra.mxu1 %v13724_v16  ;;  %17833 = vst [vmem:[#allocation187_spill] sm:$0xff] %v13736_v39  ;;  %17837 = vst [vmem:[#allocation191_spill] sm:$0xff] %v13748_v48  ;;  %v3821_v16 = vld [vmem:[#allocation20 + $0x6c8] sm:$0xff]  ;;  %v13760_v24 = vcombine.low %v3813_v17, %v3817_v7 }
 0x52f   :  { %6775 = vmatprep.subr.bf16.mxu0 %v13728_v33  ;;  %6939 = vmatprep.subr.bf16.mxu1 %v13730_v25  ;;  %17834 = vst [vmem:[#allocation188_spill] sm:$0xff] %v13740_v34  ;;  %17836 = vst [vmem:[#allocation190_spill] sm:$0xff] %v13746_v63  ;;  %v3820_v25 = vld [vmem:[#allocation20 + $0x6c0] sm:$0xff]  ;;  %v3825_v28 = vld [vmem:[#allocation20 + $0x6e8] sm:$0xff] }
 0x530   :  { %17839 = vst [vmem:[#allocation193_spill] sm:$0xff] %v13754_v26  ;;  %v3824_v33 = vld [vmem:[#allocation20 + $0x6e0] sm:$0xff]  ;;  %17840 = vst [vmem:[#allocation194_spill] sm:$0xff] %v13758_v42  ;;  %v13766_v0 = vcombine.high %v3821_v16, %v3825_v28  ;;  %v13772_v7 = vcombine.low %v3821_v16, %v3825_v28 }
 0x531   :  { %17841 = vst [vmem:[#allocation195_spill] sm:$0xff] %v13760_v24  ;;  %v13764_v20 = vcombine.high %v3820_v25, %v3824_v33  ;;  %v13770_v8 = vcombine.low %v3820_v25, %v3824_v33 }
 0x532   :  { %6776 = vmatpush1.bf16.msra.mxu0 %v13734_v15  ;;  %6940 = vmatpush1.bf16.msra.mxu1 %v13736_v39  ;;  %17843 = vst [vmem:[#allocation197_spill] sm:$0xff] %v13766_v0  ;;  %v3829_v39 = vld [vmem:[#allocation20 + $0x708] sm:$0xff]  ;;  %17845 = vst [vmem:[#allocation199_spill] sm:$0xff] %v13772_v7 }
 0x533   :  { %6777 = vmatprep.subr.bf16.mxu0 %v13740_v34  ;;  %6941 = vmatprep.subr.bf16.mxu1 %v13742_v44  ;;  %17842 = vst [vmem:[#allocation196_spill] sm:$0xff] %v13764_v20  ;;  %v3828_v44 = vld [vmem:[#allocation20 + $0x700] sm:$0xff]  ;;  %v3833_v15 = vld [vmem:[#allocation20 + $0x728] sm:$0xff]  ;;  %17844 = vst [vmem:[#allocation198_spill] sm:$0xff] %v13770_v8 }
 0x534   :  { %v3832_v34 = vld [vmem:[#allocation20 + $0x720] sm:$0xff]  ;;  %v13778_v31 = vcombine.high %v3829_v39, %v3833_v15  ;;  %v13785_v33 = vcombine.low %v3829_v39, %v3833_v15 }
 0x535   :  { %v13776_v17 = vcombine.high %v3828_v44, %v3832_v34  ;;  %v13783_v25 = vcombine.low %v3828_v44, %v3832_v34  ;;  %v17852_v34 = vsub.s32 5, %v13127_v9 }
 0x536   :  { %6778 = vmatpush1.bf16.msra.mxu0 %v13746_v63  ;;  %6942 = vmatpush1.bf16.msra.mxu1 %v13748_v48  ;;  %17847 = vst [vmem:[#allocation201_spill] sm:$0xff] %v13778_v31  ;;  %v3837_v48 = vld [vmem:[#allocation20 + $0x748] sm:$0xff]  ;;  %17849 = vst [vmem:[#allocation203_spill] sm:$0xff] %v13785_v33 }
 0x537   :  { %6779 = vmatprep.subr.bf16.mxu0 %v13752_v56  ;;  %6943 = vmatprep.subr.bf16.mxu1 %v13754_v26  ;;  %17846 = vst [vmem:[#allocation200_spill] sm:$0xff] %v13776_v17  ;;  %v3836_v26 = vld [vmem:[#allocation20 + $0x740] sm:$0xff]  ;;  %v3841_v63 = vld [vmem:[#allocation20 + $0x768] sm:$0xff]  ;;  %17848 = vst [vmem:[#allocation202_spill] sm:$0xff] %v13783_v25  ;;  %v2210_v15 = vrot.slane %v13602_v49, %v17852_v34 }
 0x538   :  { %v3840_v56 = vld [vmem:[#allocation20 + $0x760] sm:$0xff]  ;;  %v13791_v28 = vcombine.high %v3837_v48, %v3841_v63  ;;  %v13802_v44 = vcombine.low %v3837_v48, %v3841_v63  ;;  %v3857_v34 = vld [vmem:[#allocation20 + $0x7e8] sm:$0xff] }
 0x539   :  { %v13789_v16 = vcombine.high %v3836_v26, %v3840_v56  ;;  %v13800_v39 = vcombine.low %v3836_v26, %v3840_v56  ;;  %v13814_v56 = vadd.f32 %v13598_v22, %v2210_v15  ;;  %v3860_v22 = vld [vmem:[#allocation20 + $0x800] sm:$0xff] }
 0x53a   :  { %6780 = vmatpush1.bf16.msra.mxu0 %v13758_v42  ;;  %6944 = vmatpush1.bf16.msra.mxu1 %v13760_v24  ;;  %17851 = vst [vmem:[#allocation205_spill] sm:$0xff] %v13791_v28  ;;  %v3845_v24 = vld [vmem:[#allocation20 + $0x788] sm:$0xff]  ;;  %17854 = vst [vmem:[#allocation207_spill] sm:$0xff] %v13802_v44 }
 0x53b   :  { %6781 = vmatprep.subr.bf16.mxu0 %v13764_v20  ;;  %6945 = vmatprep.subr.bf16.mxu1 %v13766_v0  ;;  %17850 = vst [vmem:[#allocation204_spill] sm:$0xff] %v13789_v16  ;;  %v3844_v0 = vld [vmem:[#allocation20 + $0x780] sm:$0xff]  ;;  %v3849_v42 = vld [vmem:[#allocation20 + $0x7a8] sm:$0xff]  ;;  %17853 = vst [vmem:[#allocation206_spill] sm:$0xff] %v13800_v39  ;;  %v3585_v15 = vadd.f32 %v13716_v47, %v13814_v56 }
 0x53c   :  { %v3848_v20 = vld [vmem:[#allocation20 + $0x7a0] sm:$0xff]  ;;  %17858 = vst [vmem:[#allocation211_spill] sm:$0xff] %v13814_v56  ;;  %v13820_v48 = vcombine.low %v3845_v24, %v3849_v42 }
 0x53d   :  { %v13818_v63 = vcombine.low %v3844_v0, %v3848_v20  ;;  %v3593_v47 = vmax.f32 %v3585_v15, 0.0  ;;  %v3868_v56 = vld [vmem:[#allocation20 + $0x840] sm:$0xff] }
 0x53e   :  { %6782 = vmatpush1.bf16.msra.mxu0 %v13770_v8  ;;  %6946 = vmatpush1.bf16.msra.mxu1 %v13772_v7  ;;  %v2198_v8 = vrot.slane %v13602_v49, %v13149_v27  ;;  %v3852_v7 = vld [vmem:[#allocation20 + $0x7c0] sm:$0xff]  ;;  %17860 = vst [vmem:[#allocation213_spill] sm:$0xff] %v13820_v48 }
 0x53f   :  { %6783 = vmatprep.subr.bf16.mxu0 %v13776_v17  ;;  %6947 = vmatprep.subr.bf16.mxu1 %v13778_v31  ;;  %v13806_v31 = vcombine.high %v3844_v0, %v3848_v20  ;;  %v13808_v17 = vcombine.high %v3845_v24, %v3849_v42  ;;  %17859 = vst [vmem:[#allocation212_spill] sm:$0xff] %v13818_v63  ;;  %v3861_v20 = vld [vmem:[#allocation20 + $0x808] sm:$0xff] }
 0x540   :  { %v3865_v0 = vld [vmem:[#allocation20 + $0x828] sm:$0xff]  ;;  %v13836_v42 = vcombine.low %v3853_v21, %v3857_v34 }
 0x541   :  { %17855 = vst [vmem:[#allocation208_spill] sm:$0xff] %v13806_v31  ;;  %17856 = vst [vmem:[#allocation209_spill] sm:$0xff] %v13808_v17 }
 0x542   :  { %6784 = vmatpush1.bf16.msra.mxu0 %v13783_v25  ;;  %6948 = vmatpush1.bf16.msra.mxu1 %v13785_v33  ;;  %v13811_v25 = vadd.f32 %v13460_v2, %v2198_v8  ;;  %v13826_v2 = vcombine.high %v3852_v7, %v3856_v57  ;;  %v13828_v8 = vcombine.high %v3853_v21, %v3857_v34 }
 0x543   :  { %6785 = vmatprep.subr.bf16.mxu0 %v13789_v16  ;;  %6949 = vmatprep.subr.bf16.mxu1 %v13791_v28  ;;  %17864 = vst [vmem:[#allocation217_spill] sm:$0xff] %v13836_v42  ;;  %v13854_v34 = vpack.c.bf16 %v3593_v47, %v3593_v47 }
 0x544   :  { %17857 = vst [vmem:[#allocation210_spill] sm:$0xff] %v13811_v25  ;;  %v3582_v26 = vadd.f32 %v13619_v32, %v13811_v25  ;;  %17861 = vst [vmem:[#allocation214_spill] sm:$0xff] %v13826_v2  ;;  %v13834_v32 = vcombine.low %v3852_v7, %v3856_v57  ;;  %v3872_v25 = vld [vmem:[#allocation20 + $0x860] sm:$0xff]  ;;  %v13851_v7 = vcombine.low %v3861_v20, %v3865_v0 }
 0x545   :  { %17862 = vst [vmem:[#allocation215_spill] sm:$0xff] %v13828_v8 }
 0x546   :  { %6786 = vmatpush1.bf16.msra.mxu0 %v13800_v39  ;;  %6950 = vmatpush1.bf16.msra.mxu1 %v13802_v44  ;;  %v3864_v44 = vld [vmem:[#allocation20 + $0x820] sm:$0xff]  ;;  %17863 = vst [vmem:[#allocation216_spill] sm:$0xff] %v13834_v32  ;;  %v3590_v24 = vmax.f32 %v3582_v26, 0.0  ;;  %v3869_v39 = vld [vmem:[#allocation20 + $0x848] sm:$0xff]  ;;  %17868 = vst [vmem:[#allocation221_spill] sm:$0xff] %v13851_v7  ;;  %v13856_v26 = vcombine.high %v3868_v56, %v3872_v25 }
 0x547   :  { %6787 = vmatprep.subr.bf16.mxu0 %v13806_v31  ;;  %6951 = vmatprep.subr.bf16.mxu1 %v13808_v17  ;;  %v13840_v17 = vcombine.high %v3860_v22, %v3864_v44  ;;  %v13842_v31 = vcombine.high %v3861_v20, %v3865_v0  ;;  %v13846_v21 = vcombine.low %v3860_v22, %v3864_v44  ;;  %v3877_v44 = vld [vmem:[#allocation20 + $0x888] sm:$0xff] }
 0x548   :  { %v13848_v57 = vpack.c.bf16 %v3590_v24, %v3590_v24  ;;  %17869 = vst [vmem:[#allocation222_spill] sm:$0xff] %v13856_v26  ;;  %v3881_v22 = vld [vmem:[#allocation20 + $0x8a8] sm:$0xff]  ;;  %v13864_v20 = vcombine.low %v3868_v56, %v3872_v25 }
 0x549   :  { %17865 = vst [vmem:[#allocation218_spill] sm:$0xff] %v13840_v17  ;;  %17866 = vst [vmem:[#allocation219_spill] sm:$0xff] %v13842_v31  ;;  %v13874_v47 = vcombine.high %v3877_v44, %v3881_v22 }
 0x54a   :  { %6788 = vmatpush1.bf16.msra.mxu0 %v13818_v63  ;;  %6952 = vmatpush1.bf16.msra.mxu1 %v13820_v48  ;;  %v3873_v63 = vld [vmem:[#allocation20 + $0x868] sm:$0xff]  ;;  %17867 = vst [vmem:[#allocation220_spill] sm:$0xff] %v13846_v21  ;;  %17871 = vst [vmem:[#allocation224_spill] sm:$0xff] %v13864_v20 }
 0x54b   :  { %6789 = vmatprep.subr.bf16.mxu0 %v13826_v2  ;;  %6953 = vmatprep.subr.bf16.mxu1 %v13828_v8  ;;  %v13858_v15 = vcombine.high %v3869_v39, %v3873_v63  ;;  %v3876_v8 = vld [vmem:[#allocation20 + $0x880] sm:$0xff]  ;;  %v13868_v0 = vcombine.low %v3869_v39, %v3873_v63  ;;  %17874 = vst [vmem:[#allocation227_spill] sm:$0xff] %v13874_v47  ;;  %v3897_v2 = vld [vmem:[#allocation20 + $0x928] sm:$0xff] }
 0x54c   :  { %v13881_v39 = vcombine.low %v3877_v44, %v3881_v22 }
 0x54d   :  { %17870 = vst [vmem:[#allocation223_spill] sm:$0xff] %v13858_v15  ;;  %17872 = vst [vmem:[#allocation225_spill] sm:$0xff] %v13868_v0 }
 0x54e   :  { %6790 = vmatpush1.bf16.msra.mxu0 %v13834_v32  ;;  %6954 = vmatpush1.bf16.msra.mxu1 %v13836_v42  ;;  %v3880_v32 = vld [vmem:[#allocation20 + $0x8a0] sm:$0xff]  ;;  %v3889_v42 = vld [vmem:[#allocation20 + $0x8e8] sm:$0xff]  ;;  %17876 = vst [vmem:[#allocation229_spill] sm:$0xff] %v13881_v39 }
 0x54f   :  { %6800 = vmatprep.subr.bf16.mxu0 %v13840_v17  ;;  %6964 = vmatprep.subr.bf16.mxu1 %v13842_v31  ;;  %v13870_v24 = vcombine.high %v3876_v8, %v3880_v32  ;;  %v3884_v31 = vld [vmem:[#allocation20 + $0x8c0] sm:$0xff]  ;;  %v3885_v17 = vld [vmem:[#allocation20 + $0x8c8] sm:$0xff]  ;;  %v13877_v25 = vcombine.low %v3876_v8, %v3880_v32 }
 0x550   :  { %v13886_v63 = vcombine.high %v3885_v17, %v3889_v42  ;;  %v13893_v32 = vcombine.low %v3885_v17, %v3889_v42 }
 0x551   :  { %6792 = vmatmul.mubr.bf16.vlgmr.msra.gmra.mrb[28].mxu0 %v13848_v57  ;;  %6956 = vmatmul.mubr.bf16.vlgmr.msra.gmra.mrb[28].mxu1 %v13848_v57  ;;  %17873 = vst [vmem:[#allocation226_spill] sm:$0xff] %v13870_v24  ;;  %17875 = vst [vmem:[#allocation228_spill] sm:$0xff] %v13877_v25 }
 0x552   :  { %6801 = vmatpush1.bf16.msra.mxu0 %v13846_v21  ;;  %6832 = vmatprep.mubr.bf16.mxu0 %v13854_v34  ;;  %v3888_v21 = vld [vmem:[#allocation20 + $0x8e0] sm:$0xff]  ;;  %17878 = vst [vmem:[#allocation231_spill] sm:$0xff] %v13886_v63  ;;  %17880 = vst [vmem:[#allocation233_spill] sm:$0xff] %v13893_v32 }
 0x553   :  { %6965 = vmatpush1.bf16.msra.mxu1 %v13851_v7  ;;  %6996 = vmatprep.mubr.bf16.mxu1 %v13854_v34  ;;  %v13883_v56 = vcombine.high %v3884_v31, %v3888_v21  ;;  %v3893_v7 = vld [vmem:[#allocation20 + $0x908] sm:$0xff]  ;;  %v13889_v8 = vcombine.low %v3884_v31, %v3888_v21 }
 0x554   :  { %6802 = vmatprep.subr.bf16.mxu0 %v13856_v26  ;;  %6966 = vmatprep.subr.bf16.mxu1 %v13858_v15  ;;  %v3892_v15 = vld [vmem:[#allocation20 + $0x900] sm:$0xff]  ;;  %v13898_v22 = vcombine.high %v3893_v7, %v3897_v2  ;;  %v13905_v17 = vcombine.low %v3893_v7, %v3897_v2 }
 0x555   :  { %17877 = vst [vmem:[#allocation230_spill] sm:$0xff] %v13883_v56  ;;  %v3896_v26 = vld [vmem:[#allocation20 + $0x920] sm:$0xff]  ;;  %17879 = vst [vmem:[#allocation232_spill] sm:$0xff] %v13889_v8 }
 0x556   :  { %6803 = vmatpush1.bf16.msra.mxu0 %v13864_v20  ;;  %v13895_v44 = vcombine.high %v3892_v15, %v3896_v26  ;;  %17882 = vst [vmem:[#allocation235_spill] sm:$0xff] %v13898_v22  ;;  %v3905_v20 = vld [vmem:[#allocation20 + $0x968] sm:$0xff]  ;;  %v13901_v31 = vcombine.low %v3892_v15, %v3896_v26  ;;  %17884 = vst [vmem:[#allocation237_spill] sm:$0xff] %v13905_v17 }
 0x557   :  { %6967 = vmatpush1.bf16.msra.mxu1 %v13868_v0  ;;  %6804 = vmatprep.subr.bf16.mxu0 %v13870_v24  ;;  %v3904_v24 = vld [vmem:[#allocation20 + $0x960] sm:$0xff]  ;;  %v3901_v0 = vld [vmem:[#allocation20 + $0x948] sm:$0xff] }
 0x558   :  { %6968 = vmatprep.subr.bf16.mxu1 %v13874_v47  ;;  %17881 = vst [vmem:[#allocation234_spill] sm:$0xff] %v13895_v44  ;;  %v3900_v47 = vld [vmem:[#allocation20 + $0x940] sm:$0xff]  ;;  %17883 = vst [vmem:[#allocation236_spill] sm:$0xff] %v13901_v31  ;;  %v13910_v21 = vcombine.high %v3901_v0, %v3905_v20  ;;  %v13917_v2 = vcombine.low %v3901_v0, %v3905_v20 }
 0x559   :  { %v13907_v42 = vcombine.high %v3900_v47, %v3904_v24  ;;  %v13913_v26 = vcombine.low %v3900_v47, %v3904_v24 }
 0x55a   :  { %6805 = vmatpush1.bf16.msra.mxu0 %v13877_v25  ;;  %17886 = vst [vmem:[#allocation239_spill] sm:$0xff] %v13910_v21  ;;  %v3913_v25 = vld [vmem:[#allocation20 + $0x9a8] sm:$0xff]  ;;  %17888 = vst [vmem:[#allocation241_spill] sm:$0xff] %v13917_v2 }
 0x55b   :  { %6969 = vmatpush1.bf16.msra.mxu1 %v13881_v39  ;;  %6806 = vmatprep.subr.bf16.mxu0 %v13883_v56  ;;  %17885 = vst [vmem:[#allocation238_spill] sm:$0xff] %v13907_v42  ;;  %v3912_v56 = vld [vmem:[#allocation20 + $0x9a0] sm:$0xff]  ;;  %v3909_v39 = vld [vmem:[#allocation20 + $0x988] sm:$0xff]  ;;  %17887 = vst [vmem:[#allocation240_spill] sm:$0xff] %v13913_v26 }
 0x55c   :  { %6970 = vmatprep.subr.bf16.mxu1 %v13886_v63  ;;  %v3908_v63 = vld [vmem:[#allocation20 + $0x980] sm:$0xff]  ;;  %v13922_v15 = vcombine.high %v3909_v39, %v3913_v25  ;;  %v13929_v20 = vcombine.low %v3909_v39, %v3913_v25 }
 0x55d   :  { %v13919_v7 = vcombine.high %v3908_v63, %v3912_v56  ;;  %v13925_v24 = vcombine.low %v3908_v63, %v3912_v56 }
 0x55e   :  { %6807 = vmatpush1.bf16.msra.mxu0 %v13889_v8  ;;  %17890 = vst [vmem:[#allocation243_spill] sm:$0xff] %v13922_v15  ;;  %v3921_v8 = vld [vmem:[#allocation20 + $0x9e8] sm:$0xff]  ;;  %17892 = vst [vmem:[#allocation245_spill] sm:$0xff] %v13929_v20 }
 0x55f   :  { %6971 = vmatpush1.bf16.msra.mxu1 %v13893_v32  ;;  %6808 = vmatprep.subr.bf16.mxu0 %v13895_v44  ;;  %17889 = vst [vmem:[#allocation242_spill] sm:$0xff] %v13919_v7  ;;  %v3920_v44 = vld [vmem:[#allocation20 + $0x9e0] sm:$0xff]  ;;  %v3917_v32 = vld [vmem:[#allocation20 + $0x9c8] sm:$0xff]  ;;  %17891 = vst [vmem:[#allocation244_spill] sm:$0xff] %v13925_v24 }
 0x560   :  { %6972 = vmatprep.subr.bf16.mxu1 %v13898_v22  ;;  %v3916_v22 = vld [vmem:[#allocation20 + $0x9c0] sm:$0xff]  ;;  %v13934_v47 = vcombine.high %v3917_v32, %v3921_v8  ;;  %v13941_v25 = vcombine.low %v3917_v32, %v3921_v8 }
 0x561   :  { %v13931_v0 = vcombine.high %v3916_v22, %v3920_v44  ;;  %v13937_v56 = vcombine.low %v3916_v22, %v3920_v44 }
 0x562   :  { %6809 = vmatpush1.bf16.msra.mxu0 %v13901_v31  ;;  %17894 = vst [vmem:[#allocation247_spill] sm:$0xff] %v13934_v47  ;;  %v3929_v31 = vld [vmem:[#allocation20 + $0xa28] sm:$0xff]  ;;  %17896 = vst [vmem:[#allocation249_spill] sm:$0xff] %v13941_v25 }
 0x563   :  { %6973 = vmatpush1.bf16.msra.mxu1 %v13905_v17  ;;  %6810 = vmatprep.subr.bf16.mxu0 %v13907_v42  ;;  %17893 = vst [vmem:[#allocation246_spill] sm:$0xff] %v13931_v0  ;;  %v3928_v42 = vld [vmem:[#allocation20 + $0xa20] sm:$0xff]  ;;  %v3925_v17 = vld [vmem:[#allocation20 + $0xa08] sm:$0xff]  ;;  %17895 = vst [vmem:[#allocation248_spill] sm:$0xff] %v13937_v56 }
 0x564   :  { %6974 = vmatprep.subr.bf16.mxu1 %v13910_v21  ;;  %v3924_v21 = vld [vmem:[#allocation20 + $0xa00] sm:$0xff]  ;;  %v13946_v63 = vcombine.high %v3925_v17, %v3929_v31  ;;  %v13953_v8 = vcombine.low %v3925_v17, %v3929_v31 }
 0x565   :  { %v13943_v39 = vcombine.high %v3924_v21, %v3928_v42  ;;  %v13949_v44 = vcombine.low %v3924_v21, %v3928_v42 }
 0x566   :  { %6811 = vmatpush1.bf16.msra.mxu0 %v13913_v26  ;;  %17898 = vst [vmem:[#allocation251_spill] sm:$0xff] %v13946_v63  ;;  %v3937_v26 = vld [vmem:[#allocation20 + $0xa68] sm:$0xff]  ;;  %17900 = vst [vmem:[#allocation253_spill] sm:$0xff] %v13953_v8 }
 0x567   :  { %6975 = vmatpush1.bf16.msra.mxu1 %v13917_v2  ;;  %6812 = vmatprep.subr.bf16.mxu0 %v13919_v7  ;;  %17897 = vst [vmem:[#allocation250_spill] sm:$0xff] %v13943_v39  ;;  %v3936_v7 = vld [vmem:[#allocation20 + $0xa60] sm:$0xff]  ;;  %v3933_v2 = vld [vmem:[#allocation20 + $0xa48] sm:$0xff]  ;;  %17899 = vst [vmem:[#allocation252_spill] sm:$0xff] %v13949_v44 }
 0x568   :  { %6976 = vmatprep.subr.bf16.mxu1 %v13922_v15  ;;  %v3932_v15 = vld [vmem:[#allocation20 + $0xa40] sm:$0xff]  ;;  %v13958_v22 = vcombine.high %v3933_v2, %v3937_v26  ;;  %v13965_v31 = vcombine.low %v3933_v2, %v3937_v26 }
 0x569   :  { %v13955_v32 = vcombine.high %v3932_v15, %v3936_v7  ;;  %v13961_v42 = vcombine.low %v3932_v15, %v3936_v7 }
 0x56a   :  { %6813 = vmatpush1.bf16.msra.mxu0 %v13925_v24  ;;  %17902 = vst [vmem:[#allocation255_spill] sm:$0xff] %v13958_v22  ;;  %v3945_v24 = vld [vmem:[#allocation20 + $0xaa8] sm:$0xff]  ;;  %17904 = vst [vmem:[#allocation257_spill] sm:$0xff] %v13965_v31 }
 0x56b   :  { %6977 = vmatpush1.bf16.msra.mxu1 %v13929_v20  ;;  %6814 = vmatprep.subr.bf16.mxu0 %v13931_v0  ;;  %17901 = vst [vmem:[#allocation254_spill] sm:$0xff] %v13955_v32  ;;  %v3944_v0 = vld [vmem:[#allocation20 + $0xaa0] sm:$0xff]  ;;  %v3941_v20 = vld [vmem:[#allocation20 + $0xa88] sm:$0xff]  ;;  %17903 = vst [vmem:[#allocation256_spill] sm:$0xff] %v13961_v42 }
 0x56c   :  { %6978 = vmatprep.subr.bf16.mxu1 %v13934_v47  ;;  %v3940_v47 = vld [vmem:[#allocation20 + $0xa80] sm:$0xff]  ;;  %v13970_v21 = vcombine.high %v3941_v20, %v3945_v24  ;;  %v13977_v26 = vcombine.low %v3941_v20, %v3945_v24 }
 0x56d   :  { %v13967_v17 = vcombine.high %v3940_v47, %v3944_v0  ;;  %v13973_v7 = vcombine.low %v3940_v47, %v3944_v0 }
 0x56e   :  { %6815 = vmatpush1.bf16.msra.mxu0 %v13937_v56  ;;  %17906 = vst [vmem:[#allocation259_spill] sm:$0xff] %v13970_v21  ;;  %v3953_v56 = vld [vmem:[#allocation20 + $0xae8] sm:$0xff]  ;;  %17908 = vst [vmem:[#allocation261_spill] sm:$0xff] %v13977_v26 }
 0x56f   :  { %6979 = vmatpush1.bf16.msra.mxu1 %v13941_v25  ;;  %6816 = vmatprep.subr.bf16.mxu0 %v13943_v39  ;;  %17905 = vst [vmem:[#allocation258_spill] sm:$0xff] %v13967_v17  ;;  %v3952_v39 = vld [vmem:[#allocation20 + $0xae0] sm:$0xff]  ;;  %v3949_v25 = vld [vmem:[#allocation20 + $0xac8] sm:$0xff]  ;;  %17907 = vst [vmem:[#allocation260_spill] sm:$0xff] %v13973_v7 }
 0x570   :  { %6980 = vmatprep.subr.bf16.mxu1 %v13946_v63  ;;  %v3948_v63 = vld [vmem:[#allocation20 + $0xac0] sm:$0xff]  ;;  %v13982_v15 = vcombine.high %v3949_v25, %v3953_v56  ;;  %v13989_v24 = vcombine.low %v3949_v25, %v3953_v56 }
 0x571   :  { %v13979_v2 = vcombine.high %v3948_v63, %v3952_v39  ;;  %v13985_v0 = vcombine.low %v3948_v63, %v3952_v39  ;;  %v3965_v39 = vld [vmem:[#allocation20 + $0xb48] sm:$0xff] }
 0x572   :  { %6817 = vmatpush1.bf16.msra.mxu0 %v13949_v44  ;;  %17910 = vst [vmem:[#allocation263_spill] sm:$0xff] %v13982_v15  ;;  %v3961_v44 = vld [vmem:[#allocation20 + $0xb28] sm:$0xff]  ;;  %17912 = vst [vmem:[#allocation265_spill] sm:$0xff] %v13989_v24 }
 0x573   :  { %6981 = vmatpush1.bf16.msra.mxu1 %v13953_v8  ;;  %6818 = vmatprep.subr.bf16.mxu0 %v13955_v32  ;;  %17909 = vst [vmem:[#allocation262_spill] sm:$0xff] %v13979_v2  ;;  %v3960_v32 = vld [vmem:[#allocation20 + $0xb20] sm:$0xff]  ;;  %v3957_v8 = vld [vmem:[#allocation20 + $0xb08] sm:$0xff]  ;;  %17911 = vst [vmem:[#allocation264_spill] sm:$0xff] %v13985_v0 }
 0x574   :  { %6982 = vmatprep.subr.bf16.mxu1 %v13958_v22  ;;  %v3956_v22 = vld [vmem:[#allocation20 + $0xb00] sm:$0xff]  ;;  %v13994_v47 = vcombine.high %v3957_v8, %v3961_v44  ;;  %v3969_v63 = vld [vmem:[#allocation20 + $0xb68] sm:$0xff]  ;;  %v14003_v56 = vcombine.low %v3957_v8, %v3961_v44 }
 0x575   :  { %v13991_v20 = vcombine.high %v3956_v22, %v3960_v32  ;;  %v14021_v8 = vcombine.low %v3965_v39, %v3969_v63 }
 0x576   :  { %6819 = vmatpush1.bf16.msra.mxu0 %v13961_v42  ;;  %17914 = vst [vmem:[#allocation267_spill] sm:$0xff] %v13994_v47  ;;  %17916 = vst [vmem:[#allocation269_spill] sm:$0xff] %v14003_v56  ;;  %v3980_v42 = vld [vmem:[#allocation20 + $0xbc0] sm:$0xff] }
 0x577   :  { %6983 = vmatpush1.bf16.msra.mxu1 %v13965_v31  ;;  %6820 = vmatprep.subr.bf16.mxu0 %v13967_v17  ;;  %17913 = vst [vmem:[#allocation266_spill] sm:$0xff] %v13991_v20  ;;  %v3968_v17 = vld [vmem:[#allocation20 + $0xb60] sm:$0xff]  ;;  %17922 = vst [vmem:[#allocation273_spill] sm:$0xff] %v14021_v8 }
 0x578   :  { %6984 = vmatprep.subr.bf16.mxu1 %v13970_v21  ;;  %v3964_v21 = vld [vmem:[#allocation20 + $0xb40] sm:$0xff] }
 0x579   :  { %v14005_v25 = vcombine.high %v3964_v21, %v3968_v17  ;;  %v3972_v31 = vld [vmem:[#allocation20 + $0xb80] sm:$0xff]  ;;  %v14017_v44 = vcombine.low %v3964_v21, %v3968_v17  ;;  %v3981_v21 = vld [vmem:[#allocation20 + $0xbc8] sm:$0xff] }
 0x57a   :  { %6821 = vmatpush1.bf16.msra.mxu0 %v13973_v7  ;;  %v3976_v7 = vld [vmem:[#allocation20 + $0xba0] sm:$0xff] }
 0x57b   :  { %6985 = vmatpush1.bf16.msra.mxu1 %v13977_v26  ;;  %6822 = vmatprep.subr.bf16.mxu0 %v13979_v2  ;;  %v13999_v26 = vcombine.low %v3956_v22, %v3960_v32  ;;  %17917 = vst [vmem:[#allocation270_spill] sm:$0xff] %v14005_v25  ;;  %v17919_v2 = vsub.s32 4, %v13127_v9  ;;  %v17920_v32 = vsub.s32 7, %v13127_v9  ;;  %17921 = vst [vmem:[#allocation272_spill] sm:$0xff] %v14017_v44 }
 0x57c   :  { %6986 = vmatprep.subr.bf16.mxu1 %v13982_v15  ;;  %v14008_v15 = vcombine.high %v3965_v39, %v3969_v63  ;;  %v14035_v39 = vcombine.low %v3972_v31, %v3976_v7 }
 0x57d   :  { %17915 = vst [vmem:[#allocation268_spill] sm:$0xff] %v13999_v26  ;;  %v2218_v22 = vrot.slane %v13602_v49, %v17920_v32 }
 0x57e   :  { %6823 = vmatpush1.bf16.msra.mxu0 %v13985_v0  ;;  %17918 = vst [vmem:[#allocation271_spill] sm:$0xff] %v14008_v15  ;;  %v2206_v0 = vrot.slane %v13602_v49, %v17919_v2  ;;  %v3984_v49 = vld [vmem:[#allocation20 + $0xbe0] sm:$0xff]  ;;  %17927 = vst [vmem:[#allocation278_spill] sm:$0xff] %v14035_v39 }
 0x57f   :  { %6987 = vmatpush1.bf16.msra.mxu1 %v13989_v24  ;;  %6824 = vmatprep.subr.bf16.mxu0 %v13991_v20  ;;  %v3973_v24 = vld [vmem:[#allocation20 + $0xb88] sm:$0xff]  ;;  %v14032_v17 = vadd.f32 %v13600_v55, %v2218_v22  ;;  %v3992_v22 = vld [vmem:[#allocation20 + $0xc20] sm:$0xff] }
 0x580   :  { %6988 = vmatprep.subr.bf16.mxu1 %v13994_v47  ;;  %v3977_v20 = vld [vmem:[#allocation20 + $0xba8] sm:$0xff]  ;;  %v14023_v47 = vcombine.high %v3972_v31, %v3976_v7  ;;  %v14029_v32 = vadd.f32 %v13594_v14, %v2206_v0  ;;  %v14043_v14 = vcombine.high %v3980_v42, %v3984_v49  ;;  %v3988_v0 = vld [vmem:[#allocation20 + $0xc00] sm:$0xff] }
 0x581   :  { %v14026_v2 = vcombine.high %v3973_v24, %v3977_v20  ;;  %17926 = vst [vmem:[#allocation277_spill] sm:$0xff] %v14032_v17  ;;  %v3587_v31 = vadd.f32 %v13718_v41, %v14032_v17  ;;  %v3989_v7 = vld [vmem:[#allocation20 + $0xc08] sm:$0xff]  ;;  %v3996_v17 = vld [vmem:[#allocation20 + $0xc40] sm:$0xff] }
 0x582   :  { %6825 = vmatpush1.bf16.msra.mxu0 %v13999_v26  ;;  %17923 = vst [vmem:[#allocation274_spill] sm:$0xff] %v14023_v47  ;;  %17925 = vst [vmem:[#allocation276_spill] sm:$0xff] %v14029_v32  ;;  %v3584_v63 = vadd.f32 %v13712_v1, %v14029_v32  ;;  %v14051_v1 = vcombine.low %v3980_v42, %v3984_v49  ;;  %v14063_v42 = vcombine.low %v3988_v0, %v3992_v22  ;;  %v3997_v49 = vld [vmem:[#allocation20 + $0xc48] sm:$0xff] }
 0x583   :  { %6989 = vmatpush1.bf16.msra.mxu1 %v14003_v56  ;;  %6826 = vmatprep.subr.bf16.mxu0 %v14005_v25  ;;  %17924 = vst [vmem:[#allocation275_spill] sm:$0xff] %v14026_v2  ;;  %v3985_v56 = vld [vmem:[#allocation20 + $0xbe8] sm:$0xff]  ;;  %17929 = vst [vmem:[#allocation280_spill] sm:$0xff] %v14043_v14  ;;  %v3595_v41 = vmax.f32 %v3587_v31, 0.0  ;;  %v4004_v31 = vld [vmem:[#allocation20 + $0xc80] sm:$0xff] }
 0x584   :  { %6990 = vmatprep.subr.bf16.mxu1 %v14008_v15  ;;  %v14041_v15 = vcombine.low %v3973_v24, %v3977_v20  ;;  %v14046_v55 = vcombine.high %v3981_v21, %v3985_v56  ;;  %17931 = vst [vmem:[#allocation282_spill] sm:$0xff] %v14051_v1  ;;  %v14055_v24 = vcombine.low %v3981_v21, %v3985_v56  ;;  %17935 = vst [vmem:[#allocation286_spill] sm:$0xff] %v14063_v42 }
 0x585   :  { %v14057_v20 = vcombine.high %v3988_v0, %v3992_v22  ;;  %v4009_v22 = vld [vmem:[#allocation20 + $0xca8] sm:$0xff] }
 0x586   :  { %6827 = vmatpush1.bf16.msra.mxu0 %v14017_v44  ;;  %17928 = vst [vmem:[#allocation279_spill] sm:$0xff] %v14041_v15  ;;  %17930 = vst [vmem:[#allocation281_spill] sm:$0xff] %v14046_v55  ;;  %v3993_v44 = vld [vmem:[#allocation20 + $0xc28] sm:$0xff] }
 0x587   :  { %6991 = vmatpush1.bf16.msra.mxu1 %v14021_v8  ;;  %6828 = vmatprep.subr.bf16.mxu0 %v14023_v47  ;;  %v3592_v47 = vmax.f32 %v3584_v63, 0.0  ;;  %17932 = vst [vmem:[#allocation283_spill] sm:$0xff] %v14055_v24  ;;  %17933 = vst [vmem:[#allocation284_spill] sm:$0xff] %v14057_v20  ;;  %v4000_v8 = vld [vmem:[#allocation20 + $0xc60] sm:$0xff]  ;;  %v4001_v63 = vld [vmem:[#allocation20 + $0xc68] sm:$0xff]  ;;  %v14069_v56 = vcombine.low %v3989_v7, %v3993_v44 }
 0x588   :  { %6992 = vmatprep.subr.bf16.mxu1 %v14026_v2  ;;  %v14060_v2 = vcombine.high %v3989_v7, %v3993_v44  ;;  %v14072_v21 = vcombine.high %v3996_v17, %v4000_v8  ;;  %v14077_v0 = vcombine.high %v3997_v49, %v4001_v63  ;;  %v14081_v44 = vcombine.low %v3996_v17, %v4000_v8  ;;  %v4013_v8 = vld [vmem:[#allocation20 + $0xcc8] sm:$0xff] }
 0x589   :  { %17936 = vst [vmem:[#allocation287_spill] sm:$0xff] %v14069_v56  ;;  %v14085_v7 = vcombine.low %v3997_v49, %v4001_v63  ;;  %v4017_v17 = vld [vmem:[#allocation20 + $0xce8] sm:$0xff] }
 0x58a   :  { %6829 = vmatpush1.bf16.msra.mxu0 %v14035_v39  ;;  %17934 = vst [vmem:[#allocation285_spill] sm:$0xff] %v14060_v2  ;;  %17937 = vst [vmem:[#allocation288_spill] sm:$0xff] %v14072_v21  ;;  %v4025_v39 = vld [vmem:[#allocation20 + $0xd28] sm:$0xff] }
 0x58b   :  { %6993 = vmatpush1.bf16.msra.mxu1 %v14041_v15  ;;  %6830 = vmatprep.subr.bf16.mxu0 %v14043_v14  ;;  %v14065_v15 = vpack.c.bf16 %v3592_v47, %v3592_v47  ;;  %v14074_v14 = vpack.c.bf16 %v3595_v41, %v3595_v41  ;;  %17938 = vst [vmem:[#allocation289_spill] sm:$0xff] %v14077_v0  ;;  %v4005_v47 = vld [vmem:[#allocation20 + $0xc88] sm:$0xff]  ;;  %17939 = vst [vmem:[#allocation290_spill] sm:$0xff] %v14081_v44 }
 0x58c   :  { %6994 = vmatprep.subr.bf16.mxu1 %v14046_v55  ;;  %v4008_v55 = vld [vmem:[#allocation20 + $0xca0] sm:$0xff]  ;;  %17940 = vst [vmem:[#allocation291_spill] sm:$0xff] %v14085_v7  ;;  %v14099_v49 = vcombine.low %v4005_v47, %v4009_v22 }
 0x58d   :  { %v14087_v41 = vcombine.high %v4004_v31, %v4008_v55 }
 0x58e   :  { %6831 = vmatpush1.bf16.msra.mxu0 %v14051_v1  ;;  %17944 = vst [vmem:[#allocation295_spill] sm:$0xff] %v14099_v49  ;;  %v4021_v1 = vld [vmem:[#allocation20 + $0xd08] sm:$0xff] }
 0x58f   :  { %6995 = vmatpush1.bf16.msra.mxu1 %v14055_v24  ;;  %6841 = vmatprep.subr.bf16.mxu0 %v14057_v20  ;;  %17941 = vst [vmem:[#allocation292_spill] sm:$0xff] %v14087_v41  ;;  %v4012_v20 = vld [vmem:[#allocation20 + $0xcc0] sm:$0xff] }
 0x590   :  { %7005 = vmatprep.subr.bf16.mxu1 %v14060_v2  ;;  %v14091_v2 = vcombine.high %v4005_v47, %v4009_v22  ;;  %v4016_v24 = vld [vmem:[#allocation20 + $0xce0] sm:$0xff]  ;;  %v14116_v22 = vcombine.high %v4021_v1, %v4025_v39 }
 0x591   :  { %6833 = vmatmul.mubr.bf16.vlgmr.msra.gmra.mrb[28].mxu0 %v14065_v15  ;;  %v14101_v63 = vcombine.high %v4012_v20, %v4016_v24 }
 0x592   :  { %6997 = vmatmul.mubr.bf16.vlgmr.msra.gmra.mrb[28].mxu1 %v14065_v15  ;;  %6842 = vmatpush1.bf16.msra.mxu0 %v14063_v42  ;;  %17942 = vst [vmem:[#allocation293_spill] sm:$0xff] %v14091_v2  ;;  %v14095_v42 = vcombine.low %v4004_v31, %v4008_v55  ;;  %v14107_v55 = vcombine.low %v4012_v20, %v4016_v24  ;;  %17950 = vst [vmem:[#allocation301_spill] sm:$0xff] %v14116_v22 }
 0x593   :  { %6873 = vmatprep.mubr.bf16.mxu0 %v14074_v14  ;;  %7006 = vmatpush1.bf16.msra.mxu1 %v14069_v56  ;;  %17945 = vst [vmem:[#allocation296_spill] sm:$0xff] %v14101_v63  ;;  %v4020_v56 = vld [vmem:[#allocation20 + $0xd00] sm:$0xff]  ;;  %v14111_v31 = vcombine.low %v4013_v8, %v4017_v17  ;;  %v14123_v20 = vcombine.low %v4021_v1, %v4025_v39 }
 0x594   :  { %7037 = vmatprep.mubr.bf16.mxu1 %v14074_v14  ;;  %6843 = vmatprep.subr.bf16.mxu0 %v14072_v21  ;;  %17943 = vst [vmem:[#allocation294_spill] sm:$0xff] %v14095_v42  ;;  %v14104_v21 = vcombine.high %v4013_v8, %v4017_v17  ;;  %17947 = vst [vmem:[#allocation298_spill] sm:$0xff] %v14107_v55 }
 0x595   :  { %7007 = vmatprep.subr.bf16.mxu1 %v14077_v0  ;;  %v4024_v0 = vld [vmem:[#allocation20 + $0xd20] sm:$0xff]  ;;  %17948 = vst [vmem:[#allocation299_spill] sm:$0xff] %v14111_v31  ;;  %17952 = vst [vmem:[#allocation303_spill] sm:$0xff] %v14123_v20 }
 0x596   :  { %6844 = vmatpush1.bf16.msra.mxu0 %v14081_v44  ;;  %17946 = vst [vmem:[#allocation297_spill] sm:$0xff] %v14104_v21  ;;  %v14113_v47 = vcombine.high %v4020_v56, %v4024_v0  ;;  %v4033_v44 = vld [vmem:[#allocation20 + $0xd68] sm:$0xff]  ;;  %v14119_v24 = vcombine.low %v4020_v56, %v4024_v0 }
 0x597   :  { %7008 = vmatpush1.bf16.msra.mxu1 %v14085_v7  ;;  %6845 = vmatprep.subr.bf16.mxu0 %v14087_v41  ;;  %v4032_v41 = vld [vmem:[#allocation20 + $0xd60] sm:$0xff]  ;;  %v4029_v7 = vld [vmem:[#allocation20 + $0xd48] sm:$0xff] }
 0x598   :  { %7009 = vmatprep.subr.bf16.mxu1 %v14091_v2  ;;  %17949 = vst [vmem:[#allocation300_spill] sm:$0xff] %v14113_v47  ;;  %v4028_v2 = vld [vmem:[#allocation20 + $0xd40] sm:$0xff]  ;;  %17951 = vst [vmem:[#allocation302_spill] sm:$0xff] %v14119_v24  ;;  %v14128_v17 = vcombine.high %v4029_v7, %v4033_v44  ;;  %v14135_v39 = vcombine.low %v4029_v7, %v4033_v44 }
 0x599   :  { %v14125_v8 = vcombine.high %v4028_v2, %v4032_v41  ;;  %v14131_v56 = vcombine.low %v4028_v2, %v4032_v41 }
 0x59a   :  { %6846 = vmatpush1.bf16.msra.mxu0 %v14095_v42  ;;  %17954 = vst [vmem:[#allocation305_spill] sm:$0xff] %v14128_v17  ;;  %v4041_v42 = vld [vmem:[#allocation20 + $0xda8] sm:$0xff]  ;;  %17956 = vst [vmem:[#allocation307_spill] sm:$0xff] %v14135_v39 }
 0x59b   :  { %7010 = vmatpush1.bf16.msra.mxu1 %v14099_v49  ;;  %6847 = vmatprep.subr.bf16.mxu0 %v14101_v63  ;;  %17953 = vst [vmem:[#allocation304_spill] sm:$0xff] %v14125_v8  ;;  %v4040_v63 = vld [vmem:[#allocation20 + $0xda0] sm:$0xff]  ;;  %v4037_v49 = vld [vmem:[#allocation20 + $0xd88] sm:$0xff]  ;;  %17955 = vst [vmem:[#allocation306_spill] sm:$0xff] %v14131_v56 }
 0x59c   :  { %7011 = vmatprep.subr.bf16.mxu1 %v14104_v21  ;;  %v4036_v21 = vld [vmem:[#allocation20 + $0xd80] sm:$0xff]  ;;  %v14140_v0 = vcombine.high %v4037_v49, %v4041_v42  ;;  %v14147_v44 = vcombine.low %v4037_v49, %v4041_v42 }
 0x59d   :  { %v14137_v1 = vcombine.high %v4036_v21, %v4040_v63  ;;  %v14143_v2 = vcombine.low %v4036_v21, %v4040_v63 }
 0x59e   :  { %6848 = vmatpush1.bf16.msra.mxu0 %v14107_v55  ;;  %17958 = vst [vmem:[#allocation309_spill] sm:$0xff] %v14140_v0  ;;  %v4049_v55 = vld [vmem:[#allocation20 + $0xde8] sm:$0xff]  ;;  %17960 = vst [vmem:[#allocation311_spill] sm:$0xff] %v14147_v44 }
 0x59f   :  { %7012 = vmatpush1.bf16.msra.mxu1 %v14111_v31  ;;  %6849 = vmatprep.subr.bf16.mxu0 %v14113_v47  ;;  %17957 = vst [vmem:[#allocation308_spill] sm:$0xff] %v14137_v1  ;;  %v4048_v47 = vld [vmem:[#allocation20 + $0xde0] sm:$0xff]  ;;  %v4045_v31 = vld [vmem:[#allocation20 + $0xdc8] sm:$0xff]  ;;  %17959 = vst [vmem:[#allocation310_spill] sm:$0xff] %v14143_v2 }
 0x5a0   :  { %7013 = vmatprep.subr.bf16.mxu1 %v14116_v22  ;;  %v4044_v22 = vld [vmem:[#allocation20 + $0xdc0] sm:$0xff]  ;;  %v14152_v41 = vcombine.high %v4045_v31, %v4049_v55  ;;  %v14159_v42 = vcombine.low %v4045_v31, %v4049_v55 }
 0x5a1   :  { %v14149_v7 = vcombine.high %v4044_v22, %v4048_v47  ;;  %v14155_v21 = vcombine.low %v4044_v22, %v4048_v47 }
 0x5a2   :  { %6850 = vmatpush1.bf16.msra.mxu0 %v14119_v24  ;;  %17962 = vst [vmem:[#allocation313_spill] sm:$0xff] %v14152_v41  ;;  %v4057_v24 = vld [vmem:[#allocation20 + $0xe28] sm:$0xff]  ;;  %17964 = vst [vmem:[#allocation315_spill] sm:$0xff] %v14159_v42 }
 0x5a3   :  { %7014 = vmatpush1.bf16.msra.mxu1 %v14123_v20  ;;  %6851 = vmatprep.subr.bf16.mxu0 %v14125_v8  ;;  %17961 = vst [vmem:[#allocation312_spill] sm:$0xff] %v14149_v7  ;;  %v4056_v8 = vld [vmem:[#allocation20 + $0xe20] sm:$0xff]  ;;  %v4053_v20 = vld [vmem:[#allocation20 + $0xe08] sm:$0xff]  ;;  %17963 = vst [vmem:[#allocation314_spill] sm:$0xff] %v14155_v21 }
 0x5a4   :  { %7015 = vmatprep.subr.bf16.mxu1 %v14128_v17  ;;  %v4052_v17 = vld [vmem:[#allocation20 + $0xe00] sm:$0xff]  ;;  %v14164_v63 = vcombine.high %v4053_v20, %v4057_v24  ;;  %v14171_v55 = vcombine.low %v4053_v20, %v4057_v24 }
 0x5a5   :  { %v14161_v49 = vcombine.high %v4052_v17, %v4056_v8  ;;  %v14167_v47 = vcombine.low %v4052_v17, %v4056_v8 }
 0x5a6   :  { %6852 = vmatpush1.bf16.msra.mxu0 %v14131_v56  ;;  %17966 = vst [vmem:[#allocation317_spill] sm:$0xff] %v14164_v63  ;;  %v4065_v56 = vld [vmem:[#allocation20 + $0xe68] sm:$0xff]  ;;  %17968 = vst [vmem:[#allocation319_spill] sm:$0xff] %v14171_v55 }
 0x5a7   :  { %7016 = vmatpush1.bf16.msra.mxu1 %v14135_v39  ;;  %6853 = vmatprep.subr.bf16.mxu0 %v14137_v1  ;;  %17965 = vst [vmem:[#allocation316_spill] sm:$0xff] %v14161_v49  ;;  %v4064_v1 = vld [vmem:[#allocation20 + $0xe60] sm:$0xff]  ;;  %v4061_v39 = vld [vmem:[#allocation20 + $0xe48] sm:$0xff]  ;;  %17967 = vst [vmem:[#allocation318_spill] sm:$0xff] %v14167_v47 }
 0x5a8   :  { %7017 = vmatprep.subr.bf16.mxu1 %v14140_v0  ;;  %v4060_v0 = vld [vmem:[#allocation20 + $0xe40] sm:$0xff]  ;;  %v14176_v22 = vcombine.high %v4061_v39, %v4065_v56  ;;  %v14183_v24 = vcombine.low %v4061_v39, %v4065_v56 }
 0x5a9   :  { %v14173_v31 = vcombine.high %v4060_v0, %v4064_v1  ;;  %v14179_v8 = vcombine.low %v4060_v0, %v4064_v1 }
 0x5aa   :  { %6854 = vmatpush1.bf16.msra.mxu0 %v14143_v2  ;;  %17970 = vst [vmem:[#allocation321_spill] sm:$0xff] %v14176_v22  ;;  %v4073_v2 = vld [vmem:[#allocation20 + $0xea8] sm:$0xff]  ;;  %17972 = vst [vmem:[#allocation323_spill] sm:$0xff] %v14183_v24 }
 0x5ab   :  { %7018 = vmatpush1.bf16.msra.mxu1 %v14147_v44  ;;  %6855 = vmatprep.subr.bf16.mxu0 %v14149_v7  ;;  %17969 = vst [vmem:[#allocation320_spill] sm:$0xff] %v14173_v31  ;;  %v4072_v7 = vld [vmem:[#allocation20 + $0xea0] sm:$0xff]  ;;  %v4069_v44 = vld [vmem:[#allocation20 + $0xe88] sm:$0xff]  ;;  %17971 = vst [vmem:[#allocation322_spill] sm:$0xff] %v14179_v8 }
 0x5ac   :  { %7019 = vmatprep.subr.bf16.mxu1 %v14152_v41  ;;  %v4068_v41 = vld [vmem:[#allocation20 + $0xe80] sm:$0xff]  ;;  %v14188_v17 = vcombine.high %v4069_v44, %v4073_v2  ;;  %v14195_v56 = vcombine.low %v4069_v44, %v4073_v2 }
 0x5ad   :  { %v14185_v20 = vcombine.high %v4068_v41, %v4072_v7  ;;  %v14191_v1 = vcombine.low %v4068_v41, %v4072_v7  ;;  %v17130_v41 = vsub.s32 6, %v13127_v9 }
 0x5ae   :  { %6856 = vmatpush1.bf16.msra.mxu0 %v14155_v21  ;;  %17974 = vst [vmem:[#allocation325_spill] sm:$0xff] %v14188_v17  ;;  %v4081_v21 = vld [vmem:[#allocation20 + $0xee8] sm:$0xff]  ;;  %17976 = vst [vmem:[#allocation327_spill] sm:$0xff] %v14195_v56 }
 0x5af   :  { %7020 = vmatpush1.bf16.msra.mxu1 %v14159_v42  ;;  %6857 = vmatprep.subr.bf16.mxu0 %v14161_v49  ;;  %17973 = vst [vmem:[#allocation324_spill] sm:$0xff] %v14185_v20  ;;  %v4080_v49 = vld [vmem:[#allocation20 + $0xee0] sm:$0xff]  ;;  %v4077_v42 = vld [vmem:[#allocation20 + $0xec8] sm:$0xff]  ;;  %17975 = vst [vmem:[#allocation326_spill] sm:$0xff] %v14191_v1 }
 0x5b0   :  { %7021 = vmatprep.subr.bf16.mxu1 %v14164_v63  ;;  %v4076_v63 = vld [vmem:[#allocation20 + $0xec0] sm:$0xff]  ;;  %v14200_v0 = vcombine.high %v4077_v42, %v4081_v21  ;;  %v14208_v2 = vcombine.low %v4077_v42, %v4081_v21 }
 0x5b1   :  { %v14197_v39 = vcombine.high %v4076_v63, %v4080_v49  ;;  %v14203_v7 = vcombine.low %v4076_v63, %v4080_v49  ;;  %v12247_v63 = vld [vmem:[#allocation19] sm:$0xff] }
 0x5b2   :  { %6858 = vmatpush1.bf16.msra.mxu0 %v14167_v47  ;;  %17978 = vst [vmem:[#allocation329_spill] sm:$0xff] %v14200_v0  ;;  %v4089_v47 = vld [vmem:[#allocation20 + $0xf28] sm:$0xff]  ;;  %17980 = vst [vmem:[#allocation331_spill] sm:$0xff] %v14208_v2 }
 0x5b3   :  { %7022 = vmatpush1.bf16.msra.mxu1 %v14171_v55  ;;  %6859 = vmatprep.subr.bf16.mxu0 %v14173_v31  ;;  %17977 = vst [vmem:[#allocation328_spill] sm:$0xff] %v14197_v39  ;;  %v4088_v31 = vld [vmem:[#allocation20 + $0xf20] sm:$0xff]  ;;  %v4085_v55 = vld [vmem:[#allocation20 + $0xf08] sm:$0xff]  ;;  %17979 = vst [vmem:[#allocation330_spill] sm:$0xff] %v14203_v7 }
 0x5b4   :  { %7023 = vmatprep.subr.bf16.mxu1 %v14176_v22  ;;  %v4084_v22 = vld [vmem:[#allocation20 + $0xf00] sm:$0xff]  ;;  %v14222_v21 = vcombine.low %v4085_v55, %v4089_v47 }
 0x5b5   :  { %v14210_v44 = vcombine.high %v4084_v22, %v4088_v31  ;;  %v14216_v49 = vcombine.low %v4084_v22, %v4088_v31  ;;  %v4101_v31 = vld [vmem:[#allocation20 + $0xf88] sm:$0xff] }
 0x5b6   :  { %6860 = vmatpush1.bf16.msra.mxu0 %v14179_v8  ;;  %v4093_v8 = vld [vmem:[#allocation20 + $0xf48] sm:$0xff]  ;;  %17984 = vst [vmem:[#allocation335_spill] sm:$0xff] %v14222_v21 }
 0x5b7   :  { %7024 = vmatpush1.bf16.msra.mxu1 %v14183_v24  ;;  %6861 = vmatprep.subr.bf16.mxu0 %v14185_v20  ;;  %17981 = vst [vmem:[#allocation332_spill] sm:$0xff] %v14210_v44  ;;  %v4092_v20 = vld [vmem:[#allocation20 + $0xf40] sm:$0xff]  ;;  %17983 = vst [vmem:[#allocation334_spill] sm:$0xff] %v14216_v49  ;;  %v4105_v22 = vld [vmem:[#allocation20 + $0xfa8] sm:$0xff] }
 0x5b8   :  { %7025 = vmatprep.subr.bf16.mxu1 %v14188_v17  ;;  %v14213_v17 = vcombine.high %v4085_v55, %v4089_v47  ;;  %v4096_v24 = vld [vmem:[#allocation20 + $0xf60] sm:$0xff] }
 0x5b9   :  { %v14224_v42 = vcombine.high %v4092_v20, %v4096_v24  ;;  %v14230_v32 = vcombine.low %v4092_v20, %v4096_v24  ;;  %v4113_v24 = vld [vmem:[#allocation20 + $0xfe8] sm:$0xff] }
 0x5ba   :  { %6862 = vmatpush1.bf16.msra.mxu0 %v14191_v1  ;;  %17982 = vst [vmem:[#allocation333_spill] sm:$0xff] %v14213_v17  ;;  %v4097_v1 = vld [vmem:[#allocation20 + $0xf68] sm:$0xff] }
 0x5bb   :  { %7026 = vmatpush1.bf16.msra.mxu1 %v14195_v56  ;;  %6863 = vmatprep.subr.bf16.mxu0 %v14197_v39  ;;  %v2214_v39 = vrot.slane %v12247_v63, %v17130_v41  ;;  %17985 = vst [vmem:[#allocation336_spill] sm:$0xff] %v14224_v42  ;;  %v4100_v56 = vld [vmem:[#allocation20 + $0xf80] sm:$0xff]  ;;  %17987 = vst [vmem:[#allocation338_spill] sm:$0xff] %v14230_v32  ;;  %v14237_v47 = vcombine.low %v4093_v8, %v4097_v1 }
 0x5bc   :  { %7027 = vmatprep.subr.bf16.mxu1 %v14200_v0  ;;  %v14227_v0 = vcombine.high %v4093_v8, %v4097_v1  ;;  %v14242_v41 = vcombine.high %v4101_v31, %v4105_v22  ;;  %v14251_v8 = vcombine.low %v4101_v31, %v4105_v22 }
 0x5bd   :  { %v14233_v63 = vadd.f32 %v13596_v13, %v2214_v39  ;;  %17988 = vst [vmem:[#allocation339_spill] sm:$0xff] %v14237_v47 }
 0x5be   :  { %6864 = vmatpush1.bf16.msra.mxu0 %v14203_v7  ;;  %17986 = vst [vmem:[#allocation337_spill] sm:$0xff] %v14227_v0  ;;  %v4104_v7 = vld [vmem:[#allocation20 + $0xfa0] sm:$0xff]  ;;  %17990 = vst [vmem:[#allocation341_spill] sm:$0xff] %v14242_v41 }
 0x5bf   :  { %7028 = vmatpush1.bf16.msra.mxu1 %v14208_v2  ;;  %6865 = vmatprep.subr.bf16.mxu0 %v14210_v44  ;;  %v14239_v55 = vcombine.high %v4100_v56, %v4104_v7  ;;  %v4112_v44 = vld [vmem:[#allocation20 + $0xfe0] sm:$0xff]  ;;  %v14245_v13 = vcombine.low %v4100_v56, %v4104_v7  ;;  %v3586_v20 = vadd.f32 %v13714_v59, %v14233_v63  ;;  %v3611_v56 = vld [vmem:[#allocation20 + $0x38] sm:$0xff] }
 0x5c0   :  { %7029 = vmatprep.subr.bf16.mxu1 %v14213_v17  ;;  %v4108_v17 = vld [vmem:[#allocation20 + $0xfc0] sm:$0xff]  ;;  %17992 = vst [vmem:[#allocation343_spill] sm:$0xff] %v14251_v8 }
 0x5c1   :  { %17989 = vst [vmem:[#allocation340_spill] sm:$0xff] %v14239_v55  ;;  %17991 = vst [vmem:[#allocation342_spill] sm:$0xff] %v14245_v13  ;;  %v14253_v1 = vcombine.high %v4108_v17, %v4112_v44  ;;  %v14259_v7 = vcombine.low %v4108_v17, %v4112_v44  ;;  %v3594_v59 = vmax.f32 %v3586_v20, 0.0  ;;  %v3615_v17 = vld [vmem:[#allocation20 + $0x58] sm:$0xff] }
 0x5c2   :  { %6866 = vmatpush1.bf16.msra.mxu0 %v14216_v49  ;;  %v4109_v49 = vld [vmem:[#allocation20 + $0xfc8] sm:$0xff]  ;;  %v3619_v44 = vld [vmem:[#allocation20 + $0x78] sm:$0xff] }
 0x5c3   :  { %7030 = vmatpush1.bf16.msra.mxu1 %v14222_v21  ;;  %6867 = vmatprep.subr.bf16.mxu0 %v14224_v42  ;;  %17993 = vst [vmem:[#allocation344_spill] sm:$0xff] %v14253_v1  ;;  %v14256_v39 = vcombine.high %v4109_v49, %v4113_v24  ;;  %v3610_v42 = vld [vmem:[#allocation20 + $0x30] sm:$0xff]  ;;  %17995 = vst [vmem:[#allocation346_spill] sm:$0xff] %v14259_v7  ;;  %v14263_v31 = vcombine.low %v4109_v49, %v4113_v24 }
 0x5c4   :  { %7031 = vmatprep.subr.bf16.mxu1 %v14227_v0  ;;  %v3606_v0 = vld [vmem:[#allocation20 + $0x10] sm:$0xff]  ;;  %v14273_v20 = vpack.c.bf16 %v3594_v59, %v3594_v59 }
 0x5c5   :  { %17994 = vst [vmem:[#allocation345_spill] sm:$0xff] %v14256_v39  ;;  %17996 = vst [vmem:[#allocation347_spill] sm:$0xff] %v14263_v31  ;;  %v14265_v22 = vcombine.high %v3606_v0, %v3610_v42 }
 0x5c6   :  { %6868 = vmatpush1.bf16.msra.mxu0 %v14230_v32  ;;  %v3607_v32 = vld [vmem:[#allocation20 + $0x18] sm:$0xff] }
 0x5c7   :  { %7032 = vmatpush1.bf16.msra.mxu1 %v14237_v47  ;;  %6869 = vmatprep.subr.bf16.mxu0 %v14239_v55  ;;  %17997 = vst [vmem:[#allocation348_spill] sm:$0xff] %v14265_v22  ;;  %v3614_v55 = vld [vmem:[#allocation20 + $0x50] sm:$0xff]  ;;  %v14277_v49 = vcombine.low %v3607_v32, %v3611_v56 }
 0x5c8   :  { %7033 = vmatprep.subr.bf16.mxu1 %v14242_v41  ;;  %v14268_v41 = vcombine.high %v3607_v32, %v3611_v56  ;;  %v3618_v47 = vld [vmem:[#allocation20 + $0x70] sm:$0xff]  ;;  %v14291_v32 = vcombine.low %v3615_v17, %v3619_v44 }
 0x5c9   :  { %18000 = vst [vmem:[#allocation351_spill] sm:$0xff] %v14277_v49  ;;  %v14280_v24 = vcombine.high %v3614_v55, %v3618_v47  ;;  %v14287_v59 = vcombine.low %v3614_v55, %v3618_v47  ;;  %v3631_v47 = vld [vmem:[#allocation20 + $0xd8] sm:$0xff] }
 0x5ca   :  { %6870 = vmatpush1.bf16.msra.mxu0 %v14245_v13  ;;  %17998 = vst [vmem:[#allocation349_spill] sm:$0xff] %v14268_v41  ;;  %v14271_v13 = vcombine.low %v3606_v0, %v3610_v42  ;;  %v14283_v0 = vcombine.high %v3615_v17, %v3619_v44  ;;  %v3623_v42 = vld [vmem:[#allocation20 + $0x98] sm:$0xff]  ;;  %18004 = vst [vmem:[#allocation355_spill] sm:$0xff] %v14291_v32 }
 0x5cb   :  { %7034 = vmatpush1.bf16.msra.mxu1 %v14251_v8  ;;  %6871 = vmatprep.subr.bf16.mxu0 %v14253_v1  ;;  %18001 = vst [vmem:[#allocation352_spill] sm:$0xff] %v14280_v24  ;;  %v3626_v1 = vld [vmem:[#allocation20 + $0xb0] sm:$0xff]  ;;  %18003 = vst [vmem:[#allocation354_spill] sm:$0xff] %v14287_v59  ;;  %v3635_v55 = vld [vmem:[#allocation20 + $0xf8] sm:$0xff] }
 0x5cc   :  { %7035 = vmatprep.subr.bf16.mxu1 %v14256_v39  ;;  %17999 = vst [vmem:[#allocation350_spill] sm:$0xff] %v14271_v13  ;;  %v3622_v39 = vld [vmem:[#allocation20 + $0x90] sm:$0xff]  ;;  %18002 = vst [vmem:[#allocation353_spill] sm:$0xff] %v14283_v0  ;;  %v14310_v44 = vcombine.high %v3631_v47, %v3635_v55  ;;  %v3643_v8 = vld [vmem:[#allocation20 + $0x138] sm:$0xff] }
 0x5cd   :  { %v14293_v56 = vcombine.high %v3622_v39, %v3626_v1 }
 0x5ce   :  { %6872 = vmatpush1.bf16.msra.mxu0 %v14259_v7  ;;  %v3627_v7 = vld [vmem:[#allocation20 + $0xb8] sm:$0xff]  ;;  %18010 = vst [vmem:[#allocation361_spill] sm:$0xff] %v14310_v44 }
 0x5cf   :  { %7036 = vmatpush1.bf16.msra.mxu1 %v14263_v31  ;;  %7046 = vmatprep.subr.bf16.mxu0 %v14265_v22  ;;  %18005 = vst [vmem:[#allocation356_spill] sm:$0xff] %v14293_v56  ;;  %v3630_v22 = vld [vmem:[#allocation20 + $0xd0] sm:$0xff]  ;;  %v14305_v17 = vcombine.low %v3623_v42, %v3627_v7 }
 0x5d0   :  { %7210 = vmatprep.subr.bf16.mxu1 %v14268_v41  ;;  %v14297_v41 = vcombine.high %v3623_v42, %v3627_v7  ;;  %v3634_v31 = vld [vmem:[#allocation20 + $0xf0] sm:$0xff] }
 0x5d1   :  { %6874 = vmatmul.mubr.bf16.vlgmr.msra.gmra.mrb[28].mxu0 %v14273_v20  ;;  %18008 = vst [vmem:[#allocation359_spill] sm:$0xff] %v14305_v17 }
 0x5d2   :  { %7038 = vmatmul.mubr.bf16.vlgmr.msra.gmra.mrb[28].mxu1 %v14273_v20  ;;  %7047 = vmatpush1.bf16.msra.mxu0 %v14271_v13  ;;  %18006 = vst [vmem:[#allocation357_spill] sm:$0xff] %v14297_v41  ;;  %v14301_v13 = vcombine.low %v3622_v39, %v3626_v1  ;;  %v14313_v1 = vcombine.low %v3630_v22, %v3634_v31 }
 0x5d3   :  { %7078 = vmatprep.mubr.bf16.mxu0 %v13624_v40  ;;  %7211 = vmatpush1.bf16.msra.mxu1 %v14277_v49  ;;  %v3639_v49 = vld [vmem:[#allocation20 + $0x118] sm:$0xff]  ;;  %v14317_v39 = vcombine.low %v3631_v47, %v3635_v55 }
 0x5d4   :  { %7242 = vmatprep.mubr.bf16.mxu1 %v13624_v40  ;;  %7048 = vmatprep.subr.bf16.mxu0 %v14280_v24  ;;  %18007 = vst [vmem:[#allocation358_spill] sm:$0xff] %v14301_v13  ;;  %v14307_v40 = vcombine.high %v3630_v22, %v3634_v31  ;;  %v3638_v24 = vld [vmem:[#allocation20 + $0x110] sm:$0xff]  ;;  %18011 = vst [vmem:[#allocation362_spill] sm:$0xff] %v14313_v1  ;;  %v14322_v42 = vcombine.high %v3639_v49, %v3643_v8 }
 0x5d5   :  { %7212 = vmatprep.subr.bf16.mxu1 %v14283_v0  ;;  %v3642_v0 = vld [vmem:[#allocation20 + $0x130] sm:$0xff]  ;;  %18012 = vst [vmem:[#allocation363_spill] sm:$0xff] %v14317_v39  ;;  %v14329_v22 = vcombine.low %v3639_v49, %v3643_v8 }
 0x5d6   :  { %7049 = vmatpush1.bf16.msra.mxu0 %v14287_v59  ;;  %18009 = vst [vmem:[#allocation360_spill] sm:$0xff] %v14307_v40  ;;  %v14319_v7 = vcombine.high %v3638_v24, %v3642_v0  ;;  %18014 = vst [vmem:[#allocation365_spill] sm:$0xff] %v14322_v42  ;;  %v3651_v59 = vld [vmem:[#allocation20 + $0x178] sm:$0xff]  ;;  %v14325_v31 = vcombine.low %v3638_v24, %v3642_v0 }
 0x5d7   :  { %7213 = vmatpush1.bf16.msra.mxu1 %v14291_v32  ;;  %7050 = vmatprep.subr.bf16.mxu0 %v14293_v56  ;;  %v3650_v56 = vld [vmem:[#allocation20 + $0x170] sm:$0xff]  ;;  %v3647_v32 = vld [vmem:[#allocation20 + $0x158] sm:$0xff]  ;;  %18016 = vst [vmem:[#allocation367_spill] sm:$0xff] %v14329_v22 }
 0x5d8   :  { %7214 = vmatprep.subr.bf16.mxu1 %v14297_v41  ;;  %18013 = vst [vmem:[#allocation364_spill] sm:$0xff] %v14319_v7  ;;  %v3646_v41 = vld [vmem:[#allocation20 + $0x150] sm:$0xff]  ;;  %18015 = vst [vmem:[#allocation366_spill] sm:$0xff] %v14325_v31  ;;  %v14334_v55 = vcombine.high %v3647_v32, %v3651_v59  ;;  %v14341_v8 = vcombine.low %v3647_v32, %v3651_v59 }
 0x5d9   :  { %v14331_v47 = vcombine.high %v3646_v41, %v3650_v56  ;;  %v14337_v24 = vcombine.low %v3646_v41, %v3650_v56 }
 0x5da   :  { %7051 = vmatpush1.bf16.msra.mxu0 %v14301_v13  ;;  %18018 = vst [vmem:[#allocation369_spill] sm:$0xff] %v14334_v55  ;;  %v3659_v13 = vld [vmem:[#allocation20 + $0x1b8] sm:$0xff]  ;;  %18020 = vst [vmem:[#allocation371_spill] sm:$0xff] %v14341_v8 }
 0x5db   :  { %7215 = vmatpush1.bf16.msra.mxu1 %v14305_v17  ;;  %7052 = vmatprep.subr.bf16.mxu0 %v14307_v40  ;;  %18017 = vst [vmem:[#allocation368_spill] sm:$0xff] %v14331_v47  ;;  %v3658_v40 = vld [vmem:[#allocation20 + $0x1b0] sm:$0xff]  ;;  %v3655_v17 = vld [vmem:[#allocation20 + $0x198] sm:$0xff]  ;;  %18019 = vst [vmem:[#allocation370_spill] sm:$0xff] %v14337_v24 }
 0x5dc   :  { %7216 = vmatprep.subr.bf16.mxu1 %v14310_v44  ;;  %v3654_v44 = vld [vmem:[#allocation20 + $0x190] sm:$0xff]  ;;  %v14346_v0 = vcombine.high %v3655_v17, %v3659_v13  ;;  %v14353_v59 = vcombine.low %v3655_v17, %v3659_v13 }
 0x5dd   :  { %v14343_v49 = vcombine.high %v3654_v44, %v3658_v40  ;;  %v14349_v41 = vcombine.low %v3654_v44, %v3658_v40 }
 0x5de   :  { %7053 = vmatpush1.bf16.msra.mxu0 %v14313_v1  ;;  %18022 = vst [vmem:[#allocation373_spill] sm:$0xff] %v14346_v0  ;;  %v3667_v1 = vld [vmem:[#allocation20 + $0x1f8] sm:$0xff]  ;;  %18024 = vst [vmem:[#allocation375_spill] sm:$0xff] %v14353_v59 }
 0x5df   :  { %7217 = vmatpush1.bf16.msra.mxu1 %v14317_v39  ;;  %7054 = vmatprep.subr.bf16.mxu0 %v14319_v7  ;;  %18021 = vst [vmem:[#allocation372_spill] sm:$0xff] %v14343_v49  ;;  %v3666_v7 = vld [vmem:[#allocation20 + $0x1f0] sm:$0xff]  ;;  %v3663_v39 = vld [vmem:[#allocation20 + $0x1d8] sm:$0xff]  ;;  %18023 = vst [vmem:[#allocation374_spill] sm:$0xff] %v14349_v41 }
 0x5e0   :  { %7218 = vmatprep.subr.bf16.mxu1 %v14322_v42  ;;  %v3662_v42 = vld [vmem:[#allocation20 + $0x1d0] sm:$0xff]  ;;  %v14358_v56 = vcombine.high %v3663_v39, %v3667_v1  ;;  %v14365_v13 = vcombine.low %v3663_v39, %v3667_v1 }
 0x5e1   :  { %v14355_v32 = vcombine.high %v3662_v42, %v3666_v7  ;;  %v14361_v40 = vcombine.low %v3662_v42, %v3666_v7 }
 0x5e2   :  { %7055 = vmatpush1.bf16.msra.mxu0 %v14325_v31  ;;  %18026 = vst [vmem:[#allocation377_spill] sm:$0xff] %v14358_v56  ;;  %v3675_v31 = vld [vmem:[#allocation20 + $0x238] sm:$0xff]  ;;  %18028 = vst [vmem:[#allocation379_spill] sm:$0xff] %v14365_v13 }
 0x5e3   :  { %7219 = vmatpush1.bf16.msra.mxu1 %v14329_v22  ;;  %7056 = vmatprep.subr.bf16.mxu0 %v14331_v47  ;;  %18025 = vst [vmem:[#allocation376_spill] sm:$0xff] %v14355_v32  ;;  %v3674_v47 = vld [vmem:[#allocation20 + $0x230] sm:$0xff]  ;;  %v3671_v22 = vld [vmem:[#allocation20 + $0x218] sm:$0xff]  ;;  %18027 = vst [vmem:[#allocation378_spill] sm:$0xff] %v14361_v40 }
 0x5e4   :  { %7220 = vmatprep.subr.bf16.mxu1 %v14334_v55  ;;  %v3670_v55 = vld [vmem:[#allocation20 + $0x210] sm:$0xff]  ;;  %v14370_v44 = vcombine.high %v3671_v22, %v3675_v31  ;;  %v14377_v1 = vcombine.low %v3671_v22, %v3675_v31 }
 0x5e5   :  { %v14367_v17 = vcombine.high %v3670_v55, %v3674_v47  ;;  %v14373_v7 = vcombine.low %v3670_v55, %v3674_v47 }
 0x5e6   :  { %7057 = vmatpush1.bf16.msra.mxu0 %v14337_v24  ;;  %18030 = vst [vmem:[#allocation381_spill] sm:$0xff] %v14370_v44  ;;  %v3683_v24 = vld [vmem:[#allocation20 + $0x278] sm:$0xff]  ;;  %18032 = vst [vmem:[#allocation383_spill] sm:$0xff] %v14377_v1 }
 0x5e7   :  { %7221 = vmatpush1.bf16.msra.mxu1 %v14341_v8  ;;  %7058 = vmatprep.subr.bf16.mxu0 %v14343_v49  ;;  %18029 = vst [vmem:[#allocation380_spill] sm:$0xff] %v14367_v17  ;;  %v3682_v49 = vld [vmem:[#allocation20 + $0x270] sm:$0xff]  ;;  %v3679_v8 = vld [vmem:[#allocation20 + $0x258] sm:$0xff]  ;;  %18031 = vst [vmem:[#allocation382_spill] sm:$0xff] %v14373_v7 }
 0x5e8   :  { %7222 = vmatprep.subr.bf16.mxu1 %v14346_v0  ;;  %v3678_v0 = vld [vmem:[#allocation20 + $0x250] sm:$0xff]  ;;  %v14382_v42 = vcombine.high %v3679_v8, %v3683_v24  ;;  %v14389_v31 = vcombine.low %v3679_v8, %v3683_v24 }
 0x5e9   :  { %v14379_v39 = vcombine.high %v3678_v0, %v3682_v49  ;;  %v14385_v47 = vcombine.low %v3678_v0, %v3682_v49 }
 0x5ea   :  { %7059 = vmatpush1.bf16.msra.mxu0 %v14349_v41  ;;  %18034 = vst [vmem:[#allocation385_spill] sm:$0xff] %v14382_v42  ;;  %v3691_v41 = vld [vmem:[#allocation20 + $0x2b8] sm:$0xff]  ;;  %18036 = vst [vmem:[#allocation387_spill] sm:$0xff] %v14389_v31 }
 0x5eb   :  { %7223 = vmatpush1.bf16.msra.mxu1 %v14353_v59  ;;  %7060 = vmatprep.subr.bf16.mxu0 %v14355_v32  ;;  %18033 = vst [vmem:[#allocation384_spill] sm:$0xff] %v14379_v39  ;;  %v3690_v32 = vld [vmem:[#allocation20 + $0x2b0] sm:$0xff]  ;;  %v3687_v59 = vld [vmem:[#allocation20 + $0x298] sm:$0xff]  ;;  %18035 = vst [vmem:[#allocation386_spill] sm:$0xff] %v14385_v47 }
 0x5ec   :  { %7224 = vmatprep.subr.bf16.mxu1 %v14358_v56  ;;  %v3686_v56 = vld [vmem:[#allocation20 + $0x290] sm:$0xff]  ;;  %v14394_v55 = vcombine.high %v3687_v59, %v3691_v41  ;;  %v14401_v24 = vcombine.low %v3687_v59, %v3691_v41 }
 0x5ed   :  { %v14391_v22 = vcombine.high %v3686_v56, %v3690_v32  ;;  %v14397_v49 = vcombine.low %v3686_v56, %v3690_v32 }
 0x5ee   :  { %7061 = vmatpush1.bf16.msra.mxu0 %v14361_v40  ;;  %18038 = vst [vmem:[#allocation389_spill] sm:$0xff] %v14394_v55  ;;  %v3699_v40 = vld [vmem:[#allocation20 + $0x2f8] sm:$0xff]  ;;  %18040 = vst [vmem:[#allocation391_spill] sm:$0xff] %v14401_v24 }
 0x5ef   :  { %7225 = vmatpush1.bf16.msra.mxu1 %v14365_v13  ;;  %7062 = vmatprep.subr.bf16.mxu0 %v14367_v17  ;;  %18037 = vst [vmem:[#allocation388_spill] sm:$0xff] %v14391_v22  ;;  %v3698_v17 = vld [vmem:[#allocation20 + $0x2f0] sm:$0xff]  ;;  %v3695_v13 = vld [vmem:[#allocation20 + $0x2d8] sm:$0xff]  ;;  %18039 = vst [vmem:[#allocation390_spill] sm:$0xff] %v14397_v49 }
 0x5f0   :  { %7226 = vmatprep.subr.bf16.mxu1 %v14370_v44  ;;  %v3694_v44 = vld [vmem:[#allocation20 + $0x2d0] sm:$0xff]  ;;  %v14406_v0 = vcombine.high %v3695_v13, %v3699_v40  ;;  %v14413_v41 = vcombine.low %v3695_v13, %v3699_v40 }
 0x5f1   :  { %v14403_v8 = vcombine.high %v3694_v44, %v3698_v17  ;;  %v14409_v32 = vcombine.low %v3694_v44, %v3698_v17 }
 0x5f2   :  { %7063 = vmatpush1.bf16.msra.mxu0 %v14373_v7  ;;  %18042 = vst [vmem:[#allocation393_spill] sm:$0xff] %v14406_v0  ;;  %v3707_v7 = vld [vmem:[#allocation20 + $0x338] sm:$0xff]  ;;  %18044 = vst [vmem:[#allocation395_spill] sm:$0xff] %v14413_v41 }
 0x5f3   :  { %7227 = vmatpush1.bf16.msra.mxu1 %v14377_v1  ;;  %7064 = vmatprep.subr.bf16.mxu0 %v14379_v39  ;;  %18041 = vst [vmem:[#allocation392_spill] sm:$0xff] %v14403_v8  ;;  %v3706_v39 = vld [vmem:[#allocation20 + $0x330] sm:$0xff]  ;;  %v3703_v1 = vld [vmem:[#allocation20 + $0x318] sm:$0xff]  ;;  %18043 = vst [vmem:[#allocation394_spill] sm:$0xff] %v14409_v32 }
 0x5f4   :  { %7228 = vmatprep.subr.bf16.mxu1 %v14382_v42  ;;  %v3702_v42 = vld [vmem:[#allocation20 + $0x310] sm:$0xff]  ;;  %v14418_v56 = vcombine.high %v3703_v1, %v3707_v7  ;;  %v14425_v40 = vcombine.low %v3703_v1, %v3707_v7 }
 0x5f5   :  { %v14415_v59 = vcombine.high %v3702_v42, %v3706_v39  ;;  %v14421_v17 = vcombine.low %v3702_v42, %v3706_v39 }
 0x5f6   :  { %7065 = vmatpush1.bf16.msra.mxu0 %v14385_v47  ;;  %18046 = vst [vmem:[#allocation397_spill] sm:$0xff] %v14418_v56  ;;  %v3715_v47 = vld [vmem:[#allocation20 + $0x378] sm:$0xff]  ;;  %18048 = vst [vmem:[#allocation399_spill] sm:$0xff] %v14425_v40 }
 0x5f7   :  { %7229 = vmatpush1.bf16.msra.mxu1 %v14389_v31  ;;  %7066 = vmatprep.subr.bf16.mxu0 %v14391_v22  ;;  %18045 = vst [vmem:[#allocation396_spill] sm:$0xff] %v14415_v59  ;;  %v3714_v22 = vld [vmem:[#allocation20 + $0x370] sm:$0xff]  ;;  %v3711_v31 = vld [vmem:[#allocation20 + $0x358] sm:$0xff]  ;;  %18047 = vst [vmem:[#allocation398_spill] sm:$0xff] %v14421_v17 }
 0x5f8   :  { %7230 = vmatprep.subr.bf16.mxu1 %v14394_v55  ;;  %v3710_v55 = vld [vmem:[#allocation20 + $0x350] sm:$0xff]  ;;  %v14430_v44 = vcombine.high %v3711_v31, %v3715_v47  ;;  %v14437_v7 = vcombine.low %v3711_v31, %v3715_v47 }
 0x5f9   :  { %v14427_v13 = vcombine.high %v3710_v55, %v3714_v22  ;;  %v14433_v39 = vcombine.low %v3710_v55, %v3714_v22 }
 0x5fa   :  { %7067 = vmatpush1.bf16.msra.mxu0 %v14397_v49  ;;  %18050 = vst [vmem:[#allocation401_spill] sm:$0xff] %v14430_v44  ;;  %v3723_v49 = vld [vmem:[#allocation20 + $0x3b8] sm:$0xff]  ;;  %18052 = vst [vmem:[#allocation403_spill] sm:$0xff] %v14437_v7 }
 0x5fb   :  { %7231 = vmatpush1.bf16.msra.mxu1 %v14401_v24  ;;  %7068 = vmatprep.subr.bf16.mxu0 %v14403_v8  ;;  %18049 = vst [vmem:[#allocation400_spill] sm:$0xff] %v14427_v13  ;;  %v3722_v8 = vld [vmem:[#allocation20 + $0x3b0] sm:$0xff]  ;;  %v3719_v24 = vld [vmem:[#allocation20 + $0x398] sm:$0xff]  ;;  %18051 = vst [vmem:[#allocation402_spill] sm:$0xff] %v14433_v39 }
 0x5fc   :  { %7232 = vmatprep.subr.bf16.mxu1 %v14406_v0  ;;  %v3718_v0 = vld [vmem:[#allocation20 + $0x390] sm:$0xff]  ;;  %v14442_v42 = vcombine.high %v3719_v24, %v3723_v49  ;;  %v14449_v47 = vcombine.low %v3719_v24, %v3723_v49 }
 0x5fd   :  { %v14439_v1 = vcombine.high %v3718_v0, %v3722_v8  ;;  %v14445_v22 = vcombine.low %v3718_v0, %v3722_v8 }
 0x5fe   :  { %7069 = vmatpush1.bf16.msra.mxu0 %v14409_v32  ;;  %18054 = vst [vmem:[#allocation405_spill] sm:$0xff] %v14442_v42  ;;  %v3731_v32 = vld [vmem:[#allocation20 + $0x3f8] sm:$0xff]  ;;  %18056 = vst [vmem:[#allocation407_spill] sm:$0xff] %v14449_v47 }
 0x5ff   :  { %7233 = vmatpush1.bf16.msra.mxu1 %v14413_v41  ;;  %7070 = vmatprep.subr.bf16.mxu0 %v14415_v59  ;;  %18053 = vst [vmem:[#allocation404_spill] sm:$0xff] %v14439_v1  ;;  %v3730_v59 = vld [vmem:[#allocation20 + $0x3f0] sm:$0xff]  ;;  %v3727_v41 = vld [vmem:[#allocation20 + $0x3d8] sm:$0xff]  ;;  %18055 = vst [vmem:[#allocation406_spill] sm:$0xff] %v14445_v22 }
 0x600   :  { %7234 = vmatprep.subr.bf16.mxu1 %v14418_v56  ;;  %v3726_v56 = vld [vmem:[#allocation20 + $0x3d0] sm:$0xff]  ;;  %v14454_v55 = vcombine.high %v3727_v41, %v3731_v32  ;;  %v14461_v49 = vcombine.low %v3727_v41, %v3731_v32 }
 0x601   :  { %v14451_v31 = vcombine.high %v3726_v56, %v3730_v59  ;;  %v14457_v8 = vcombine.low %v3726_v56, %v3730_v59  ;;  %v3743_v59 = vld [vmem:[#allocation20 + $0x458] sm:$0xff] }
 0x602   :  { %7071 = vmatpush1.bf16.msra.mxu0 %v14421_v17  ;;  %18058 = vst [vmem:[#allocation409_spill] sm:$0xff] %v14454_v55  ;;  %v3739_v17 = vld [vmem:[#allocation20 + $0x438] sm:$0xff]  ;;  %18060 = vst [vmem:[#allocation411_spill] sm:$0xff] %v14461_v49 }
 0x603   :  { %7235 = vmatpush1.bf16.msra.mxu1 %v14425_v40  ;;  %7072 = vmatprep.subr.bf16.mxu0 %v14427_v13  ;;  %18057 = vst [vmem:[#allocation408_spill] sm:$0xff] %v14451_v31  ;;  %v3738_v13 = vld [vmem:[#allocation20 + $0x430] sm:$0xff]  ;;  %v3735_v40 = vld [vmem:[#allocation20 + $0x418] sm:$0xff]  ;;  %18059 = vst [vmem:[#allocation410_spill] sm:$0xff] %v14457_v8 }
 0x604   :  { %7236 = vmatprep.subr.bf16.mxu1 %v14430_v44  ;;  %v3734_v44 = vld [vmem:[#allocation20 + $0x410] sm:$0xff]  ;;  %v14466_v0 = vcombine.high %v3735_v40, %v3739_v17  ;;  %v3747_v56 = vld [vmem:[#allocation20 + $0x478] sm:$0xff]  ;;  %v14473_v32 = vcombine.low %v3735_v40, %v3739_v17 }
 0x605   :  { %v14463_v24 = vcombine.high %v3734_v44, %v3738_v13  ;;  %v14487_v17 = vcombine.low %v3743_v59, %v3747_v56 }
 0x606   :  { %7073 = vmatpush1.bf16.msra.mxu0 %v14433_v39  ;;  %18062 = vst [vmem:[#allocation413_spill] sm:$0xff] %v14466_v0  ;;  %18064 = vst [vmem:[#allocation415_spill] sm:$0xff] %v14473_v32 }
 0x607   :  { %7237 = vmatpush1.bf16.msra.mxu1 %v14437_v7  ;;  %7074 = vmatprep.subr.bf16.mxu0 %v14439_v1  ;;  %18061 = vst [vmem:[#allocation412_spill] sm:$0xff] %v14463_v24  ;;  %v3746_v1 = vld [vmem:[#allocation20 + $0x470] sm:$0xff]  ;;  %v14469_v7 = vcombine.low %v3734_v44, %v3738_v13  ;;  %v3751_v13 = vld [vmem:[#allocation20 + $0x498] sm:$0xff]  ;;  %18068 = vst [vmem:[#allocation419_spill] sm:$0xff] %v14487_v17 }
 0x608   :  { %7238 = vmatprep.subr.bf16.mxu1 %v14442_v42  ;;  %v3742_v42 = vld [vmem:[#allocation20 + $0x450] sm:$0xff]  ;;  %v3755_v44 = vld [vmem:[#allocation20 + $0x4b8] sm:$0xff] }
 0x609   :  { %18063 = vst [vmem:[#allocation414_spill] sm:$0xff] %v14469_v7  ;;  %v14476_v41 = vcombine.high %v3742_v42, %v3746_v1 }
 0x60a   :  { %7075 = vmatpush1.bf16.msra.mxu0 %v14445_v22  ;;  %v4058_v22 = vld [vmem:[#allocation20 + $0xe30] sm:$0xff] }
 0x60b   :  { %7239 = vmatpush1.bf16.msra.mxu1 %v14449_v47  ;;  %7076 = vmatprep.subr.bf16.mxu0 %v14451_v31  ;;  %18065 = vst [vmem:[#allocation416_spill] sm:$0xff] %v14476_v41  ;;  %v3754_v31 = vld [vmem:[#allocation20 + $0x4b0] sm:$0xff]  ;;  %v14479_v47 = vcombine.high %v3743_v59, %v3747_v56  ;;  %v14501_v59 = vcombine.low %v3751_v13, %v3755_v44 }
 0x60c   :  { %7240 = vmatprep.subr.bf16.mxu1 %v14454_v55  ;;  %v3750_v55 = vld [vmem:[#allocation20 + $0x490] sm:$0xff] }
 0x60d   :  { %18066 = vst [vmem:[#allocation417_spill] sm:$0xff] %v14479_v47  ;;  %v14489_v40 = vcombine.high %v3750_v55, %v3754_v31  ;;  %18072 = vst [vmem:[#allocation423_spill] sm:$0xff] %v14501_v59 }
 0x60e   :  { %7077 = vmatpush1.bf16.msra.mxu0 %v14457_v8  ;;  %v3771_v8 = vld [vmem:[#allocation20 + $0x538] sm:$0xff] }
 0x60f   :  { %7241 = vmatpush1.bf16.msra.mxu1 %v14461_v49  ;;  %7087 = vmatprep.subr.bf16.mxu0 %v14463_v24  ;;  %v14483_v49 = vcombine.low %v3742_v42, %v3746_v1  ;;  %18069 = vst [vmem:[#allocation420_spill] sm:$0xff] %v14489_v40  ;;  %v3758_v24 = vld [vmem:[#allocation20 + $0x4d0] sm:$0xff]  ;;  %v3759_v1 = vld [vmem:[#allocation20 + $0x4d8] sm:$0xff] }
 0x610   :  { %7251 = vmatprep.subr.bf16.mxu1 %v14466_v0  ;;  %v14493_v0 = vcombine.high %v3751_v13, %v3755_v44  ;;  %v3763_v42 = vld [vmem:[#allocation20 + $0x4f8] sm:$0xff] }
 0x611   :  { %7079 = vmatmul.mubr.bf16.vlgmr.msra.gmra.mrb[32].mxu0 %v13626_v54  ;;  %18067 = vst [vmem:[#allocation418_spill] sm:$0xff] %v14483_v49  ;;  %v14506_v56 = vcombine.high %v3759_v1, %v3763_v42 }
 0x612   :  { %7243 = vmatmul.mubr.bf16.vlgmr.msra.gmra.mrb[32].mxu1 %v13626_v54  ;;  %7088 = vmatpush1.bf16.msra.mxu0 %v14469_v7  ;;  %18070 = vst [vmem:[#allocation421_spill] sm:$0xff] %v14493_v0  ;;  %v3762_v54 = vld [vmem:[#allocation20 + $0x4f0] sm:$0xff]  ;;  %v14497_v7 = vcombine.low %v3750_v55, %v3754_v31  ;;  %v14513_v55 = vcombine.low %v3759_v1, %v3763_v42 }
 0x613   :  { %7119 = vmatprep.mubr.bf16.mxu0 %v13634_v23  ;;  %7252 = vmatpush1.bf16.msra.mxu1 %v14473_v32  ;;  %18074 = vst [vmem:[#allocation425_spill] sm:$0xff] %v14506_v56  ;;  %v3767_v32 = vld [vmem:[#allocation20 + $0x518] sm:$0xff]  ;;  %v14509_v31 = vcombine.low %v3758_v24, %v3762_v54 }
 0x614   :  { %7283 = vmatprep.mubr.bf16.mxu1 %v13634_v23  ;;  %7089 = vmatprep.subr.bf16.mxu0 %v14476_v41  ;;  %18071 = vst [vmem:[#allocation422_spill] sm:$0xff] %v14497_v7  ;;  %v14503_v23 = vcombine.high %v3758_v24, %v3762_v54  ;;  %v3766_v41 = vld [vmem:[#allocation20 + $0x510] sm:$0xff]  ;;  %18076 = vst [vmem:[#allocation427_spill] sm:$0xff] %v14513_v55  ;;  %v14518_v44 = vcombine.high %v3767_v32, %v3771_v8 }
 0x615   :  { %7253 = vmatprep.subr.bf16.mxu1 %v14479_v47  ;;  %v3770_v47 = vld [vmem:[#allocation20 + $0x530] sm:$0xff]  ;;  %18075 = vst [vmem:[#allocation426_spill] sm:$0xff] %v14509_v31  ;;  %v14525_v54 = vcombine.low %v3767_v32, %v3771_v8 }
 0x616   :  { %7090 = vmatpush1.bf16.msra.mxu0 %v14483_v49  ;;  %18073 = vst [vmem:[#allocation424_spill] sm:$0xff] %v14503_v23  ;;  %v14515_v13 = vcombine.high %v3766_v41, %v3770_v47  ;;  %18078 = vst [vmem:[#allocation429_spill] sm:$0xff] %v14518_v44  ;;  %v3779_v49 = vld [vmem:[#allocation20 + $0x578] sm:$0xff]  ;;  %v14521_v24 = vcombine.low %v3766_v41, %v3770_v47 }
 0x617   :  { %7254 = vmatpush1.bf16.msra.mxu1 %v14487_v17  ;;  %7091 = vmatprep.subr.bf16.mxu0 %v14489_v40  ;;  %v3778_v40 = vld [vmem:[#allocation20 + $0x570] sm:$0xff]  ;;  %v3775_v17 = vld [vmem:[#allocation20 + $0x558] sm:$0xff]  ;;  %18080 = vst [vmem:[#allocation431_spill] sm:$0xff] %v14525_v54 }
 0x618   :  { %7255 = vmatprep.subr.bf16.mxu1 %v14493_v0  ;;  %18077 = vst [vmem:[#allocation428_spill] sm:$0xff] %v14515_v13  ;;  %v3774_v0 = vld [vmem:[#allocation20 + $0x550] sm:$0xff]  ;;  %18079 = vst [vmem:[#allocation430_spill] sm:$0xff] %v14521_v24  ;;  %v14530_v42 = vcombine.high %v3775_v17, %v3779_v49  ;;  %v14537_v8 = vcombine.low %v3775_v17, %v3779_v49 }
 0x619   :  { %v14527_v1 = vcombine.high %v3774_v0, %v3778_v40  ;;  %v14533_v47 = vcombine.low %v3774_v0, %v3778_v40 }
 0x61a   :  { %7092 = vmatpush1.bf16.msra.mxu0 %v14497_v7  ;;  %18082 = vst [vmem:[#allocation433_spill] sm:$0xff] %v14530_v42  ;;  %v3787_v7 = vld [vmem:[#allocation20 + $0x5b8] sm:$0xff]  ;;  %18084 = vst [vmem:[#allocation435_spill] sm:$0xff] %v14537_v8 }
 0x61b   :  { %7256 = vmatpush1.bf16.msra.mxu1 %v14501_v59  ;;  %7093 = vmatprep.subr.bf16.mxu0 %v14503_v23  ;;  %18081 = vst [vmem:[#allocation432_spill] sm:$0xff] %v14527_v1  ;;  %v3786_v23 = vld [vmem:[#allocation20 + $0x5b0] sm:$0xff]  ;;  %v3783_v59 = vld [vmem:[#allocation20 + $0x598] sm:$0xff]  ;;  %18083 = vst [vmem:[#allocation434_spill] sm:$0xff] %v14533_v47 }
 0x61c   :  { %7257 = vmatprep.subr.bf16.mxu1 %v14506_v56  ;;  %v3782_v56 = vld [vmem:[#allocation20 + $0x590] sm:$0xff]  ;;  %v14542_v41 = vcombine.high %v3783_v59, %v3787_v7  ;;  %v14549_v49 = vcombine.low %v3783_v59, %v3787_v7 }
 0x61d   :  { %v14539_v32 = vcombine.high %v3782_v56, %v3786_v23  ;;  %v14545_v0 = vcombine.low %v3782_v56, %v3786_v23 }
 0x61e   :  { %7094 = vmatpush1.bf16.msra.mxu0 %v14509_v31  ;;  %18086 = vst [vmem:[#allocation437_spill] sm:$0xff] %v14542_v41  ;;  %v3795_v31 = vld [vmem:[#allocation20 + $0x5f8] sm:$0xff]  ;;  %18088 = vst [vmem:[#allocation439_spill] sm:$0xff] %v14549_v49 }
 0x61f   :  { %7258 = vmatpush1.bf16.msra.mxu1 %v14513_v55  ;;  %7095 = vmatprep.subr.bf16.mxu0 %v14515_v13  ;;  %18085 = vst [vmem:[#allocation436_spill] sm:$0xff] %v14539_v32  ;;  %v3794_v13 = vld [vmem:[#allocation20 + $0x5f0] sm:$0xff]  ;;  %v3791_v55 = vld [vmem:[#allocation20 + $0x5d8] sm:$0xff]  ;;  %18087 = vst [vmem:[#allocation438_spill] sm:$0xff] %v14545_v0 }
 0x620   :  { %7259 = vmatprep.subr.bf16.mxu1 %v14518_v44  ;;  %v3790_v44 = vld [vmem:[#allocation20 + $0x5d0] sm:$0xff]  ;;  %v14554_v40 = vcombine.high %v3791_v55, %v3795_v31  ;;  %v14561_v7 = vcombine.low %v3791_v55, %v3795_v31 }
 0x621   :  { %v14551_v17 = vcombine.high %v3790_v44, %v3794_v13  ;;  %v14557_v23 = vcombine.low %v3790_v44, %v3794_v13 }
 0x622   :  { %7096 = vmatpush1.bf16.msra.mxu0 %v14521_v24  ;;  %18090 = vst [vmem:[#allocation441_spill] sm:$0xff] %v14554_v40  ;;  %v3803_v24 = vld [vmem:[#allocation20 + $0x638] sm:$0xff]  ;;  %18092 = vst [vmem:[#allocation443_spill] sm:$0xff] %v14561_v7 }
 0x623   :  { %7260 = vmatpush1.bf16.msra.mxu1 %v14525_v54  ;;  %7097 = vmatprep.subr.bf16.mxu0 %v14527_v1  ;;  %18089 = vst [vmem:[#allocation440_spill] sm:$0xff] %v14551_v17  ;;  %v3802_v1 = vld [vmem:[#allocation20 + $0x630] sm:$0xff]  ;;  %v3799_v54 = vld [vmem:[#allocation20 + $0x618] sm:$0xff]  ;;  %18091 = vst [vmem:[#allocation442_spill] sm:$0xff] %v14557_v23 }
 0x624   :  { %7261 = vmatprep.subr.bf16.mxu1 %v14530_v42  ;;  %v3798_v42 = vld [vmem:[#allocation20 + $0x610] sm:$0xff]  ;;  %v14566_v56 = vcombine.high %v3799_v54, %v3803_v24  ;;  %v14573_v31 = vcombine.low %v3799_v54, %v3803_v24 }
 0x625   :  { %v14563_v59 = vcombine.high %v3798_v42, %v3802_v1  ;;  %v14569_v13 = vcombine.low %v3798_v42, %v3802_v1 }
 0x626   :  { %7098 = vmatpush1.bf16.msra.mxu0 %v14533_v47  ;;  %18094 = vst [vmem:[#allocation445_spill] sm:$0xff] %v14566_v56  ;;  %v3811_v47 = vld [vmem:[#allocation20 + $0x678] sm:$0xff]  ;;  %18096 = vst [vmem:[#allocation447_spill] sm:$0xff] %v14573_v31 }
 0x627   :  { %7262 = vmatpush1.bf16.msra.mxu1 %v14537_v8  ;;  %7099 = vmatprep.subr.bf16.mxu0 %v14539_v32  ;;  %18093 = vst [vmem:[#allocation444_spill] sm:$0xff] %v14563_v59  ;;  %v3810_v32 = vld [vmem:[#allocation20 + $0x670] sm:$0xff]  ;;  %v3807_v8 = vld [vmem:[#allocation20 + $0x658] sm:$0xff]  ;;  %18095 = vst [vmem:[#allocation446_spill] sm:$0xff] %v14569_v13 }
 0x628   :  { %7263 = vmatprep.subr.bf16.mxu1 %v14542_v41  ;;  %v3806_v41 = vld [vmem:[#allocation20 + $0x650] sm:$0xff]  ;;  %v14578_v44 = vcombine.high %v3807_v8, %v3811_v47  ;;  %v14585_v24 = vcombine.low %v3807_v8, %v3811_v47 }
 0x629   :  { %v14575_v55 = vcombine.high %v3806_v41, %v3810_v32  ;;  %v14581_v1 = vcombine.low %v3806_v41, %v3810_v32 }
 0x62a   :  { %7100 = vmatpush1.bf16.msra.mxu0 %v14545_v0  ;;  %18098 = vst [vmem:[#allocation449_spill] sm:$0xff] %v14578_v44  ;;  %v3819_v0 = vld [vmem:[#allocation20 + $0x6b8] sm:$0xff]  ;;  %18100 = vst [vmem:[#allocation451_spill] sm:$0xff] %v14585_v24 }
 0x62b   :  { %7264 = vmatpush1.bf16.msra.mxu1 %v14549_v49  ;;  %7101 = vmatprep.subr.bf16.mxu0 %v14551_v17  ;;  %18097 = vst [vmem:[#allocation448_spill] sm:$0xff] %v14575_v55  ;;  %v3818_v17 = vld [vmem:[#allocation20 + $0x6b0] sm:$0xff]  ;;  %v3815_v49 = vld [vmem:[#allocation20 + $0x698] sm:$0xff]  ;;  %18099 = vst [vmem:[#allocation450_spill] sm:$0xff] %v14581_v1 }
 0x62c   :  { %7265 = vmatprep.subr.bf16.mxu1 %v14554_v40  ;;  %v3814_v40 = vld [vmem:[#allocation20 + $0x690] sm:$0xff]  ;;  %v14590_v42 = vcombine.high %v3815_v49, %v3819_v0  ;;  %v14597_v47 = vcombine.low %v3815_v49, %v3819_v0 }
 0x62d   :  { %v14587_v54 = vcombine.high %v3814_v40, %v3818_v17  ;;  %v14593_v32 = vcombine.low %v3814_v40, %v3818_v17 }
 0x62e   :  { %7102 = vmatpush1.bf16.msra.mxu0 %v14557_v23  ;;  %18102 = vst [vmem:[#allocation453_spill] sm:$0xff] %v14590_v42  ;;  %v3827_v23 = vld [vmem:[#allocation20 + $0x6f8] sm:$0xff]  ;;  %18104 = vst [vmem:[#allocation455_spill] sm:$0xff] %v14597_v47 }
 0x62f   :  { %7266 = vmatpush1.bf16.msra.mxu1 %v14561_v7  ;;  %7103 = vmatprep.subr.bf16.mxu0 %v14563_v59  ;;  %18101 = vst [vmem:[#allocation452_spill] sm:$0xff] %v14587_v54  ;;  %v3826_v59 = vld [vmem:[#allocation20 + $0x6f0] sm:$0xff]  ;;  %v3823_v7 = vld [vmem:[#allocation20 + $0x6d8] sm:$0xff]  ;;  %18103 = vst [vmem:[#allocation454_spill] sm:$0xff] %v14593_v32 }
 0x630   :  { %7267 = vmatprep.subr.bf16.mxu1 %v14566_v56  ;;  %v3822_v56 = vld [vmem:[#allocation20 + $0x6d0] sm:$0xff]  ;;  %v14602_v41 = vcombine.high %v3823_v7, %v3827_v23  ;;  %v14609_v0 = vcombine.low %v3823_v7, %v3827_v23 }
 0x631   :  { %v14599_v8 = vcombine.high %v3822_v56, %v3826_v59  ;;  %v14605_v17 = vcombine.low %v3822_v56, %v3826_v59 }
 0x632   :  { %7104 = vmatpush1.bf16.msra.mxu0 %v14569_v13  ;;  %18106 = vst [vmem:[#allocation457_spill] sm:$0xff] %v14602_v41  ;;  %v3835_v13 = vld [vmem:[#allocation20 + $0x738] sm:$0xff]  ;;  %18108 = vst [vmem:[#allocation459_spill] sm:$0xff] %v14609_v0 }
 0x633   :  { %7268 = vmatpush1.bf16.msra.mxu1 %v14573_v31  ;;  %7105 = vmatprep.subr.bf16.mxu0 %v14575_v55  ;;  %18105 = vst [vmem:[#allocation456_spill] sm:$0xff] %v14599_v8  ;;  %v3834_v55 = vld [vmem:[#allocation20 + $0x730] sm:$0xff]  ;;  %v3831_v31 = vld [vmem:[#allocation20 + $0x718] sm:$0xff]  ;;  %18107 = vst [vmem:[#allocation458_spill] sm:$0xff] %v14605_v17 }
 0x634   :  { %7269 = vmatprep.subr.bf16.mxu1 %v14578_v44  ;;  %v3830_v44 = vld [vmem:[#allocation20 + $0x710] sm:$0xff]  ;;  %v14614_v40 = vcombine.high %v3831_v31, %v3835_v13  ;;  %v14621_v23 = vcombine.low %v3831_v31, %v3835_v13 }
 0x635   :  { %v14611_v49 = vcombine.high %v3830_v44, %v3834_v55  ;;  %v14617_v59 = vcombine.low %v3830_v44, %v3834_v55 }
 0x636   :  { %7106 = vmatpush1.bf16.msra.mxu0 %v14581_v1  ;;  %18110 = vst [vmem:[#allocation461_spill] sm:$0xff] %v14614_v40  ;;  %v3843_v1 = vld [vmem:[#allocation20 + $0x778] sm:$0xff]  ;;  %18112 = vst [vmem:[#allocation463_spill] sm:$0xff] %v14621_v23 }
 0x637   :  { %7270 = vmatpush1.bf16.msra.mxu1 %v14585_v24  ;;  %7107 = vmatprep.subr.bf16.mxu0 %v14587_v54  ;;  %18109 = vst [vmem:[#allocation460_spill] sm:$0xff] %v14611_v49  ;;  %v3842_v54 = vld [vmem:[#allocation20 + $0x770] sm:$0xff]  ;;  %v3839_v24 = vld [vmem:[#allocation20 + $0x758] sm:$0xff]  ;;  %18111 = vst [vmem:[#allocation462_spill] sm:$0xff] %v14617_v59 }
 0x638   :  { %7271 = vmatprep.subr.bf16.mxu1 %v14590_v42  ;;  %v3838_v42 = vld [vmem:[#allocation20 + $0x750] sm:$0xff]  ;;  %v14626_v56 = vcombine.high %v3839_v24, %v3843_v1  ;;  %v14633_v13 = vcombine.low %v3839_v24, %v3843_v1 }
 0x639   :  { %v14623_v7 = vcombine.high %v3838_v42, %v3842_v54  ;;  %v14629_v55 = vcombine.low %v3838_v42, %v3842_v54 }
 0x63a   :  { %7108 = vmatpush1.bf16.msra.mxu0 %v14593_v32  ;;  %18114 = vst [vmem:[#allocation465_spill] sm:$0xff] %v14626_v56  ;;  %v3851_v32 = vld [vmem:[#allocation20 + $0x7b8] sm:$0xff]  ;;  %18116 = vst [vmem:[#allocation467_spill] sm:$0xff] %v14633_v13 }
 0x63b   :  { %7272 = vmatpush1.bf16.msra.mxu1 %v14597_v47  ;;  %7109 = vmatprep.subr.bf16.mxu0 %v14599_v8  ;;  %18113 = vst [vmem:[#allocation464_spill] sm:$0xff] %v14623_v7  ;;  %v3850_v8 = vld [vmem:[#allocation20 + $0x7b0] sm:$0xff]  ;;  %v3847_v47 = vld [vmem:[#allocation20 + $0x798] sm:$0xff]  ;;  %18115 = vst [vmem:[#allocation466_spill] sm:$0xff] %v14629_v55 }
 0x63c   :  { %7273 = vmatprep.subr.bf16.mxu1 %v14602_v41  ;;  %v3846_v41 = vld [vmem:[#allocation20 + $0x790] sm:$0xff]  ;;  %v14638_v44 = vcombine.high %v3847_v47, %v3851_v32  ;;  %v14645_v1 = vcombine.low %v3847_v47, %v3851_v32 }
 0x63d   :  { %v14635_v31 = vcombine.high %v3846_v41, %v3850_v8  ;;  %v14641_v54 = vcombine.low %v3846_v41, %v3850_v8 }
 0x63e   :  { %7110 = vmatpush1.bf16.msra.mxu0 %v14605_v17  ;;  %18118 = vst [vmem:[#allocation469_spill] sm:$0xff] %v14638_v44  ;;  %v3859_v17 = vld [vmem:[#allocation20 + $0x7f8] sm:$0xff]  ;;  %18120 = vst [vmem:[#allocation471_spill] sm:$0xff] %v14645_v1 }
 0x63f   :  { %7274 = vmatpush1.bf16.msra.mxu1 %v14609_v0  ;;  %7111 = vmatprep.subr.bf16.mxu0 %v14611_v49  ;;  %18117 = vst [vmem:[#allocation468_spill] sm:$0xff] %v14635_v31  ;;  %v3858_v49 = vld [vmem:[#allocation20 + $0x7f0] sm:$0xff]  ;;  %v3855_v0 = vld [vmem:[#allocation20 + $0x7d8] sm:$0xff]  ;;  %18119 = vst [vmem:[#allocation470_spill] sm:$0xff] %v14641_v54 }
 0x640   :  { %7275 = vmatprep.subr.bf16.mxu1 %v14614_v40  ;;  %v3854_v40 = vld [vmem:[#allocation20 + $0x7d0] sm:$0xff]  ;;  %v14650_v42 = vcombine.high %v3855_v0, %v3859_v17  ;;  %v14657_v32 = vcombine.low %v3855_v0, %v3859_v17 }
 0x641   :  { %v14647_v24 = vcombine.high %v3854_v40, %v3858_v49  ;;  %v14653_v8 = vcombine.low %v3854_v40, %v3858_v49  ;;  %v3871_v49 = vld [vmem:[#allocation20 + $0x858] sm:$0xff] }
 0x642   :  { %7112 = vmatpush1.bf16.msra.mxu0 %v14617_v59  ;;  %18122 = vst [vmem:[#allocation473_spill] sm:$0xff] %v14650_v42  ;;  %v3867_v59 = vld [vmem:[#allocation20 + $0x838] sm:$0xff]  ;;  %18124 = vst [vmem:[#allocation475_spill] sm:$0xff] %v14657_v32 }
 0x643   :  { %7276 = vmatpush1.bf16.msra.mxu1 %v14621_v23  ;;  %7113 = vmatprep.subr.bf16.mxu0 %v14623_v7  ;;  %18121 = vst [vmem:[#allocation472_spill] sm:$0xff] %v14647_v24  ;;  %v3866_v7 = vld [vmem:[#allocation20 + $0x830] sm:$0xff]  ;;  %v3863_v23 = vld [vmem:[#allocation20 + $0x818] sm:$0xff]  ;;  %18123 = vst [vmem:[#allocation474_spill] sm:$0xff] %v14653_v8 }
 0x644   :  { %7277 = vmatprep.subr.bf16.mxu1 %v14626_v56  ;;  %v3862_v56 = vld [vmem:[#allocation20 + $0x810] sm:$0xff]  ;;  %v14662_v41 = vcombine.high %v3863_v23, %v3867_v59  ;;  %v3875_v40 = vld [vmem:[#allocation20 + $0x878] sm:$0xff]  ;;  %v14669_v17 = vcombine.low %v3863_v23, %v3867_v59 }
 0x645   :  { %v14659_v47 = vcombine.high %v3862_v56, %v3866_v7  ;;  %v14683_v59 = vcombine.low %v3871_v49, %v3875_v40 }
 0x646   :  { %7114 = vmatpush1.bf16.msra.mxu0 %v14629_v55  ;;  %18126 = vst [vmem:[#allocation477_spill] sm:$0xff] %v14662_v41  ;;  %18128 = vst [vmem:[#allocation479_spill] sm:$0xff] %v14669_v17 }
 0x647   :  { %7278 = vmatpush1.bf16.msra.mxu1 %v14633_v13  ;;  %7115 = vmatprep.subr.bf16.mxu0 %v14635_v31  ;;  %18125 = vst [vmem:[#allocation476_spill] sm:$0xff] %v14659_v47  ;;  %v3874_v31 = vld [vmem:[#allocation20 + $0x870] sm:$0xff]  ;;  %v14665_v13 = vcombine.low %v3862_v56, %v3866_v7  ;;  %v3879_v7 = vld [vmem:[#allocation20 + $0x898] sm:$0xff]  ;;  %18132 = vst [vmem:[#allocation483_spill] sm:$0xff] %v14683_v59 }
 0x648   :  { %7279 = vmatprep.subr.bf16.mxu1 %v14638_v44  ;;  %v3870_v44 = vld [vmem:[#allocation20 + $0x850] sm:$0xff]  ;;  %v3883_v56 = vld [vmem:[#allocation20 + $0x8b8] sm:$0xff] }
 0x649   :  { %18127 = vst [vmem:[#allocation478_spill] sm:$0xff] %v14665_v13  ;;  %v14672_v0 = vcombine.high %v3870_v44, %v3874_v31 }
 0x64a   :  { %7116 = vmatpush1.bf16.msra.mxu0 %v14641_v54 }
 0x64b   :  { %7280 = vmatpush1.bf16.msra.mxu1 %v14645_v1  ;;  %7117 = vmatprep.subr.bf16.mxu0 %v14647_v24  ;;  %18129 = vst [vmem:[#allocation480_spill] sm:$0xff] %v14672_v0  ;;  %v3882_v24 = vld [vmem:[#allocation20 + $0x8b0] sm:$0xff]  ;;  %v14675_v1 = vcombine.high %v3871_v49, %v3875_v40  ;;  %v14697_v49 = vcombine.low %v3879_v7, %v3883_v56 }
 0x64c   :  { %7281 = vmatprep.subr.bf16.mxu1 %v14650_v42  ;;  %v3878_v42 = vld [vmem:[#allocation20 + $0x890] sm:$0xff] }
 0x64d   :  { %18130 = vst [vmem:[#allocation481_spill] sm:$0xff] %v14675_v1  ;;  %v14685_v23 = vcombine.high %v3878_v42, %v3882_v24  ;;  %18136 = vst [vmem:[#allocation487_spill] sm:$0xff] %v14697_v49 }
 0x64e   :  { %7118 = vmatpush1.bf16.msra.mxu0 %v14653_v8  ;;  %v3899_v8 = vld [vmem:[#allocation20 + $0x938] sm:$0xff] }
 0x64f   :  { %7282 = vmatpush1.bf16.msra.mxu1 %v14657_v32  ;;  %7128 = vmatprep.subr.bf16.mxu0 %v14659_v47  ;;  %v14679_v32 = vcombine.low %v3870_v44, %v3874_v31  ;;  %18133 = vst [vmem:[#allocation484_spill] sm:$0xff] %v14685_v23  ;;  %v3886_v47 = vld [vmem:[#allocation20 + $0x8d0] sm:$0xff]  ;;  %v3887_v31 = vld [vmem:[#allocation20 + $0x8d8] sm:$0xff] }
 0x650   :  { %7292 = vmatprep.subr.bf16.mxu1 %v14662_v41  ;;  %v14689_v41 = vcombine.high %v3879_v7, %v3883_v56  ;;  %v3891_v44 = vld [vmem:[#allocation20 + $0x8f8] sm:$0xff] }
 0x651   :  { %7120 = vmatmul.mubr.bf16.vlgmr.msra.gmra.mrb[32].mxu0 %v13848_v57  ;;  %18131 = vst [vmem:[#allocation482_spill] sm:$0xff] %v14679_v32  ;;  %v14702_v40 = vcombine.high %v3887_v31, %v3891_v44 }
 0x652   :  { %7284 = vmatmul.mubr.bf16.vlgmr.msra.gmra.mrb[32].mxu1 %v13848_v57  ;;  %7129 = vmatpush1.bf16.msra.mxu0 %v14665_v13  ;;  %18134 = vst [vmem:[#allocation485_spill] sm:$0xff] %v14689_v41  ;;  %v3890_v57 = vld [vmem:[#allocation20 + $0x8f0] sm:$0xff]  ;;  %v14693_v13 = vcombine.low %v3878_v42, %v3882_v24  ;;  %v14709_v42 = vcombine.low %v3887_v31, %v3891_v44 }
 0x653   :  { %7160 = vmatprep.mubr.bf16.mxu0 %v13854_v34  ;;  %7293 = vmatpush1.bf16.msra.mxu1 %v14669_v17  ;;  %18138 = vst [vmem:[#allocation489_spill] sm:$0xff] %v14702_v40  ;;  %v3895_v17 = vld [vmem:[#allocation20 + $0x918] sm:$0xff]  ;;  %v14705_v24 = vcombine.low %v3886_v47, %v3890_v57 }
 0x654   :  { %7324 = vmatprep.mubr.bf16.mxu1 %v13854_v34  ;;  %7130 = vmatprep.subr.bf16.mxu0 %v14672_v0  ;;  %18135 = vst [vmem:[#allocation486_spill] sm:$0xff] %v14693_v13  ;;  %v14699_v34 = vcombine.high %v3886_v47, %v3890_v57  ;;  %v3894_v0 = vld [vmem:[#allocation20 + $0x910] sm:$0xff]  ;;  %18140 = vst [vmem:[#allocation491_spill] sm:$0xff] %v14709_v42  ;;  %v14714_v56 = vcombine.high %v3895_v17, %v3899_v8 }
 0x655   :  { %7294 = vmatprep.subr.bf16.mxu1 %v14675_v1  ;;  %v3898_v1 = vld [vmem:[#allocation20 + $0x930] sm:$0xff]  ;;  %18139 = vst [vmem:[#allocation490_spill] sm:$0xff] %v14705_v24  ;;  %v14721_v57 = vcombine.low %v3895_v17, %v3899_v8 }
 0x656   :  { %7131 = vmatpush1.bf16.msra.mxu0 %v14679_v32  ;;  %18137 = vst [vmem:[#allocation488_spill] sm:$0xff] %v14699_v34  ;;  %v14711_v7 = vcombine.high %v3894_v0, %v3898_v1  ;;  %18142 = vst [vmem:[#allocation493_spill] sm:$0xff] %v14714_v56  ;;  %v3907_v32 = vld [vmem:[#allocation20 + $0x978] sm:$0xff]  ;;  %v14717_v47 = vcombine.low %v3894_v0, %v3898_v1 }
 0x657   :  { %7295 = vmatpush1.bf16.msra.mxu1 %v14683_v59  ;;  %7132 = vmatprep.subr.bf16.mxu0 %v14685_v23  ;;  %v3906_v23 = vld [vmem:[#allocation20 + $0x970] sm:$0xff]  ;;  %v3903_v59 = vld [vmem:[#allocation20 + $0x958] sm:$0xff]  ;;  %18144 = vst [vmem:[#allocation495_spill] sm:$0xff] %v14721_v57 }
 0x658   :  { %7296 = vmatprep.subr.bf16.mxu1 %v14689_v41  ;;  %18141 = vst [vmem:[#allocation492_spill] sm:$0xff] %v14711_v7  ;;  %v3902_v41 = vld [vmem:[#allocation20 + $0x950] sm:$0xff]  ;;  %18143 = vst [vmem:[#allocation494_spill] sm:$0xff] %v14717_v47  ;;  %v14726_v44 = vcombine.high %v3903_v59, %v3907_v32  ;;  %v14733_v8 = vcombine.low %v3903_v59, %v3907_v32 }
 0x659   :  { %v14723_v31 = vcombine.high %v3902_v41, %v3906_v23  ;;  %v14729_v1 = vcombine.low %v3902_v41, %v3906_v23 }
 0x65a   :  { %7133 = vmatpush1.bf16.msra.mxu0 %v14693_v13  ;;  %18146 = vst [vmem:[#allocation497_spill] sm:$0xff] %v14726_v44  ;;  %v3915_v13 = vld [vmem:[#allocation20 + $0x9b8] sm:$0xff]  ;;  %18148 = vst [vmem:[#allocation499_spill] sm:$0xff] %v14733_v8 }
 0x65b   :  { %7297 = vmatpush1.bf16.msra.mxu1 %v14697_v49  ;;  %7134 = vmatprep.subr.bf16.mxu0 %v14699_v34  ;;  %18145 = vst [vmem:[#allocation496_spill] sm:$0xff] %v14723_v31  ;;  %v3914_v34 = vld [vmem:[#allocation20 + $0x9b0] sm:$0xff]  ;;  %v3911_v49 = vld [vmem:[#allocation20 + $0x998] sm:$0xff]  ;;  %18147 = vst [vmem:[#allocation498_spill] sm:$0xff] %v14729_v1 }
 0x65c   :  { %7298 = vmatprep.subr.bf16.mxu1 %v14702_v40  ;;  %v3910_v40 = vld [vmem:[#allocation20 + $0x990] sm:$0xff]  ;;  %v14738_v0 = vcombine.high %v3911_v49, %v3915_v13  ;;  %v14745_v32 = vcombine.low %v3911_v49, %v3915_v13 }
 0x65d   :  { %v14735_v17 = vcombine.high %v3910_v40, %v3914_v34  ;;  %v14741_v41 = vcombine.low %v3910_v40, %v3914_v34 }
 0x65e   :  { %7135 = vmatpush1.bf16.msra.mxu0 %v14705_v24  ;;  %18150 = vst [vmem:[#allocation501_spill] sm:$0xff] %v14738_v0  ;;  %v3923_v24 = vld [vmem:[#allocation20 + $0x9f8] sm:$0xff]  ;;  %18152 = vst [vmem:[#allocation503_spill] sm:$0xff] %v14745_v32 }
 0x65f   :  { %7299 = vmatpush1.bf16.msra.mxu1 %v14709_v42  ;;  %7136 = vmatprep.subr.bf16.mxu0 %v14711_v7  ;;  %18149 = vst [vmem:[#allocation500_spill] sm:$0xff] %v14735_v17  ;;  %v3922_v7 = vld [vmem:[#allocation20 + $0x9f0] sm:$0xff]  ;;  %v3919_v42 = vld [vmem:[#allocation20 + $0x9d8] sm:$0xff]  ;;  %18151 = vst [vmem:[#allocation502_spill] sm:$0xff] %v14741_v41 }
 0x660   :  { %7300 = vmatprep.subr.bf16.mxu1 %v14714_v56  ;;  %v3918_v56 = vld [vmem:[#allocation20 + $0x9d0] sm:$0xff]  ;;  %v14750_v23 = vcombine.high %v3919_v42, %v3923_v24  ;;  %v14757_v13 = vcombine.low %v3919_v42, %v3923_v24 }
 0x661   :  { %v14747_v59 = vcombine.high %v3918_v56, %v3922_v7  ;;  %v14753_v34 = vcombine.low %v3918_v56, %v3922_v7 }
 0x662   :  { %7137 = vmatpush1.bf16.msra.mxu0 %v14717_v47  ;;  %18154 = vst [vmem:[#allocation505_spill] sm:$0xff] %v14750_v23  ;;  %v3931_v47 = vld [vmem:[#allocation20 + $0xa38] sm:$0xff]  ;;  %18156 = vst [vmem:[#allocation507_spill] sm:$0xff] %v14757_v13 }
 0x663   :  { %7301 = vmatpush1.bf16.msra.mxu1 %v14721_v57  ;;  %7138 = vmatprep.subr.bf16.mxu0 %v14723_v31  ;;  %18153 = vst [vmem:[#allocation504_spill] sm:$0xff] %v14747_v59  ;;  %v3930_v31 = vld [vmem:[#allocation20 + $0xa30] sm:$0xff]  ;;  %v3927_v57 = vld [vmem:[#allocation20 + $0xa18] sm:$0xff]  ;;  %18155 = vst [vmem:[#allocation506_spill] sm:$0xff] %v14753_v34 }
 0x664   :  { %7302 = vmatprep.subr.bf16.mxu1 %v14726_v44  ;;  %v3926_v44 = vld [vmem:[#allocation20 + $0xa10] sm:$0xff]  ;;  %v14762_v40 = vcombine.high %v3927_v57, %v3931_v47  ;;  %v14769_v24 = vcombine.low %v3927_v57, %v3931_v47 }
 0x665   :  { %v14759_v49 = vcombine.high %v3926_v44, %v3930_v31  ;;  %v14765_v7 = vcombine.low %v3926_v44, %v3930_v31 }
 0x666   :  { %7139 = vmatpush1.bf16.msra.mxu0 %v14729_v1  ;;  %18158 = vst [vmem:[#allocation509_spill] sm:$0xff] %v14762_v40  ;;  %v3939_v1 = vld [vmem:[#allocation20 + $0xa78] sm:$0xff]  ;;  %18160 = vst [vmem:[#allocation511_spill] sm:$0xff] %v14769_v24 }
 0x667   :  { %7303 = vmatpush1.bf16.msra.mxu1 %v14733_v8  ;;  %7140 = vmatprep.subr.bf16.mxu0 %v14735_v17  ;;  %18157 = vst [vmem:[#allocation508_spill] sm:$0xff] %v14759_v49  ;;  %v3938_v17 = vld [vmem:[#allocation20 + $0xa70] sm:$0xff]  ;;  %v3935_v8 = vld [vmem:[#allocation20 + $0xa58] sm:$0xff]  ;;  %18159 = vst [vmem:[#allocation510_spill] sm:$0xff] %v14765_v7 }
 0x668   :  { %7304 = vmatprep.subr.bf16.mxu1 %v14738_v0  ;;  %v3934_v0 = vld [vmem:[#allocation20 + $0xa50] sm:$0xff]  ;;  %v14774_v56 = vcombine.high %v3935_v8, %v3939_v1  ;;  %v14781_v47 = vcombine.low %v3935_v8, %v3939_v1 }
 0x669   :  { %v14771_v42 = vcombine.high %v3934_v0, %v3938_v17  ;;  %v14777_v31 = vcombine.low %v3934_v0, %v3938_v17 }
 0x66a   :  { %7141 = vmatpush1.bf16.msra.mxu0 %v14741_v41  ;;  %18162 = vst [vmem:[#allocation513_spill] sm:$0xff] %v14774_v56  ;;  %v3947_v41 = vld [vmem:[#allocation20 + $0xab8] sm:$0xff]  ;;  %18164 = vst [vmem:[#allocation515_spill] sm:$0xff] %v14781_v47 }
 0x66b   :  { %7305 = vmatpush1.bf16.msra.mxu1 %v14745_v32  ;;  %7142 = vmatprep.subr.bf16.mxu0 %v14747_v59  ;;  %18161 = vst [vmem:[#allocation512_spill] sm:$0xff] %v14771_v42  ;;  %v3946_v59 = vld [vmem:[#allocation20 + $0xab0] sm:$0xff]  ;;  %v3943_v32 = vld [vmem:[#allocation20 + $0xa98] sm:$0xff]  ;;  %18163 = vst [vmem:[#allocation514_spill] sm:$0xff] %v14777_v31 }
 0x66c   :  { %7306 = vmatprep.subr.bf16.mxu1 %v14750_v23  ;;  %v3942_v23 = vld [vmem:[#allocation20 + $0xa90] sm:$0xff]  ;;  %v14786_v44 = vcombine.high %v3943_v32, %v3947_v41  ;;  %v14793_v1 = vcombine.low %v3943_v32, %v3947_v41 }
 0x66d   :  { %v14783_v57 = vcombine.high %v3942_v23, %v3946_v59  ;;  %v14789_v17 = vcombine.low %v3942_v23, %v3946_v59 }
 0x66e   :  { %7143 = vmatpush1.bf16.msra.mxu0 %v14753_v34  ;;  %18166 = vst [vmem:[#allocation517_spill] sm:$0xff] %v14786_v44  ;;  %v3955_v34 = vld [vmem:[#allocation20 + $0xaf8] sm:$0xff]  ;;  %18168 = vst [vmem:[#allocation519_spill] sm:$0xff] %v14793_v1 }
 0x66f   :  { %7307 = vmatpush1.bf16.msra.mxu1 %v14757_v13  ;;  %7144 = vmatprep.subr.bf16.mxu0 %v14759_v49  ;;  %18165 = vst [vmem:[#allocation516_spill] sm:$0xff] %v14783_v57  ;;  %v3954_v49 = vld [vmem:[#allocation20 + $0xaf0] sm:$0xff]  ;;  %v3951_v13 = vld [vmem:[#allocation20 + $0xad8] sm:$0xff]  ;;  %18167 = vst [vmem:[#allocation518_spill] sm:$0xff] %v14789_v17 }
 0x670   :  { %7308 = vmatprep.subr.bf16.mxu1 %v14762_v40  ;;  %v3950_v40 = vld [vmem:[#allocation20 + $0xad0] sm:$0xff]  ;;  %v14798_v0 = vcombine.high %v3951_v13, %v3955_v34  ;;  %v14805_v41 = vcombine.low %v3951_v13, %v3955_v34 }
 0x671   :  { %v14795_v8 = vcombine.high %v3950_v40, %v3954_v49  ;;  %v14801_v59 = vcombine.low %v3950_v40, %v3954_v49 }
 0x672   :  { %7145 = vmatpush1.bf16.msra.mxu0 %v14765_v7  ;;  %18170 = vst [vmem:[#allocation521_spill] sm:$0xff] %v14798_v0  ;;  %v3963_v7 = vld [vmem:[#allocation20 + $0xb38] sm:$0xff]  ;;  %18172 = vst [vmem:[#allocation523_spill] sm:$0xff] %v14805_v41 }
 0x673   :  { %7309 = vmatpush1.bf16.msra.mxu1 %v14769_v24  ;;  %7146 = vmatprep.subr.bf16.mxu0 %v14771_v42  ;;  %18169 = vst [vmem:[#allocation520_spill] sm:$0xff] %v14795_v8  ;;  %v3962_v42 = vld [vmem:[#allocation20 + $0xb30] sm:$0xff]  ;;  %v3959_v24 = vld [vmem:[#allocation20 + $0xb18] sm:$0xff]  ;;  %18171 = vst [vmem:[#allocation522_spill] sm:$0xff] %v14801_v59 }
 0x674   :  { %7310 = vmatprep.subr.bf16.mxu1 %v14774_v56  ;;  %v3958_v56 = vld [vmem:[#allocation20 + $0xb10] sm:$0xff]  ;;  %v14810_v23 = vcombine.high %v3959_v24, %v3963_v7  ;;  %v14817_v34 = vcombine.low %v3959_v24, %v3963_v7 }
 0x675   :  { %v14807_v32 = vcombine.high %v3958_v56, %v3962_v42  ;;  %v14813_v49 = vcombine.low %v3958_v56, %v3962_v42 }
 0x676   :  { %7147 = vmatpush1.bf16.msra.mxu0 %v14777_v31  ;;  %18174 = vst [vmem:[#allocation525_spill] sm:$0xff] %v14810_v23  ;;  %v3971_v31 = vld [vmem:[#allocation20 + $0xb78] sm:$0xff]  ;;  %18176 = vst [vmem:[#allocation527_spill] sm:$0xff] %v14817_v34 }
 0x677   :  { %7311 = vmatpush1.bf16.msra.mxu1 %v14781_v47  ;;  %7148 = vmatprep.subr.bf16.mxu0 %v14783_v57  ;;  %18173 = vst [vmem:[#allocation524_spill] sm:$0xff] %v14807_v32  ;;  %v3970_v57 = vld [vmem:[#allocation20 + $0xb70] sm:$0xff]  ;;  %v3967_v47 = vld [vmem:[#allocation20 + $0xb58] sm:$0xff]  ;;  %18175 = vst [vmem:[#allocation526_spill] sm:$0xff] %v14813_v49 }
 0x678   :  { %7312 = vmatprep.subr.bf16.mxu1 %v14786_v44  ;;  %v3966_v44 = vld [vmem:[#allocation20 + $0xb50] sm:$0xff]  ;;  %v14822_v40 = vcombine.high %v3967_v47, %v3971_v31  ;;  %v14829_v7 = vcombine.low %v3967_v47, %v3971_v31 }
 0x679   :  { %v14819_v13 = vcombine.high %v3966_v44, %v3970_v57  ;;  %v14825_v42 = vcombine.low %v3966_v44, %v3970_v57 }
 0x67a   :  { %7149 = vmatpush1.bf16.msra.mxu0 %v14789_v17  ;;  %18178 = vst [vmem:[#allocation529_spill] sm:$0xff] %v14822_v40  ;;  %v3979_v17 = vld [vmem:[#allocation20 + $0xbb8] sm:$0xff]  ;;  %18180 = vst [vmem:[#allocation531_spill] sm:$0xff] %v14829_v7 }
 0x67b   :  { %7313 = vmatpush1.bf16.msra.mxu1 %v14793_v1  ;;  %7150 = vmatprep.subr.bf16.mxu0 %v14795_v8  ;;  %18177 = vst [vmem:[#allocation528_spill] sm:$0xff] %v14819_v13  ;;  %v3978_v8 = vld [vmem:[#allocation20 + $0xbb0] sm:$0xff]  ;;  %v3975_v1 = vld [vmem:[#allocation20 + $0xb98] sm:$0xff]  ;;  %18179 = vst [vmem:[#allocation530_spill] sm:$0xff] %v14825_v42 }
 0x67c   :  { %7314 = vmatprep.subr.bf16.mxu1 %v14798_v0  ;;  %v3974_v0 = vld [vmem:[#allocation20 + $0xb90] sm:$0xff]  ;;  %v14834_v56 = vcombine.high %v3975_v1, %v3979_v17  ;;  %v14841_v31 = vcombine.low %v3975_v1, %v3979_v17 }
 0x67d   :  { %v14831_v24 = vcombine.high %v3974_v0, %v3978_v8  ;;  %v14837_v57 = vcombine.low %v3974_v0, %v3978_v8 }
 0x67e   :  { %7151 = vmatpush1.bf16.msra.mxu0 %v14801_v59  ;;  %18182 = vst [vmem:[#allocation533_spill] sm:$0xff] %v14834_v56  ;;  %v3987_v59 = vld [vmem:[#allocation20 + $0xbf8] sm:$0xff]  ;;  %18184 = vst [vmem:[#allocation535_spill] sm:$0xff] %v14841_v31 }
 0x67f   :  { %7315 = vmatpush1.bf16.msra.mxu1 %v14805_v41  ;;  %7152 = vmatprep.subr.bf16.mxu0 %v14807_v32  ;;  %18181 = vst [vmem:[#allocation532_spill] sm:$0xff] %v14831_v24  ;;  %v3986_v32 = vld [vmem:[#allocation20 + $0xbf0] sm:$0xff]  ;;  %v3983_v41 = vld [vmem:[#allocation20 + $0xbd8] sm:$0xff]  ;;  %18183 = vst [vmem:[#allocation534_spill] sm:$0xff] %v14837_v57 }
 0x680   :  { %7316 = vmatprep.subr.bf16.mxu1 %v14810_v23  ;;  %v3982_v23 = vld [vmem:[#allocation20 + $0xbd0] sm:$0xff]  ;;  %v14846_v44 = vcombine.high %v3983_v41, %v3987_v59  ;;  %v14853_v17 = vcombine.low %v3983_v41, %v3987_v59 }
 0x681   :  { %v14843_v47 = vcombine.high %v3982_v23, %v3986_v32  ;;  %v14849_v8 = vcombine.low %v3982_v23, %v3986_v32  ;;  %v3999_v32 = vld [vmem:[#allocation20 + $0xc58] sm:$0xff] }
 0x682   :  { %7153 = vmatpush1.bf16.msra.mxu0 %v14813_v49  ;;  %18186 = vst [vmem:[#allocation537_spill] sm:$0xff] %v14846_v44  ;;  %v3995_v49 = vld [vmem:[#allocation20 + $0xc38] sm:$0xff]  ;;  %18188 = vst [vmem:[#allocation539_spill] sm:$0xff] %v14853_v17 }
 0x683   :  { %7317 = vmatpush1.bf16.msra.mxu1 %v14817_v34  ;;  %7154 = vmatprep.subr.bf16.mxu0 %v14819_v13  ;;  %18185 = vst [vmem:[#allocation536_spill] sm:$0xff] %v14843_v47  ;;  %v3994_v13 = vld [vmem:[#allocation20 + $0xc30] sm:$0xff]  ;;  %v3991_v34 = vld [vmem:[#allocation20 + $0xc18] sm:$0xff]  ;;  %18187 = vst [vmem:[#allocation538_spill] sm:$0xff] %v14849_v8 }
 0x684   :  { %7318 = vmatprep.subr.bf16.mxu1 %v14822_v40  ;;  %v3990_v40 = vld [vmem:[#allocation20 + $0xc10] sm:$0xff]  ;;  %v14858_v0 = vcombine.high %v3991_v34, %v3995_v49  ;;  %v4003_v23 = vld [vmem:[#allocation20 + $0xc78] sm:$0xff]  ;;  %v14865_v59 = vcombine.low %v3991_v34, %v3995_v49 }
 0x685   :  { %v14855_v1 = vcombine.high %v3990_v40, %v3994_v13  ;;  %v14879_v49 = vcombine.low %v3999_v32, %v4003_v23 }
 0x686   :  { %7155 = vmatpush1.bf16.msra.mxu0 %v14825_v42  ;;  %18190 = vst [vmem:[#allocation541_spill] sm:$0xff] %v14858_v0  ;;  %18192 = vst [vmem:[#allocation543_spill] sm:$0xff] %v14865_v59 }
 0x687   :  { %7319 = vmatpush1.bf16.msra.mxu1 %v14829_v7  ;;  %7156 = vmatprep.subr.bf16.mxu0 %v14831_v24  ;;  %18189 = vst [vmem:[#allocation540_spill] sm:$0xff] %v14855_v1  ;;  %v4002_v24 = vld [vmem:[#allocation20 + $0xc70] sm:$0xff]  ;;  %v14861_v7 = vcombine.low %v3990_v40, %v3994_v13  ;;  %v4007_v13 = vld [vmem:[#allocation20 + $0xc98] sm:$0xff]  ;;  %18196 = vst [vmem:[#allocation547_spill] sm:$0xff] %v14879_v49 }
 0x688   :  { %7320 = vmatprep.subr.bf16.mxu1 %v14834_v56  ;;  %v3998_v56 = vld [vmem:[#allocation20 + $0xc50] sm:$0xff]  ;;  %v4011_v40 = vld [vmem:[#allocation20 + $0xcb8] sm:$0xff] }
 0x689   :  { %18191 = vst [vmem:[#allocation542_spill] sm:$0xff] %v14861_v7  ;;  %v14868_v41 = vcombine.high %v3998_v56, %v4002_v24 }
 0x68a   :  { %7157 = vmatpush1.bf16.msra.mxu0 %v14837_v57 }
 0x68b   :  { %7321 = vmatpush1.bf16.msra.mxu1 %v14841_v31  ;;  %7158 = vmatprep.subr.bf16.mxu0 %v14843_v47  ;;  %18193 = vst [vmem:[#allocation544_spill] sm:$0xff] %v14868_v41  ;;  %v4010_v47 = vld [vmem:[#allocation20 + $0xcb0] sm:$0xff]  ;;  %v14871_v31 = vcombine.high %v3999_v32, %v4003_v23  ;;  %v14893_v32 = vcombine.low %v4007_v13, %v4011_v40 }
 0x68c   :  { %7322 = vmatprep.subr.bf16.mxu1 %v14846_v44  ;;  %v4006_v44 = vld [vmem:[#allocation20 + $0xc90] sm:$0xff] }
 0x68d   :  { %18194 = vst [vmem:[#allocation545_spill] sm:$0xff] %v14871_v31  ;;  %v14881_v34 = vcombine.high %v4006_v44, %v4010_v47  ;;  %18200 = vst [vmem:[#allocation551_spill] sm:$0xff] %v14893_v32 }
 0x68e   :  { %7159 = vmatpush1.bf16.msra.mxu0 %v14849_v8  ;;  %v4027_v8 = vld [vmem:[#allocation20 + $0xd38] sm:$0xff] }
 0x68f   :  { %7323 = vmatpush1.bf16.msra.mxu1 %v14853_v17  ;;  %7169 = vmatprep.subr.bf16.mxu0 %v14855_v1  ;;  %v14875_v17 = vcombine.low %v3998_v56, %v4002_v24  ;;  %18197 = vst [vmem:[#allocation548_spill] sm:$0xff] %v14881_v34  ;;  %v4014_v1 = vld [vmem:[#allocation20 + $0xcd0] sm:$0xff]  ;;  %v4015_v24 = vld [vmem:[#allocation20 + $0xcd8] sm:$0xff] }
 0x690   :  { %7333 = vmatprep.subr.bf16.mxu1 %v14858_v0  ;;  %v14885_v0 = vcombine.high %v4007_v13, %v4011_v40  ;;  %v4019_v56 = vld [vmem:[#allocation20 + $0xcf8] sm:$0xff] }
 0x691   :  { %7161 = vmatmul.mubr.bf16.vlgmr.msra.gmra.mrb[32].mxu0 %v14065_v15  ;;  %18195 = vst [vmem:[#allocation546_spill] sm:$0xff] %v14875_v17  ;;  %v14898_v23 = vcombine.high %v4015_v24, %v4019_v56 }
 0x692   :  { %7325 = vmatmul.mubr.bf16.vlgmr.msra.gmra.mrb[32].mxu1 %v14065_v15  ;;  %7170 = vmatpush1.bf16.msra.mxu0 %v14861_v7  ;;  %18198 = vst [vmem:[#allocation549_spill] sm:$0xff] %v14885_v0  ;;  %v4018_v15 = vld [vmem:[#allocation20 + $0xcf0] sm:$0xff]  ;;  %v14889_v7 = vcombine.low %v4006_v44, %v4010_v47  ;;  %v14905_v44 = vcombine.low %v4015_v24, %v4019_v56 }
 0x693   :  { %7201 = vmatprep.mubr.bf16.mxu0 %v14074_v14  ;;  %7334 = vmatpush1.bf16.msra.mxu1 %v14865_v59  ;;  %18202 = vst [vmem:[#allocation553_spill] sm:$0xff] %v14898_v23  ;;  %v4023_v59 = vld [vmem:[#allocation20 + $0xd18] sm:$0xff]  ;;  %v14901_v47 = vcombine.low %v4014_v1, %v4018_v15 }
 0x694   :  { %7365 = vmatprep.mubr.bf16.mxu1 %v14074_v14  ;;  %7171 = vmatprep.subr.bf16.mxu0 %v14868_v41  ;;  %18199 = vst [vmem:[#allocation550_spill] sm:$0xff] %v14889_v7  ;;  %v14895_v14 = vcombine.high %v4014_v1, %v4018_v15  ;;  %v4022_v41 = vld [vmem:[#allocation20 + $0xd10] sm:$0xff]  ;;  %18204 = vst [vmem:[#allocation555_spill] sm:$0xff] %v14905_v44  ;;  %v14910_v40 = vcombine.high %v4023_v59, %v4027_v8 }
 0x695   :  { %7335 = vmatprep.subr.bf16.mxu1 %v14871_v31  ;;  %v4026_v31 = vld [vmem:[#allocation20 + $0xd30] sm:$0xff]  ;;  %18203 = vst [vmem:[#allocation554_spill] sm:$0xff] %v14901_v47  ;;  %v14917_v15 = vcombine.low %v4023_v59, %v4027_v8 }
 0x696   :  { %7172 = vmatpush1.bf16.msra.mxu0 %v14875_v17  ;;  %18201 = vst [vmem:[#allocation552_spill] sm:$0xff] %v14895_v14  ;;  %v14907_v13 = vcombine.high %v4022_v41, %v4026_v31  ;;  %18206 = vst [vmem:[#allocation557_spill] sm:$0xff] %v14910_v40  ;;  %v4035_v17 = vld [vmem:[#allocation20 + $0xd78] sm:$0xff]  ;;  %v14913_v1 = vcombine.low %v4022_v41, %v4026_v31 }
 0x697   :  { %7336 = vmatpush1.bf16.msra.mxu1 %v14879_v49  ;;  %7173 = vmatprep.subr.bf16.mxu0 %v14881_v34  ;;  %v4034_v34 = vld [vmem:[#allocation20 + $0xd70] sm:$0xff]  ;;  %v4031_v49 = vld [vmem:[#allocation20 + $0xd58] sm:$0xff]  ;;  %18208 = vst [vmem:[#allocation559_spill] sm:$0xff] %v14917_v15 }
 0x698   :  { %7337 = vmatprep.subr.bf16.mxu1 %v14885_v0  ;;  %18205 = vst [vmem:[#allocation556_spill] sm:$0xff] %v14907_v13  ;;  %v4030_v0 = vld [vmem:[#allocation20 + $0xd50] sm:$0xff]  ;;  %18207 = vst [vmem:[#allocation558_spill] sm:$0xff] %v14913_v1  ;;  %v14922_v56 = vcombine.high %v4031_v49, %v4035_v17  ;;  %v14929_v8 = vcombine.low %v4031_v49, %v4035_v17 }
 0x699   :  { %v14919_v24 = vcombine.high %v4030_v0, %v4034_v34  ;;  %v14925_v31 = vcombine.low %v4030_v0, %v4034_v34  ;;  %v4047_v34 = vld [vmem:[#allocation20 + $0xdd8] sm:$0xff] }
 0x69a   :  { %7174 = vmatpush1.bf16.msra.mxu0 %v14889_v7  ;;  %18210 = vst [vmem:[#allocation561_spill] sm:$0xff] %v14922_v56  ;;  %v4043_v7 = vld [vmem:[#allocation20 + $0xdb8] sm:$0xff]  ;;  %18212 = vst [vmem:[#allocation563_spill] sm:$0xff] %v14929_v8 }
 0x69b   :  { %7338 = vmatpush1.bf16.msra.mxu1 %v14893_v32  ;;  %7175 = vmatprep.subr.bf16.mxu0 %v14895_v14  ;;  %18209 = vst [vmem:[#allocation560_spill] sm:$0xff] %v14919_v24  ;;  %v4042_v14 = vld [vmem:[#allocation20 + $0xdb0] sm:$0xff]  ;;  %v4039_v32 = vld [vmem:[#allocation20 + $0xd98] sm:$0xff]  ;;  %18211 = vst [vmem:[#allocation562_spill] sm:$0xff] %v14925_v31 }
 0x69c   :  { %7339 = vmatprep.subr.bf16.mxu1 %v14898_v23  ;;  %v4038_v23 = vld [vmem:[#allocation20 + $0xd90] sm:$0xff]  ;;  %v14949_v57 = vcombine.low %v4039_v32, %v4043_v7 }
 0x69d   :  { %v14931_v59 = vcombine.high %v4038_v23, %v4042_v14  ;;  %v14945_v49 = vcombine.low %v4038_v23, %v4042_v14  ;;  %v4059_v14 = vld [vmem:[#allocation20 + $0xe38] sm:$0xff] }
 0x69e   :  { %7176 = vmatpush1.bf16.msra.mxu0 %v14901_v47  ;;  %18216 = vst [vmem:[#allocation567_spill] sm:$0xff] %v14949_v57 }
 0x69f   :  { %7340 = vmatpush1.bf16.msra.mxu1 %v14905_v44  ;;  %7177 = vmatprep.subr.bf16.mxu0 %v14907_v13  ;;  %18213 = vst [vmem:[#allocation564_spill] sm:$0xff] %v14931_v59  ;;  %v4046_v13 = vld [vmem:[#allocation20 + $0xdd0] sm:$0xff]  ;;  %18215 = vst [vmem:[#allocation566_spill] sm:$0xff] %v14945_v49 }
 0x6a0   :  { %7341 = vmatprep.subr.bf16.mxu1 %v14910_v40  ;;  %v14936_v40 = vcombine.high %v4039_v32, %v4043_v7  ;;  %v4050_v44 = vld [vmem:[#allocation20 + $0xdf0] sm:$0xff] }
 0x6a1   :  { %v14951_v42 = vcombine.high %v4046_v13, %v4050_v44  ;;  %v14957_v23 = vcombine.low %v4046_v13, %v4050_v44 }
 0x6a2   :  { %7178 = vmatpush1.bf16.msra.mxu0 %v14913_v1  ;;  %18214 = vst [vmem:[#allocation565_spill] sm:$0xff] %v14936_v40 }
 0x6a3   :  { %7342 = vmatpush1.bf16.msra.mxu1 %v14917_v15  ;;  %7179 = vmatprep.subr.bf16.mxu0 %v14919_v24  ;;  %v4051_v15 = vld [vmem:[#allocation20 + $0xdf8] sm:$0xff]  ;;  %18217 = vst [vmem:[#allocation568_spill] sm:$0xff] %v14951_v42  ;;  %18219 = vst [vmem:[#allocation570_spill] sm:$0xff] %v14957_v23 }
 0x6a4   :  { %v14933_v41 = vpop.f32.mrb[28].mxu0  ;;  %7343 = vmatprep.subr.bf16.mxu1 %v14922_v56  ;;  %v14954_v55 = vcombine.high %v4047_v34, %v4051_v15  ;;  %v14961_v7 = vcombine.low %v4047_v34, %v4051_v15 }
 0x6a5   :  { %v14938_v47 = vpop.f32.mrb[28].mxu1  ;;  %v14940_v0 = vpop.f32.mrb[29].mxu0 }
 0x6a6   :  { %v14942_v1 = vpop.f32.mrb[29].mxu1  ;;  %v6879_v17 = vpop.f32.mrb[30].mxu0  ;;  %7180 = vmatpush1.bf16.msra.mxu0 %v14925_v31  ;;  %18218 = vst [vmem:[#allocation569_spill] sm:$0xff] %v14954_v55  ;;  %v4055_v31 = vld [vmem:[#allocation20 + $0xe18] sm:$0xff]  ;;  %18220 = vst [vmem:[#allocation571_spill] sm:$0xff] %v14961_v7 }
 0x6a7   :  { %v7043_v24 = vpop.f32.mrb[30].mxu1  ;;  %7344 = vmatpush1.bf16.msra.mxu1 %v14929_v8  ;;  %v6880_v56 = vpop.f32.mrb[31].mxu0  ;;  %7181 = vmatprep.subr.bf16.mxu0 %v14931_v59  ;;  %v4054_v17 = vld [vmem:[#allocation20 + $0xe10] sm:$0xff]  ;;  %v4067_v59 = vld [vmem:[#allocation20 + $0xe78] sm:$0xff]  ;;  %v14973_v13 = vcombine.low %v4055_v31, %v4059_v14  ;;  %v15028_v8 = vld [vmem:[#allocation22] sm:$0xff] }
 0x6a8   :  { %v7044_v54 = vpop.f32.mrb[31].mxu1  ;;  %7345 = vmatprep.subr.bf16.mxu1 %v14936_v40  ;;  %v14963_v32 = vcombine.high %v4054_v17, %v4058_v22  ;;  %v4062_v24 = vld [vmem:[#allocation20 + $0xe50] sm:$0xff]  ;;  %v4063_v40 = vld [vmem:[#allocation20 + $0xe58] sm:$0xff]  ;;  %v14969_v44 = vcombine.low %v4054_v17, %v4058_v22 }
 0x6a9   :  { %v14966_v54 = vcombine.high %v4055_v31, %v4059_v14  ;;  %v4066_v56 = vld [vmem:[#allocation20 + $0xe70] sm:$0xff]  ;;  %18224 = vst [vmem:[#allocation575_spill] sm:$0xff] %v14973_v13  ;;  %v14978_v34 = vcombine.high %v4063_v40, %v4067_v59  ;;  %v14985_v31 = vcombine.low %v4063_v40, %v4067_v59 }
 0x6aa   :  { %7182 = vmatpush1.bf16.msra.mxu0 %v14945_v49  ;;  %18221 = vst [vmem:[#allocation572_spill] sm:$0xff] %v14963_v32  ;;  %18223 = vst [vmem:[#allocation574_spill] sm:$0xff] %v14969_v44  ;;  %v14975_v15 = vcombine.high %v4062_v24, %v4066_v56  ;;  %v4075_v49 = vld [vmem:[#allocation20 + $0xeb8] sm:$0xff]  ;;  %v14981_v22 = vcombine.low %v4062_v24, %v4066_v56 }
 0x6ab   :  { %7346 = vmatpush1.bf16.msra.mxu1 %v14949_v57  ;;  %7183 = vmatprep.subr.bf16.mxu0 %v14951_v42  ;;  %18222 = vst [vmem:[#allocation573_spill] sm:$0xff] %v14966_v54  ;;  %18226 = vst [vmem:[#allocation577_spill] sm:$0xff] %v14978_v34  ;;  %v4074_v42 = vld [vmem:[#allocation20 + $0xeb0] sm:$0xff]  ;;  %v4071_v57 = vld [vmem:[#allocation20 + $0xe98] sm:$0xff] }
 0x6ac   :  { %7347 = vmatprep.subr.bf16.mxu1 %v14954_v55  ;;  %18225 = vst [vmem:[#allocation576_spill] sm:$0xff] %v14975_v15  ;;  %v4070_v55 = vld [vmem:[#allocation20 + $0xe90] sm:$0xff]  ;;  %18227 = vst [vmem:[#allocation578_spill] sm:$0xff] %v14981_v22  ;;  %v14990_v14 = vcombine.high %v4071_v57, %v4075_v49  ;;  %v14997_v40 = vcombine.low %v4071_v57, %v4075_v49 }
 0x6ad   :  { %18228 = vst [vmem:[#allocation579_spill] sm:$0xff] %v14985_v31  ;;  %v14987_v17 = vcombine.high %v4070_v55, %v4074_v42  ;;  %v14993_v24 = vcombine.low %v4070_v55, %v4074_v42 }
 0x6ae   :  { %7184 = vmatpush1.bf16.msra.mxu0 %v14957_v23  ;;  %18230 = vst [vmem:[#allocation581_spill] sm:$0xff] %v14990_v14  ;;  %v4083_v23 = vld [vmem:[#allocation20 + $0xef8] sm:$0xff]  ;;  %18232 = vst [vmem:[#allocation583_spill] sm:$0xff] %v14997_v40 }
 0x6af   :  { %7348 = vmatpush1.bf16.msra.mxu1 %v14961_v7  ;;  %7185 = vmatprep.subr.bf16.mxu0 %v14963_v32  ;;  %18229 = vst [vmem:[#allocation580_spill] sm:$0xff] %v14987_v17  ;;  %v4082_v32 = vld [vmem:[#allocation20 + $0xef0] sm:$0xff]  ;;  %v4079_v7 = vld [vmem:[#allocation20 + $0xed8] sm:$0xff]  ;;  %18231 = vst [vmem:[#allocation582_spill] sm:$0xff] %v14993_v24 }
 0x6b0   :  { %7349 = vmatprep.subr.bf16.mxu1 %v14966_v54  ;;  %v4078_v54 = vld [vmem:[#allocation20 + $0xed0] sm:$0xff]  ;;  %v15002_v56 = vcombine.high %v4079_v7, %v4083_v23  ;;  %v15009_v42 = vcombine.low %v4079_v7, %v4083_v23 }
 0x6b1   :  { %v14999_v59 = vcombine.high %v4078_v54, %v4082_v32  ;;  %v15005_v55 = vcombine.low %v4078_v54, %v4082_v32 }
 0x6b2   :  { %7186 = vmatpush1.bf16.msra.mxu0 %v14969_v44  ;;  %18234 = vst [vmem:[#allocation585_spill] sm:$0xff] %v15002_v56  ;;  %v4091_v44 = vld [vmem:[#allocation20 + $0xf38] sm:$0xff]  ;;  %18236 = vst [vmem:[#allocation587_spill] sm:$0xff] %v15009_v42 }
 0x6b3   :  { %7350 = vmatpush1.bf16.msra.mxu1 %v14973_v13  ;;  %7187 = vmatprep.subr.bf16.mxu0 %v14975_v15  ;;  %18233 = vst [vmem:[#allocation584_spill] sm:$0xff] %v14999_v59  ;;  %v4090_v15 = vld [vmem:[#allocation20 + $0xf30] sm:$0xff]  ;;  %v4087_v13 = vld [vmem:[#allocation20 + $0xf18] sm:$0xff]  ;;  %18235 = vst [vmem:[#allocation586_spill] sm:$0xff] %v15005_v55 }
 0x6b4   :  { %7351 = vmatprep.subr.bf16.mxu1 %v14978_v34  ;;  %v4086_v34 = vld [vmem:[#allocation20 + $0xf10] sm:$0xff]  ;;  %v15014_v49 = vcombine.high %v4087_v13, %v4091_v44  ;;  %v15021_v23 = vcombine.low %v4087_v13, %v4091_v44 }
 0x6b5   :  { %v15011_v57 = vcombine.high %v4086_v34, %v4090_v15  ;;  %v15017_v32 = vcombine.low %v4086_v34, %v4090_v15 }
 0x6b6   :  { %7188 = vmatpush1.bf16.msra.mxu0 %v14981_v22  ;;  %18238 = vst [vmem:[#allocation589_spill] sm:$0xff] %v15014_v49  ;;  %v4099_v22 = vld [vmem:[#allocation20 + $0xf78] sm:$0xff]  ;;  %18239 = vst [vmem:[#allocation590_spill] sm:$0xff] %v15021_v23 }
 0x6b7   :  { %7352 = vmatpush1.bf16.msra.mxu1 %v14985_v31  ;;  %7189 = vmatprep.subr.bf16.mxu0 %v14987_v17  ;;  %18237 = vst [vmem:[#allocation588_spill] sm:$0xff] %v15011_v57  ;;  %v4098_v17 = vld [vmem:[#allocation20 + $0xf70] sm:$0xff]  ;;  %v4095_v31 = vld [vmem:[#allocation20 + $0xf58] sm:$0xff] }
 0x6b8   :  { %7353 = vmatprep.subr.bf16.mxu1 %v14990_v14  ;;  %v4094_v14 = vld [vmem:[#allocation20 + $0xf50] sm:$0xff]  ;;  %v15026_v54 = vcombine.high %v4095_v31, %v4099_v22  ;;  %v15035_v44 = vcombine.low %v4095_v31, %v4099_v22 }
 0x6b9   :  { %v15023_v7 = vcombine.high %v4094_v14, %v4098_v17  ;;  %v15031_v15 = vcombine.low %v4094_v14, %v4098_v17  ;;  %v4111_v17 = vld [vmem:[#allocation20 + $0xfd8] sm:$0xff] }
 0x6ba   :  { %7190 = vmatpush1.bf16.msra.mxu0 %v14993_v24  ;;  %18241 = vst [vmem:[#allocation592_spill] sm:$0xff] %v15026_v54  ;;  %v4107_v24 = vld [vmem:[#allocation20 + $0xfb8] sm:$0xff]  ;;  %18243 = vst [vmem:[#allocation594_spill] sm:$0xff] %v15035_v44 }
 0x6bb   :  { %7354 = vmatpush1.bf16.msra.mxu1 %v14997_v40  ;;  %7191 = vmatprep.subr.bf16.mxu0 %v14999_v59  ;;  %18240 = vst [vmem:[#allocation591_spill] sm:$0xff] %v15023_v7  ;;  %v4106_v59 = vld [vmem:[#allocation20 + $0xfb0] sm:$0xff]  ;;  %v4103_v40 = vld [vmem:[#allocation20 + $0xf98] sm:$0xff]  ;;  %18242 = vst [vmem:[#allocation593_spill] sm:$0xff] %v15031_v15 }
 0x6bc   :  { %7355 = vmatprep.subr.bf16.mxu1 %v15002_v56  ;;  %v4102_v56 = vld [vmem:[#allocation20 + $0xf90] sm:$0xff]  ;;  %v15040_v34 = vcombine.high %v4103_v40, %v4107_v24  ;;  %v4115_v14 = vld [vmem:[#allocation20 + $0xff8] sm:$0xff]  ;;  %v15055_v31 = vcombine.low %v4103_v40, %v4107_v24  ;;  %v12175_v40 = vld [vmem:[#allocation23 + $0x40] sm:$0xff]  }
 0x6bd   :  { %v15037_v13 = vcombine.high %v4102_v56, %v4106_v59  ;;  %v15051_v22 = vcombine.low %v4102_v56, %v4106_v59  ;;  %v15071_v24 = vcombine.low %v4111_v17, %v4115_v14  ;;  %v12176_v56 = vld [vmem:[#allocation23 + $0xc0] sm:$0xff]  }
 0x6be   :  { %7192 = vmatpush1.bf16.msra.mxu0 %v15005_v55  ;;  %18245 = vst [vmem:[#allocation596_spill] sm:$0xff] %v15040_v34  ;;  %18248 = vst [vmem:[#allocation599_spill] sm:$0xff] %v15055_v31 }
 0x6bf   :  { %7356 = vmatpush1.bf16.msra.mxu1 %v15009_v42  ;;  %7193 = vmatprep.subr.bf16.mxu0 %v15011_v57  ;;  %18244 = vst [vmem:[#allocation595_spill] sm:$0xff] %v15037_v13  ;;  %v4114_v57 = vld [vmem:[#allocation20 + $0xff0] sm:$0xff]  ;;  %v15044_v42 = vrot.slane %v15028_v8, %v13135_v12  ;;  %18247 = vst [vmem:[#allocation598_spill] sm:$0xff] %v15051_v22  ;;  %v15060_v12 = vcombine.high %v4111_v17, %v4115_v14 }
 0x6c0   :  { %7357 = vmatprep.subr.bf16.mxu1 %v15014_v49  ;;  %v4110_v49 = vld [vmem:[#allocation20 + $0xfd0] sm:$0xff]  ;;  %18252 = vst [vmem:[#allocation603_spill] sm:$0xff] %v15071_v24 }
 0x6c1   :  { %18250 = vst [vmem:[#allocation601_spill] sm:$0xff] %v15060_v12  ;;  %v15067_v59 = vcombine.low %v4110_v49, %v4114_v57  ;;  %v12180_v17 = vld [vmem:[#allocation23 + $0xc8] sm:$0xff]  }
 0x6c2   :  { %7194 = vmatpush1.bf16.msra.mxu0 %v15017_v32 }
 0x6c3   :  { %7358 = vmatpush1.bf16.msra.mxu1 %v15021_v23  ;;  %7195 = vmatprep.subr.bf16.mxu0 %v15023_v7  ;;  %v15048_v23 = vrot.slane %v15028_v8, %v13142_v38  ;;  %v11650_v38 = vadd.f32 %v14940_v0, %v15044_v42  ;;  %18251 = vst [vmem:[#allocation602_spill] sm:$0xff] %v15067_v59  ;;  %v12177_v0 = vld [vmem:[#allocation23] sm:$0xff]  }
 0x6c4   :  { %7359 = vmatprep.subr.bf16.mxu1 %v15026_v54  ;;  %v15057_v54 = vcombine.high %v4110_v49, %v4114_v57  ;;  %v12179_v57 = vld [vmem:[#allocation23 + $0x48] sm:$0xff]  }
 0x6c5   :  { %18246 = vst [vmem:[#allocation597_spill] sm:$0xff] %v15048_v23 }
 0x6c6   :  { %7196 = vmatpush1.bf16.msra.mxu0 %v15031_v15  ;;  %18249 = vst [vmem:[#allocation600_spill] sm:$0xff] %v15057_v54  ;;  %v11652_v15 = vadd.f32 %v14942_v1, %v15048_v23  ;;  %v12178_v1 = vld [vmem:[#allocation23 + $0x80] sm:$0xff]  }
 0x6c7   :  { %7360 = vmatpush1.bf16.msra.mxu1 %v15035_v44  ;;  %7197 = vmatprep.subr.bf16.mxu0 %v15037_v13 }
 0x6c8   :  { %7361 = vmatprep.subr.bf16.mxu1 %v15040_v34  ;;  %v7375_v34 = vmax.f32 %v11650_v38, 0.0  ;;  %v7377_v13 = vmax.f32 %v11652_v15, 0.0  ;;  %v12182_v15 = vld [vmem:[#allocation23 + $0x88] sm:$0xff]   ;;  %v12183_v38 = vld [vmem:[#allocation23 + $0x50] sm:$0xff]  }
 0x6ca   :  { %7198 = vmatpush1.bf16.msra.mxu0 %v15051_v22  ;;  %v7383_v49 = vpack.c.bf16 %v7375_v34, %v7375_v34  ;;  %v7385_v14 = vpack.c.bf16 %v7377_v13, %v7377_v13  ;;  %v12186_v34 = vld [vmem:[#allocation23 + $0x90] sm:$0xff]   ;;  %v12188_v13 = vld [vmem:[#allocation23 + $0xd8] sm:$0xff]  }
 0x6cb   :  { %7362 = vmatpush1.bf16.msra.mxu1 %v15055_v31  ;;  %7199 = vmatprep.subr.bf16.mxu0 %v15057_v54 }
 0x6cc   :  { %7363 = vmatprep.subr.bf16.mxu1 %v15060_v12  ;;  %v12181_v12 = vld [vmem:[#allocation23 + $0x8] sm:$0xff]  }
 0x6ce   :  { %7200 = vmatpush1.bf16.msra.mxu0 %v15067_v59 }
 0x6cf   :  { %7364 = vmatpush1.bf16.msra.mxu1 %v15071_v24  ;;  %11381 = vmatprep.subr.bf16.mxu0 %v12175_v40  ;;  %v12184_v24 = vld [vmem:[#allocation23 + $0xd0] sm:$0xff]  }
 0x6d0   :  { %11403 = vmatprep.subr.bf16.mxu1 %v12176_v56  ;;  %v12185_v40 = vld [vmem:[#allocation23 + $0x10] sm:$0xff]   ;;  %v12187_v56 = vld [vmem:[#allocation23 + $0x58] sm:$0xff]  }
 0x6d1   :  { %7202 = vmatmul.mubr.bf16.vlgmr.msra.gmra.mrb[32].mxu0 %v14273_v20 }
 0x6d2   :  { %7366 = vmatmul.mubr.bf16.vlgmr.msra.gmra.mrb[32].mxu1 %v14273_v20  ;;  %11382 = vmatpush3.bf16.msra.mxu0 %v12177_v0  ;;  %v12189_v20 = vld [vmem:[#allocation23 + $0x18] sm:$0xff]  }
 0x6d3   :  { %7934 = vmatprep.mubr.bf16.mxu0 %v7383_v49  ;;  %11404 = vmatpush3.bf16.msra.mxu1 %v12178_v1  ;;  %v12190_v0 = vld [vmem:[#allocation23 + $0x98] sm:$0xff]   ;;  %v12191_v1 = vld [vmem:[#allocation23 + $0x60] sm:$0xff]  }
 0x6d4   :  { %7974 = vmatprep.mubr.bf16.mxu1 %v7385_v14  ;;  %11383 = vmatprep.subr.bf16.mxu0 %v12179_v57  ;;  %v12192_v49 = vld [vmem:[#allocation23 + $0xe0] sm:$0xff]   ;;  %v12196_v14 = vld [vmem:[#allocation23 + $0xe8] sm:$0xff]  }
 0x6d5   :  { %11405 = vmatprep.subr.bf16.mxu1 %v12180_v17  ;;  %v12193_v57 = vld [vmem:[#allocation23 + $0x20] sm:$0xff]   ;;  %v12195_v17 = vld [vmem:[#allocation23 + $0x68] sm:$0xff]  }
 0x6d6   :  { %11384 = vmatpush3.bf16.msra.mxu0 %v12181_v12  ;;  %v12194_v12 = vld [vmem:[#allocation23 + $0xa0] sm:$0xff]  }
 0x6d7   :  { %11406 = vmatpush3.bf16.msra.mxu1 %v12182_v15  ;;  %11385 = vmatprep.subr.bf16.mxu0 %v12183_v38  ;;  %v12197_v15 = vld [vmem:[#allocation23 + $0x28] sm:$0xff]  }
 0x6d8   :  { %11407 = vmatprep.subr.bf16.mxu1 %v12184_v24  ;;  %v15080_v24 = vrot.slane %v15028_v8, %v13130_v10  ;;  %v12198_v38 = vld [vmem:[#allocation23 + $0xa8] sm:$0xff]   ;;  %v12203_v10 = vld [vmem:[#allocation23 + $0x78] sm:$0xff]  }
 0x6da   :  { %11386 = vmatpush3.bf16.msra.mxu0 %v12185_v40  ;;  %18253 = vst [vmem:[#allocation604_spill] sm:$0xff] %v15080_v24  ;;  %v12199_v40 = vld [vmem:[#allocation23 + $0x70] sm:$0xff]  }
 0x6db   :  { %11408 = vmatpush3.bf16.msra.mxu1 %v12186_v34  ;;  %11387 = vmatprep.subr.bf16.mxu0 %v12187_v56  ;;  %v15084_v34 = vrot.slane %v15028_v8, %v13149_v27  ;;  %v12200_v56 = vld [vmem:[#allocation23 + $0xf0] sm:$0xff]  }
 0x6dc   :  { %11409 = vmatprep.subr.bf16.mxu1 %v12188_v13  ;;  %v12201_v13 = vld [vmem:[#allocation23 + $0x30] sm:$0xff]  }
 0x6dd   :  { %18254 = vst [vmem:[#allocation605_spill] sm:$0xff] %v15084_v34 }
 0x6de   :  { %11388 = vmatpush3.bf16.msra.mxu0 %v12189_v20  ;;  %v11649_v20 = vadd.f32 %v14933_v41, %v15080_v24  ;;  %v12209_v41 = vld [vmem:[#allocation23 + $0x100] sm:$0xff]   ;;  %v12211_v24 = vld [vmem:[#allocation23 + $0x148] sm:$0xff]  }
 0x6df   :  { %11410 = vmatpush3.bf16.msra.mxu1 %v12190_v0  ;;  %11389 = vmatprep.subr.bf16.mxu0 %v12191_v1  ;;  %v12202_v0 = vld [vmem:[#allocation23 + $0xb0] sm:$0xff]   ;;  %v11651_v1 = vadd.f32 %v14938_v47, %v15084_v34 }
 0x6e0   :  { %11411 = vmatprep.subr.bf16.mxu1 %v12192_v49  ;;  %v12204_v49 = vld [vmem:[#allocation23 + $0xf8] sm:$0xff]   ;;  %v7374_v27 = vmax.f32 %v11649_v20, 0.0  ;;  %v12214_v20 = vld [vmem:[#allocation23 + $0x188] sm:$0xff]  }
 0x6e2   :  { %11390 = vmatpush3.bf16.msra.mxu0 %v12193_v57  ;;  %v12205_v57 = vld [vmem:[#allocation23 + $0x38] sm:$0xff]  }
 0x6e3   :  { %11412 = vmatpush3.bf16.msra.mxu1 %v12194_v12  ;;  %11391 = vmatprep.subr.bf16.mxu0 %v12195_v17  ;;  %v12206_v12 = vld [vmem:[#allocation23 + $0xb8] sm:$0xff]   ;;  %v12207_v17 = vld [vmem:[#allocation23 + $0x140] sm:$0xff]  }
 0x6e4   :  { %11413 = vmatprep.subr.bf16.mxu1 %v12196_v14  ;;  %v7376_v14 = vmax.f32 %v11651_v1, 0.0  ;;  %v12217_v1 = vld [vmem:[#allocation23 + $0x110] sm:$0xff]  }
 0x6e6   :  { %11392 = vmatpush3.bf16.msra.mxu0 %v12197_v15  ;;  %v12208_v15 = vld [vmem:[#allocation23 + $0x1c0] sm:$0xff]   ;;  %v7384_v47 = vpack.c.bf16 %v7376_v14, %v7376_v14 }
 0x6e7   :  { %11414 = vmatpush3.bf16.msra.mxu1 %v12198_v38  ;;  %11393 = vmatprep.subr.bf16.mxu0 %v12199_v40  ;;  %v7382_v38 = vpack.c.bf16 %v7374_v27, %v7374_v27  ;;  %v12210_v40 = vld [vmem:[#allocation23 + $0x180] sm:$0xff]   ;;  %v12220_v27 = vld [vmem:[#allocation23 + $0x1d8] sm:$0xff]  }
 0x6e8   :  { %11415 = vmatprep.subr.bf16.mxu1 %v12200_v56  ;;  %v12212_v56 = vld [vmem:[#allocation23 + $0x1c8] sm:$0xff]   ;;  %v12223_v14 = vld [vmem:[#allocation23 + $0x160] sm:$0xff]  }
 0x6ea   :  { %11394 = vmatpush3.bf16.msra.mxu0 %v12201_v13  ;;  %v12213_v13 = vld [vmem:[#allocation23 + $0x108] sm:$0xff]  }
 0x6eb   :  { %11416 = vmatpush3.bf16.msra.mxu1 %v12202_v0  ;;  %11395 = vmatprep.subr.bf16.mxu0 %v12203_v10  ;;  %v12215_v0 = vld [vmem:[#allocation23 + $0x150] sm:$0xff]  }
 0x6ec   :  { %11417 = vmatprep.subr.bf16.mxu1 %v12204_v49  ;;  %v12216_v10 = vld [vmem:[#allocation23 + $0x1d0] sm:$0xff]  }
 0x6ed   :  { %v12218_v49 = vld [vmem:[#allocation23 + $0x190] sm:$0xff]  }
 0x6ee   :  { %11396 = vmatpush3.bf16.msra.mxu0 %v12205_v57  ;;  %v12219_v57 = vld [vmem:[#allocation23 + $0x158] sm:$0xff]  }
 0x6ef   :  { %11418 = vmatpush3.bf16.msra.mxu1 %v12206_v12  ;;  %11425 = vmatprep.subr.bf16.mxu0 %v12207_v17  ;;  %v12221_v12 = vld [vmem:[#allocation23 + $0x118] sm:$0xff]  }
 0x6f0   :  { %11447 = vmatprep.subr.bf16.mxu1 %v12208_v15  ;;  %v12222_v17 = vld [vmem:[#allocation23 + $0x198] sm:$0xff]   ;;  %v12225_v15 = vld [vmem:[#allocation23 + $0x120] sm:$0xff]  }
 0x6f1   :  { %7935 = vmatmul.mubr.bf16.vlgmr.msra.gmra.mrb[36].mxu0 %v7382_v38  ;;  %v12227_v38 = vld [vmem:[#allocation23 + $0x168] sm:$0xff]  }
 0x6f2   :  { %7975 = vmatmul.mubr.bf16.vlgmr.msra.gmra.mrb[36].mxu1 %v7384_v47  ;;  %11426 = vmatpush3.bf16.msra.mxu0 %v12209_v41  ;;  %v12226_v41 = vld [vmem:[#allocation23 + $0x1a0] sm:$0xff]   ;;  %v12229_v47 = vld [vmem:[#allocation23 + $0x128] sm:$0xff]  }
 0x6f3   :  { %11448 = vmatpush3.bf16.msra.mxu1 %v12210_v40  ;;  %11427 = vmatprep.subr.bf16.mxu0 %v12211_v24  ;;  %v12224_v24 = vld [vmem:[#allocation23 + $0x1e0] sm:$0xff]   ;;  %v12228_v40 = vld [vmem:[#allocation23 + $0x1e8] sm:$0xff]  }
 0x6f4   :  { %11449 = vmatprep.subr.bf16.mxu1 %v12212_v56  ;;  %v12230_v56 = vld [vmem:[#allocation23 + $0x1a8] sm:$0xff]  }
 0x6f6   :  { %11428 = vmatpush3.bf16.msra.mxu0 %v12213_v13  ;;  %v12231_v13 = vld [vmem:[#allocation23 + $0x170] sm:$0xff]  }
 0x6f7   :  { %11450 = vmatpush3.bf16.msra.mxu1 %v12214_v20  ;;  %11429 = vmatprep.subr.bf16.mxu0 %v12215_v0  ;;  %v12232_v20 = vld [vmem:[#allocation23 + $0x1f0] sm:$0xff]  }
 0x6f8   :  { %11451 = vmatprep.subr.bf16.mxu1 %v12216_v10  ;;  %v12233_v0 = vld [vmem:[#allocation23 + $0x130] sm:$0xff]  }
 0x6f9   :  { %v12234_v10 = vld [vmem:[#allocation23 + $0x1b0] sm:$0xff]  }
 0x6fa   :  { %11430 = vmatpush3.bf16.msra.mxu0 %v12217_v1  ;;  %v12235_v1 = vld [vmem:[#allocation23 + $0x178] sm:$0xff]  }
 0x6fb   :  { %11452 = vmatpush3.bf16.msra.mxu1 %v12218_v49  ;;  %11431 = vmatprep.subr.bf16.mxu0 %v12219_v57  ;;  %v12236_v49 = vld [vmem:[#allocation23 + $0x1f8] sm:$0xff]  }
 0x6fc   :  { %11453 = vmatprep.subr.bf16.mxu1 %v12220_v27  ;;  %v12237_v57 = vld [vmem:[#allocation23 + $0x138] sm:$0xff]  }
 0x6fd   :  { %v12238_v27 = vld [vmem:[#allocation23 + $0x1b8] sm:$0xff]  }
 0x6fe   :  { %11432 = vmatpush3.bf16.msra.mxu0 %v12221_v12  ;;  %v18255_v12 = vsub.s32 4, %v13127_v9 }
 0x6ff   :  { %11454 = vmatpush3.bf16.msra.mxu1 %v12222_v17  ;;  %11433 = vmatprep.subr.bf16.mxu0 %v12223_v14  ;;  %v18257_v14 = vsub.s32 6, %v13127_v9 }
 0x700   :  { %11455 = vmatprep.subr.bf16.mxu1 %v12224_v24  ;;  %v15095_v17 = vrot.slane %v15028_v8, %v18255_v12 }
 0x701   :  { %v15100_v24 = vrot.slane %v15028_v8, %v18257_v14 }
 0x702   :  { %11434 = vmatpush3.bf16.msra.mxu0 %v12225_v15  ;;  %18256 = vst [vmem:[#allocation606_spill] sm:$0xff] %v15095_v17  ;;  %v18258_v15 = vsub.s32 5, %v13127_v9 }
 0x703   :  { %11456 = vmatpush3.bf16.msra.mxu1 %v12226_v41  ;;  %11435 = vmatprep.subr.bf16.mxu0 %v12227_v38  ;;  %v18259_v38 = vsub.s32 7, %v13127_v9 }
 0x704   :  { %11457 = vmatprep.subr.bf16.mxu1 %v12228_v40  ;;  %v15105_v41 = vrot.slane %v15028_v8, %v18258_v15 }
 0x705   :  { %v15110_v40 = vrot.slane %v15028_v8, %v18259_v38 }
 0x706   :  { %11436 = vmatpush3.bf16.msra.mxu0 %v12229_v47 }
 0x707   :  { %11458 = vmatpush3.bf16.msra.mxu1 %v12230_v56  ;;  %11437 = vmatprep.subr.bf16.mxu0 %v12231_v13 }
 0x708   :  { %11459 = vmatprep.subr.bf16.mxu1 %v12232_v20 }
 0x70a   :  { %11438 = vmatpush3.bf16.msra.mxu0 %v12233_v0 }
 0x70b   :  { %11460 = vmatpush3.bf16.msra.mxu1 %v12234_v10  ;;  %11439 = vmatprep.subr.bf16.mxu0 %v12235_v1 }
 0x70c   :  { %11461 = vmatprep.subr.bf16.mxu1 %v12236_v49 }
 0x70e   :  { %11440 = vmatpush3.bf16.msra.mxu0 %v12237_v57 }
 0x70f   :  { %11462 = vmatpush3.bf16.msra.mxu1 %v12238_v27  ;;  %8072 = vmatprep.subr.bf16.mxu0 %v13180_v29 }
 0x710   :  { %8113 = vmatprep.subr.bf16.mxu1 %v13182_v30 }
 0x7a4   :  { %v7203_v47 = vpop.f32.mrb[32].mxu0 }
 0x7a5   :  { %v11653_v56 = vadd.f32 %v7203_v47, %v15095_v17  ;;  %v7367_v13 = vpop.f32.mrb[32].mxu1  ;;  %v7205_v20 = vpop.f32.mrb[33].mxu0 }
 0x7a6   :  { %v11655_v0 = vadd.f32 %v7367_v13, %v15100_v24  ;;  %v11654_v10 = vadd.f32 %v7205_v20, %v15105_v41  ;;  %v7369_v1 = vpop.f32.mrb[33].mxu1  ;;  %v7207_v49 = vpop.f32.mrb[34].mxu0  ;;  %v18263_v13 = vld [vmem:[#allocation48_spill] sm:$0xff] }
 0x7a7   :  { %v7378_v57 = vmax.f32 %v11653_v56, 0.0  ;;  %v11656_v27 = vadd.f32 %v7369_v1, %v15110_v40  ;;  %v7371_v12 = vpop.f32.mrb[34].mxu1  ;;  %v7208_v14 = vpop.f32.mrb[35].mxu0  ;;  %v18260_v56 = vmov 0  }
 0x7a8   :  { %v7380_v9 = vmax.f32 %v11655_v0, 0.0  ;;  %v7379_v15 = vmax.f32 %v11654_v10, 0.0  ;;  %v7372_v8 = vpop.f32.mrb[35].mxu1 }
 0x7a9   :  { %v7381_v38 = vmax.f32 %v11656_v27, 0.0  ;;  %v7386_v29 = vpack.c.bf16 %v7378_v57, %v7378_v57  ;;  %v18264_v57 = vld [vmem:[#allocation49_spill] sm:$0xff] }
 0x7aa   :  { %v7387_v30 = vpack.c.bf16 %v7379_v15, %v7379_v15  ;;  %v7388_v17 = vpack.c.bf16 %v7380_v9, %v7380_v9  ;;  %v18265_v9 = vld [vmem:[#allocation50_spill] sm:$0xff]  ;;  %v18266_v15 = vld [vmem:[#allocation51_spill] sm:$0xff] }
 0x7ab   :  { %v7389_v47 = vpack.c.bf16 %v7381_v38, %v7381_v38  ;;  %v18267_v38 = vld [vmem:[#allocation52_spill] sm:$0xff] }
 0x7ac   :  { %8014 = vmatprep.mubr.bf16.mxu0 %v7387_v30  ;;  %v18262_v30 = vld [vmem:[#allocation47_spill] sm:$0xff] }
 0x7ad   :  { %8054 = vmatprep.mubr.bf16.mxu1 %v7389_v47  ;;  %8015 = vmatmul.mubr.bf16.vlgmr.msra.gmra.mrb[40].mxu0 %v7386_v29  ;;  %v18261_v29 = vld [vmem:[#allocation46_spill] sm:$0xff] }
 0x7ae   :  { %8055 = vmatmul.mubr.bf16.vlgmr.msra.gmra.mrb[40].mxu1 %v7388_v17  ;;  %8073 = vmatpush1.bf16.msra.mxu0 %v13184_v35 }
 0x7af   :  { %8114 = vmatpush1.bf16.msra.mxu1 %v13186_v36  ;;  %8074 = vmatprep.subr.bf16.mxu0 %v13190_v37 }
 0x7b0   :  { %8115 = vmatprep.subr.bf16.mxu1 %v13192_v18  ;;  %8104 = vmatprep.mubr.bf16.mxu0 %v18260_v56 }
 0x7b1   :  { %8145 = vmatprep.mubr.bf16.mxu1 %v18260_v56 }
 0x7b2   :  { %8075 = vmatpush1.bf16.msra.mxu0 %v13198_v43 }
 0x7b3   :  { %8116 = vmatpush1.bf16.msra.mxu1 %v13200_v11  ;;  %8076 = vmatprep.subr.bf16.mxu0 %v13204_v45 }
 0x7b4   :  { %8117 = vmatprep.subr.bf16.mxu1 %v13206_v46 }
 0x7b6   :  { %8077 = vmatpush1.bf16.msra.mxu0 %v13212_v50 }
 0x7b7   :  { %8118 = vmatpush1.bf16.msra.mxu1 %v13214_v51  ;;  %8078 = vmatprep.subr.bf16.mxu0 %v13218_v52 }
 0x7b8   :  { %8119 = vmatprep.subr.bf16.mxu1 %v13220_v53 }
 0x7ba   :  { %8079 = vmatpush1.bf16.msra.mxu0 %v13224_v58 }
 0x7bb   :  { %8120 = vmatpush1.bf16.msra.mxu1 %v13226_v60  ;;  %8080 = vmatprep.subr.bf16.mxu0 %v13230_v61 }
 0x7bc   :  { %8121 = vmatprep.subr.bf16.mxu1 %v13232_v62 }
 0x7be   :  { %8081 = vmatpush1.bf16.msra.mxu0 %v13236_v3 }
 0x7bf   :  { %8122 = vmatpush1.bf16.msra.mxu1 %v13238_v4  ;;  %8082 = vmatprep.subr.bf16.mxu0 %v13242_v5 }
 0x7c0   :  { %8123 = vmatprep.subr.bf16.mxu1 %v13244_v6  ;;  %v18403_v6 = vld [vmem:[#allocation185_spill] sm:$0xff] }
 0x7c2   :  { %8083 = vmatpush1.bf16.msra.mxu0 %v13248_v19 }
 0x7c3   :  { %8124 = vmatpush1.bf16.msra.mxu1 %v18261_v29  ;;  %8084 = vmatprep.subr.bf16.mxu0 %v18262_v30  ;;  %v18268_v30 = vld [vmem:[#allocation53_spill] sm:$0xff] }
 0x7c4   :  { %v11397_v17 = vpop.f32.mrb[36].mxu0  ;;  %8125 = vmatprep.subr.bf16.mxu1 %v18263_v13  ;;  %v18269_v13 = vld [vmem:[#allocation54_spill] sm:$0xff] }
 0x7c5   :  { %v11419_v20 = vpop.f32.mrb[36].mxu1  ;;  %v11398_v0 = vpop.f32.mrb[37].mxu0 }
 0x7c6   :  { %v11399_v10 = vadd.f32 %v11398_v0, %v11397_v17  ;;  %v11420_v1 = vpop.f32.mrb[37].mxu1  ;;  %v11400_v49 = vpop.f32.mrb[38].mxu0  ;;  %8085 = vmatpush1.bf16.msra.mxu0 %v18264_v57  ;;  %v18270_v17 = vld [vmem:[#allocation55_spill] sm:$0xff]  ;;  %v18271_v0 = vld [vmem:[#allocation56_spill] sm:$0xff] }
 0x7c7   :  { %v11421_v27 = vadd.f32 %v11420_v1, %v11419_v20  ;;  %v11422_v12 = vpop.f32.mrb[38].mxu1  ;;  %v11401_v14 = vpop.f32.mrb[39].mxu0  ;;  %8126 = vmatpush1.bf16.msra.mxu1 %v18265_v9  ;;  %8086 = vmatprep.subr.bf16.mxu0 %v18266_v15 }
 0x7c8   :  { %v11423_v8 = vpop.f32.mrb[39].mxu1  ;;  %8127 = vmatprep.subr.bf16.mxu1 %v18267_v38 }
 0x7c9   :  { %v7977_v47 = vadd.f32 %v11421_v27, %v11399_v10  ;;  %v11336_v27 = vld [vmem:[#allocation25] ss:$0 sm:$0xff] }
 0x7ca   :  { %8087 = vmatpush1.bf16.msra.mxu0 %v18268_v30  ;;  %v12248_v30 = vld [vmem:[#allocation26] sm:$0xff] }
 0x7cb   :  { %8128 = vmatpush1.bf16.msra.mxu1 %v18269_v13  ;;  %8154 = vmatprep.subr.bf16.mxu0 %v18270_v17  ;;  %v18273_v17 = vld [vmem:[#allocation40_spill] sm:$0xff] }
 0x7cc   :  { %8195 = vmatprep.subr.bf16.mxu1 %v18271_v0 }
 0x880   :  { %v11441_v49 = vpop.f32.mrb[40].mxu0 }
 0x881   :  { %v11463_v20 = vpop.f32.mrb[40].mxu1  ;;  %v11442_v1 = vpop.f32.mrb[41].mxu0 }
 0x882   :  { %v11443_v12 = vadd.f32 %v11442_v1, %v11441_v49  ;;  %v11464_v14 = vpop.f32.mrb[41].mxu1  ;;  %v11444_v9 = vpop.f32.mrb[42].mxu0  ;;  %v18274_v49 = vld [vmem:[#allocation41_spill] sm:$0xff]  ;;  %v18284_v1 = vld [vmem:[#allocation66_spill] sm:$0xff] }
 0x883   :  { %v11465_v57 = vadd.f32 %v11464_v14, %v11463_v20  ;;  %v11466_v15 = vpop.f32.mrb[42].mxu1  ;;  %v11445_v8 = vpop.f32.mrb[43].mxu0  ;;  %v18275_v9 = vld [vmem:[#allocation57_spill] sm:$0xff]  ;;  %v18286_v14 = vld [vmem:[#allocation68_spill] sm:$0xff] }
 0x884   :  { %v8017_v29 = vadd.f32 %v11443_v12, %v7977_v47  ;;  %v11467_v38 = vpop.f32.mrb[43].mxu1  ;;  %v18276_v15 = vld [vmem:[#allocation58_spill] sm:$0xff]  ;;  %v18282_v47 = vld [vmem:[#allocation64_spill] sm:$0xff]  ;;  %v18283_v20 = vld [vmem:[#allocation65_spill] sm:$0xff] }
 0x885   :  { %v18281_v38 = vld [vmem:[#allocation63_spill] sm:$0xff]  ;;  %v18287_v8 = vld [vmem:[#allocation69_spill] sm:$0xff] }
 0x886   :  { %v8057_v10 = vadd.f32 %v11465_v57, %v8017_v29  ;;  %v18277_v29 = vld [vmem:[#allocation59_spill] sm:$0xff]  ;;  %v18280_v57 = vld [vmem:[#allocation62_spill] sm:$0xff] }
 0x887   :  { %v18285_v12 = vld [vmem:[#allocation67_spill] sm:$0xff] }
 0x888   :  { %v8062_v19 = vadd.f32 %v12248_v30, %v8057_v10  ;;  %v18279_v30 = vld [vmem:[#allocation61_spill] sm:$0xff]  ;;  %v18288_v10 = vld [vmem:[#allocation70_spill] sm:$0xff] }
 0x88a   :  { %v15150_v13 = vadd.f32 %v11336_v27, %v8062_v19  ;;  %v18278_v19 = vld [vmem:[#allocation60_spill] sm:$0xff]  ;;  %v18289_v27 = vld [vmem:[#allocation71_spill] sm:$0xff] }
 0x88c   :  { %18272 = vst [vmem:[#allocation607_spill] sm:$0xff] %v15150_v13  ;;  %v8071_v0 = vpack.c.bf16 %v15150_v13, %v15150_v13 }
 0x88e   :  { %8105 = vmatmul.mubr.bf16.vlgmr.msra.gmra.mrb[44].mxu0 %v8071_v0  ;;  %8146 = vmatmul.mubr.bf16.vlgmr.msra.gmra.mrb[44].mxu1 %v8071_v0 }
 0x88f   :  { %8155 = vmatpush1.bf16.msra.mxu0 %v18273_v17  ;;  %8196 = vmatpush1.bf16.msra.mxu1 %v18274_v49 }
 0x890   :  { %8156 = vmatprep.subr.bf16.mxu0 %v18275_v9  ;;  %8197 = vmatprep.subr.bf16.mxu1 %v18276_v15 }
 0x891   :  { %8186 = vmatprep.mubr.bf16.mxu0 %v18260_v56  ;;  %8227 = vmatprep.mubr.bf16.mxu1 %v18260_v56 }
 0x893   :  { %8157 = vmatpush1.bf16.msra.mxu0 %v18277_v29  ;;  %8198 = vmatpush1.bf16.msra.mxu1 %v18278_v19 }
 0x894   :  { %8158 = vmatprep.subr.bf16.mxu0 %v18279_v30  ;;  %8199 = vmatprep.subr.bf16.mxu1 %v18280_v57  ;;  %v18290_v30 = vld [vmem:[#allocation72_spill] sm:$0xff]  ;;  %v18291_v57 = vld [vmem:[#allocation73_spill] sm:$0xff] }
 0x897   :  { %8159 = vmatpush1.bf16.msra.mxu0 %v18281_v38  ;;  %8200 = vmatpush1.bf16.msra.mxu1 %v18282_v47  ;;  %v18292_v38 = vld [vmem:[#allocation74_spill] sm:$0xff]  ;;  %v18293_v47 = vld [vmem:[#allocation75_spill] sm:$0xff] }
 0x898   :  { %8160 = vmatprep.subr.bf16.mxu0 %v18283_v20  ;;  %8201 = vmatprep.subr.bf16.mxu1 %v18284_v1  ;;  %v18294_v20 = vld [vmem:[#allocation76_spill] sm:$0xff]  ;;  %v18295_v1 = vld [vmem:[#allocation77_spill] sm:$0xff] }
 0x89b   :  { %8161 = vmatpush1.bf16.msra.mxu0 %v18285_v12  ;;  %8202 = vmatpush1.bf16.msra.mxu1 %v18286_v14  ;;  %v18296_v12 = vld [vmem:[#allocation78_spill] sm:$0xff]  ;;  %v18297_v14 = vld [vmem:[#allocation79_spill] sm:$0xff] }
 0x89c   :  { %8162 = vmatprep.subr.bf16.mxu0 %v18287_v8  ;;  %8203 = vmatprep.subr.bf16.mxu1 %v18288_v10  ;;  %v18298_v8 = vld [vmem:[#allocation80_spill] sm:$0xff]  ;;  %v18299_v10 = vld [vmem:[#allocation81_spill] sm:$0xff] }
 0x89f   :  { %8163 = vmatpush1.bf16.msra.mxu0 %v18289_v27  ;;  %8204 = vmatpush1.bf16.msra.mxu1 %v18290_v30  ;;  %v18300_v27 = vld [vmem:[#allocation82_spill] sm:$0xff]  ;;  %v18301_v30 = vld [vmem:[#allocation83_spill] sm:$0xff] }
 0x8a0   :  { %8164 = vmatprep.subr.bf16.mxu0 %v18291_v57  ;;  %8205 = vmatprep.subr.bf16.mxu1 %v18292_v38  ;;  %v18302_v57 = vld [vmem:[#allocation84_spill] sm:$0xff]  ;;  %v18303_v38 = vld [vmem:[#allocation85_spill] sm:$0xff] }
 0x8a3   :  { %8165 = vmatpush1.bf16.msra.mxu0 %v18293_v47  ;;  %8206 = vmatpush1.bf16.msra.mxu1 %v18294_v20  ;;  %v18304_v47 = vld [vmem:[#allocation86_spill] sm:$0xff] }
 0x8a4   :  { %8166 = vmatprep.subr.bf16.mxu0 %v18295_v1  ;;  %8207 = vmatprep.subr.bf16.mxu1 %v18296_v12  ;;  %v18305_v1 = vld [vmem:[#allocation87_spill] sm:$0xff]  ;;  %v18306_v12 = vld [vmem:[#allocation88_spill] sm:$0xff] }
 0x8a7   :  { %8167 = vmatpush1.bf16.msra.mxu0 %v18297_v14  ;;  %8208 = vmatpush1.bf16.msra.mxu1 %v18298_v8  ;;  %v18307_v14 = vld [vmem:[#allocation89_spill] sm:$0xff]  ;;  %v18308_v8 = vld [vmem:[#allocation90_spill] sm:$0xff] }
 0x8a8   :  { %8168 = vmatprep.subr.bf16.mxu0 %v18299_v10  ;;  %8209 = vmatprep.subr.bf16.mxu1 %v18300_v27  ;;  %v18309_v10 = vld [vmem:[#allocation91_spill] sm:$0xff]  ;;  %v18310_v27 = vld [vmem:[#allocation92_spill] sm:$0xff] }
 0x8ab   :  { %8169 = vmatpush1.bf16.msra.mxu0 %v18301_v30  ;;  %8210 = vmatpush1.bf16.msra.mxu1 %v18302_v57  ;;  %v18311_v30 = vld [vmem:[#allocation93_spill] sm:$0xff]  ;;  %v18312_v57 = vld [vmem:[#allocation94_spill] sm:$0xff] }
 0x8ac   :  { %8260 = vmatprep.subr.bf16.mxu0 %v18303_v38  ;;  %8424 = vmatprep.subr.bf16.mxu1 %v18304_v47  ;;  %v18313_v38 = vld [vmem:[#allocation95_spill] sm:$0xff]  ;;  %v18314_v47 = vld [vmem:[#allocation96_spill] sm:$0xff] }
 0x8ae   :  { %8187 = vmatmul.mubr.bf16.vlgmr.msra.gmra.mrb[48].mxu0 %v8071_v0  ;;  %8228 = vmatmul.mubr.bf16.vlgmr.msra.gmra.mrb[48].mxu1 %v8071_v0  ;;  %v18315_v0 = vld [vmem:[#allocation97_spill] sm:$0xff] }
 0x8af   :  { %8261 = vmatpush1.bf16.msra.mxu0 %v18305_v1  ;;  %8425 = vmatpush1.bf16.msra.mxu1 %v18306_v12  ;;  %v18316_v1 = vld [vmem:[#allocation98_spill] sm:$0xff]  ;;  %v18317_v12 = vld [vmem:[#allocation99_spill] sm:$0xff] }
 0x8b0   :  { %8262 = vmatprep.subr.bf16.mxu0 %v18307_v14  ;;  %8426 = vmatprep.subr.bf16.mxu1 %v18308_v8  ;;  %v18318_v14 = vld [vmem:[#allocation100_spill] sm:$0xff]  ;;  %v18319_v8 = vld [vmem:[#allocation101_spill] sm:$0xff] }
 0x8b3   :  { %8263 = vmatpush1.bf16.msra.mxu0 %v18309_v10  ;;  %8427 = vmatpush1.bf16.msra.mxu1 %v18310_v27  ;;  %v18320_v10 = vld [vmem:[#allocation102_spill] sm:$0xff]  ;;  %v18321_v27 = vld [vmem:[#allocation103_spill] sm:$0xff] }
 0x8b4   :  { %8264 = vmatprep.subr.bf16.mxu0 %v18311_v30  ;;  %8428 = vmatprep.subr.bf16.mxu1 %v18312_v57  ;;  %v18322_v30 = vld [vmem:[#allocation104_spill] sm:$0xff]  ;;  %v18323_v57 = vld [vmem:[#allocation105_spill] sm:$0xff] }
 0x8b7   :  { %8265 = vmatpush1.bf16.msra.mxu0 %v18313_v38  ;;  %8429 = vmatpush1.bf16.msra.mxu1 %v18314_v47  ;;  %v18324_v38 = vld [vmem:[#allocation106_spill] sm:$0xff]  ;;  %v18325_v47 = vld [vmem:[#allocation107_spill] sm:$0xff] }
 0x8b8   :  { %8266 = vmatprep.subr.bf16.mxu0 %v18315_v0  ;;  %8430 = vmatprep.subr.bf16.mxu1 %v18316_v1  ;;  %v18326_v0 = vld [vmem:[#allocation108_spill] sm:$0xff]  ;;  %v18327_v1 = vld [vmem:[#allocation109_spill] sm:$0xff] }
 0x8bb   :  { %8267 = vmatpush1.bf16.msra.mxu0 %v18317_v12  ;;  %8431 = vmatpush1.bf16.msra.mxu1 %v18318_v14  ;;  %v18328_v12 = vld [vmem:[#allocation110_spill] sm:$0xff]  ;;  %v18329_v14 = vld [vmem:[#allocation111_spill] sm:$0xff] }
 0x8bc   :  { %8268 = vmatprep.subr.bf16.mxu0 %v18319_v8  ;;  %8432 = vmatprep.subr.bf16.mxu1 %v18320_v10  ;;  %v18330_v8 = vld [vmem:[#allocation112_spill] sm:$0xff]  ;;  %v18331_v10 = vld [vmem:[#allocation113_spill] sm:$0xff] }
 0x8bf   :  { %8269 = vmatpush1.bf16.msra.mxu0 %v18321_v27  ;;  %8433 = vmatpush1.bf16.msra.mxu1 %v18322_v30  ;;  %v18332_v27 = vld [vmem:[#allocation114_spill] sm:$0xff]  ;;  %v18333_v30 = vld [vmem:[#allocation115_spill] sm:$0xff] }
 0x8c0   :  { %8270 = vmatprep.subr.bf16.mxu0 %v18323_v57  ;;  %8434 = vmatprep.subr.bf16.mxu1 %v18324_v38  ;;  %v18334_v57 = vld [vmem:[#allocation116_spill] sm:$0xff]  ;;  %v18335_v38 = vld [vmem:[#allocation117_spill] sm:$0xff] }
 0x8c3   :  { %8271 = vmatpush1.bf16.msra.mxu0 %v18325_v47  ;;  %8435 = vmatpush1.bf16.msra.mxu1 %v18326_v0  ;;  %v18336_v47 = vld [vmem:[#allocation118_spill] sm:$0xff]  ;;  %v18337_v0 = vld [vmem:[#allocation119_spill] sm:$0xff] }
 0x8c4   :  { %8272 = vmatprep.subr.bf16.mxu0 %v18327_v1  ;;  %8436 = vmatprep.subr.bf16.mxu1 %v18328_v12  ;;  %v18338_v1 = vld [vmem:[#allocation120_spill] sm:$0xff]  ;;  %v18339_v12 = vld [vmem:[#allocation121_spill] sm:$0xff] }
 0x8c7   :  { %8273 = vmatpush1.bf16.msra.mxu0 %v18329_v14  ;;  %8437 = vmatpush1.bf16.msra.mxu1 %v18330_v8  ;;  %v18340_v14 = vld [vmem:[#allocation122_spill] sm:$0xff]  ;;  %v18341_v8 = vld [vmem:[#allocation123_spill] sm:$0xff] }
 0x8c8   :  { %8274 = vmatprep.subr.bf16.mxu0 %v18331_v10  ;;  %8438 = vmatprep.subr.bf16.mxu1 %v18332_v27  ;;  %v18342_v10 = vld [vmem:[#allocation124_spill] sm:$0xff]  ;;  %v18343_v27 = vld [vmem:[#allocation125_spill] sm:$0xff] }
 0x8cb   :  { %8275 = vmatpush1.bf16.msra.mxu0 %v18333_v30  ;;  %8439 = vmatpush1.bf16.msra.mxu1 %v18334_v57  ;;  %v18344_v30 = vld [vmem:[#allocation126_spill] sm:$0xff]  ;;  %v18345_v57 = vld [vmem:[#allocation127_spill] sm:$0xff] }
 0x8cc   :  { %8276 = vmatprep.subr.bf16.mxu0 %v18335_v38  ;;  %8440 = vmatprep.subr.bf16.mxu1 %v18336_v47  ;;  %v18346_v38 = vld [vmem:[#allocation128_spill] sm:$0xff]  ;;  %v18347_v47 = vld [vmem:[#allocation129_spill] sm:$0xff] }
 0x8cf   :  { %8277 = vmatpush1.bf16.msra.mxu0 %v18337_v0  ;;  %8441 = vmatpush1.bf16.msra.mxu1 %v18338_v1  ;;  %v18348_v0 = vld [vmem:[#allocation130_spill] sm:$0xff]  ;;  %v18349_v1 = vld [vmem:[#allocation131_spill] sm:$0xff] }
 0x8d0   :  { %8278 = vmatprep.subr.bf16.mxu0 %v18339_v12  ;;  %8442 = vmatprep.subr.bf16.mxu1 %v18340_v14  ;;  %v18350_v12 = vld [vmem:[#allocation132_spill] sm:$0xff]  ;;  %v18351_v14 = vld [vmem:[#allocation133_spill] sm:$0xff] }
 0x8d3   :  { %8279 = vmatpush1.bf16.msra.mxu0 %v18341_v8  ;;  %8443 = vmatpush1.bf16.msra.mxu1 %v18342_v10  ;;  %v18352_v8 = vld [vmem:[#allocation134_spill] sm:$0xff]  ;;  %v18353_v10 = vld [vmem:[#allocation135_spill] sm:$0xff] }
 0x8d4   :  { %8280 = vmatprep.subr.bf16.mxu0 %v18343_v27  ;;  %8444 = vmatprep.subr.bf16.mxu1 %v18344_v30  ;;  %v18354_v27 = vld [vmem:[#allocation136_spill] sm:$0xff]  ;;  %v18355_v30 = vld [vmem:[#allocation137_spill] sm:$0xff] }
 0x8d7   :  { %8281 = vmatpush1.bf16.msra.mxu0 %v18345_v57  ;;  %8445 = vmatpush1.bf16.msra.mxu1 %v18346_v38  ;;  %v18356_v57 = vld [vmem:[#allocation138_spill] sm:$0xff]  ;;  %v18357_v38 = vld [vmem:[#allocation139_spill] sm:$0xff] }
 0x8d8   :  { %8282 = vmatprep.subr.bf16.mxu0 %v18347_v47  ;;  %8446 = vmatprep.subr.bf16.mxu1 %v18348_v0  ;;  %v18358_v47 = vld [vmem:[#allocation140_spill] sm:$0xff]  ;;  %v18359_v0 = vld [vmem:[#allocation141_spill] sm:$0xff] }
 0x8db   :  { %8283 = vmatpush1.bf16.msra.mxu0 %v18349_v1  ;;  %8447 = vmatpush1.bf16.msra.mxu1 %v18350_v12  ;;  %v18360_v1 = vld [vmem:[#allocation142_spill] sm:$0xff]  ;;  %v18361_v12 = vld [vmem:[#allocation143_spill] sm:$0xff] }
 0x8dc   :  { %8284 = vmatprep.subr.bf16.mxu0 %v18351_v14  ;;  %8448 = vmatprep.subr.bf16.mxu1 %v18352_v8  ;;  %v18362_v14 = vld [vmem:[#allocation144_spill] sm:$0xff]  ;;  %v18363_v8 = vld [vmem:[#allocation145_spill] sm:$0xff] }
 0x8df   :  { %8285 = vmatpush1.bf16.msra.mxu0 %v18353_v10  ;;  %8449 = vmatpush1.bf16.msra.mxu1 %v18354_v27  ;;  %v18364_v10 = vld [vmem:[#allocation146_spill] sm:$0xff]  ;;  %v18365_v27 = vld [vmem:[#allocation147_spill] sm:$0xff] }
 0x8e0   :  { %8286 = vmatprep.subr.bf16.mxu0 %v18355_v30  ;;  %8450 = vmatprep.subr.bf16.mxu1 %v18356_v57  ;;  %v18366_v30 = vld [vmem:[#allocation148_spill] sm:$0xff]  ;;  %v18367_v57 = vld [vmem:[#allocation149_spill] sm:$0xff] }
 0x8e3   :  { %8287 = vmatpush1.bf16.msra.mxu0 %v18357_v38  ;;  %8451 = vmatpush1.bf16.msra.mxu1 %v18358_v47  ;;  %v18368_v38 = vld [vmem:[#allocation152_spill] sm:$0xff] }
 0x8e4   :  { %8288 = vmatprep.subr.bf16.mxu0 %v18359_v0  ;;  %8452 = vmatprep.subr.bf16.mxu1 %v18360_v1  ;;  %v18369_v1 = vld [vmem:[#allocation153_spill] sm:$0xff] }
 0x8e7   :  { %8289 = vmatpush1.bf16.msra.mxu0 %v18361_v12  ;;  %8453 = vmatpush1.bf16.msra.mxu1 %v18362_v14  ;;  %v18370_v14 = vld [vmem:[#allocation154_spill] sm:$0xff] }
 0x8e8   :  { %8290 = vmatprep.subr.bf16.mxu0 %v18363_v8  ;;  %8454 = vmatprep.subr.bf16.mxu1 %v18364_v10  ;;  %v18371_v8 = vld [vmem:[#allocation155_spill] sm:$0xff] }
 0x8eb   :  { %8291 = vmatpush1.bf16.msra.mxu0 %v18365_v27  ;;  %8455 = vmatpush1.bf16.msra.mxu1 %v18366_v30 }
 0x8ec   :  { %8301 = vmatprep.subr.bf16.mxu0 %v18367_v57  ;;  %8465 = vmatprep.subr.bf16.mxu1 %v18368_v38 }
 0x961   :  { %v8106_v47 = vpop.f32.mrb[44].mxu0  ;;  %v15252_v0 = vpop.f32.mrb[44].mxu1 }
 0x962   :  { %v8236_v20 = vadd.f32 %v8106_v47, %v18369_v1  ;;  %v8108_v12 = vpop.f32.mrb[45].mxu0  ;;  %v8149_v19 = vpop.f32.mrb[45].mxu1  ;;  %v18402_v1 = vld [vmem:[#allocation184_spill] sm:$0xff] }
 0x963   :  { %v8237_v29 = vadd.f32 %v8108_v12, %v18370_v14  ;;  %v8239_v15 = vadd.f32 %v8149_v19, %v18371_v8  ;;  %v8110_v10 = vpop.f32.mrb[46].mxu0  ;;  %v8151_v9 = vpop.f32.mrb[46].mxu1  ;;  %v18377_v19 = vld [vmem:[#allocation159_spill] sm:$0xff] }
 0x964   :  { %v8244_v27 = vmax.f32 %v8236_v20, 0.0  ;;  %v8111_v49 = vpop.f32.mrb[47].mxu0  ;;  %v8152_v30 = vpop.f32.mrb[47].mxu1  ;;  %v18372_v9 = vld [vmem:[#allocation150_spill] sm:$0xff]  ;;  %v18381_v12 = vld [vmem:[#allocation163_spill] sm:$0xff]  ;;  %v18382_v10 = vld [vmem:[#allocation164_spill] sm:$0xff] }
 0x965   :  { %v8245_v17 = vmax.f32 %v8237_v29, 0.0  ;;  %v8247_v57 = vmax.f32 %v8239_v15, 0.0  ;;  %v18373_v49 = vld [vmem:[#allocation151_spill] sm:$0xff]  ;;  %v18375_v15 = vld [vmem:[#allocation157_spill] sm:$0xff]  ;;  %v18376_v29 = vld [vmem:[#allocation158_spill] sm:$0xff] }
 0x966   :  { %v15259_v38 = vpack.c.bf16 %v8244_v27, %v8244_v27  ;;  %v18378_v30 = vld [vmem:[#allocation160_spill] sm:$0xff]  ;;  %v18380_v20 = vld [vmem:[#allocation162_spill] sm:$0xff]  ;;  %v18383_v27 = vld [vmem:[#allocation165_spill] sm:$0xff] }
 0x967   :  { %v15257_v13 = vpack.c.bf16 %v8245_v17, %v8245_v17  ;;  %v15263_v47 = vpack.c.bf16 %v8247_v57, %v8247_v57  ;;  %v18374_v17 = vld [vmem:[#allocation156_spill] sm:$0xff]  ;;  %v18379_v57 = vld [vmem:[#allocation161_spill] sm:$0xff]  ;;  %v18401_v14 = vld [vmem:[#allocation183_spill] sm:$0xff] }
 0x969   :  { %8292 = vmatprep.mubr.bf16.mxu0 %v15257_v13  ;;  %8456 = vmatprep.mubr.bf16.mxu1 %v15257_v13 }
 0x96a   :  { %8293 = vmatmul.mubr.bf16.vlgmr.msra.gmra.mrb[52].mxu0 %v15259_v38  ;;  %8457 = vmatmul.mubr.bf16.vlgmr.msra.gmra.mrb[52].mxu1 %v15259_v38 }
 0x96b   :  { %8302 = vmatpush1.bf16.msra.mxu0 %v18372_v9  ;;  %8466 = vmatpush1.bf16.msra.mxu1 %v18373_v49  ;;  %v18384_v49 = vld [vmem:[#allocation166_spill] sm:$0xff] }
 0x96c   :  { %8333 = vmatprep.mubr.bf16.mxu0 %v15263_v47  ;;  %8497 = vmatprep.mubr.bf16.mxu1 %v15263_v47 }
 0x96d   :  { %8303 = vmatprep.subr.bf16.mxu0 %v18374_v17  ;;  %8467 = vmatprep.subr.bf16.mxu1 %v18375_v15  ;;  %v18385_v17 = vld [vmem:[#allocation167_spill] sm:$0xff]  ;;  %v18386_v15 = vld [vmem:[#allocation168_spill] sm:$0xff] }
 0x96f   :  { %8304 = vmatpush1.bf16.msra.mxu0 %v18376_v29  ;;  %8468 = vmatpush1.bf16.msra.mxu1 %v18377_v19  ;;  %v18387_v29 = vld [vmem:[#allocation169_spill] sm:$0xff]  ;;  %v18388_v19 = vld [vmem:[#allocation170_spill] sm:$0xff] }
 0x970   :  { %8305 = vmatprep.subr.bf16.mxu0 %v18378_v30  ;;  %8469 = vmatprep.subr.bf16.mxu1 %v18379_v57  ;;  %v18389_v30 = vld [vmem:[#allocation171_spill] sm:$0xff]  ;;  %v18390_v57 = vld [vmem:[#allocation172_spill] sm:$0xff] }
 0x973   :  { %8306 = vmatpush1.bf16.msra.mxu0 %v18380_v20  ;;  %8470 = vmatpush1.bf16.msra.mxu1 %v18381_v12  ;;  %v18391_v20 = vld [vmem:[#allocation173_spill] sm:$0xff]  ;;  %v18392_v12 = vld [vmem:[#allocation174_spill] sm:$0xff] }
 0x974   :  { %8307 = vmatprep.subr.bf16.mxu0 %v18382_v10  ;;  %8471 = vmatprep.subr.bf16.mxu1 %v18383_v27  ;;  %v18393_v10 = vld [vmem:[#allocation175_spill] sm:$0xff]  ;;  %v18394_v27 = vld [vmem:[#allocation176_spill] sm:$0xff] }
 0x977   :  { %8308 = vmatpush1.bf16.msra.mxu0 %v18384_v49  ;;  %8472 = vmatpush1.bf16.msra.mxu1 %v18385_v17  ;;  %v18395_v49 = vld [vmem:[#allocation177_spill] sm:$0xff] }
 0x978   :  { %8309 = vmatprep.subr.bf16.mxu0 %v18386_v15  ;;  %8473 = vmatprep.subr.bf16.mxu1 %v18387_v29 }
 0x97b   :  { %8310 = vmatpush1.bf16.msra.mxu0 %v18388_v19  ;;  %8474 = vmatpush1.bf16.msra.mxu1 %v18389_v30 }
 0x97c   :  { %8311 = vmatprep.subr.bf16.mxu0 %v18390_v57  ;;  %8475 = vmatprep.subr.bf16.mxu1 %v18391_v20  ;;  %v18396_v57 = vld [vmem:[#allocation178_spill] sm:$0xff]  ;;  %v18397_v20 = vld [vmem:[#allocation179_spill] sm:$0xff] }
 0x97f   :  { %8312 = vmatpush1.bf16.msra.mxu0 %v18392_v12  ;;  %8476 = vmatpush1.bf16.msra.mxu1 %v18393_v10  ;;  %v18398_v10 = vld [vmem:[#allocation180_spill] sm:$0xff] }
 0x980   :  { %8313 = vmatprep.subr.bf16.mxu0 %v18394_v27  ;;  %8477 = vmatprep.subr.bf16.mxu1 %v18395_v49  ;;  %v18399_v27 = vld [vmem:[#allocation181_spill] sm:$0xff]  ;;  %v18400_v49 = vld [vmem:[#allocation182_spill] sm:$0xff] }
 0x981   :  { %v15293_v17 = vpop.f32.mrb[48].mxu0  ;;  %v15295_v15 = vpop.f32.mrb[48].mxu1 }
 0x982   :  { %v8190_v29 = vpop.f32.mrb[49].mxu0  ;;  %v15297_v19 = vpop.f32.mrb[49].mxu1 }
 0x983   :  { %v8192_v30 = vpop.f32.mrb[50].mxu0  ;;  %v8233_v9 = vpop.f32.mrb[50].mxu1  ;;  %8314 = vmatpush1.bf16.msra.mxu0 %v18396_v57  ;;  %8478 = vmatpush1.bf16.msra.mxu1 %v18397_v20  ;;  %v18406_v57 = vld [vmem:[#allocation188_spill] sm:$0xff] }
 0x984   :  { %v8193_v12 = vpop.f32.mrb[51].mxu0  ;;  %v8234_v8 = vpop.f32.mrb[51].mxu1  ;;  %8315 = vmatprep.subr.bf16.mxu0 %v18398_v10  ;;  %8479 = vmatprep.subr.bf16.mxu1 %v18399_v27  ;;  %v18404_v30 = vld [vmem:[#allocation186_spill] sm:$0xff]  ;;  %v18405_v9 = vld [vmem:[#allocation187_spill] sm:$0xff]  ;;  %v18410_v27 = vld [vmem:[#allocation192_spill] sm:$0xff] }
 0x985   :  { %v18407_v12 = vld [vmem:[#allocation189_spill] sm:$0xff]  ;;  %v18408_v8 = vld [vmem:[#allocation190_spill] sm:$0xff]  ;;  %v18409_v10 = vld [vmem:[#allocation191_spill] sm:$0xff] }
 0x987   :  { %8316 = vmatpush1.bf16.msra.mxu0 %v18400_v49  ;;  %8480 = vmatpush1.bf16.msra.mxu1 %v18401_v14  ;;  %v18411_v49 = vld [vmem:[#allocation193_spill] sm:$0xff]  ;;  %v18412_v14 = vld [vmem:[#allocation194_spill] sm:$0xff] }
 0x988   :  { %8317 = vmatprep.subr.bf16.mxu0 %v18402_v1  ;;  %8481 = vmatprep.subr.bf16.mxu1 %v18403_v6  ;;  %v18413_v1 = vld [vmem:[#allocation195_spill] sm:$0xff]  ;;  %v18414_v6 = vld [vmem:[#allocation196_spill] sm:$0xff] }
 0x98b   :  { %8318 = vmatpush1.bf16.msra.mxu0 %v18404_v30  ;;  %8482 = vmatpush1.bf16.msra.mxu1 %v18405_v9  ;;  %v18415_v30 = vld [vmem:[#allocation197_spill] sm:$0xff]  ;;  %v18416_v9 = vld [vmem:[#allocation198_spill] sm:$0xff] }
 0x98c   :  { %8319 = vmatprep.subr.bf16.mxu0 %v18406_v57  ;;  %8483 = vmatprep.subr.bf16.mxu1 %v18407_v12  ;;  %v18417_v57 = vld [vmem:[#allocation199_spill] sm:$0xff]  ;;  %v18418_v12 = vld [vmem:[#allocation200_spill] sm:$0xff] }
 0x98f   :  { %8320 = vmatpush1.bf16.msra.mxu0 %v18408_v8  ;;  %8484 = vmatpush1.bf16.msra.mxu1 %v18409_v10  ;;  %v18419_v8 = vld [vmem:[#allocation201_spill] sm:$0xff]  ;;  %v18420_v10 = vld [vmem:[#allocation202_spill] sm:$0xff] }
 0x990   :  { %8321 = vmatprep.subr.bf16.mxu0 %v18410_v27  ;;  %8485 = vmatprep.subr.bf16.mxu1 %v18411_v49  ;;  %v18431_v49 = vld [vmem:[#allocation217_spill] sm:$0xff] }
 0x993   :  { %8322 = vmatpush1.bf16.msra.mxu0 %v18412_v14  ;;  %8486 = vmatpush1.bf16.msra.mxu1 %v18413_v1  ;;  %v18421_v1 = vld [vmem:[#allocation206_spill] sm:$0xff] }
 0x994   :  { %8323 = vmatprep.subr.bf16.mxu0 %v18414_v6  ;;  %8487 = vmatprep.subr.bf16.mxu1 %v18415_v30  ;;  %v18422_v6 = vld [vmem:[#allocation207_spill] sm:$0xff]  ;;  %v18423_v30 = vld [vmem:[#allocation210_spill] sm:$0xff] }
 0x997   :  { %8324 = vmatpush1.bf16.msra.mxu0 %v18416_v9  ;;  %8488 = vmatpush1.bf16.msra.mxu1 %v18417_v57  ;;  %v8238_v9 = vadd.f32 %v15252_v0, %v18423_v30  ;;  %v18424_v57 = vld [vmem:[#allocation208_spill] sm:$0xff] }
 0x998   :  { %8325 = vmatprep.subr.bf16.mxu0 %v18418_v12  ;;  %8489 = vmatprep.subr.bf16.mxu1 %v18419_v8  ;;  %v18425_v12 = vld [vmem:[#allocation209_spill] sm:$0xff]  ;;  %v18426_v8 = vld [vmem:[#allocation211_spill] sm:$0xff] }
 0x999   :  { %v8241_v14 = vadd.f32 %v8190_v29, %v18426_v8 }
 0x99b   :  { %8326 = vmatpush1.bf16.msra.mxu0 %v18420_v10  ;;  %8490 = vmatpush1.bf16.msra.mxu1 %v13785_v33  ;;  %v18427_v10 = vld [vmem:[#allocation212_spill] sm:$0xff]  ;;  %v18428_v33 = vld [vmem:[#allocation214_spill] sm:$0xff] }
 0x99c   :  { %8327 = vmatprep.subr.bf16.mxu0 %v13789_v16  ;;  %8491 = vmatprep.subr.bf16.mxu1 %v13791_v28  ;;  %v8246_v16 = vmax.f32 %v8238_v9, 0.0  ;;  %v18429_v28 = vld [vmem:[#allocation215_spill] sm:$0xff]  ;;  %v18434_v9 = vld [vmem:[#allocation220_spill] sm:$0xff] }
 0x99e   :  { %v15340_v0 = vpack.c.bf16 %v8246_v16, %v8246_v16  ;;  %v18436_v16 = vld [vmem:[#allocation222_spill] sm:$0xff] }
 0x99f   :  { %8328 = vmatpush1.bf16.msra.mxu0 %v18421_v1  ;;  %8492 = vmatpush1.bf16.msra.mxu1 %v18422_v6  ;;  %v8249_v1 = vmax.f32 %v8241_v14, 0.0  ;;  %v18430_v6 = vld [vmem:[#allocation216_spill] sm:$0xff]  ;;  %v18435_v14 = vld [vmem:[#allocation221_spill] sm:$0xff] }
 0x9a0   :  { %8329 = vmatprep.subr.bf16.mxu0 %v18424_v57  ;;  %8493 = vmatprep.subr.bf16.mxu1 %v18425_v12  ;;  %v18432_v57 = vld [vmem:[#allocation218_spill] sm:$0xff]  ;;  %v18433_v12 = vld [vmem:[#allocation219_spill] sm:$0xff] }
 0x9a1   :  { %v15344_v29 = vpack.c.bf16 %v8249_v1, %v8249_v1  ;;  %v18439_v1 = vld [vmem:[#allocation225_spill] sm:$0xff] }
 0x9a3   :  { %8330 = vmatpush1.bf16.msra.mxu0 %v18427_v10  ;;  %8494 = vmatpush1.bf16.msra.mxu1 %v13820_v48  ;;  %v18446_v48 = vld [vmem:[#allocation232_spill] sm:$0xff] }
 0x9a4   :  { %8331 = vmatprep.subr.bf16.mxu0 %v18428_v33  ;;  %8495 = vmatprep.subr.bf16.mxu1 %v18429_v28  ;;  %v18442_v28 = vld [vmem:[#allocation228_spill] sm:$0xff]  ;;  %v18444_v33 = vld [vmem:[#allocation230_spill] sm:$0xff] }
 0x9a7   :  { %8332 = vmatpush1.bf16.msra.mxu0 %v18430_v6  ;;  %8496 = vmatpush1.bf16.msra.mxu1 %v18431_v49  ;;  %v18437_v49 = vld [vmem:[#allocation223_spill] sm:$0xff] }
 0x9a8   :  { %8342 = vmatprep.subr.bf16.mxu0 %v18432_v57  ;;  %8506 = vmatprep.subr.bf16.mxu1 %v18433_v12  ;;  %v18438_v57 = vld [vmem:[#allocation224_spill] sm:$0xff]  ;;  %v18440_v12 = vld [vmem:[#allocation226_spill] sm:$0xff]  ;;  %v18441_v6 = vld [vmem:[#allocation227_spill] sm:$0xff] }
 0x9aa   :  { %8334 = vmatmul.mubr.bf16.vlgmr.msra.gmra.mrb[52].mxu0 %v15340_v0  ;;  %8498 = vmatmul.mubr.bf16.vlgmr.msra.gmra.mrb[52].mxu1 %v15340_v0 }
 0x9ab   :  { %8343 = vmatpush1.bf16.msra.mxu0 %v18434_v9  ;;  %8374 = vmatprep.mubr.bf16.mxu0 %v15344_v29  ;;  %v18443_v9 = vld [vmem:[#allocation229_spill] sm:$0xff] }
 0x9ac   :  { %8507 = vmatpush1.bf16.msra.mxu1 %v18435_v14  ;;  %8538 = vmatprep.mubr.bf16.mxu1 %v15344_v29  ;;  %v18445_v14 = vld [vmem:[#allocation231_spill] sm:$0xff] }
 0x9ad   :  { %8344 = vmatprep.subr.bf16.mxu0 %v18436_v16  ;;  %8508 = vmatprep.subr.bf16.mxu1 %v18437_v49  ;;  %v18447_v16 = vld [vmem:[#allocation233_spill] sm:$0xff]  ;;  %v18448_v49 = vld [vmem:[#allocation234_spill] sm:$0xff] }
 0x9af   :  { %8345 = vmatpush1.bf16.msra.mxu0 %v18438_v57  ;;  %v18449_v57 = vld [vmem:[#allocation235_spill] sm:$0xff] }
 0x9b0   :  { %8509 = vmatpush1.bf16.msra.mxu1 %v18439_v1  ;;  %8346 = vmatprep.subr.bf16.mxu0 %v18440_v12  ;;  %v18450_v1 = vld [vmem:[#allocation236_spill] sm:$0xff]  ;;  %v18451_v12 = vld [vmem:[#allocation237_spill] sm:$0xff] }
 0x9b1   :  { %8510 = vmatprep.subr.bf16.mxu1 %v18441_v6  ;;  %v18452_v6 = vld [vmem:[#allocation238_spill] sm:$0xff] }
 0x9b3   :  { %8347 = vmatpush1.bf16.msra.mxu0 %v18442_v28  ;;  %v18453_v28 = vld [vmem:[#allocation239_spill] sm:$0xff] }
 0x9b4   :  { %8511 = vmatpush1.bf16.msra.mxu1 %v18443_v9  ;;  %8348 = vmatprep.subr.bf16.mxu0 %v18444_v33  ;;  %v18454_v9 = vld [vmem:[#allocation240_spill] sm:$0xff]  ;;  %v18455_v33 = vld [vmem:[#allocation241_spill] sm:$0xff] }
 0x9b5   :  { %8512 = vmatprep.subr.bf16.mxu1 %v18445_v14  ;;  %v18456_v14 = vld [vmem:[#allocation242_spill] sm:$0xff] }
 0x9b7   :  { %8349 = vmatpush1.bf16.msra.mxu0 %v18446_v48  ;;  %v18457_v48 = vld [vmem:[#allocation243_spill] sm:$0xff] }
 0x9b8   :  { %8513 = vmatpush1.bf16.msra.mxu1 %v18447_v16  ;;  %8350 = vmatprep.subr.bf16.mxu0 %v18448_v49  ;;  %v18458_v16 = vld [vmem:[#allocation244_spill] sm:$0xff]  ;;  %v18459_v49 = vld [vmem:[#allocation245_spill] sm:$0xff] }
 0x9b9   :  { %8514 = vmatprep.subr.bf16.mxu1 %v18449_v57  ;;  %v18460_v57 = vld [vmem:[#allocation246_spill] sm:$0xff] }
 0x9bb   :  { %8351 = vmatpush1.bf16.msra.mxu0 %v18450_v1  ;;  %v18461_v1 = vld [vmem:[#allocation247_spill] sm:$0xff] }
 0x9bc   :  { %8515 = vmatpush1.bf16.msra.mxu1 %v18451_v12  ;;  %8352 = vmatprep.subr.bf16.mxu0 %v18452_v6  ;;  %v18462_v12 = vld [vmem:[#allocation248_spill] sm:$0xff]  ;;  %v18463_v6 = vld [vmem:[#allocation249_spill] sm:$0xff] }
 0x9bd   :  { %8516 = vmatprep.subr.bf16.mxu1 %v18453_v28  ;;  %v18464_v28 = vld [vmem:[#allocation250_spill] sm:$0xff] }
 0x9bf   :  { %8353 = vmatpush1.bf16.msra.mxu0 %v18454_v9  ;;  %v18465_v9 = vld [vmem:[#allocation251_spill] sm:$0xff] }
 0x9c0   :  { %8517 = vmatpush1.bf16.msra.mxu1 %v18455_v33  ;;  %8354 = vmatprep.subr.bf16.mxu0 %v18456_v14  ;;  %v18466_v33 = vld [vmem:[#allocation252_spill] sm:$0xff]  ;;  %v18467_v14 = vld [vmem:[#allocation253_spill] sm:$0xff] }
 0x9c1   :  { %8518 = vmatprep.subr.bf16.mxu1 %v18457_v48  ;;  %v18468_v48 = vld [vmem:[#allocation254_spill] sm:$0xff] }
 0x9c3   :  { %8355 = vmatpush1.bf16.msra.mxu0 %v18458_v16  ;;  %v18469_v16 = vld [vmem:[#allocation255_spill] sm:$0xff] }
 0x9c4   :  { %8519 = vmatpush1.bf16.msra.mxu1 %v18459_v49  ;;  %8356 = vmatprep.subr.bf16.mxu0 %v18460_v57  ;;  %v18470_v49 = vld [vmem:[#allocation256_spill] sm:$0xff]  ;;  %v18471_v57 = vld [vmem:[#allocation257_spill] sm:$0xff] }
 0x9c5   :  { %8520 = vmatprep.subr.bf16.mxu1 %v18461_v1  ;;  %v18472_v1 = vld [vmem:[#allocation258_spill] sm:$0xff] }
 0x9c7   :  { %8357 = vmatpush1.bf16.msra.mxu0 %v18462_v12  ;;  %v18473_v12 = vld [vmem:[#allocation259_spill] sm:$0xff] }
 0x9c8   :  { %8521 = vmatpush1.bf16.msra.mxu1 %v18463_v6  ;;  %8358 = vmatprep.subr.bf16.mxu0 %v18464_v28  ;;  %v18474_v6 = vld [vmem:[#allocation260_spill] sm:$0xff]  ;;  %v18475_v28 = vld [vmem:[#allocation261_spill] sm:$0xff] }
 0x9c9   :  { %8522 = vmatprep.subr.bf16.mxu1 %v18465_v9  ;;  %v18476_v9 = vld [vmem:[#allocation262_spill] sm:$0xff] }
 0x9cb   :  { %8359 = vmatpush1.bf16.msra.mxu0 %v18466_v33  ;;  %v18477_v33 = vld [vmem:[#allocation263_spill] sm:$0xff] }
 0x9cc   :  { %8523 = vmatpush1.bf16.msra.mxu1 %v18467_v14  ;;  %8360 = vmatprep.subr.bf16.mxu0 %v18468_v48  ;;  %v18478_v14 = vld [vmem:[#allocation264_spill] sm:$0xff]  ;;  %v18479_v48 = vld [vmem:[#allocation265_spill] sm:$0xff] }
 0x9cd   :  { %8524 = vmatprep.subr.bf16.mxu1 %v18469_v16  ;;  %v18480_v16 = vld [vmem:[#allocation266_spill] sm:$0xff] }
 0x9cf   :  { %8361 = vmatpush1.bf16.msra.mxu0 %v18470_v49  ;;  %v18481_v49 = vld [vmem:[#allocation267_spill] sm:$0xff] }
 0x9d0   :  { %8525 = vmatpush1.bf16.msra.mxu1 %v18471_v57  ;;  %8362 = vmatprep.subr.bf16.mxu0 %v18472_v1  ;;  %v18482_v1 = vld [vmem:[#allocation269_spill] sm:$0xff] }
 0x9d1   :  { %8526 = vmatprep.subr.bf16.mxu1 %v18473_v12  ;;  %v18490_v12 = vld [vmem:[#allocation278_spill] sm:$0xff] }
 0x9d3   :  { %8363 = vmatpush1.bf16.msra.mxu0 %v18474_v6  ;;  %v18483_v6 = vld [vmem:[#allocation271_spill] sm:$0xff] }
 0x9d4   :  { %8527 = vmatpush1.bf16.msra.mxu1 %v18475_v28  ;;  %8364 = vmatprep.subr.bf16.mxu0 %v18476_v9  ;;  %v18484_v28 = vld [vmem:[#allocation272_spill] sm:$0xff] }
 0x9d5   :  { %8528 = vmatprep.subr.bf16.mxu1 %v18477_v33  ;;  %v18485_v9 = vld [vmem:[#allocation276_spill] sm:$0xff] }
 0x9d6   :  { %v8240_v33 = vadd.f32 %v15293_v17, %v18485_v9  ;;  %v18494_v17 = vld [vmem:[#allocation282_spill] sm:$0xff]  ;;  %v18497_v9 = vld [vmem:[#allocation285_spill] sm:$0xff] }
 0x9d7   :  { %8365 = vmatpush1.bf16.msra.mxu0 %v18478_v14  ;;  %v18486_v14 = vld [vmem:[#allocation273_spill] sm:$0xff] }
 0x9d8   :  { %8529 = vmatpush1.bf16.msra.mxu1 %v18479_v48  ;;  %8366 = vmatprep.subr.bf16.mxu0 %v18480_v16  ;;  %v18487_v48 = vld [vmem:[#allocation274_spill] sm:$0xff]  ;;  %v18488_v16 = vld [vmem:[#allocation275_spill] sm:$0xff] }
 0x9d9   :  { %8530 = vmatprep.subr.bf16.mxu1 %v18481_v49  ;;  %v18489_v49 = vld [vmem:[#allocation277_spill] sm:$0xff] }
 0x9db   :  { %8367 = vmatpush1.bf16.msra.mxu0 %v13999_v26  ;;  %v8243_v26 = vadd.f32 %v15297_v19, %v18489_v49 }
 0x9dc   :  { %8531 = vmatpush1.bf16.msra.mxu1 %v18482_v1  ;;  %8368 = vmatprep.subr.bf16.mxu0 %v14005_v25  ;;  %v8248_v1 = vmax.f32 %v8240_v33, 0.0  ;;  %v18491_v25 = vld [vmem:[#allocation279_spill] sm:$0xff]  ;;  %v18498_v33 = vld [vmem:[#allocation286_spill] sm:$0xff] }
 0x9dd   :  { %8532 = vmatprep.subr.bf16.mxu1 %v18483_v6  ;;  %v18492_v6 = vld [vmem:[#allocation280_spill] sm:$0xff]  ;;  %v8251_v57 = vmax.f32 %v8243_v26, 0.0  ;;  %v18499_v26 = vld [vmem:[#allocation287_spill] sm:$0xff] }
 0x9df   :  { %8369 = vmatpush1.bf16.msra.mxu0 %v18484_v28  ;;  %v18493_v28 = vld [vmem:[#allocation281_spill] sm:$0xff]  ;;  %v15420_v19 = vpack.c.bf16 %v8251_v57, %v8251_v57  ;;  %v18503_v57 = vld [vmem:[#allocation291_spill] sm:$0xff] }
 0x9e0   :  { %8533 = vmatpush1.bf16.msra.mxu1 %v18486_v14  ;;  %8370 = vmatprep.subr.bf16.mxu0 %v18487_v48  ;;  %v15415_v14 = vpack.c.bf16 %v8248_v1, %v8248_v1  ;;  %v18495_v48 = vld [vmem:[#allocation283_spill] sm:$0xff]  ;;  %v18500_v1 = vld [vmem:[#allocation288_spill] sm:$0xff] }
 0x9e1   :  { %8534 = vmatprep.subr.bf16.mxu1 %v18488_v16  ;;  %v18496_v16 = vld [vmem:[#allocation284_spill] sm:$0xff] }
 0x9e3   :  { %8371 = vmatpush1.bf16.msra.mxu0 %v18490_v12 }
 0x9e4   :  { %8535 = vmatpush1.bf16.msra.mxu1 %v18491_v25  ;;  %8372 = vmatprep.subr.bf16.mxu0 %v18492_v6  ;;  %v18508_v6 = vld [vmem:[#allocation296_spill] sm:$0xff]  ;;  %v18510_v25 = vld [vmem:[#allocation298_spill] sm:$0xff] }
 0x9e5   :  { %8536 = vmatprep.subr.bf16.mxu1 %v18493_v28  ;;  %v18506_v28 = vld [vmem:[#allocation294_spill] sm:$0xff] }
 0x9e7   :  { %8373 = vmatpush1.bf16.msra.mxu0 %v18494_v17  ;;  %v18505_v17 = vld [vmem:[#allocation293_spill] sm:$0xff] }
 0x9e8   :  { %8537 = vmatpush1.bf16.msra.mxu1 %v18495_v48  ;;  %8383 = vmatprep.subr.bf16.mxu0 %v18496_v16  ;;  %v18501_v48 = vld [vmem:[#allocation289_spill] sm:$0xff]  ;;  %v18502_v16 = vld [vmem:[#allocation290_spill] sm:$0xff] }
 0x9e9   :  { %8547 = vmatprep.subr.bf16.mxu1 %v18497_v9  ;;  %v18504_v9 = vld [vmem:[#allocation292_spill] sm:$0xff] }
 0x9ea   :  { %8375 = vmatmul.mubr.bf16.vlgmr.msra.gmra.mrb[52].mxu0 %v15415_v14 }
 0x9eb   :  { %8539 = vmatmul.mubr.bf16.vlgmr.msra.gmra.mrb[52].mxu1 %v15415_v14  ;;  %8384 = vmatpush1.bf16.msra.mxu0 %v18498_v33  ;;  %v18507_v33 = vld [vmem:[#allocation295_spill] sm:$0xff] }
 0x9ec   :  { %8415 = vmatprep.mubr.bf16.mxu0 %v15420_v19  ;;  %8548 = vmatpush1.bf16.msra.mxu1 %v18499_v26  ;;  %v18509_v26 = vld [vmem:[#allocation297_spill] sm:$0xff] }
 0x9ed   :  { %8579 = vmatprep.mubr.bf16.mxu1 %v15420_v19  ;;  %8385 = vmatprep.subr.bf16.mxu0 %v18500_v1  ;;  %v18511_v1 = vld [vmem:[#allocation299_spill] sm:$0xff] }
 0x9ee   :  { %8549 = vmatprep.subr.bf16.mxu1 %v18501_v48  ;;  %v18512_v48 = vld [vmem:[#allocation300_spill] sm:$0xff] }
 0x9ef   :  { %8386 = vmatpush1.bf16.msra.mxu0 %v18502_v16  ;;  %v18513_v16 = vld [vmem:[#allocation301_spill] sm:$0xff] }
 0x9f0   :  { %8550 = vmatpush1.bf16.msra.mxu1 %v18503_v57  ;;  %8387 = vmatprep.subr.bf16.mxu0 %v18504_v9  ;;  %v18514_v57 = vld [vmem:[#allocation302_spill] sm:$0xff]  ;;  %v18515_v9 = vld [vmem:[#allocation303_spill] sm:$0xff] }
 0x9f1   :  { %8551 = vmatprep.subr.bf16.mxu1 %v18505_v17  ;;  %v18516_v17 = vld [vmem:[#allocation304_spill] sm:$0xff] }
 0x9f3   :  { %8388 = vmatpush1.bf16.msra.mxu0 %v18506_v28  ;;  %v18517_v28 = vld [vmem:[#allocation305_spill] sm:$0xff] }
 0x9f4   :  { %8552 = vmatpush1.bf16.msra.mxu1 %v18507_v33  ;;  %8389 = vmatprep.subr.bf16.mxu0 %v18508_v6  ;;  %v18518_v33 = vld [vmem:[#allocation306_spill] sm:$0xff]  ;;  %v18519_v6 = vld [vmem:[#allocation307_spill] sm:$0xff] }
 0x9f5   :  { %8553 = vmatprep.subr.bf16.mxu1 %v18509_v26  ;;  %v18520_v26 = vld [vmem:[#allocation308_spill] sm:$0xff] }
 0x9f7   :  { %8390 = vmatpush1.bf16.msra.mxu0 %v18510_v25  ;;  %v18521_v25 = vld [vmem:[#allocation309_spill] sm:$0xff] }
 0x9f8   :  { %8554 = vmatpush1.bf16.msra.mxu1 %v18511_v1  ;;  %8391 = vmatprep.subr.bf16.mxu0 %v18512_v48  ;;  %v18522_v1 = vld [vmem:[#allocation310_spill] sm:$0xff]  ;;  %v18523_v48 = vld [vmem:[#allocation311_spill] sm:$0xff] }
 0x9f9   :  { %8555 = vmatprep.subr.bf16.mxu1 %v18513_v16  ;;  %v18524_v16 = vld [vmem:[#allocation312_spill] sm:$0xff] }
 0x9fb   :  { %8392 = vmatpush1.bf16.msra.mxu0 %v18514_v57  ;;  %v18525_v57 = vld [vmem:[#allocation313_spill] sm:$0xff] }
 0x9fc   :  { %8556 = vmatpush1.bf16.msra.mxu1 %v18515_v9  ;;  %8393 = vmatprep.subr.bf16.mxu0 %v18516_v17  ;;  %v18526_v9 = vld [vmem:[#allocation314_spill] sm:$0xff]  ;;  %v18527_v17 = vld [vmem:[#allocation315_spill] sm:$0xff] }
 0x9fd   :  { %8557 = vmatprep.subr.bf16.mxu1 %v18517_v28  ;;  %v18528_v28 = vld [vmem:[#allocation316_spill] sm:$0xff] }
 0x9ff   :  { %8394 = vmatpush1.bf16.msra.mxu0 %v18518_v33  ;;  %v18529_v33 = vld [vmem:[#allocation317_spill] sm:$0xff] }
 0xa00   :  { %8558 = vmatpush1.bf16.msra.mxu1 %v18519_v6  ;;  %8395 = vmatprep.subr.bf16.mxu0 %v18520_v26  ;;  %v18530_v6 = vld [vmem:[#allocation318_spill] sm:$0xff]  ;;  %v18531_v26 = vld [vmem:[#allocation319_spill] sm:$0xff] }
 0xa01   :  { %8559 = vmatprep.subr.bf16.mxu1 %v18521_v25  ;;  %v18532_v25 = vld [vmem:[#allocation320_spill] sm:$0xff] }
 0xa03   :  { %8396 = vmatpush1.bf16.msra.mxu0 %v18522_v1  ;;  %v18533_v1 = vld [vmem:[#allocation321_spill] sm:$0xff] }
 0xa04   :  { %8560 = vmatpush1.bf16.msra.mxu1 %v18523_v48  ;;  %8397 = vmatprep.subr.bf16.mxu0 %v18524_v16  ;;  %v18534_v48 = vld [vmem:[#allocation322_spill] sm:$0xff]  ;;  %v18535_v16 = vld [vmem:[#allocation323_spill] sm:$0xff] }
 0xa05   :  { %8561 = vmatprep.subr.bf16.mxu1 %v18525_v57  ;;  %v18536_v57 = vld [vmem:[#allocation324_spill] sm:$0xff] }
 0xa07   :  { %8398 = vmatpush1.bf16.msra.mxu0 %v18526_v9  ;;  %v18537_v9 = vld [vmem:[#allocation325_spill] sm:$0xff] }
 0xa08   :  { %8562 = vmatpush1.bf16.msra.mxu1 %v18527_v17  ;;  %8399 = vmatprep.subr.bf16.mxu0 %v18528_v28  ;;  %v18538_v17 = vld [vmem:[#allocation326_spill] sm:$0xff]  ;;  %v18539_v28 = vld [vmem:[#allocation327_spill] sm:$0xff] }
 0xa09   :  { %8563 = vmatprep.subr.bf16.mxu1 %v18529_v33  ;;  %v18540_v33 = vld [vmem:[#allocation328_spill] sm:$0xff] }
 0xa0b   :  { %8400 = vmatpush1.bf16.msra.mxu0 %v18530_v6  ;;  %v18541_v6 = vld [vmem:[#allocation329_spill] sm:$0xff] }
 0xa0c   :  { %8564 = vmatpush1.bf16.msra.mxu1 %v18531_v26  ;;  %8401 = vmatprep.subr.bf16.mxu0 %v18532_v25  ;;  %v18542_v26 = vld [vmem:[#allocation330_spill] sm:$0xff] }
 0xa0d   :  { %8565 = vmatprep.subr.bf16.mxu1 %v18533_v1  ;;  %v18543_v1 = vld [vmem:[#allocation332_spill] sm:$0xff] }
 0xa0f   :  { %8402 = vmatpush1.bf16.msra.mxu0 %v18534_v48  ;;  %v18544_v48 = vld [vmem:[#allocation333_spill] sm:$0xff] }
 0xa10   :  { %8566 = vmatpush1.bf16.msra.mxu1 %v18535_v16  ;;  %8403 = vmatprep.subr.bf16.mxu0 %v18536_v57  ;;  %v18545_v16 = vld [vmem:[#allocation334_spill] sm:$0xff] }
 0xa11   :  { %8567 = vmatprep.subr.bf16.mxu1 %v18537_v9  ;;  %v18546_v9 = vld [vmem:[#allocation336_spill] sm:$0xff] }
 0xa13   :  { %8404 = vmatpush1.bf16.msra.mxu0 %v18538_v17  ;;  %v18547_v17 = vld [vmem:[#allocation337_spill] sm:$0xff] }
 0xa14   :  { %8568 = vmatpush1.bf16.msra.mxu1 %v18539_v28  ;;  %8405 = vmatprep.subr.bf16.mxu0 %v18540_v33  ;;  %v18548_v28 = vld [vmem:[#allocation338_spill] sm:$0xff]  ;;  %v18553_v33 = vld [vmem:[#allocation343_spill] sm:$0xff] }
 0xa15   :  { %8569 = vmatprep.subr.bf16.mxu1 %v18541_v6  ;;  %v8242_v6 = vadd.f32 %v15295_v15, %v14233_v63  ;;  %v18557_v15 = vld [vmem:[#allocation347_spill] sm:$0xff] }
 0xa17   :  { %8406 = vmatpush1.bf16.msra.mxu0 %v18542_v26  ;;  %v18549_v26 = vld [vmem:[#allocation339_spill] sm:$0xff] }
 0xa18   :  { %8570 = vmatpush1.bf16.msra.mxu1 %v14208_v2  ;;  %8407 = vmatprep.subr.bf16.mxu0 %v18543_v1  ;;  %v18550_v2 = vld [vmem:[#allocation340_spill] sm:$0xff]  ;;  %v18551_v1 = vld [vmem:[#allocation341_spill] sm:$0xff] }
 0xa19   :  { %8571 = vmatprep.subr.bf16.mxu1 %v18544_v48  ;;  %v18552_v48 = vld [vmem:[#allocation342_spill] sm:$0xff] }
 0xa1b   :  { %8408 = vmatpush1.bf16.msra.mxu0 %v18545_v16  ;;  %v8250_v16 = vmax.f32 %v8242_v6, 0.0  ;;  %v18560_v6 = vld [vmem:[#allocation350_spill] sm:$0xff] }
 0xa1c   :  { %8572 = vmatpush1.bf16.msra.mxu1 %v14222_v21  ;;  %8409 = vmatprep.subr.bf16.mxu0 %v18546_v9  ;;  %v18554_v21 = vld [vmem:[#allocation344_spill] sm:$0xff]  ;;  %v18555_v9 = vld [vmem:[#allocation345_spill] sm:$0xff] }
 0xa1d   :  { %8573 = vmatprep.subr.bf16.mxu1 %v18547_v17  ;;  %v18556_v17 = vld [vmem:[#allocation346_spill] sm:$0xff] }
 0xa1f   :  { %8410 = vmatpush1.bf16.msra.mxu0 %v18548_v28  ;;  %v15489_v28 = vpack.c.bf16 %v8250_v16, %v8250_v16  ;;  %v18562_v16 = vld [vmem:[#allocation352_spill] sm:$0xff] }
 0xa20   :  { %8574 = vmatpush1.bf16.msra.mxu1 %v18549_v26  ;;  %8411 = vmatprep.subr.bf16.mxu0 %v18550_v2  ;;  %v18558_v26 = vld [vmem:[#allocation348_spill] sm:$0xff]  ;;  %v18559_v2 = vld [vmem:[#allocation349_spill] sm:$0xff] }
 0xa21   :  { %8575 = vmatprep.subr.bf16.mxu1 %v18551_v1 }
 0xa23   :  { %8412 = vmatpush1.bf16.msra.mxu0 %v18552_v48  ;;  %v18570_v48 = vld [vmem:[#allocation360_spill] sm:$0xff] }
 0xa24   :  { %8576 = vmatpush1.bf16.msra.mxu1 %v18553_v33  ;;  %8413 = vmatprep.subr.bf16.mxu0 %v18554_v21  ;;  %v18561_v21 = vld [vmem:[#allocation351_spill] sm:$0xff]  ;;  %v18568_v33 = vld [vmem:[#allocation358_spill] sm:$0xff] }
 0xa25   :  { %8577 = vmatprep.subr.bf16.mxu1 %v18555_v9  ;;  %v18567_v9 = vld [vmem:[#allocation357_spill] sm:$0xff] }
 0xa27   :  { %8414 = vmatpush1.bf16.msra.mxu0 %v18556_v17  ;;  %v18563_v17 = vld [vmem:[#allocation353_spill] sm:$0xff] }
 0xa28   :  { %8578 = vmatpush1.bf16.msra.mxu1 %v18557_v15  ;;  %8588 = vmatprep.subr.bf16.mxu0 %v18558_v26  ;;  %v18564_v15 = vld [vmem:[#allocation354_spill] sm:$0xff]  ;;  %v18565_v26 = vld [vmem:[#allocation355_spill] sm:$0xff] }
 0xa29   :  { %8752 = vmatprep.subr.bf16.mxu1 %v18559_v2  ;;  %v18566_v2 = vld [vmem:[#allocation356_spill] sm:$0xff] }
 0xa2a   :  { %8416 = vmatmul.mubr.bf16.vlgmr.msra.gmra.mrb[52].mxu0 %v15489_v28 }
 0xa2b   :  { %8580 = vmatmul.mubr.bf16.vlgmr.msra.gmra.mrb[52].mxu1 %v15489_v28  ;;  %8589 = vmatpush1.bf16.msra.mxu0 %v18560_v6  ;;  %v18569_v6 = vld [vmem:[#allocation359_spill] sm:$0xff] }
 0xa2c   :  { %8620 = vmatprep.mubr.bf16.mxu0 %v15257_v13  ;;  %8753 = vmatpush1.bf16.msra.mxu1 %v18561_v21  ;;  %v18571_v21 = vld [vmem:[#allocation361_spill] sm:$0xff] }
 0xa2d   :  { %8784 = vmatprep.mubr.bf16.mxu1 %v15257_v13  ;;  %8590 = vmatprep.subr.bf16.mxu0 %v18562_v16  ;;  %v18572_v13 = vld [vmem:[#allocation362_spill] sm:$0xff]  ;;  %v18573_v16 = vld [vmem:[#allocation363_spill] sm:$0xff] }
 0xa2e   :  { %8754 = vmatprep.subr.bf16.mxu1 %v18563_v17  ;;  %v18574_v17 = vld [vmem:[#allocation364_spill] sm:$0xff] }
 0xa2f   :  { %8591 = vmatpush1.bf16.msra.mxu0 %v18564_v15  ;;  %v18575_v15 = vld [vmem:[#allocation365_spill] sm:$0xff] }
 0xa30   :  { %8755 = vmatpush1.bf16.msra.mxu1 %v18565_v26  ;;  %8592 = vmatprep.subr.bf16.mxu0 %v18566_v2  ;;  %v18576_v26 = vld [vmem:[#allocation366_spill] sm:$0xff]  ;;  %v18577_v2 = vld [vmem:[#allocation367_spill] sm:$0xff] }
 0xa31   :  { %8756 = vmatprep.subr.bf16.mxu1 %v18567_v9  ;;  %v18578_v9 = vld [vmem:[#allocation368_spill] sm:$0xff] }
 0xa33   :  { %8593 = vmatpush1.bf16.msra.mxu0 %v18568_v33  ;;  %v18579_v33 = vld [vmem:[#allocation369_spill] sm:$0xff] }
 0xa34   :  { %8757 = vmatpush1.bf16.msra.mxu1 %v18569_v6  ;;  %8594 = vmatprep.subr.bf16.mxu0 %v18570_v48  ;;  %v18580_v6 = vld [vmem:[#allocation370_spill] sm:$0xff]  ;;  %v18581_v48 = vld [vmem:[#allocation371_spill] sm:$0xff] }
 0xa35   :  { %8758 = vmatprep.subr.bf16.mxu1 %v18571_v21  ;;  %v18582_v21 = vld [vmem:[#allocation372_spill] sm:$0xff] }
 0xa37   :  { %8595 = vmatpush1.bf16.msra.mxu0 %v18572_v13  ;;  %v18583_v13 = vld [vmem:[#allocation373_spill] sm:$0xff] }
 0xa38   :  { %8759 = vmatpush1.bf16.msra.mxu1 %v18573_v16  ;;  %8596 = vmatprep.subr.bf16.mxu0 %v18574_v17  ;;  %v18584_v16 = vld [vmem:[#allocation374_spill] sm:$0xff]  ;;  %v18585_v17 = vld [vmem:[#allocation375_spill] sm:$0xff] }
 0xa39   :  { %8760 = vmatprep.subr.bf16.mxu1 %v18575_v15  ;;  %v18586_v15 = vld [vmem:[#allocation376_spill] sm:$0xff] }
 0xa3b   :  { %8597 = vmatpush1.bf16.msra.mxu0 %v18576_v26  ;;  %v18587_v26 = vld [vmem:[#allocation377_spill] sm:$0xff] }
 0xa3c   :  { %8761 = vmatpush1.bf16.msra.mxu1 %v18577_v2  ;;  %8598 = vmatprep.subr.bf16.mxu0 %v18578_v9  ;;  %v18588_v2 = vld [vmem:[#allocation378_spill] sm:$0xff]  ;;  %v18589_v9 = vld [vmem:[#allocation379_spill] sm:$0xff] }
 0xa3d   :  { %8762 = vmatprep.subr.bf16.mxu1 %v18579_v33  ;;  %v18590_v33 = vld [vmem:[#allocation380_spill] sm:$0xff] }
 0xa3f   :  { %8599 = vmatpush1.bf16.msra.mxu0 %v18580_v6  ;;  %v18591_v6 = vld [vmem:[#allocation381_spill] sm:$0xff] }
 0xa40   :  { %8763 = vmatpush1.bf16.msra.mxu1 %v18581_v48  ;;  %8600 = vmatprep.subr.bf16.mxu0 %v18582_v21  ;;  %v18592_v48 = vld [vmem:[#allocation382_spill] sm:$0xff]  ;;  %v18593_v21 = vld [vmem:[#allocation383_spill] sm:$0xff] }
 0xa41   :  { %8764 = vmatprep.subr.bf16.mxu1 %v18583_v13  ;;  %v18594_v13 = vld [vmem:[#allocation384_spill] sm:$0xff] }
 0xa43   :  { %8601 = vmatpush1.bf16.msra.mxu0 %v18584_v16  ;;  %v18595_v16 = vld [vmem:[#allocation385_spill] sm:$0xff] }
 0xa44   :  { %8765 = vmatpush1.bf16.msra.mxu1 %v18585_v17  ;;  %8602 = vmatprep.subr.bf16.mxu0 %v18586_v15  ;;  %v18596_v17 = vld [vmem:[#allocation386_spill] sm:$0xff]  ;;  %v18597_v15 = vld [vmem:[#allocation387_spill] sm:$0xff] }
 0xa45   :  { %8766 = vmatprep.subr.bf16.mxu1 %v18587_v26  ;;  %v18598_v26 = vld [vmem:[#allocation388_spill] sm:$0xff] }
 0xa47   :  { %8603 = vmatpush1.bf16.msra.mxu0 %v18588_v2  ;;  %v18599_v2 = vld [vmem:[#allocation389_spill] sm:$0xff] }
 0xa48   :  { %8767 = vmatpush1.bf16.msra.mxu1 %v18589_v9  ;;  %8604 = vmatprep.subr.bf16.mxu0 %v18590_v33  ;;  %v18600_v9 = vld [vmem:[#allocation390_spill] sm:$0xff]  ;;  %v18601_v33 = vld [vmem:[#allocation391_spill] sm:$0xff] }
 0xa49   :  { %8768 = vmatprep.subr.bf16.mxu1 %v18591_v6  ;;  %v18602_v6 = vld [vmem:[#allocation392_spill] sm:$0xff] }
 0xa4b   :  { %8605 = vmatpush1.bf16.msra.mxu0 %v18592_v48  ;;  %v18603_v48 = vld [vmem:[#allocation393_spill] sm:$0xff] }
 0xa4c   :  { %8769 = vmatpush1.bf16.msra.mxu1 %v18593_v21  ;;  %8606 = vmatprep.subr.bf16.mxu0 %v18594_v13  ;;  %v18604_v21 = vld [vmem:[#allocation394_spill] sm:$0xff]  ;;  %v18605_v13 = vld [vmem:[#allocation395_spill] sm:$0xff] }
 0xa4d   :  { %8770 = vmatprep.subr.bf16.mxu1 %v18595_v16  ;;  %v18606_v16 = vld [vmem:[#allocation396_spill] sm:$0xff] }
 0xa4f   :  { %8607 = vmatpush1.bf16.msra.mxu0 %v18596_v17  ;;  %v18607_v17 = vld [vmem:[#allocation397_spill] sm:$0xff] }
 0xa50   :  { %8771 = vmatpush1.bf16.msra.mxu1 %v18597_v15  ;;  %8608 = vmatprep.subr.bf16.mxu0 %v18598_v26  ;;  %v18608_v15 = vld [vmem:[#allocation398_spill] sm:$0xff]  ;;  %v18609_v26 = vld [vmem:[#allocation399_spill] sm:$0xff] }
 0xa51   :  { %8772 = vmatprep.subr.bf16.mxu1 %v18599_v2  ;;  %v18610_v2 = vld [vmem:[#allocation400_spill] sm:$0xff] }
 0xa53   :  { %8609 = vmatpush1.bf16.msra.mxu0 %v18600_v9  ;;  %v18611_v9 = vld [vmem:[#allocation401_spill] sm:$0xff] }
 0xa54   :  { %8773 = vmatpush1.bf16.msra.mxu1 %v18601_v33  ;;  %8610 = vmatprep.subr.bf16.mxu0 %v18602_v6  ;;  %v18612_v6 = vld [vmem:[#allocation403_spill] sm:$0xff] }
 0xa55   :  { %8774 = vmatprep.subr.bf16.mxu1 %v18603_v48  ;;  %v18613_v48 = vld [vmem:[#allocation404_spill] sm:$0xff] }
 0xa57   :  { %8611 = vmatpush1.bf16.msra.mxu0 %v18604_v21  ;;  %v18614_v21 = vld [vmem:[#allocation405_spill] sm:$0xff] }
 0xa58   :  { %8775 = vmatpush1.bf16.msra.mxu1 %v18605_v13  ;;  %8612 = vmatprep.subr.bf16.mxu0 %v18606_v16  ;;  %v18615_v13 = vld [vmem:[#allocation406_spill] sm:$0xff]  ;;  %v18616_v16 = vld [vmem:[#allocation407_spill] sm:$0xff] }
 0xa59   :  { %8776 = vmatprep.subr.bf16.mxu1 %v18607_v17  ;;  %v18617_v17 = vld [vmem:[#allocation408_spill] sm:$0xff] }
 0xa5b   :  { %8613 = vmatpush1.bf16.msra.mxu0 %v18608_v15  ;;  %v18618_v15 = vld [vmem:[#allocation409_spill] sm:$0xff] }
 0xa5c   :  { %8777 = vmatpush1.bf16.msra.mxu1 %v18609_v26  ;;  %8614 = vmatprep.subr.bf16.mxu0 %v18610_v2  ;;  %v18619_v26 = vld [vmem:[#allocation410_spill] sm:$0xff]  ;;  %v18620_v2 = vld [vmem:[#allocation411_spill] sm:$0xff] }
 0xa5d   :  { %8778 = vmatprep.subr.bf16.mxu1 %v18611_v9  ;;  %v18621_v9 = vld [vmem:[#allocation412_spill] sm:$0xff] }
 0xa5f   :  { %8615 = vmatpush1.bf16.msra.mxu0 %v14433_v39  ;;  %v18622_v39 = vld [vmem:[#allocation413_spill] sm:$0xff] }
 0xa60   :  { %8779 = vmatpush1.bf16.msra.mxu1 %v18612_v6  ;;  %8616 = vmatprep.subr.bf16.mxu0 %v18613_v48  ;;  %v18778_v48 = vld [vmem:[#allocation569_spill] sm:$0xff] }
 0xa61   :  { %8780 = vmatprep.subr.bf16.mxu1 %v18614_v21  ;;  %v18623_v21 = vld [vmem:[#allocation414_spill] sm:$0xff] }
 0xa63   :  { %8617 = vmatpush1.bf16.msra.mxu0 %v18615_v13  ;;  %v18633_v13 = vld [vmem:[#allocation424_spill] sm:$0xff] }
 0xa64   :  { %8781 = vmatpush1.bf16.msra.mxu1 %v18616_v16  ;;  %8618 = vmatprep.subr.bf16.mxu0 %v18617_v17  ;;  %v18624_v16 = vld [vmem:[#allocation415_spill] sm:$0xff]  ;;  %v18630_v17 = vld [vmem:[#allocation421_spill] sm:$0xff] }
 0xa65   :  { %8782 = vmatprep.subr.bf16.mxu1 %v18618_v15  ;;  %v18625_v15 = vld [vmem:[#allocation416_spill] sm:$0xff] }
 0xa67   :  { %8619 = vmatpush1.bf16.msra.mxu0 %v18619_v26  ;;  %v18626_v26 = vld [vmem:[#allocation417_spill] sm:$0xff] }
 0xa68   :  { %8783 = vmatpush1.bf16.msra.mxu1 %v18620_v2  ;;  %8629 = vmatprep.subr.bf16.mxu0 %v18621_v9  ;;  %v18627_v2 = vld [vmem:[#allocation418_spill] sm:$0xff]  ;;  %v18628_v9 = vld [vmem:[#allocation419_spill] sm:$0xff] }
 0xa69   :  { %8793 = vmatprep.subr.bf16.mxu1 %v18622_v39  ;;  %v18629_v39 = vld [vmem:[#allocation420_spill] sm:$0xff] }
 0xa6a   :  { %8621 = vmatmul.mubr.bf16.vlgmr.msra.gmra.mrb[56].mxu0 %v15259_v38 }
 0xa6b   :  { %8785 = vmatmul.mubr.bf16.vlgmr.msra.gmra.mrb[56].mxu1 %v15259_v38  ;;  %8630 = vmatpush1.bf16.msra.mxu0 %v18623_v21  ;;  %v18631_v38 = vld [vmem:[#allocation422_spill] sm:$0xff]  ;;  %v18632_v21 = vld [vmem:[#allocation423_spill] sm:$0xff] }
 0xa6c   :  { %8661 = vmatprep.mubr.bf16.mxu0 %v15263_v47  ;;  %8794 = vmatpush1.bf16.msra.mxu1 %v18624_v16  ;;  %v18634_v16 = vld [vmem:[#allocation425_spill] sm:$0xff] }
 0xa6d   :  { %8825 = vmatprep.mubr.bf16.mxu1 %v15263_v47  ;;  %8631 = vmatprep.subr.bf16.mxu0 %v18625_v15  ;;  %v18635_v47 = vld [vmem:[#allocation426_spill] sm:$0xff]  ;;  %v18636_v15 = vld [vmem:[#allocation427_spill] sm:$0xff] }
 0xa6e   :  { %8795 = vmatprep.subr.bf16.mxu1 %v18626_v26  ;;  %v18637_v26 = vld [vmem:[#allocation428_spill] sm:$0xff] }
 0xa6f   :  { %8632 = vmatpush1.bf16.msra.mxu0 %v18627_v2  ;;  %v18638_v2 = vld [vmem:[#allocation429_spill] sm:$0xff] }
 0xa70   :  { %8796 = vmatpush1.bf16.msra.mxu1 %v18628_v9  ;;  %8633 = vmatprep.subr.bf16.mxu0 %v18629_v39  ;;  %v18639_v9 = vld [vmem:[#allocation430_spill] sm:$0xff]  ;;  %v18640_v39 = vld [vmem:[#allocation431_spill] sm:$0xff] }
 0xa71   :  { %8797 = vmatprep.subr.bf16.mxu1 %v18630_v17  ;;  %v18641_v17 = vld [vmem:[#allocation432_spill] sm:$0xff] }
 0xa73   :  { %8634 = vmatpush1.bf16.msra.mxu0 %v18631_v38  ;;  %v18642_v38 = vld [vmem:[#allocation433_spill] sm:$0xff] }
 0xa74   :  { %8798 = vmatpush1.bf16.msra.mxu1 %v18632_v21  ;;  %8635 = vmatprep.subr.bf16.mxu0 %v18633_v13  ;;  %v18643_v21 = vld [vmem:[#allocation434_spill] sm:$0xff]  ;;  %v18644_v13 = vld [vmem:[#allocation435_spill] sm:$0xff] }
 0xa75   :  { %8799 = vmatprep.subr.bf16.mxu1 %v18634_v16  ;;  %v18645_v16 = vld [vmem:[#allocation436_spill] sm:$0xff] }
 0xa77   :  { %8636 = vmatpush1.bf16.msra.mxu0 %v18635_v47  ;;  %v18646_v47 = vld [vmem:[#allocation437_spill] sm:$0xff] }
 0xa78   :  { %8800 = vmatpush1.bf16.msra.mxu1 %v18636_v15  ;;  %8637 = vmatprep.subr.bf16.mxu0 %v18637_v26  ;;  %v18647_v15 = vld [vmem:[#allocation438_spill] sm:$0xff]  ;;  %v18648_v26 = vld [vmem:[#allocation439_spill] sm:$0xff] }
 0xa79   :  { %8801 = vmatprep.subr.bf16.mxu1 %v18638_v2  ;;  %v18649_v2 = vld [vmem:[#allocation440_spill] sm:$0xff] }
 0xa7b   :  { %8638 = vmatpush1.bf16.msra.mxu0 %v18639_v9  ;;  %v18650_v9 = vld [vmem:[#allocation441_spill] sm:$0xff] }
 0xa7c   :  { %8802 = vmatpush1.bf16.msra.mxu1 %v18640_v39  ;;  %8639 = vmatprep.subr.bf16.mxu0 %v18641_v17  ;;  %v18651_v39 = vld [vmem:[#allocation442_spill] sm:$0xff]  ;;  %v18652_v17 = vld [vmem:[#allocation443_spill] sm:$0xff] }
 0xa7d   :  { %8803 = vmatprep.subr.bf16.mxu1 %v18642_v38  ;;  %v18653_v38 = vld [vmem:[#allocation444_spill] sm:$0xff] }
 0xa7f   :  { %8640 = vmatpush1.bf16.msra.mxu0 %v18643_v21  ;;  %v18654_v21 = vld [vmem:[#allocation445_spill] sm:$0xff] }
 0xa80   :  { %8804 = vmatpush1.bf16.msra.mxu1 %v18644_v13  ;;  %8641 = vmatprep.subr.bf16.mxu0 %v18645_v16  ;;  %v18655_v13 = vld [vmem:[#allocation446_spill] sm:$0xff]  ;;  %v18656_v16 = vld [vmem:[#allocation447_spill] sm:$0xff] }
 0xa81   :  { %8805 = vmatprep.subr.bf16.mxu1 %v18646_v47  ;;  %v18657_v47 = vld [vmem:[#allocation448_spill] sm:$0xff] }
 0xa83   :  { %8642 = vmatpush1.bf16.msra.mxu0 %v18647_v15  ;;  %v18658_v15 = vld [vmem:[#allocation449_spill] sm:$0xff] }
 0xa84   :  { %8806 = vmatpush1.bf16.msra.mxu1 %v18648_v26  ;;  %8643 = vmatprep.subr.bf16.mxu0 %v18649_v2  ;;  %v18659_v26 = vld [vmem:[#allocation450_spill] sm:$0xff]  ;;  %v18660_v2 = vld [vmem:[#allocation451_spill] sm:$0xff] }
 0xa85   :  { %8807 = vmatprep.subr.bf16.mxu1 %v18650_v9  ;;  %v18661_v9 = vld [vmem:[#allocation452_spill] sm:$0xff] }
 0xa87   :  { %8644 = vmatpush1.bf16.msra.mxu0 %v18651_v39  ;;  %v18662_v39 = vld [vmem:[#allocation453_spill] sm:$0xff] }
 0xa88   :  { %8808 = vmatpush1.bf16.msra.mxu1 %v18652_v17  ;;  %8645 = vmatprep.subr.bf16.mxu0 %v18653_v38  ;;  %v18663_v17 = vld [vmem:[#allocation454_spill] sm:$0xff]  ;;  %v18664_v38 = vld [vmem:[#allocation455_spill] sm:$0xff] }
 0xa89   :  { %8809 = vmatprep.subr.bf16.mxu1 %v18654_v21  ;;  %v18665_v21 = vld [vmem:[#allocation456_spill] sm:$0xff] }
 0xa8b   :  { %8646 = vmatpush1.bf16.msra.mxu0 %v18655_v13  ;;  %v18666_v13 = vld [vmem:[#allocation457_spill] sm:$0xff] }
 0xa8c   :  { %8810 = vmatpush1.bf16.msra.mxu1 %v18656_v16  ;;  %8647 = vmatprep.subr.bf16.mxu0 %v18657_v47  ;;  %v18667_v16 = vld [vmem:[#allocation458_spill] sm:$0xff]  ;;  %v18668_v47 = vld [vmem:[#allocation459_spill] sm:$0xff] }
 0xa8d   :  { %8811 = vmatprep.subr.bf16.mxu1 %v18658_v15  ;;  %v18669_v15 = vld [vmem:[#allocation460_spill] sm:$0xff] }
 0xa8f   :  { %8648 = vmatpush1.bf16.msra.mxu0 %v18659_v26  ;;  %v18670_v26 = vld [vmem:[#allocation461_spill] sm:$0xff] }
 0xa90   :  { %8812 = vmatpush1.bf16.msra.mxu1 %v18660_v2  ;;  %8649 = vmatprep.subr.bf16.mxu0 %v18661_v9  ;;  %v18671_v2 = vld [vmem:[#allocation462_spill] sm:$0xff]  ;;  %v18672_v9 = vld [vmem:[#allocation463_spill] sm:$0xff] }
 0xa91   :  { %8813 = vmatprep.subr.bf16.mxu1 %v18662_v39  ;;  %v18673_v39 = vld [vmem:[#allocation464_spill] sm:$0xff] }
 0xa93   :  { %8650 = vmatpush1.bf16.msra.mxu0 %v18663_v17  ;;  %v18674_v17 = vld [vmem:[#allocation465_spill] sm:$0xff] }
 0xa94   :  { %8814 = vmatpush1.bf16.msra.mxu1 %v18664_v38  ;;  %8651 = vmatprep.subr.bf16.mxu0 %v18665_v21  ;;  %v18675_v38 = vld [vmem:[#allocation466_spill] sm:$0xff]  ;;  %v18676_v21 = vld [vmem:[#allocation467_spill] sm:$0xff] }
 0xa95   :  { %8815 = vmatprep.subr.bf16.mxu1 %v18666_v13  ;;  %v18677_v13 = vld [vmem:[#allocation468_spill] sm:$0xff] }
 0xa97   :  { %8652 = vmatpush1.bf16.msra.mxu0 %v18667_v16  ;;  %v18678_v16 = vld [vmem:[#allocation469_spill] sm:$0xff] }
 0xa98   :  { %8816 = vmatpush1.bf16.msra.mxu1 %v18668_v47  ;;  %8653 = vmatprep.subr.bf16.mxu0 %v18669_v15  ;;  %v18679_v47 = vld [vmem:[#allocation470_spill] sm:$0xff]  ;;  %v18680_v15 = vld [vmem:[#allocation471_spill] sm:$0xff] }
 0xa99   :  { %8817 = vmatprep.subr.bf16.mxu1 %v18670_v26  ;;  %v18681_v26 = vld [vmem:[#allocation472_spill] sm:$0xff] }
 0xa9b   :  { %8654 = vmatpush1.bf16.msra.mxu0 %v18671_v2  ;;  %v18682_v2 = vld [vmem:[#allocation473_spill] sm:$0xff] }
 0xa9c   :  { %8818 = vmatpush1.bf16.msra.mxu1 %v18672_v9  ;;  %8655 = vmatprep.subr.bf16.mxu0 %v18673_v39  ;;  %v18683_v9 = vld [vmem:[#allocation474_spill] sm:$0xff]  ;;  %v18684_v39 = vld [vmem:[#allocation475_spill] sm:$0xff] }
 0xa9d   :  { %8819 = vmatprep.subr.bf16.mxu1 %v18674_v17  ;;  %v18685_v17 = vld [vmem:[#allocation476_spill] sm:$0xff] }
 0xa9f   :  { %8656 = vmatpush1.bf16.msra.mxu0 %v18675_v38  ;;  %v18686_v38 = vld [vmem:[#allocation477_spill] sm:$0xff] }
 0xaa0   :  { %8820 = vmatpush1.bf16.msra.mxu1 %v18676_v21  ;;  %8657 = vmatprep.subr.bf16.mxu0 %v18677_v13  ;;  %v18774_v13 = vld [vmem:[#allocation565_spill] sm:$0xff]  ;;  %v18776_v21 = vld [vmem:[#allocation567_spill] sm:$0xff] }
 0xaa1   :  { %8821 = vmatprep.subr.bf16.mxu1 %v18678_v16  ;;  %v18687_v16 = vld [vmem:[#allocation478_spill] sm:$0xff] }
 0xaa3   :  { %8658 = vmatpush1.bf16.msra.mxu0 %v18679_v47  ;;  %v18697_v47 = vld [vmem:[#allocation488_spill] sm:$0xff] }
 0xaa4   :  { %8822 = vmatpush1.bf16.msra.mxu1 %v18680_v15  ;;  %8659 = vmatprep.subr.bf16.mxu0 %v18681_v26  ;;  %v18688_v15 = vld [vmem:[#allocation479_spill] sm:$0xff]  ;;  %v18694_v26 = vld [vmem:[#allocation485_spill] sm:$0xff] }
 0xaa5   :  { %8823 = vmatprep.subr.bf16.mxu1 %v18682_v2  ;;  %v18689_v2 = vld [vmem:[#allocation480_spill] sm:$0xff] }
 0xaa7   :  { %8660 = vmatpush1.bf16.msra.mxu0 %v18683_v9  ;;  %v18690_v9 = vld [vmem:[#allocation481_spill] sm:$0xff] }
 0xaa8   :  { %8824 = vmatpush1.bf16.msra.mxu1 %v18684_v39  ;;  %8670 = vmatprep.subr.bf16.mxu0 %v18685_v17  ;;  %v18691_v39 = vld [vmem:[#allocation482_spill] sm:$0xff]  ;;  %v18692_v17 = vld [vmem:[#allocation483_spill] sm:$0xff] }
 0xaa9   :  { %8834 = vmatprep.subr.bf16.mxu1 %v18686_v38  ;;  %v18693_v38 = vld [vmem:[#allocation484_spill] sm:$0xff] }
 0xaaa   :  { %8662 = vmatmul.mubr.bf16.vlgmr.msra.gmra.mrb[56].mxu0 %v15340_v0 }
 0xaab   :  { %8826 = vmatmul.mubr.bf16.vlgmr.msra.gmra.mrb[56].mxu1 %v15340_v0  ;;  %8671 = vmatpush1.bf16.msra.mxu0 %v18687_v16  ;;  %v18695_v0 = vld [vmem:[#allocation486_spill] sm:$0xff]  ;;  %v18696_v16 = vld [vmem:[#allocation487_spill] sm:$0xff] }
 0xaac   :  { %8702 = vmatprep.mubr.bf16.mxu0 %v15344_v29  ;;  %8835 = vmatpush1.bf16.msra.mxu1 %v18688_v15  ;;  %v18698_v15 = vld [vmem:[#allocation489_spill] sm:$0xff] }
 0xaad   :  { %8866 = vmatprep.mubr.bf16.mxu1 %v15344_v29  ;;  %8672 = vmatprep.subr.bf16.mxu0 %v18689_v2  ;;  %v18699_v29 = vld [vmem:[#allocation490_spill] sm:$0xff]  ;;  %v18700_v2 = vld [vmem:[#allocation491_spill] sm:$0xff] }
 0xaae   :  { %8836 = vmatprep.subr.bf16.mxu1 %v18690_v9  ;;  %v18701_v9 = vld [vmem:[#allocation492_spill] sm:$0xff] }
 0xaaf   :  { %8673 = vmatpush1.bf16.msra.mxu0 %v18691_v39  ;;  %v18702_v39 = vld [vmem:[#allocation493_spill] sm:$0xff] }
 0xab0   :  { %8837 = vmatpush1.bf16.msra.mxu1 %v18692_v17  ;;  %8674 = vmatprep.subr.bf16.mxu0 %v18693_v38  ;;  %v18703_v17 = vld [vmem:[#allocation494_spill] sm:$0xff]  ;;  %v18704_v38 = vld [vmem:[#allocation495_spill] sm:$0xff] }
 0xab1   :  { %8838 = vmatprep.subr.bf16.mxu1 %v18694_v26  ;;  %v18705_v26 = vld [vmem:[#allocation496_spill] sm:$0xff] }
 0xab3   :  { %8675 = vmatpush1.bf16.msra.mxu0 %v18695_v0  ;;  %v18706_v0 = vld [vmem:[#allocation497_spill] sm:$0xff] }
 0xab4   :  { %8839 = vmatpush1.bf16.msra.mxu1 %v18696_v16  ;;  %8676 = vmatprep.subr.bf16.mxu0 %v18697_v47  ;;  %v18707_v16 = vld [vmem:[#allocation498_spill] sm:$0xff]  ;;  %v18708_v47 = vld [vmem:[#allocation499_spill] sm:$0xff] }
 0xab5   :  { %8840 = vmatprep.subr.bf16.mxu1 %v18698_v15  ;;  %v18709_v15 = vld [vmem:[#allocation500_spill] sm:$0xff] }
 0xab7   :  { %8677 = vmatpush1.bf16.msra.mxu0 %v18699_v29  ;;  %v18710_v29 = vld [vmem:[#allocation501_spill] sm:$0xff] }
 0xab8   :  { %8841 = vmatpush1.bf16.msra.mxu1 %v18700_v2  ;;  %8678 = vmatprep.subr.bf16.mxu0 %v18701_v9  ;;  %v18711_v2 = vld [vmem:[#allocation502_spill] sm:$0xff]  ;;  %v18712_v9 = vld [vmem:[#allocation503_spill] sm:$0xff] }
 0xab9   :  { %8842 = vmatprep.subr.bf16.mxu1 %v18702_v39  ;;  %v18713_v39 = vld [vmem:[#allocation504_spill] sm:$0xff] }
 0xabb   :  { %8679 = vmatpush1.bf16.msra.mxu0 %v18703_v17  ;;  %v18714_v17 = vld [vmem:[#allocation505_spill] sm:$0xff] }
 0xabc   :  { %8843 = vmatpush1.bf16.msra.mxu1 %v18704_v38  ;;  %8680 = vmatprep.subr.bf16.mxu0 %v18705_v26  ;;  %v18715_v38 = vld [vmem:[#allocation506_spill] sm:$0xff]  ;;  %v18716_v26 = vld [vmem:[#allocation507_spill] sm:$0xff] }
 0xabd   :  { %8844 = vmatprep.subr.bf16.mxu1 %v18706_v0  ;;  %v18717_v0 = vld [vmem:[#allocation508_spill] sm:$0xff] }
 0xabf   :  { %8681 = vmatpush1.bf16.msra.mxu0 %v18707_v16  ;;  %v18718_v16 = vld [vmem:[#allocation509_spill] sm:$0xff] }
 0xac0   :  { %8845 = vmatpush1.bf16.msra.mxu1 %v18708_v47  ;;  %8682 = vmatprep.subr.bf16.mxu0 %v18709_v15  ;;  %v18719_v47 = vld [vmem:[#allocation510_spill] sm:$0xff]  ;;  %v18720_v15 = vld [vmem:[#allocation511_spill] sm:$0xff] }
 0xac1   :  { %8846 = vmatprep.subr.bf16.mxu1 %v18710_v29  ;;  %v18721_v29 = vld [vmem:[#allocation512_spill] sm:$0xff] }
 0xac3   :  { %8683 = vmatpush1.bf16.msra.mxu0 %v18711_v2  ;;  %v18722_v2 = vld [vmem:[#allocation513_spill] sm:$0xff] }
 0xac4   :  { %8847 = vmatpush1.bf16.msra.mxu1 %v18712_v9  ;;  %8684 = vmatprep.subr.bf16.mxu0 %v18713_v39  ;;  %v18723_v9 = vld [vmem:[#allocation514_spill] sm:$0xff]  ;;  %v18724_v39 = vld [vmem:[#allocation515_spill] sm:$0xff] }
 0xac5   :  { %8848 = vmatprep.subr.bf16.mxu1 %v18714_v17  ;;  %v18725_v17 = vld [vmem:[#allocation516_spill] sm:$0xff] }
 0xac7   :  { %8685 = vmatpush1.bf16.msra.mxu0 %v18715_v38  ;;  %v18726_v38 = vld [vmem:[#allocation517_spill] sm:$0xff] }
 0xac8   :  { %8849 = vmatpush1.bf16.msra.mxu1 %v18716_v26  ;;  %8686 = vmatprep.subr.bf16.mxu0 %v18717_v0  ;;  %v18727_v26 = vld [vmem:[#allocation518_spill] sm:$0xff]  ;;  %v18728_v0 = vld [vmem:[#allocation519_spill] sm:$0xff] }
 0xac9   :  { %8850 = vmatprep.subr.bf16.mxu1 %v18718_v16  ;;  %v18729_v16 = vld [vmem:[#allocation520_spill] sm:$0xff] }
 0xacb   :  { %8687 = vmatpush1.bf16.msra.mxu0 %v18719_v47  ;;  %v18730_v47 = vld [vmem:[#allocation521_spill] sm:$0xff] }
 0xacc   :  { %8851 = vmatpush1.bf16.msra.mxu1 %v18720_v15  ;;  %8688 = vmatprep.subr.bf16.mxu0 %v18721_v29  ;;  %v18731_v15 = vld [vmem:[#allocation522_spill] sm:$0xff]  ;;  %v18732_v29 = vld [vmem:[#allocation523_spill] sm:$0xff] }
 0xacd   :  { %8852 = vmatprep.subr.bf16.mxu1 %v18722_v2  ;;  %v18733_v2 = vld [vmem:[#allocation524_spill] sm:$0xff] }
 0xacf   :  { %8689 = vmatpush1.bf16.msra.mxu0 %v18723_v9  ;;  %v18734_v9 = vld [vmem:[#allocation525_spill] sm:$0xff] }
 0xad0   :  { %8853 = vmatpush1.bf16.msra.mxu1 %v18724_v39  ;;  %8690 = vmatprep.subr.bf16.mxu0 %v18725_v17  ;;  %v18735_v39 = vld [vmem:[#allocation526_spill] sm:$0xff]  ;;  %v18736_v17 = vld [vmem:[#allocation527_spill] sm:$0xff] }
 0xad1   :  { %8854 = vmatprep.subr.bf16.mxu1 %v18726_v38  ;;  %v18737_v38 = vld [vmem:[#allocation528_spill] sm:$0xff] }
 0xad3   :  { %8691 = vmatpush1.bf16.msra.mxu0 %v18727_v26  ;;  %v18738_v26 = vld [vmem:[#allocation529_spill] sm:$0xff] }
 0xad4   :  { %8855 = vmatpush1.bf16.msra.mxu1 %v18728_v0  ;;  %8692 = vmatprep.subr.bf16.mxu0 %v18729_v16  ;;  %v18739_v0 = vld [vmem:[#allocation530_spill] sm:$0xff]  ;;  %v18740_v16 = vld [vmem:[#allocation531_spill] sm:$0xff] }
 0xad5   :  { %8856 = vmatprep.subr.bf16.mxu1 %v18730_v47  ;;  %v18741_v47 = vld [vmem:[#allocation532_spill] sm:$0xff] }
 0xad7   :  { %8693 = vmatpush1.bf16.msra.mxu0 %v18731_v15  ;;  %v18742_v15 = vld [vmem:[#allocation533_spill] sm:$0xff] }
 0xad8   :  { %8857 = vmatpush1.bf16.msra.mxu1 %v18732_v29  ;;  %8694 = vmatprep.subr.bf16.mxu0 %v18733_v2  ;;  %v18743_v29 = vld [vmem:[#allocation534_spill] sm:$0xff]  ;;  %v18744_v2 = vld [vmem:[#allocation535_spill] sm:$0xff] }
 0xad9   :  { %8858 = vmatprep.subr.bf16.mxu1 %v18734_v9  ;;  %v18745_v9 = vld [vmem:[#allocation536_spill] sm:$0xff] }
 0xadb   :  { %8695 = vmatpush1.bf16.msra.mxu0 %v18735_v39  ;;  %v18746_v39 = vld [vmem:[#allocation537_spill] sm:$0xff] }
 0xadc   :  { %8859 = vmatpush1.bf16.msra.mxu1 %v18736_v17  ;;  %8696 = vmatprep.subr.bf16.mxu0 %v18737_v38  ;;  %v18747_v17 = vld [vmem:[#allocation538_spill] sm:$0xff]  ;;  %v18748_v38 = vld [vmem:[#allocation539_spill] sm:$0xff] }
 0xadd   :  { %8860 = vmatprep.subr.bf16.mxu1 %v18738_v26  ;;  %v18749_v26 = vld [vmem:[#allocation540_spill] sm:$0xff] }
 0xadf   :  { %8697 = vmatpush1.bf16.msra.mxu0 %v18739_v0  ;;  %v18750_v0 = vld [vmem:[#allocation541_spill] sm:$0xff] }
 0xae0   :  { %8861 = vmatpush1.bf16.msra.mxu1 %v18740_v16  ;;  %8698 = vmatprep.subr.bf16.mxu0 %v18741_v47  ;;  %v18772_v16 = vld [vmem:[#allocation563_spill] sm:$0xff] }
 0xae1   :  { %8862 = vmatprep.subr.bf16.mxu1 %v18742_v15  ;;  %v18751_v15 = vld [vmem:[#allocation542_spill] sm:$0xff] }
 0xae3   :  { %8699 = vmatpush1.bf16.msra.mxu0 %v18743_v29  ;;  %v18761_v29 = vld [vmem:[#allocation552_spill] sm:$0xff] }
 0xae4   :  { %8863 = vmatpush1.bf16.msra.mxu1 %v18744_v2  ;;  %8700 = vmatprep.subr.bf16.mxu0 %v18745_v9  ;;  %v18752_v2 = vld [vmem:[#allocation543_spill] sm:$0xff]  ;;  %v18758_v9 = vld [vmem:[#allocation549_spill] sm:$0xff] }
 0xae5   :  { %8864 = vmatprep.subr.bf16.mxu1 %v18746_v39  ;;  %v18753_v39 = vld [vmem:[#allocation544_spill] sm:$0xff] }
 0xae7   :  { %8701 = vmatpush1.bf16.msra.mxu0 %v18747_v17  ;;  %v18754_v17 = vld [vmem:[#allocation545_spill] sm:$0xff] }
 0xae8   :  { %8865 = vmatpush1.bf16.msra.mxu1 %v18748_v38  ;;  %8711 = vmatprep.subr.bf16.mxu0 %v18749_v26  ;;  %v18755_v38 = vld [vmem:[#allocation546_spill] sm:$0xff]  ;;  %v18756_v26 = vld [vmem:[#allocation547_spill] sm:$0xff] }
 0xae9   :  { %8875 = vmatprep.subr.bf16.mxu1 %v18750_v0  ;;  %v18757_v0 = vld [vmem:[#allocation548_spill] sm:$0xff] }
 0xaea   :  { %8703 = vmatmul.mubr.bf16.vlgmr.msra.gmra.mrb[56].mxu0 %v15415_v14 }
 0xaeb   :  { %8867 = vmatmul.mubr.bf16.vlgmr.msra.gmra.mrb[56].mxu1 %v15415_v14  ;;  %8712 = vmatpush1.bf16.msra.mxu0 %v18751_v15  ;;  %v18759_v14 = vld [vmem:[#allocation550_spill] sm:$0xff]  ;;  %v18760_v15 = vld [vmem:[#allocation551_spill] sm:$0xff] }
 0xaec   :  { %8743 = vmatprep.mubr.bf16.mxu0 %v15420_v19  ;;  %8876 = vmatpush1.bf16.msra.mxu1 %v18752_v2  ;;  %v18762_v2 = vld [vmem:[#allocation553_spill] sm:$0xff] }
 0xaed   :  { %8907 = vmatprep.mubr.bf16.mxu1 %v15420_v19  ;;  %8713 = vmatprep.subr.bf16.mxu0 %v18753_v39  ;;  %v18763_v19 = vld [vmem:[#allocation554_spill] sm:$0xff]  ;;  %v18764_v39 = vld [vmem:[#allocation555_spill] sm:$0xff] }
 0xaee   :  { %8877 = vmatprep.subr.bf16.mxu1 %v18754_v17  ;;  %v18765_v17 = vld [vmem:[#allocation556_spill] sm:$0xff] }
 0xaef   :  { %8714 = vmatpush1.bf16.msra.mxu0 %v18755_v38  ;;  %v18766_v38 = vld [vmem:[#allocation557_spill] sm:$0xff] }
 0xaf0   :  { %8878 = vmatpush1.bf16.msra.mxu1 %v18756_v26  ;;  %8715 = vmatprep.subr.bf16.mxu0 %v18757_v0  ;;  %v18767_v26 = vld [vmem:[#allocation558_spill] sm:$0xff]  ;;  %v18768_v0 = vld [vmem:[#allocation559_spill] sm:$0xff] }
 0xaf1   :  { %8879 = vmatprep.subr.bf16.mxu1 %v18758_v9  ;;  %v18769_v9 = vld [vmem:[#allocation560_spill] sm:$0xff] }
 0xaf3   :  { %8716 = vmatpush1.bf16.msra.mxu0 %v18759_v14 }
 0xaf4   :  { %8880 = vmatpush1.bf16.msra.mxu1 %v18760_v15  ;;  %8717 = vmatprep.subr.bf16.mxu0 %v18761_v29  ;;  %v18770_v15 = vld [vmem:[#allocation561_spill] sm:$0xff] }
 0xaf5   :  { %8881 = vmatprep.subr.bf16.mxu1 %v18762_v2 }
 0xaf7   :  { %8718 = vmatpush1.bf16.msra.mxu0 %v18763_v19 }
 0xaf8   :  { %8882 = vmatpush1.bf16.msra.mxu1 %v18764_v39  ;;  %8719 = vmatprep.subr.bf16.mxu0 %v18765_v17  ;;  %v18771_v39 = vld [vmem:[#allocation562_spill] sm:$0xff] }
 0xaf9   :  { %8883 = vmatprep.subr.bf16.mxu1 %v18766_v38 }
 0xafb   :  { %8720 = vmatpush1.bf16.msra.mxu0 %v18767_v26  ;;  %v18773_v26 = vld [vmem:[#allocation564_spill] sm:$0xff] }
 0xafc   :  { %8884 = vmatpush1.bf16.msra.mxu1 %v18768_v0  ;;  %8721 = vmatprep.subr.bf16.mxu0 %v18769_v9  ;;  %v18775_v9 = vld [vmem:[#allocation566_spill] sm:$0xff] }
 0xafd   :  { %v15721_v14 = vpop.f32.mrb[52].mxu0  ;;  %8885 = vmatprep.subr.bf16.mxu1 %v18770_v15  ;;  %v18777_v15 = vld [vmem:[#allocation568_spill] sm:$0xff] }
 0xafe   :  { %v15724_v29 = vpop.f32.mrb[52].mxu1  ;;  %v8419_v2 = vpop.f32.mrb[53].mxu0 }
 0xaff   :  { %v8583_v19 = vpop.f32.mrb[53].mxu1  ;;  %v8421_v47 = vpop.f32.mrb[54].mxu0  ;;  %8722 = vmatpush1.bf16.msra.mxu0 %v18771_v39  ;;  %v18780_v39 = vld [vmem:[#allocation571_spill] sm:$0xff] }
 0xb00   :  { %v8585_v17 = vpop.f32.mrb[54].mxu1  ;;  %8886 = vmatpush1.bf16.msra.mxu1 %v18772_v16  ;;  %v8422_v38 = vpop.f32.mrb[55].mxu0  ;;  %8723 = vmatprep.subr.bf16.mxu0 %v18773_v26  ;;  %v18779_v47 = vld [vmem:[#allocation570_spill] sm:$0xff] }
 0xb01   :  { %v8586_v0 = vpop.f32.mrb[55].mxu1  ;;  %8887 = vmatprep.subr.bf16.mxu1 %v18774_v13  ;;  %v18781_v17 = vld [vmem:[#allocation572_spill] sm:$0xff]  ;;  %v18782_v38 = vld [vmem:[#allocation573_spill] sm:$0xff]  ;;  %v18783_v26 = vld [vmem:[#allocation574_spill] sm:$0xff] }
 0xb02   :  { %v18784_v0 = vld [vmem:[#allocation575_spill] sm:$0xff]  ;;  %v18785_v13 = vld [vmem:[#allocation576_spill] sm:$0xff] }
 0xb03   :  { %8724 = vmatpush1.bf16.msra.mxu0 %v18775_v9  ;;  %v18786_v9 = vld [vmem:[#allocation577_spill] sm:$0xff] }
 0xb04   :  { %8888 = vmatpush1.bf16.msra.mxu1 %v18776_v21  ;;  %8725 = vmatprep.subr.bf16.mxu0 %v18777_v15  ;;  %v18787_v21 = vld [vmem:[#allocation578_spill] sm:$0xff]  ;;  %v18788_v15 = vld [vmem:[#allocation579_spill] sm:$0xff] }
 0xb05   :  { %8889 = vmatprep.subr.bf16.mxu1 %v18778_v48  ;;  %v18789_v48 = vld [vmem:[#allocation580_spill] sm:$0xff] }
 0xb07   :  { %8726 = vmatpush1.bf16.msra.mxu0 %v18779_v47  ;;  %v18790_v47 = vld [vmem:[#allocation581_spill] sm:$0xff] }
 0xb08   :  { %8890 = vmatpush1.bf16.msra.mxu1 %v18780_v39  ;;  %8727 = vmatprep.subr.bf16.mxu0 %v18781_v17  ;;  %v18791_v39 = vld [vmem:[#allocation582_spill] sm:$0xff]  ;;  %v18792_v17 = vld [vmem:[#allocation583_spill] sm:$0xff] }
 0xb09   :  { %8891 = vmatprep.subr.bf16.mxu1 %v18782_v38  ;;  %v18793_v38 = vld [vmem:[#allocation584_spill] sm:$0xff] }
 0xb0b   :  { %8728 = vmatpush1.bf16.msra.mxu0 %v18783_v26  ;;  %v18794_v26 = vld [vmem:[#allocation585_spill] sm:$0xff] }
 0xb0c   :  { %8892 = vmatpush1.bf16.msra.mxu1 %v18784_v0  ;;  %8729 = vmatprep.subr.bf16.mxu0 %v18785_v13  ;;  %v18795_v13 = vld [vmem:[#allocation587_spill] sm:$0xff] }
 0xb0d   :  { %8893 = vmatprep.subr.bf16.mxu1 %v18786_v9  ;;  %v18796_v9 = vld [vmem:[#allocation588_spill] sm:$0xff] }
 0xb0f   :  { %8730 = vmatpush1.bf16.msra.mxu0 %v18787_v21  ;;  %v18797_v21 = vld [vmem:[#allocation589_spill] sm:$0xff] }
 0xb10   :  { %8894 = vmatpush1.bf16.msra.mxu1 %v18788_v15  ;;  %8731 = vmatprep.subr.bf16.mxu0 %v18789_v48  ;;  %v18798_v48 = vld [vmem:[#allocation590_spill] sm:$0xff] }
 0xb11   :  { %8895 = vmatprep.subr.bf16.mxu1 %v18790_v47 }
 0xb13   :  { %8732 = vmatpush1.bf16.msra.mxu0 %v18791_v39  ;;  %v18799_v39 = vld [vmem:[#allocation592_spill] sm:$0xff] }
 0xb14   :  { %8896 = vmatpush1.bf16.msra.mxu1 %v18792_v17  ;;  %8733 = vmatprep.subr.bf16.mxu0 %v18793_v38  ;;  %v18800_v17 = vld [vmem:[#allocation593_spill] sm:$0xff] }
 0xb15   :  { %8897 = vmatprep.subr.bf16.mxu1 %v18794_v26  ;;  %v18801_v26 = vld [vmem:[#allocation595_spill] sm:$0xff] }
 0xb17   :  { %8734 = vmatpush1.bf16.msra.mxu0 %v15005_v55  ;;  %v18802_v55 = vld [vmem:[#allocation596_spill] sm:$0xff] }
 0xb18   :  { %8898 = vmatpush1.bf16.msra.mxu1 %v18795_v13  ;;  %8735 = vmatprep.subr.bf16.mxu0 %v18796_v9  ;;  %v11658_v9 = vadd.f32 %v8419_v2, %v15044_v42 }
 0xb19   :  { %8899 = vmatprep.subr.bf16.mxu1 %v18797_v21  ;;  %v11660_v21 = vadd.f32 %v8583_v19, %v15048_v23 }
 0xb1b   :  { %8736 = vmatpush1.bf16.msra.mxu0 %v15017_v32 }
 0xb1c   :  { %8900 = vmatpush1.bf16.msra.mxu1 %v18798_v48  ;;  %8737 = vmatprep.subr.bf16.mxu0 %v15023_v7  ;;  %v18803_v7 = vld [vmem:[#allocation601_spill] sm:$0xff] }
 0xb1d   :  { %8901 = vmatprep.subr.bf16.mxu1 %v18799_v39  ;;  %v8917_v39 = vmax.f32 %v11658_v9, 0.0  ;;  %v12254_v9 = vld [vmem:[#allocation23 + $0xc8] sm:$0xff]  }
 0xb1f   :  { %8738 = vmatpush1.bf16.msra.mxu0 %v18800_v17  ;;  %v8919_v17 = vmax.f32 %v11660_v21, 0.0  ;;  %v8925_v2 = vpack.c.bf16 %v8917_v39, %v8917_v39  ;;  %v12253_v21 = vld [vmem:[#allocation23 + $0x48] sm:$0xff]   ;;  %v12257_v39 = vld [vmem:[#allocation23 + $0x50] sm:$0xff]  }
 0xb20   :  { %8902 = vmatpush1.bf16.msra.mxu1 %v15035_v44  ;;  %8739 = vmatprep.subr.bf16.mxu0 %v18801_v26  ;;  %v18804_v44 = vld [vmem:[#allocation603_spill] sm:$0xff] }
 0xb21   :  { %8903 = vmatprep.subr.bf16.mxu1 %v18802_v55  ;;  %v12249_v26 = vld [vmem:[#allocation23 + $0x40] sm:$0xff]   ;;  %v8927_v19 = vpack.c.bf16 %v8919_v17, %v8919_v17  ;;  %v12259_v17 = vld [vmem:[#allocation23 + $0x10] sm:$0xff]  }
 0xb22   :  { %v12250_v55 = vld [vmem:[#allocation23 + $0xc0] sm:$0xff]  }
 0xb23   :  { %8740 = vmatpush1.bf16.msra.mxu0 %v15051_v22 }
 0xb24   :  { %8904 = vmatpush1.bf16.msra.mxu1 %v15055_v31  ;;  %8741 = vmatprep.subr.bf16.mxu0 %v15057_v54  ;;  %v12251_v31 = vld [vmem:[#allocation23] sm:$0xff]  }
 0xb25   :  { %8905 = vmatprep.subr.bf16.mxu1 %v18803_v7  ;;  %v12252_v7 = vld [vmem:[#allocation23 + $0x80] sm:$0xff]  }
 0xb27   :  { %8742 = vmatpush1.bf16.msra.mxu0 %v15067_v59 }
 0xb28   :  { %8906 = vmatpush1.bf16.msra.mxu1 %v18804_v44  ;;  %11469 = vmatprep.subr.bf16.mxu0 %v12249_v26  ;;  %v12255_v44 = vld [vmem:[#allocation23 + $0x8] sm:$0xff]  }
 0xb29   :  { %11491 = vmatprep.subr.bf16.mxu1 %v12250_v55  ;;  %v12256_v26 = vld [vmem:[#allocation23 + $0x88] sm:$0xff]   ;;  %v12258_v55 = vld [vmem:[#allocation23 + $0xd0] sm:$0xff]  }
 0xb2a   :  { %8744 = vmatmul.mubr.bf16.vlgmr.msra.gmra.mrb[56].mxu0 %v15489_v28 }
 0xb2b   :  { %8908 = vmatmul.mubr.bf16.vlgmr.msra.gmra.mrb[56].mxu1 %v15489_v28  ;;  %11470 = vmatpush3.bf16.msra.mxu0 %v12251_v31  ;;  %v12260_v28 = vld [vmem:[#allocation23 + $0x90] sm:$0xff]   ;;  %v12261_v31 = vld [vmem:[#allocation23 + $0x58] sm:$0xff]  }
 0xb2c   :  { %8964 = vmatprep.mubr.bf16.mxu0 %v8925_v2  ;;  %11492 = vmatpush3.bf16.msra.mxu1 %v12252_v7  ;;  %v12262_v7 = vld [vmem:[#allocation23 + $0xd8] sm:$0xff]  }
 0xb2d   :  { %9004 = vmatprep.mubr.bf16.mxu1 %v8927_v19  ;;  %11471 = vmatprep.subr.bf16.mxu0 %v12253_v21  ;;  %v12263_v2 = vld [vmem:[#allocation23 + $0x18] sm:$0xff]   ;;  %v12265_v21 = vld [vmem:[#allocation23 + $0x60] sm:$0xff]  }
 0xb2e   :  { %11493 = vmatprep.subr.bf16.mxu1 %v12254_v9  ;;  %v12264_v19 = vld [vmem:[#allocation23 + $0x98] sm:$0xff]   ;;  %v12267_v9 = vld [vmem:[#allocation23 + $0x20] sm:$0xff]  }
 0xb2f   :  { %11472 = vmatpush3.bf16.msra.mxu0 %v12255_v44  ;;  %v12266_v44 = vld [vmem:[#allocation23 + $0xe0] sm:$0xff]  }
 0xb30   :  { %11494 = vmatpush3.bf16.msra.mxu1 %v12256_v26  ;;  %11473 = vmatprep.subr.bf16.mxu0 %v12257_v39  ;;  %v12268_v26 = vld [vmem:[#allocation23 + $0xa0] sm:$0xff]   ;;  %v12269_v39 = vld [vmem:[#allocation23 + $0x68] sm:$0xff]  }
 0xb31   :  { %11495 = vmatprep.subr.bf16.mxu1 %v12258_v55  ;;  %v12270_v55 = vld [vmem:[#allocation23 + $0xe8] sm:$0xff]  }
 0xb33   :  { %11474 = vmatpush3.bf16.msra.mxu0 %v12259_v17  ;;  %v12271_v17 = vld [vmem:[#allocation23 + $0x28] sm:$0xff]  }
 0xb34   :  { %11496 = vmatpush3.bf16.msra.mxu1 %v12260_v28  ;;  %11475 = vmatprep.subr.bf16.mxu0 %v12261_v31  ;;  %v18805_v28 = vld [vmem:[#allocation604_spill] sm:$0xff] }
 0xb35   :  { %11497 = vmatprep.subr.bf16.mxu1 %v12262_v7  ;;  %v11657_v31 = vadd.f32 %v15721_v14, %v18805_v28  ;;  %v12272_v7 = vld [vmem:[#allocation23 + $0xa8] sm:$0xff]   ;;  %v12279_v14 = vld [vmem:[#allocation23 + $0x38] sm:$0xff]  }
 0xb36   :  { %v12280_v28 = vld [vmem:[#allocation23 + $0xb8] sm:$0xff]  }
 0xb37   :  { %11476 = vmatpush3.bf16.msra.mxu0 %v12263_v2  ;;  %v12273_v2 = vld [vmem:[#allocation23 + $0x70] sm:$0xff]  }
 0xb38   :  { %11498 = vmatpush3.bf16.msra.mxu1 %v12264_v19  ;;  %11477 = vmatprep.subr.bf16.mxu0 %v12265_v21  ;;  %v11659_v19 = vadd.f32 %v15724_v29, %v15084_v34  ;;  %v12274_v21 = vld [vmem:[#allocation23 + $0xf0] sm:$0xff]   ;;  %v12282_v34 = vld [vmem:[#allocation23 + $0x1c0] sm:$0xff]  }
 0xb39   :  { %11499 = vmatprep.subr.bf16.mxu1 %v12266_v44  ;;  %v12275_v44 = vld [vmem:[#allocation23 + $0x30] sm:$0xff]  }
 0xb3b   :  { %11478 = vmatpush3.bf16.msra.mxu0 %v12267_v9  ;;  %v8916_v9 = vmax.f32 %v11657_v31, 0.0  ;;  %v12283_v31 = vld [vmem:[#allocation23 + $0x100] sm:$0xff]  }
 0xb3c   :  { %11500 = vmatpush3.bf16.msra.mxu1 %v12268_v26  ;;  %11479 = vmatprep.subr.bf16.mxu0 %v12269_v39  ;;  %v12276_v26 = vld [vmem:[#allocation23 + $0xb0] sm:$0xff]   ;;  %v12277_v39 = vld [vmem:[#allocation23 + $0x78] sm:$0xff]  }
 0xb3d   :  { %11501 = vmatprep.subr.bf16.mxu1 %v12270_v55  ;;  %v8918_v55 = vmax.f32 %v11659_v19, 0.0  ;;  %v12286_v19 = vld [vmem:[#allocation23 + $0x1c8] sm:$0xff]  }
 0xb3f   :  { %11480 = vmatpush3.bf16.msra.mxu0 %v12271_v17  ;;  %v12278_v17 = vld [vmem:[#allocation23 + $0xf8] sm:$0xff]   ;;  %v8926_v29 = vpack.c.bf16 %v8918_v55, %v8918_v55  ;;  %v12291_v55 = vld [vmem:[#allocation23 + $0x110] sm:$0xff]  }
 0xb40   :  { %11502 = vmatpush3.bf16.msra.mxu1 %v12272_v7  ;;  %11481 = vmatprep.subr.bf16.mxu0 %v12273_v2  ;;  %v8924_v7 = vpack.c.bf16 %v8916_v9, %v8916_v9  ;;  %v12281_v2 = vld [vmem:[#allocation23 + $0x140] sm:$0xff]   ;;  %v12288_v9 = vld [vmem:[#allocation23 + $0x188] sm:$0xff]  }
 0xb41   :  { %11503 = vmatprep.subr.bf16.mxu1 %v12274_v21  ;;  %v12284_v21 = vld [vmem:[#allocation23 + $0x180] sm:$0xff]  }
 0xb43   :  { %11482 = vmatpush3.bf16.msra.mxu0 %v12275_v44  ;;  %v12285_v44 = vld [vmem:[#allocation23 + $0x148] sm:$0xff]  }
 0xb44   :  { %11504 = vmatpush3.bf16.msra.mxu1 %v12276_v26  ;;  %11483 = vmatprep.subr.bf16.mxu0 %v12277_v39  ;;  %v12287_v26 = vld [vmem:[#allocation23 + $0x108] sm:$0xff]   ;;  %v12290_v39 = vld [vmem:[#allocation23 + $0x1d0] sm:$0xff]  }
 0xb45   :  { %11505 = vmatprep.subr.bf16.mxu1 %v12278_v17  ;;  %v12293_v17 = vld [vmem:[#allocation23 + $0x158] sm:$0xff]  }
 0xb47   :  { %11484 = vmatpush3.bf16.msra.mxu0 %v12279_v14  ;;  %v12294_v14 = vld [vmem:[#allocation23 + $0x1d8] sm:$0xff]  }
 0xb48   :  { %11506 = vmatpush3.bf16.msra.mxu1 %v12280_v28  ;;  %11513 = vmatprep.subr.bf16.mxu0 %v12281_v2  ;;  %v12289_v28 = vld [vmem:[#allocation23 + $0x150] sm:$0xff]   ;;  %v12296_v2 = vld [vmem:[#allocation23 + $0x198] sm:$0xff]  }
 0xb49   :  { %11535 = vmatprep.subr.bf16.mxu1 %v12282_v34  ;;  %v12292_v34 = vld [vmem:[#allocation23 + $0x190] sm:$0xff]  }
 0xb4a   :  { %8965 = vmatmul.mubr.bf16.vlgmr.msra.gmra.mrb[60].mxu0 %v8924_v7  ;;  %v12295_v7 = vld [vmem:[#allocation23 + $0x118] sm:$0xff]  }
 0xb4b   :  { %9005 = vmatmul.mubr.bf16.vlgmr.msra.gmra.mrb[60].mxu1 %v8926_v29  ;;  %11514 = vmatpush3.bf16.msra.mxu0 %v12283_v31  ;;  %v12297_v29 = vld [vmem:[#allocation23 + $0x160] sm:$0xff]  }
 0xb4c   :  { %11536 = vmatpush3.bf16.msra.mxu1 %v12284_v21  ;;  %11515 = vmatprep.subr.bf16.mxu0 %v12285_v44  ;;  %v12298_v31 = vld [vmem:[#allocation23 + $0x1e0] sm:$0xff]  }
 0xb4d   :  { %11537 = vmatprep.subr.bf16.mxu1 %v12286_v19  ;;  %v12299_v21 = vld [vmem:[#allocation23 + $0x120] sm:$0xff]   ;;  %v12301_v19 = vld [vmem:[#allocation23 + $0x168] sm:$0xff]  }
 0xb4e   :  { %v12300_v44 = vld [vmem:[#allocation23 + $0x1a0] sm:$0xff]  }
 0xb4f   :  { %11516 = vmatpush3.bf16.msra.mxu0 %v12287_v26  ;;  %v12302_v26 = vld [vmem:[#allocation23 + $0x1e8] sm:$0xff]  }
 0xb50   :  { %11538 = vmatpush3.bf16.msra.mxu1 %v12288_v9  ;;  %11517 = vmatprep.subr.bf16.mxu0 %v12289_v28  ;;  %v12303_v9 = vld [vmem:[#allocation23 + $0x128] sm:$0xff]  }
 0xb51   :  { %11539 = vmatprep.subr.bf16.mxu1 %v12290_v39  ;;  %v12304_v28 = vld [vmem:[#allocation23 + $0x1a8] sm:$0xff]   ;;  %v12305_v39 = vld [vmem:[#allocation23 + $0x170] sm:$0xff]  }
 0xb53   :  { %11518 = vmatpush3.bf16.msra.mxu0 %v12291_v55  ;;  %v12306_v55 = vld [vmem:[#allocation23 + $0x1f0] sm:$0xff]  }
 0xb54   :  { %11540 = vmatpush3.bf16.msra.mxu1 %v12292_v34  ;;  %11519 = vmatprep.subr.bf16.mxu0 %v12293_v17  ;;  %v12307_v34 = vld [vmem:[#allocation23 + $0x130] sm:$0xff]  }
 0xb55   :  { %11541 = vmatprep.subr.bf16.mxu1 %v12294_v14  ;;  %v12308_v17 = vld [vmem:[#allocation23 + $0x1b0] sm:$0xff]   ;;  %v12309_v14 = vld [vmem:[#allocation23 + $0x178] sm:$0xff]  }
 0xb57   :  { %11520 = vmatpush3.bf16.msra.mxu0 %v12295_v7  ;;  %v12310_v7 = vld [vmem:[#allocation23 + $0x1f8] sm:$0xff]  }
 0xb58   :  { %11542 = vmatpush3.bf16.msra.mxu1 %v12296_v2  ;;  %11521 = vmatprep.subr.bf16.mxu0 %v12297_v29  ;;  %v12311_v2 = vld [vmem:[#allocation23 + $0x138] sm:$0xff]  }
 0xb59   :  { %11543 = vmatprep.subr.bf16.mxu1 %v12298_v31  ;;  %v12312_v29 = vld [vmem:[#allocation23 + $0x1b8] sm:$0xff]  }
 0xb5a   :  { %v18806_v31 = vld [vmem:[#allocation42_spill] sm:$0xff] }
 0xb5b   :  { %11522 = vmatpush3.bf16.msra.mxu0 %v12299_v21  ;;  %v18807_v21 = vld [vmem:[#allocation43_spill] sm:$0xff] }
 0xb5c   :  { %11544 = vmatpush3.bf16.msra.mxu1 %v12300_v44  ;;  %11523 = vmatprep.subr.bf16.mxu0 %v12301_v19  ;;  %v18808_v19 = vld [vmem:[#allocation606_spill] sm:$0xff] }
 0xb5d   :  { %11545 = vmatprep.subr.bf16.mxu1 %v12302_v26 }
 0xb5f   :  { %11524 = vmatpush3.bf16.msra.mxu0 %v12303_v9 }
 0xb60   :  { %11546 = vmatpush3.bf16.msra.mxu1 %v12304_v28  ;;  %11525 = vmatprep.subr.bf16.mxu0 %v12305_v39 }
 0xb61   :  { %11547 = vmatprep.subr.bf16.mxu1 %v12306_v55 }
 0xb63   :  { %11526 = vmatpush3.bf16.msra.mxu0 %v12307_v34 }
 0xb64   :  { %11548 = vmatpush3.bf16.msra.mxu1 %v12308_v17  ;;  %11527 = vmatprep.subr.bf16.mxu0 %v12309_v14 }
 0xb65   :  { %11549 = vmatprep.subr.bf16.mxu1 %v12310_v7 }
 0xb67   :  { %11528 = vmatpush3.bf16.msra.mxu0 %v12311_v2 }
 0xb68   :  { %11550 = vmatpush3.bf16.msra.mxu1 %v12312_v29  ;;  %9095 = vmatprep.subr.bf16.mxu0 %v18806_v31 }
 0xb69   :  { %9136 = vmatprep.subr.bf16.mxu1 %v18807_v21 }
 0xbfd   :  { %v8745_v44 = vpop.f32.mrb[56].mxu0 }
 0xbfe   :  { %v11661_v26 = vadd.f32 %v8745_v44, %v18808_v19  ;;  %v8909_v9 = vpop.f32.mrb[56].mxu1  ;;  %v8747_v28 = vpop.f32.mrb[57].mxu0 }
 0xbff   :  { %v11663_v39 = vadd.f32 %v8909_v9, %v15100_v24  ;;  %v11662_v55 = vadd.f32 %v8747_v28, %v15105_v41  ;;  %v8911_v34 = vpop.f32.mrb[57].mxu1  ;;  %v8749_v17 = vpop.f32.mrb[58].mxu0 }
 0xc00   :  { %v8920_v14 = vmax.f32 %v11661_v26, 0.0  ;;  %v11664_v7 = vadd.f32 %v8911_v34, %v15110_v40  ;;  %v8913_v2 = vpop.f32.mrb[58].mxu1  ;;  %v8750_v29 = vpop.f32.mrb[59].mxu0 }
 0xc01   :  { %v8922_v59 = vmax.f32 %v11663_v39, 0.0  ;;  %v8921_v31 = vmax.f32 %v11662_v55, 0.0  ;;  %v8914_v54 = vpop.f32.mrb[59].mxu1 }
 0xc02   :  { %v8923_v21 = vmax.f32 %v11664_v7, 0.0  ;;  %v8928_v23 = vpack.c.bf16 %v8920_v14, %v8920_v14  ;;  %v18818_v54 = vld [vmem:[#allocation53_spill] sm:$0xff] }
 0xc03   :  { %v8929_v22 = vpack.c.bf16 %v8921_v31, %v8921_v31  ;;  %v8930_v19 = vpack.c.bf16 %v8922_v59, %v8922_v59  ;;  %v18820_v59 = vld [vmem:[#allocation55_spill] sm:$0xff] }
 0xc04   :  { %v8931_v44 = vpack.c.bf16 %v8923_v21, %v8923_v21  ;;  %v18822_v21 = vld [vmem:[#allocation607_spill] sm:$0xff] }
 0xc05   :  { %9044 = vmatprep.mubr.bf16.mxu0 %v8929_v22  ;;  %v18819_v22 = vld [vmem:[#allocation54_spill] sm:$0xff] }
 0xc06   :  { %9084 = vmatprep.mubr.bf16.mxu1 %v8931_v44  ;;  %9045 = vmatmul.mubr.bf16.vlgmr.msra.gmra.mrb[64].mxu0 %v8928_v23 }
 0xc07   :  { %9085 = vmatmul.mubr.bf16.vlgmr.msra.gmra.mrb[64].mxu1 %v8930_v19  ;;  %9096 = vmatpush1.bf16.msra.mxu0 %v13184_v35  ;;  %v18809_v35 = vld [vmem:[#allocation44_spill] sm:$0xff] }
 0xc08   :  { %9137 = vmatpush1.bf16.msra.mxu1 %v13186_v36  ;;  %9097 = vmatprep.subr.bf16.mxu0 %v13190_v37  ;;  %v18810_v36 = vld [vmem:[#allocation45_spill] sm:$0xff]  ;;  %v18811_v37 = vld [vmem:[#allocation46_spill] sm:$0xff]  ;;  %v18821_v19 = vld [vmem:[#allocation56_spill] sm:$0xff] }
 0xc09   :  { %9138 = vmatprep.subr.bf16.mxu1 %v13192_v18  ;;  %9127 = vmatprep.mubr.bf16.mxu0 %v18260_v56  ;;  %v18812_v18 = vld [vmem:[#allocation47_spill] sm:$0xff] }
 0xc0a   :  { %9168 = vmatprep.mubr.bf16.mxu1 %v18260_v56 }
 0xc0b   :  { %9098 = vmatpush1.bf16.msra.mxu0 %v13198_v43 }
 0xc0c   :  { %9139 = vmatpush1.bf16.msra.mxu1 %v13200_v11  ;;  %9099 = vmatprep.subr.bf16.mxu0 %v13204_v45  ;;  %v18813_v11 = vld [vmem:[#allocation48_spill] sm:$0xff] }
 0xc0d   :  { %9140 = vmatprep.subr.bf16.mxu1 %v13206_v46 }
 0xc0f   :  { %9100 = vmatpush1.bf16.msra.mxu0 %v13212_v50 }
 0xc10   :  { %9141 = vmatpush1.bf16.msra.mxu1 %v13214_v51  ;;  %9101 = vmatprep.subr.bf16.mxu0 %v13218_v52 }
 0xc11   :  { %9142 = vmatprep.subr.bf16.mxu1 %v13220_v53  ;;  %v18814_v53 = vld [vmem:[#allocation49_spill] sm:$0xff] }
 0xc13   :  { %9102 = vmatpush1.bf16.msra.mxu0 %v13224_v58 }
 0xc14   :  { %9143 = vmatpush1.bf16.msra.mxu1 %v13226_v60  ;;  %9103 = vmatprep.subr.bf16.mxu0 %v13230_v61 }
 0xc15   :  { %9144 = vmatprep.subr.bf16.mxu1 %v13232_v62  ;;  %v18815_v62 = vld [vmem:[#allocation50_spill] sm:$0xff] }
 0xc17   :  { %9104 = vmatpush1.bf16.msra.mxu0 %v13236_v3  ;;  %v18816_v3 = vld [vmem:[#allocation51_spill] sm:$0xff] }
 0xc18   :  { %9145 = vmatpush1.bf16.msra.mxu1 %v13238_v4  ;;  %9105 = vmatprep.subr.bf16.mxu0 %v13242_v5  ;;  %v18817_v5 = vld [vmem:[#allocation52_spill] sm:$0xff] }
 0xc19   :  { %9146 = vmatprep.subr.bf16.mxu1 %v18809_v35  ;;  %v12313_v35 = vld [vmem:[#allocation25] ss:$0 sm:$0xff] }
 0xc1b   :  { %9106 = vmatpush1.bf16.msra.mxu0 %v18810_v36 }
 0xc1c   :  { %9147 = vmatpush1.bf16.msra.mxu1 %v18811_v37  ;;  %9107 = vmatprep.subr.bf16.mxu0 %v18812_v18  ;;  %v18823_v18 = vld [vmem:[#allocation40_spill] sm:$0xff] }
 0xc1d   :  { %v11485_v43 = vpop.f32.mrb[60].mxu0  ;;  %9148 = vmatprep.subr.bf16.mxu1 %v18813_v11  ;;  %v18825_v11 = vld [vmem:[#allocation57_spill] sm:$0xff] }
 0xc1e   :  { %v11507_v45 = vpop.f32.mrb[60].mxu1  ;;  %v11486_v46 = vpop.f32.mrb[61].mxu0 }
 0xc1f   :  { %v11487_v50 = vadd.f32 %v11486_v46, %v11485_v43  ;;  %v11508_v51 = vpop.f32.mrb[61].mxu1  ;;  %v11488_v52 = vpop.f32.mrb[62].mxu0  ;;  %9108 = vmatpush1.bf16.msra.mxu0 %v18814_v53  ;;  %v18824_v43 = vld [vmem:[#allocation41_spill] sm:$0xff]  ;;  %v18827_v46 = vld [vmem:[#allocation59_spill] sm:$0xff] }
 0xc20   :  { %v11509_v58 = vadd.f32 %v11508_v51, %v11507_v45  ;;  %v11510_v60 = vpop.f32.mrb[62].mxu1  ;;  %v11489_v61 = vpop.f32.mrb[63].mxu0  ;;  %9149 = vmatpush1.bf16.msra.mxu1 %v18815_v62  ;;  %9109 = vmatprep.subr.bf16.mxu0 %v18816_v3  ;;  %v18826_v45 = vld [vmem:[#allocation58_spill] sm:$0xff]  ;;  %v18829_v51 = vld [vmem:[#allocation61_spill] sm:$0xff]  ;;  %v18831_v53 = vld [vmem:[#allocation63_spill] sm:$0xff] }
 0xc21   :  { %v11511_v4 = vpop.f32.mrb[63].mxu1  ;;  %9150 = vmatprep.subr.bf16.mxu1 %v18817_v5  ;;  %v18830_v52 = vld [vmem:[#allocation62_spill] sm:$0xff]  ;;  %v18833_v60 = vld [vmem:[#allocation65_spill] sm:$0xff]  ;;  %v18835_v62 = vld [vmem:[#allocation67_spill] sm:$0xff] }
 0xc22   :  { %v9007_v23 = vadd.f32 %v11509_v58, %v11487_v50  ;;  %v18828_v50 = vld [vmem:[#allocation60_spill] sm:$0xff]  ;;  %v18834_v61 = vld [vmem:[#allocation66_spill] sm:$0xff]  ;;  %v18839_v5 = vld [vmem:[#allocation71_spill] sm:$0xff] }
 0xc23   :  { %9110 = vmatpush1.bf16.msra.mxu0 %v18818_v54  ;;  %v18832_v58 = vld [vmem:[#allocation64_spill] sm:$0xff]  ;;  %v18838_v4 = vld [vmem:[#allocation70_spill] sm:$0xff]  ;;  %v18841_v54 = vld [vmem:[#allocation73_spill] sm:$0xff] }
 0xc24   :  { %9151 = vmatpush1.bf16.msra.mxu1 %v18819_v22  ;;  %9177 = vmatprep.subr.bf16.mxu0 %v18820_v59  ;;  %v18836_v3 = vld [vmem:[#allocation68_spill] sm:$0xff]  ;;  %v18842_v22 = vld [vmem:[#allocation74_spill] sm:$0xff]  ;;  %v18843_v59 = vld [vmem:[#allocation75_spill] sm:$0xff] }
 0xc25   :  { %9218 = vmatprep.subr.bf16.mxu1 %v18821_v19  ;;  %v18844_v19 = vld [vmem:[#allocation76_spill] sm:$0xff] }
 0xcd9   :  { %v11529_v26 = vpop.f32.mrb[64].mxu0 }
 0xcda   :  { %v11551_v9 = vpop.f32.mrb[64].mxu1  ;;  %v11530_v28 = vpop.f32.mrb[65].mxu0 }
 0xcdb   :  { %v11531_v39 = vadd.f32 %v11530_v28, %v11529_v26  ;;  %v11552_v55 = vpop.f32.mrb[65].mxu1  ;;  %v11532_v34 = vpop.f32.mrb[66].mxu0  ;;  %v18845_v26 = vld [vmem:[#allocation77_spill] sm:$0xff]  ;;  %v18847_v28 = vld [vmem:[#allocation79_spill] sm:$0xff] }
 0xcdc   :  { %v11553_v17 = vadd.f32 %v11552_v55, %v11551_v9  ;;  %v11554_v14 = vpop.f32.mrb[66].mxu1  ;;  %v11533_v7 = vpop.f32.mrb[67].mxu0  ;;  %v18846_v9 = vld [vmem:[#allocation78_spill] sm:$0xff]  ;;  %v18849_v55 = vld [vmem:[#allocation81_spill] sm:$0xff] }
 0xcdd   :  { %v9047_v2 = vadd.f32 %v11531_v39, %v9007_v23  ;;  %v11555_v29 = vpop.f32.mrb[67].mxu1  ;;  %v18840_v23 = vld [vmem:[#allocation72_spill] sm:$0xff]  ;;  %v18850_v34 = vld [vmem:[#allocation82_spill] sm:$0xff]  ;;  %v18853_v7 = vld [vmem:[#allocation85_spill] sm:$0xff] }
 0xcde   :  { %v18848_v39 = vld [vmem:[#allocation80_spill] sm:$0xff]  ;;  %v18855_v29 = vld [vmem:[#allocation87_spill] sm:$0xff] }
 0xcdf   :  { %v9087_v31 = vadd.f32 %v11553_v17, %v9047_v2  ;;  %v18851_v17 = vld [vmem:[#allocation83_spill] sm:$0xff]  ;;  %v18852_v14 = vld [vmem:[#allocation84_spill] sm:$0xff]  ;;  %v18854_v2 = vld [vmem:[#allocation86_spill] sm:$0xff] }
 0xce1   :  { %v9092_v44 = vadd.f32 %v9087_v31, %v18822_v21  ;;  %v18856_v31 = vld [vmem:[#allocation88_spill] sm:$0xff]  ;;  %v18857_v21 = vld [vmem:[#allocation89_spill] sm:$0xff] }
 0xce3   :  { %v15817_v36 = vadd.f32 %v12313_v35, %v9092_v44  ;;  %v18858_v44 = vld [vmem:[#allocation90_spill] sm:$0xff]  ;;  %v18859_v35 = vld [vmem:[#allocation91_spill] sm:$0xff] }
 0xce5   :  { %v9094_v37 = vpack.c.bf16 %v15817_v36, %v15817_v36 }
 0xce7   :  { %9128 = vmatmul.mubr.bf16.vlgmr.msra.gmra.mrb[68].mxu0 %v9094_v37  ;;  %9169 = vmatmul.mubr.bf16.vlgmr.msra.gmra.mrb[68].mxu1 %v9094_v37 }
 0xce8   :  { %9178 = vmatpush1.bf16.msra.mxu0 %v18823_v18  ;;  %9219 = vmatpush1.bf16.msra.mxu1 %v18824_v43  ;;  %v18860_v18 = vld [vmem:[#allocation92_spill] sm:$0xff]  ;;  %v18861_v43 = vld [vmem:[#allocation93_spill] sm:$0xff] }
 0xce9   :  { %9179 = vmatprep.subr.bf16.mxu0 %v18825_v11  ;;  %9220 = vmatprep.subr.bf16.mxu1 %v18826_v45  ;;  %v18862_v11 = vld [vmem:[#allocation94_spill] sm:$0xff]  ;;  %v18863_v45 = vld [vmem:[#allocation95_spill] sm:$0xff] }
 0xcea   :  { %9209 = vmatprep.mubr.bf16.mxu0 %v18260_v56  ;;  %9250 = vmatprep.mubr.bf16.mxu1 %v18260_v56  ;;  %v18837_v56 = vld [vmem:[#allocation69_spill] sm:$0xff] }
 0xcec   :  { %9180 = vmatpush1.bf16.msra.mxu0 %v18827_v46  ;;  %9221 = vmatpush1.bf16.msra.mxu1 %v18828_v50  ;;  %v18864_v46 = vld [vmem:[#allocation96_spill] sm:$0xff]  ;;  %v18866_v50 = vld [vmem:[#allocation98_spill] sm:$0xff] }
 0xced   :  { %9181 = vmatprep.subr.bf16.mxu0 %v18829_v51  ;;  %9222 = vmatprep.subr.bf16.mxu1 %v18830_v52  ;;  %v18867_v51 = vld [vmem:[#allocation99_spill] sm:$0xff]  ;;  %v18868_v52 = vld [vmem:[#allocation100_spill] sm:$0xff] }
 0xcf0   :  { %9182 = vmatpush1.bf16.msra.mxu0 %v18831_v53  ;;  %9223 = vmatpush1.bf16.msra.mxu1 %v18832_v58  ;;  %v18869_v53 = vld [vmem:[#allocation101_spill] sm:$0xff]  ;;  %v18870_v58 = vld [vmem:[#allocation102_spill] sm:$0xff] }
 0xcf1   :  { %9183 = vmatprep.subr.bf16.mxu0 %v18833_v60  ;;  %9224 = vmatprep.subr.bf16.mxu1 %v18834_v61  ;;  %v18871_v60 = vld [vmem:[#allocation103_spill] sm:$0xff]  ;;  %v18872_v61 = vld [vmem:[#allocation104_spill] sm:$0xff] }
 0xcf4   :  { %9184 = vmatpush1.bf16.msra.mxu0 %v18835_v62  ;;  %9225 = vmatpush1.bf16.msra.mxu1 %v18836_v3  ;;  %v18873_v62 = vld [vmem:[#allocation105_spill] sm:$0xff]  ;;  %v18874_v3 = vld [vmem:[#allocation106_spill] sm:$0xff] }
 0xcf5   :  { %9185 = vmatprep.subr.bf16.mxu0 %v18837_v56  ;;  %9226 = vmatprep.subr.bf16.mxu1 %v18838_v4  ;;  %v18875_v56 = vld [vmem:[#allocation107_spill] sm:$0xff]  ;;  %v18876_v4 = vld [vmem:[#allocation108_spill] sm:$0xff] }
 0xcf8   :  { %9186 = vmatpush1.bf16.msra.mxu0 %v18839_v5  ;;  %9227 = vmatpush1.bf16.msra.mxu1 %v18840_v23  ;;  %v18877_v5 = vld [vmem:[#allocation109_spill] sm:$0xff]  ;;  %v18878_v23 = vld [vmem:[#allocation110_spill] sm:$0xff] }
 0xcf9   :  { %9187 = vmatprep.subr.bf16.mxu0 %v18841_v54  ;;  %9228 = vmatprep.subr.bf16.mxu1 %v18842_v22  ;;  %v18879_v54 = vld [vmem:[#allocation111_spill] sm:$0xff]  ;;  %v18880_v22 = vld [vmem:[#allocation112_spill] sm:$0xff] }
 0xcfc   :  { %9188 = vmatpush1.bf16.msra.mxu0 %v18843_v59  ;;  %9229 = vmatpush1.bf16.msra.mxu1 %v18844_v19  ;;  %v18881_v59 = vld [vmem:[#allocation113_spill] sm:$0xff]  ;;  %v18882_v19 = vld [vmem:[#allocation114_spill] sm:$0xff] }
 0xcfd   :  { %9189 = vmatprep.subr.bf16.mxu0 %v18845_v26  ;;  %9230 = vmatprep.subr.bf16.mxu1 %v18846_v9  ;;  %v18883_v26 = vld [vmem:[#allocation115_spill] sm:$0xff]  ;;  %v18884_v9 = vld [vmem:[#allocation116_spill] sm:$0xff] }
 0xd00   :  { %9190 = vmatpush1.bf16.msra.mxu0 %v18847_v28  ;;  %9231 = vmatpush1.bf16.msra.mxu1 %v18848_v39  ;;  %v18885_v28 = vld [vmem:[#allocation117_spill] sm:$0xff]  ;;  %v18886_v39 = vld [vmem:[#allocation118_spill] sm:$0xff] }
 0xd01   :  { %9191 = vmatprep.subr.bf16.mxu0 %v18849_v55  ;;  %9232 = vmatprep.subr.bf16.mxu1 %v18850_v34  ;;  %v18887_v55 = vld [vmem:[#allocation119_spill] sm:$0xff]  ;;  %v18888_v34 = vld [vmem:[#allocation120_spill] sm:$0xff] }
 0xd04   :  { %9192 = vmatpush1.bf16.msra.mxu0 %v18851_v17  ;;  %9233 = vmatpush1.bf16.msra.mxu1 %v18852_v14  ;;  %v18889_v17 = vld [vmem:[#allocation121_spill] sm:$0xff]  ;;  %v18890_v14 = vld [vmem:[#allocation122_spill] sm:$0xff] }
 0xd05   :  { %9283 = vmatprep.subr.bf16.mxu0 %v18853_v7  ;;  %9447 = vmatprep.subr.bf16.mxu1 %v18854_v2  ;;  %v18891_v7 = vld [vmem:[#allocation123_spill] sm:$0xff]  ;;  %v18892_v2 = vld [vmem:[#allocation124_spill] sm:$0xff] }
 0xd07   :  { %9210 = vmatmul.mubr.bf16.vlgmr.msra.gmra.mrb[72].mxu0 %v9094_v37  ;;  %9251 = vmatmul.mubr.bf16.vlgmr.msra.gmra.mrb[72].mxu1 %v9094_v37  ;;  %v18865_v37 = vld [vmem:[#allocation97_spill] sm:$0xff] }
 0xd08   :  { %9284 = vmatpush1.bf16.msra.mxu0 %v18855_v29  ;;  %9448 = vmatpush1.bf16.msra.mxu1 %v18856_v31  ;;  %v18893_v29 = vld [vmem:[#allocation125_spill] sm:$0xff]  ;;  %v18894_v31 = vld [vmem:[#allocation126_spill] sm:$0xff] }
 0xd09   :  { %9285 = vmatprep.subr.bf16.mxu0 %v18857_v21  ;;  %9449 = vmatprep.subr.bf16.mxu1 %v18858_v44  ;;  %v18895_v21 = vld [vmem:[#allocation127_spill] sm:$0xff]  ;;  %v18896_v44 = vld [vmem:[#allocation128_spill] sm:$0xff] }
 0xd0c   :  { %9286 = vmatpush1.bf16.msra.mxu0 %v18859_v35  ;;  %9450 = vmatpush1.bf16.msra.mxu1 %v18860_v18  ;;  %v18897_v35 = vld [vmem:[#allocation129_spill] sm:$0xff]  ;;  %v18898_v18 = vld [vmem:[#allocation130_spill] sm:$0xff] }
 0xd0d   :  { %9287 = vmatprep.subr.bf16.mxu0 %v18861_v43  ;;  %9451 = vmatprep.subr.bf16.mxu1 %v18862_v11  ;;  %v18899_v43 = vld [vmem:[#allocation131_spill] sm:$0xff]  ;;  %v18900_v11 = vld [vmem:[#allocation132_spill] sm:$0xff] }
 0xd10   :  { %9288 = vmatpush1.bf16.msra.mxu0 %v18863_v45  ;;  %9452 = vmatpush1.bf16.msra.mxu1 %v18864_v46  ;;  %v18901_v45 = vld [vmem:[#allocation133_spill] sm:$0xff]  ;;  %v18902_v46 = vld [vmem:[#allocation134_spill] sm:$0xff] }
 0xd11   :  { %9289 = vmatprep.subr.bf16.mxu0 %v18865_v37  ;;  %9453 = vmatprep.subr.bf16.mxu1 %v18866_v50  ;;  %v18903_v37 = vld [vmem:[#allocation135_spill] sm:$0xff]  ;;  %v18904_v50 = vld [vmem:[#allocation136_spill] sm:$0xff] }
 0xd14   :  { %9290 = vmatpush1.bf16.msra.mxu0 %v18867_v51  ;;  %9454 = vmatpush1.bf16.msra.mxu1 %v18868_v52  ;;  %v18905_v51 = vld [vmem:[#allocation137_spill] sm:$0xff]  ;;  %v18906_v52 = vld [vmem:[#allocation138_spill] sm:$0xff] }
 0xd15   :  { %9291 = vmatprep.subr.bf16.mxu0 %v18869_v53  ;;  %9455 = vmatprep.subr.bf16.mxu1 %v18870_v58  ;;  %v18907_v53 = vld [vmem:[#allocation139_spill] sm:$0xff]  ;;  %v18908_v58 = vld [vmem:[#allocation140_spill] sm:$0xff] }
 0xd18   :  { %9292 = vmatpush1.bf16.msra.mxu0 %v18871_v60  ;;  %9456 = vmatpush1.bf16.msra.mxu1 %v18872_v61  ;;  %v18909_v60 = vld [vmem:[#allocation141_spill] sm:$0xff]  ;;  %v18910_v61 = vld [vmem:[#allocation142_spill] sm:$0xff] }
 0xd19   :  { %9293 = vmatprep.subr.bf16.mxu0 %v18873_v62  ;;  %9457 = vmatprep.subr.bf16.mxu1 %v18874_v3  ;;  %v18911_v62 = vld [vmem:[#allocation143_spill] sm:$0xff]  ;;  %v18912_v3 = vld [vmem:[#allocation144_spill] sm:$0xff] }
 0xd1c   :  { %9294 = vmatpush1.bf16.msra.mxu0 %v18875_v56  ;;  %9458 = vmatpush1.bf16.msra.mxu1 %v18876_v4  ;;  %v18913_v56 = vld [vmem:[#allocation145_spill] sm:$0xff]  ;;  %v18914_v4 = vld [vmem:[#allocation146_spill] sm:$0xff] }
 0xd1d   :  { %9295 = vmatprep.subr.bf16.mxu0 %v18877_v5  ;;  %9459 = vmatprep.subr.bf16.mxu1 %v18878_v23  ;;  %v18915_v5 = vld [vmem:[#allocation147_spill] sm:$0xff]  ;;  %v18916_v23 = vld [vmem:[#allocation148_spill] sm:$0xff] }
 0xd20   :  { %9296 = vmatpush1.bf16.msra.mxu0 %v18879_v54  ;;  %9460 = vmatpush1.bf16.msra.mxu1 %v18880_v22  ;;  %v18917_v54 = vld [vmem:[#allocation149_spill] sm:$0xff]  ;;  %v18918_v22 = vld [vmem:[#allocation152_spill] sm:$0xff] }
 0xd21   :  { %9297 = vmatprep.subr.bf16.mxu0 %v18881_v59  ;;  %9461 = vmatprep.subr.bf16.mxu1 %v18882_v19 }
 0xd24   :  { %9298 = vmatpush1.bf16.msra.mxu0 %v18883_v26  ;;  %9462 = vmatpush1.bf16.msra.mxu1 %v18884_v9  ;;  %v18919_v26 = vld [vmem:[#allocation153_spill] sm:$0xff] }
 0xd25   :  { %9299 = vmatprep.subr.bf16.mxu0 %v18885_v28  ;;  %9463 = vmatprep.subr.bf16.mxu1 %v18886_v39 }
 0xd28   :  { %9300 = vmatpush1.bf16.msra.mxu0 %v18887_v55  ;;  %9464 = vmatpush1.bf16.msra.mxu1 %v18888_v34  ;;  %v18920_v55 = vld [vmem:[#allocation154_spill] sm:$0xff] }
 0xd29   :  { %9301 = vmatprep.subr.bf16.mxu0 %v18889_v17  ;;  %9465 = vmatprep.subr.bf16.mxu1 %v18890_v14  ;;  %v18921_v17 = vld [vmem:[#allocation155_spill] sm:$0xff] }
 0xd2c   :  { %9302 = vmatpush1.bf16.msra.mxu0 %v18891_v7  ;;  %9466 = vmatpush1.bf16.msra.mxu1 %v18892_v2 }
 0xd2d   :  { %9303 = vmatprep.subr.bf16.mxu0 %v18893_v29  ;;  %9467 = vmatprep.subr.bf16.mxu1 %v18894_v31 }
 0xd30   :  { %9304 = vmatpush1.bf16.msra.mxu0 %v18895_v21  ;;  %9468 = vmatpush1.bf16.msra.mxu1 %v18896_v44 }
 0xd31   :  { %9305 = vmatprep.subr.bf16.mxu0 %v18897_v35  ;;  %9469 = vmatprep.subr.bf16.mxu1 %v18898_v18 }
 0xd34   :  { %9306 = vmatpush1.bf16.msra.mxu0 %v18899_v43  ;;  %9470 = vmatpush1.bf16.msra.mxu1 %v18900_v11 }
 0xd35   :  { %9307 = vmatprep.subr.bf16.mxu0 %v18901_v45  ;;  %9471 = vmatprep.subr.bf16.mxu1 %v18902_v46  ;;  %v18922_v45 = vld [vmem:[#allocation150_spill] sm:$0xff]  ;;  %v18923_v46 = vld [vmem:[#allocation151_spill] sm:$0xff] }
 0xd38   :  { %9308 = vmatpush1.bf16.msra.mxu0 %v18903_v37  ;;  %9472 = vmatpush1.bf16.msra.mxu1 %v18904_v50  ;;  %v18924_v37 = vld [vmem:[#allocation156_spill] sm:$0xff]  ;;  %v18925_v50 = vld [vmem:[#allocation157_spill] sm:$0xff] }
 0xd39   :  { %9309 = vmatprep.subr.bf16.mxu0 %v18905_v51  ;;  %9473 = vmatprep.subr.bf16.mxu1 %v18906_v52  ;;  %v18926_v51 = vld [vmem:[#allocation158_spill] sm:$0xff]  ;;  %v18927_v52 = vld [vmem:[#allocation159_spill] sm:$0xff] }
 0xd3c   :  { %9310 = vmatpush1.bf16.msra.mxu0 %v18907_v53  ;;  %9474 = vmatpush1.bf16.msra.mxu1 %v18908_v58  ;;  %v18928_v53 = vld [vmem:[#allocation160_spill] sm:$0xff]  ;;  %v18929_v58 = vld [vmem:[#allocation161_spill] sm:$0xff] }
 0xd3d   :  { %9311 = vmatprep.subr.bf16.mxu0 %v18909_v60  ;;  %9475 = vmatprep.subr.bf16.mxu1 %v18910_v61  ;;  %v18930_v60 = vld [vmem:[#allocation162_spill] sm:$0xff]  ;;  %v18931_v61 = vld [vmem:[#allocation163_spill] sm:$0xff] }
 0xd40   :  { %9312 = vmatpush1.bf16.msra.mxu0 %v18911_v62  ;;  %9476 = vmatpush1.bf16.msra.mxu1 %v18912_v3  ;;  %v18932_v62 = vld [vmem:[#allocation164_spill] sm:$0xff]  ;;  %v18933_v3 = vld [vmem:[#allocation165_spill] sm:$0xff] }
 0xd41   :  { %9313 = vmatprep.subr.bf16.mxu0 %v18913_v56  ;;  %9477 = vmatprep.subr.bf16.mxu1 %v18914_v4  ;;  %v18934_v56 = vld [vmem:[#allocation166_spill] sm:$0xff]  ;;  %v18935_v4 = vld [vmem:[#allocation167_spill] sm:$0xff] }
 0xd44   :  { %9314 = vmatpush1.bf16.msra.mxu0 %v18915_v5  ;;  %9478 = vmatpush1.bf16.msra.mxu1 %v18916_v23  ;;  %v18936_v5 = vld [vmem:[#allocation168_spill] sm:$0xff]  ;;  %v18937_v23 = vld [vmem:[#allocation169_spill] sm:$0xff] }
 0xd45   :  { %9324 = vmatprep.subr.bf16.mxu0 %v18917_v54  ;;  %9488 = vmatprep.subr.bf16.mxu1 %v18918_v22  ;;  %v18938_v54 = vld [vmem:[#allocation170_spill] sm:$0xff]  ;;  %v18939_v22 = vld [vmem:[#allocation171_spill] sm:$0xff] }
 0xdba   :  { %v9129_v59 = vpop.f32.mrb[68].mxu0  ;;  %v15919_v19 = vpop.f32.mrb[68].mxu1 }
 0xdbb   :  { %v9259_v9 = vadd.f32 %v9129_v59, %v18919_v26  ;;  %v9131_v28 = vpop.f32.mrb[69].mxu0  ;;  %v9172_v39 = vpop.f32.mrb[69].mxu1  ;;  %v18940_v59 = vld [vmem:[#allocation172_spill] sm:$0xff]  ;;  %v18941_v26 = vld [vmem:[#allocation173_spill] sm:$0xff] }
 0xdbc   :  { %v9260_v34 = vadd.f32 %v9131_v28, %v18920_v55  ;;  %v9262_v14 = vadd.f32 %v9172_v39, %v18921_v17  ;;  %v9133_v7 = vpop.f32.mrb[70].mxu0  ;;  %v9174_v2 = vpop.f32.mrb[70].mxu1  ;;  %v18943_v28 = vld [vmem:[#allocation175_spill] sm:$0xff]  ;;  %v18944_v39 = vld [vmem:[#allocation176_spill] sm:$0xff]  ;;  %v18945_v55 = vld [vmem:[#allocation177_spill] sm:$0xff] }
 0xdbd   :  { %v9267_v29 = vmax.f32 %v9259_v9, 0.0  ;;  %v9134_v31 = vpop.f32.mrb[71].mxu0  ;;  %v9175_v21 = vpop.f32.mrb[71].mxu1  ;;  %v18942_v9 = vld [vmem:[#allocation174_spill] sm:$0xff] }
 0xdbe   :  { %v9268_v44 = vmax.f32 %v9260_v34, 0.0  ;;  %v9270_v35 = vmax.f32 %v9262_v14, 0.0  ;;  %v18946_v31 = vld [vmem:[#allocation178_spill] sm:$0xff] }
 0xdbf   :  { %v15926_v43 = vpack.c.bf16 %v9267_v29, %v9267_v29 }
 0xdc0   :  { %v15924_v18 = vpack.c.bf16 %v9268_v44, %v9268_v44  ;;  %v15930_v11 = vpack.c.bf16 %v9270_v35, %v9270_v35  ;;  %v18947_v35 = vld [vmem:[#allocation180_spill] sm:$0xff] }
 0xdc2   :  { %9315 = vmatprep.mubr.bf16.mxu0 %v15924_v18  ;;  %9479 = vmatprep.mubr.bf16.mxu1 %v15924_v18 }
 0xdc3   :  { %9316 = vmatmul.mubr.bf16.vlgmr.msra.gmra.mrb[76].mxu0 %v15926_v43  ;;  %9480 = vmatmul.mubr.bf16.vlgmr.msra.gmra.mrb[76].mxu1 %v15926_v43 }
 0xdc4   :  { %9325 = vmatpush1.bf16.msra.mxu0 %v18922_v45  ;;  %9489 = vmatpush1.bf16.msra.mxu1 %v18923_v46  ;;  %v18948_v45 = vld [vmem:[#allocation181_spill] sm:$0xff]  ;;  %v18949_v46 = vld [vmem:[#allocation182_spill] sm:$0xff] }
 0xdc5   :  { %9356 = vmatprep.mubr.bf16.mxu0 %v15930_v11  ;;  %9520 = vmatprep.mubr.bf16.mxu1 %v15930_v11 }
 0xdc6   :  { %9326 = vmatprep.subr.bf16.mxu0 %v18924_v37  ;;  %9490 = vmatprep.subr.bf16.mxu1 %v18925_v50  ;;  %v18950_v37 = vld [vmem:[#allocation183_spill] sm:$0xff]  ;;  %v18951_v50 = vld [vmem:[#allocation184_spill] sm:$0xff] }
 0xdc8   :  { %9327 = vmatpush1.bf16.msra.mxu0 %v18926_v51  ;;  %9491 = vmatpush1.bf16.msra.mxu1 %v18927_v52  ;;  %v18952_v51 = vld [vmem:[#allocation185_spill] sm:$0xff]  ;;  %v18953_v52 = vld [vmem:[#allocation186_spill] sm:$0xff] }
 0xdc9   :  { %9328 = vmatprep.subr.bf16.mxu0 %v18928_v53  ;;  %9492 = vmatprep.subr.bf16.mxu1 %v18929_v58  ;;  %v18954_v53 = vld [vmem:[#allocation187_spill] sm:$0xff]  ;;  %v18955_v58 = vld [vmem:[#allocation188_spill] sm:$0xff] }
 0xdcc   :  { %9329 = vmatpush1.bf16.msra.mxu0 %v18930_v60  ;;  %9493 = vmatpush1.bf16.msra.mxu1 %v18931_v61  ;;  %v18957_v60 = vld [vmem:[#allocation190_spill] sm:$0xff]  ;;  %v18958_v61 = vld [vmem:[#allocation191_spill] sm:$0xff] }
 0xdcd   :  { %9330 = vmatprep.subr.bf16.mxu0 %v18932_v62  ;;  %9494 = vmatprep.subr.bf16.mxu1 %v18933_v3  ;;  %v18959_v62 = vld [vmem:[#allocation193_spill] sm:$0xff]  ;;  %v18960_v3 = vld [vmem:[#allocation194_spill] sm:$0xff] }
 0xdd0   :  { %9331 = vmatpush1.bf16.msra.mxu0 %v18934_v56  ;;  %9495 = vmatpush1.bf16.msra.mxu1 %v18935_v4  ;;  %v18961_v56 = vld [vmem:[#allocation195_spill] sm:$0xff]  ;;  %v18962_v4 = vld [vmem:[#allocation196_spill] sm:$0xff] }
 0xdd1   :  { %9332 = vmatprep.subr.bf16.mxu0 %v18936_v5  ;;  %9496 = vmatprep.subr.bf16.mxu1 %v18937_v23  ;;  %v18963_v5 = vld [vmem:[#allocation197_spill] sm:$0xff]  ;;  %v18964_v23 = vld [vmem:[#allocation198_spill] sm:$0xff] }
 0xdd4   :  { %9333 = vmatpush1.bf16.msra.mxu0 %v18938_v54  ;;  %9497 = vmatpush1.bf16.msra.mxu1 %v18939_v22  ;;  %v18965_v54 = vld [vmem:[#allocation199_spill] sm:$0xff]  ;;  %v18966_v22 = vld [vmem:[#allocation200_spill] sm:$0xff] }
 0xdd5   :  { %9334 = vmatprep.subr.bf16.mxu0 %v18940_v59  ;;  %9498 = vmatprep.subr.bf16.mxu1 %v18941_v26  ;;  %v18967_v59 = vld [vmem:[#allocation201_spill] sm:$0xff]  ;;  %v18968_v26 = vld [vmem:[#allocation202_spill] sm:$0xff] }
 0xdd8   :  { %9335 = vmatpush1.bf16.msra.mxu0 %v18942_v9  ;;  %9499 = vmatpush1.bf16.msra.mxu1 %v18943_v28  ;;  %v18970_v9 = vld [vmem:[#allocation204_spill] sm:$0xff]  ;;  %v18971_v28 = vld [vmem:[#allocation205_spill] sm:$0xff] }
 0xdd9   :  { %9336 = vmatprep.subr.bf16.mxu0 %v18944_v39  ;;  %9500 = vmatprep.subr.bf16.mxu1 %v18945_v55  ;;  %v18972_v39 = vld [vmem:[#allocation206_spill] sm:$0xff]  ;;  %v18973_v55 = vld [vmem:[#allocation207_spill] sm:$0xff] }
 0xdda   :  { %v15960_v34 = vpop.f32.mrb[72].mxu0  ;;  %v15962_v17 = vpop.f32.mrb[72].mxu1 }
 0xddb   :  { %v9213_v14 = vpop.f32.mrb[73].mxu0  ;;  %v15964_v7 = vpop.f32.mrb[73].mxu1 }
 0xddc   :  { %v9215_v2 = vpop.f32.mrb[74].mxu0  ;;  %v9256_v29 = vpop.f32.mrb[74].mxu1  ;;  %9337 = vmatpush1.bf16.msra.mxu0 %v18946_v31  ;;  %9501 = vmatpush1.bf16.msra.mxu1 %v18397_v20  ;;  %v18956_v20 = vld [vmem:[#allocation189_spill] sm:$0xff] }
 0xddd   :  { %v9216_v21 = vpop.f32.mrb[75].mxu0  ;;  %v9257_v44 = vpop.f32.mrb[75].mxu1  ;;  %9338 = vmatprep.subr.bf16.mxu0 %v18947_v35  ;;  %9502 = vmatprep.subr.bf16.mxu1 %v18948_v45  ;;  %v9261_v2 = vadd.f32 %v15919_v19, %v18423_v30  ;;  %v18974_v29 = vld [vmem:[#allocation208_spill] sm:$0xff]  ;;  %v18975_v31 = vld [vmem:[#allocation209_spill] sm:$0xff]  ;;  %v18977_v45 = vld [vmem:[#allocation214_spill] sm:$0xff] }
 0xdde   :  { %v9264_v21 = vadd.f32 %v9213_v14, %v18426_v8  ;;  %v18976_v44 = vld [vmem:[#allocation213_spill] sm:$0xff]  ;;  %v18981_v19 = vld [vmem:[#allocation218_spill] sm:$0xff] }
 0xddf   :  { %v9269_v35 = vmax.f32 %v9261_v2, 0.0  ;;  %v18984_v14 = vld [vmem:[#allocation221_spill] sm:$0xff]  ;;  %v19005_v2 = vld [vmem:[#allocation242_spill] sm:$0xff] }
 0xde0   :  { %9339 = vmatpush1.bf16.msra.mxu0 %v18949_v46  ;;  %9503 = vmatpush1.bf16.msra.mxu1 %v18950_v37  ;;  %v18978_v46 = vld [vmem:[#allocation215_spill] sm:$0xff]  ;;  %v9272_v37 = vmax.f32 %v9264_v21, 0.0  ;;  %v19008_v21 = vld [vmem:[#allocation245_spill] sm:$0xff] }
 0xde1   :  { %9340 = vmatprep.subr.bf16.mxu0 %v18951_v50  ;;  %9504 = vmatprep.subr.bf16.mxu1 %v18952_v51  ;;  %v18979_v50 = vld [vmem:[#allocation216_spill] sm:$0xff]  ;;  %v18980_v51 = vld [vmem:[#allocation217_spill] sm:$0xff]  ;;  %v16007_v30 = vpack.c.bf16 %v9269_v35, %v9269_v35  ;;  %v19010_v35 = vld [vmem:[#allocation247_spill] sm:$0xff] }
 0xde2   :  { %v16011_v8 = vpack.c.bf16 %v9272_v37, %v9272_v37  ;;  %v19013_v37 = vld [vmem:[#allocation250_spill] sm:$0xff] }
 0xde4   :  { %9341 = vmatpush1.bf16.msra.mxu0 %v18953_v52  ;;  %9505 = vmatpush1.bf16.msra.mxu1 %v18954_v53  ;;  %v18982_v52 = vld [vmem:[#allocation219_spill] sm:$0xff]  ;;  %v18985_v53 = vld [vmem:[#allocation222_spill] sm:$0xff] }
 0xde5   :  { %9342 = vmatprep.subr.bf16.mxu0 %v18955_v58  ;;  %9506 = vmatprep.subr.bf16.mxu1 %v18956_v20  ;;  %v18986_v58 = vld [vmem:[#allocation223_spill] sm:$0xff]  ;;  %v18987_v20 = vld [vmem:[#allocation224_spill] sm:$0xff] }
 0xde8   :  { %9343 = vmatpush1.bf16.msra.mxu0 %v18957_v60  ;;  %9507 = vmatpush1.bf16.msra.mxu1 %v18958_v61  ;;  %v18988_v60 = vld [vmem:[#allocation225_spill] sm:$0xff]  ;;  %v18989_v61 = vld [vmem:[#allocation226_spill] sm:$0xff] }
 0xde9   :  { %9344 = vmatprep.subr.bf16.mxu0 %v18410_v27  ;;  %9508 = vmatprep.subr.bf16.mxu1 %v18959_v62  ;;  %v18969_v27 = vld [vmem:[#allocation203_spill] sm:$0xff] }
 0xdea   :  { %v18990_v62 = vld [vmem:[#allocation227_spill] sm:$0xff] }
 0xdec   :  { %9345 = vmatpush1.bf16.msra.mxu0 %v18960_v3  ;;  %9509 = vmatpush1.bf16.msra.mxu1 %v18961_v56  ;;  %v18991_v3 = vld [vmem:[#allocation228_spill] sm:$0xff]  ;;  %v18992_v56 = vld [vmem:[#allocation229_spill] sm:$0xff] }
 0xded   :  { %9346 = vmatprep.subr.bf16.mxu0 %v18962_v4  ;;  %9510 = vmatprep.subr.bf16.mxu1 %v18963_v5  ;;  %v18993_v4 = vld [vmem:[#allocation230_spill] sm:$0xff]  ;;  %v18994_v5 = vld [vmem:[#allocation231_spill] sm:$0xff] }
 0xdf0   :  { %9347 = vmatpush1.bf16.msra.mxu0 %v18964_v23  ;;  %9511 = vmatpush1.bf16.msra.mxu1 %v18965_v54  ;;  %v18995_v23 = vld [vmem:[#allocation232_spill] sm:$0xff]  ;;  %v18996_v54 = vld [vmem:[#allocation233_spill] sm:$0xff] }
 0xdf1   :  { %9348 = vmatprep.subr.bf16.mxu0 %v18966_v22  ;;  %9512 = vmatprep.subr.bf16.mxu1 %v18967_v59  ;;  %v18997_v22 = vld [vmem:[#allocation234_spill] sm:$0xff]  ;;  %v18998_v59 = vld [vmem:[#allocation235_spill] sm:$0xff] }
 0xdf4   :  { %9349 = vmatpush1.bf16.msra.mxu0 %v18968_v26  ;;  %9513 = vmatpush1.bf16.msra.mxu1 %v18969_v27  ;;  %v18999_v26 = vld [vmem:[#allocation236_spill] sm:$0xff]  ;;  %v19000_v27 = vld [vmem:[#allocation237_spill] sm:$0xff] }
 0xdf5   :  { %9350 = vmatprep.subr.bf16.mxu0 %v18970_v9  ;;  %9514 = vmatprep.subr.bf16.mxu1 %v18971_v28  ;;  %v19001_v9 = vld [vmem:[#allocation238_spill] sm:$0xff]  ;;  %v19002_v28 = vld [vmem:[#allocation239_spill] sm:$0xff] }
 0xdf8   :  { %9351 = vmatpush1.bf16.msra.mxu0 %v18972_v39  ;;  %9515 = vmatpush1.bf16.msra.mxu1 %v18973_v55  ;;  %v19003_v39 = vld [vmem:[#allocation240_spill] sm:$0xff]  ;;  %v19004_v55 = vld [vmem:[#allocation241_spill] sm:$0xff] }
 0xdf9   :  { %9352 = vmatprep.subr.bf16.mxu0 %v18974_v29  ;;  %9516 = vmatprep.subr.bf16.mxu1 %v18975_v31  ;;  %v19006_v29 = vld [vmem:[#allocation243_spill] sm:$0xff]  ;;  %v19007_v31 = vld [vmem:[#allocation244_spill] sm:$0xff] }
 0xdfc   :  { %9353 = vmatpush1.bf16.msra.mxu0 %v18427_v10  ;;  %9517 = vmatpush1.bf16.msra.mxu1 %v18976_v44  ;;  %v18983_v10 = vld [vmem:[#allocation220_spill] sm:$0xff]  ;;  %v19009_v44 = vld [vmem:[#allocation246_spill] sm:$0xff] }
 0xdfd   :  { %9354 = vmatprep.subr.bf16.mxu0 %v18977_v45  ;;  %9518 = vmatprep.subr.bf16.mxu1 %v18978_v46  ;;  %v19011_v45 = vld [vmem:[#allocation248_spill] sm:$0xff]  ;;  %v19012_v46 = vld [vmem:[#allocation249_spill] sm:$0xff] }
 0xe00   :  { %9355 = vmatpush1.bf16.msra.mxu0 %v18979_v50  ;;  %9519 = vmatpush1.bf16.msra.mxu1 %v18980_v51  ;;  %v19014_v50 = vld [vmem:[#allocation251_spill] sm:$0xff]  ;;  %v19015_v51 = vld [vmem:[#allocation252_spill] sm:$0xff] }
 0xe01   :  { %9365 = vmatprep.subr.bf16.mxu0 %v18981_v19  ;;  %9529 = vmatprep.subr.bf16.mxu1 %v18982_v52  ;;  %v19016_v19 = vld [vmem:[#allocation253_spill] sm:$0xff]  ;;  %v19017_v52 = vld [vmem:[#allocation254_spill] sm:$0xff] }
 0xe03   :  { %9357 = vmatmul.mubr.bf16.vlgmr.msra.gmra.mrb[76].mxu0 %v16007_v30  ;;  %9521 = vmatmul.mubr.bf16.vlgmr.msra.gmra.mrb[76].mxu1 %v16007_v30 }
 0xe04   :  { %9366 = vmatpush1.bf16.msra.mxu0 %v18983_v10  ;;  %9397 = vmatprep.mubr.bf16.mxu0 %v16011_v8  ;;  %v19018_v10 = vld [vmem:[#allocation255_spill] sm:$0xff] }
 0xe05   :  { %9530 = vmatpush1.bf16.msra.mxu1 %v18984_v14  ;;  %9561 = vmatprep.mubr.bf16.mxu1 %v16011_v8  ;;  %v19019_v14 = vld [vmem:[#allocation256_spill] sm:$0xff] }
 0xe06   :  { %9367 = vmatprep.subr.bf16.mxu0 %v18985_v53  ;;  %9531 = vmatprep.subr.bf16.mxu1 %v18986_v58  ;;  %v19020_v53 = vld [vmem:[#allocation257_spill] sm:$0xff]  ;;  %v19021_v58 = vld [vmem:[#allocation258_spill] sm:$0xff] }
 0xe08   :  { %9368 = vmatpush1.bf16.msra.mxu0 %v18987_v20  ;;  %v19022_v20 = vld [vmem:[#allocation259_spill] sm:$0xff] }
 0xe09   :  { %9532 = vmatpush1.bf16.msra.mxu1 %v18988_v60  ;;  %9369 = vmatprep.subr.bf16.mxu0 %v18989_v61  ;;  %v19023_v60 = vld [vmem:[#allocation260_spill] sm:$0xff]  ;;  %v19024_v61 = vld [vmem:[#allocation261_spill] sm:$0xff] }
 0xe0a   :  { %9533 = vmatprep.subr.bf16.mxu1 %v18990_v62  ;;  %v19025_v62 = vld [vmem:[#allocation262_spill] sm:$0xff] }
 0xe0c   :  { %9370 = vmatpush1.bf16.msra.mxu0 %v18991_v3  ;;  %v19026_v3 = vld [vmem:[#allocation263_spill] sm:$0xff] }
 0xe0d   :  { %9534 = vmatpush1.bf16.msra.mxu1 %v18992_v56  ;;  %9371 = vmatprep.subr.bf16.mxu0 %v18993_v4  ;;  %v19027_v56 = vld [vmem:[#allocation264_spill] sm:$0xff]  ;;  %v19028_v4 = vld [vmem:[#allocation265_spill] sm:$0xff] }
 0xe0e   :  { %9535 = vmatprep.subr.bf16.mxu1 %v18994_v5  ;;  %v19029_v5 = vld [vmem:[#allocation266_spill] sm:$0xff] }
 0xe10   :  { %9372 = vmatpush1.bf16.msra.mxu0 %v18995_v23  ;;  %v19030_v23 = vld [vmem:[#allocation267_spill] sm:$0xff] }
 0xe11   :  { %9536 = vmatpush1.bf16.msra.mxu1 %v18996_v54  ;;  %9373 = vmatprep.subr.bf16.mxu0 %v18997_v22  ;;  %v19031_v54 = vld [vmem:[#allocation268_spill] sm:$0xff]  ;;  %v19032_v22 = vld [vmem:[#allocation269_spill] sm:$0xff] }
 0xe12   :  { %9537 = vmatprep.subr.bf16.mxu1 %v18998_v59  ;;  %v19033_v59 = vld [vmem:[#allocation270_spill] sm:$0xff] }
 0xe14   :  { %9374 = vmatpush1.bf16.msra.mxu0 %v18999_v26  ;;  %v19034_v26 = vld [vmem:[#allocation271_spill] sm:$0xff] }
 0xe15   :  { %9538 = vmatpush1.bf16.msra.mxu1 %v19000_v27  ;;  %9375 = vmatprep.subr.bf16.mxu0 %v19001_v9  ;;  %v19035_v27 = vld [vmem:[#allocation272_spill] sm:$0xff] }
 0xe16   :  { %9539 = vmatprep.subr.bf16.mxu1 %v19002_v28  ;;  %v19036_v9 = vld [vmem:[#allocation276_spill] sm:$0xff] }
 0xe17   :  { %v9263_v28 = vadd.f32 %v15960_v34, %v19036_v9  ;;  %v19043_v34 = vld [vmem:[#allocation282_spill] sm:$0xff]  ;;  %v19069_v9 = vld [vmem:[#allocation308_spill] sm:$0xff] }
 0xe18   :  { %9376 = vmatpush1.bf16.msra.mxu0 %v19003_v39  ;;  %v19037_v39 = vld [vmem:[#allocation273_spill] sm:$0xff] }
 0xe19   :  { %9540 = vmatpush1.bf16.msra.mxu1 %v19004_v55  ;;  %9377 = vmatprep.subr.bf16.mxu0 %v19005_v2  ;;  %v19038_v55 = vld [vmem:[#allocation274_spill] sm:$0xff]  ;;  %v19039_v2 = vld [vmem:[#allocation275_spill] sm:$0xff] }
 0xe1a   :  { %9541 = vmatprep.subr.bf16.mxu1 %v19006_v29  ;;  %v9266_v29 = vadd.f32 %v15964_v7, %v18489_v49  ;;  %v19048_v7 = vld [vmem:[#allocation287_spill] sm:$0xff] }
 0xe1c   :  { %9378 = vmatpush1.bf16.msra.mxu0 %v19007_v31  ;;  %v9271_v31 = vmax.f32 %v9263_v28, 0.0  ;;  %v19070_v28 = vld [vmem:[#allocation309_spill] sm:$0xff] }
 0xe1d   :  { %9542 = vmatpush1.bf16.msra.mxu1 %v19008_v21  ;;  %9379 = vmatprep.subr.bf16.mxu0 %v19009_v44  ;;  %v19040_v21 = vld [vmem:[#allocation279_spill] sm:$0xff]  ;;  %v19041_v44 = vld [vmem:[#allocation280_spill] sm:$0xff] }
 0xe1e   :  { %9543 = vmatprep.subr.bf16.mxu1 %v19010_v35  ;;  %v19042_v35 = vld [vmem:[#allocation281_spill] sm:$0xff] }
 0xe20   :  { %9380 = vmatpush1.bf16.msra.mxu0 %v19011_v45  ;;  %v9274_v45 = vmax.f32 %v9266_v29, 0.0  ;;  %v19074_v29 = vld [vmem:[#allocation313_spill] sm:$0xff] }
 0xe21   :  { %9544 = vmatpush1.bf16.msra.mxu1 %v19012_v46  ;;  %9381 = vmatprep.subr.bf16.mxu0 %v19013_v37  ;;  %v16082_v46 = vpack.c.bf16 %v9271_v31, %v9271_v31  ;;  %v19044_v37 = vld [vmem:[#allocation283_spill] sm:$0xff]  ;;  %v19075_v31 = vld [vmem:[#allocation314_spill] sm:$0xff] }
 0xe22   :  { %9545 = vmatprep.subr.bf16.mxu1 %v19014_v50  ;;  %v19045_v50 = vld [vmem:[#allocation284_spill] sm:$0xff]  ;;  %v16087_v49 = vpack.c.bf16 %v9274_v45, %v9274_v45  ;;  %v19079_v45 = vld [vmem:[#allocation318_spill] sm:$0xff] }
 0xe24   :  { %9382 = vmatpush1.bf16.msra.mxu0 %v19015_v51  ;;  %v19046_v51 = vld [vmem:[#allocation285_spill] sm:$0xff] }
 0xe25   :  { %9546 = vmatpush1.bf16.msra.mxu1 %v19016_v19  ;;  %9383 = vmatprep.subr.bf16.mxu0 %v19017_v52  ;;  %v19049_v19 = vld [vmem:[#allocation288_spill] sm:$0xff]  ;;  %v19050_v52 = vld [vmem:[#allocation289_spill] sm:$0xff] }
 0xe26   :  { %9547 = vmatprep.subr.bf16.mxu1 %v19018_v10  ;;  %v19051_v10 = vld [vmem:[#allocation290_spill] sm:$0xff] }
 0xe28   :  { %9384 = vmatpush1.bf16.msra.mxu0 %v19019_v14  ;;  %v19052_v14 = vld [vmem:[#allocation291_spill] sm:$0xff] }
 0xe29   :  { %9548 = vmatpush1.bf16.msra.mxu1 %v19020_v53  ;;  %9385 = vmatprep.subr.bf16.mxu0 %v19021_v58  ;;  %v19053_v53 = vld [vmem:[#allocation292_spill] sm:$0xff]  ;;  %v19054_v58 = vld [vmem:[#allocation293_spill] sm:$0xff] }
 0xe2a   :  { %9549 = vmatprep.subr.bf16.mxu1 %v19022_v20  ;;  %v19055_v20 = vld [vmem:[#allocation294_spill] sm:$0xff] }
 0xe2c   :  { %9386 = vmatpush1.bf16.msra.mxu0 %v19023_v60  ;;  %v19056_v60 = vld [vmem:[#allocation295_spill] sm:$0xff] }
 0xe2d   :  { %9550 = vmatpush1.bf16.msra.mxu1 %v19024_v61  ;;  %9387 = vmatprep.subr.bf16.mxu0 %v19025_v62  ;;  %v19057_v61 = vld [vmem:[#allocation296_spill] sm:$0xff]  ;;  %v19058_v62 = vld [vmem:[#allocation297_spill] sm:$0xff] }
 0xe2e   :  { %9551 = vmatprep.subr.bf16.mxu1 %v19026_v3  ;;  %v19059_v3 = vld [vmem:[#allocation298_spill] sm:$0xff] }
 0xe30   :  { %9388 = vmatpush1.bf16.msra.mxu0 %v19027_v56  ;;  %v19060_v56 = vld [vmem:[#allocation299_spill] sm:$0xff] }
 0xe31   :  { %9552 = vmatpush1.bf16.msra.mxu1 %v19028_v4  ;;  %9389 = vmatprep.subr.bf16.mxu0 %v19029_v5  ;;  %v19061_v4 = vld [vmem:[#allocation300_spill] sm:$0xff]  ;;  %v19062_v5 = vld [vmem:[#allocation301_spill] sm:$0xff] }
 0xe32   :  { %9553 = vmatprep.subr.bf16.mxu1 %v19030_v23  ;;  %v19063_v23 = vld [vmem:[#allocation302_spill] sm:$0xff] }
 0xe34   :  { %9390 = vmatpush1.bf16.msra.mxu0 %v19031_v54  ;;  %v19064_v54 = vld [vmem:[#allocation303_spill] sm:$0xff] }
 0xe35   :  { %9554 = vmatpush1.bf16.msra.mxu1 %v19032_v22  ;;  %9391 = vmatprep.subr.bf16.mxu0 %v19033_v59  ;;  %v19065_v22 = vld [vmem:[#allocation304_spill] sm:$0xff]  ;;  %v19066_v59 = vld [vmem:[#allocation305_spill] sm:$0xff] }
 0xe36   :  { %9555 = vmatprep.subr.bf16.mxu1 %v19034_v26  ;;  %v19067_v26 = vld [vmem:[#allocation306_spill] sm:$0xff] }
 0xe38   :  { %9392 = vmatpush1.bf16.msra.mxu0 %v19035_v27  ;;  %v19068_v27 = vld [vmem:[#allocation307_spill] sm:$0xff] }
 0xe39   :  { %9556 = vmatpush1.bf16.msra.mxu1 %v19037_v39  ;;  %9393 = vmatprep.subr.bf16.mxu0 %v19038_v55  ;;  %v19071_v39 = vld [vmem:[#allocation310_spill] sm:$0xff]  ;;  %v19072_v55 = vld [vmem:[#allocation311_spill] sm:$0xff] }
 0xe3a   :  { %9557 = vmatprep.subr.bf16.mxu1 %v19039_v2  ;;  %v19073_v2 = vld [vmem:[#allocation312_spill] sm:$0xff] }
 0xe3c   :  { %9394 = vmatpush1.bf16.msra.mxu0 %v18490_v12  ;;  %v19047_v12 = vld [vmem:[#allocation286_spill] sm:$0xff] }
 0xe3d   :  { %9558 = vmatpush1.bf16.msra.mxu1 %v19040_v21  ;;  %9395 = vmatprep.subr.bf16.mxu0 %v19041_v44  ;;  %v19076_v21 = vld [vmem:[#allocation315_spill] sm:$0xff]  ;;  %v19077_v44 = vld [vmem:[#allocation316_spill] sm:$0xff] }
 0xe3e   :  { %9559 = vmatprep.subr.bf16.mxu1 %v19042_v35  ;;  %v19078_v35 = vld [vmem:[#allocation317_spill] sm:$0xff] }
 0xe40   :  { %9396 = vmatpush1.bf16.msra.mxu0 %v19043_v34  ;;  %v19080_v34 = vld [vmem:[#allocation319_spill] sm:$0xff] }
 0xe41   :  { %9560 = vmatpush1.bf16.msra.mxu1 %v19044_v37  ;;  %9406 = vmatprep.subr.bf16.mxu0 %v19045_v50  ;;  %v19081_v37 = vld [vmem:[#allocation321_spill] sm:$0xff]  ;;  %v19082_v50 = vld [vmem:[#allocation322_spill] sm:$0xff] }
 0xe42   :  { %9570 = vmatprep.subr.bf16.mxu1 %v19046_v51  ;;  %v19083_v51 = vld [vmem:[#allocation323_spill] sm:$0xff] }
 0xe43   :  { %9398 = vmatmul.mubr.bf16.vlgmr.msra.gmra.mrb[76].mxu0 %v16082_v46 }
 0xe44   :  { %9562 = vmatmul.mubr.bf16.vlgmr.msra.gmra.mrb[76].mxu1 %v16082_v46  ;;  %9407 = vmatpush1.bf16.msra.mxu0 %v19047_v12  ;;  %v19084_v12 = vld [vmem:[#allocation325_spill] sm:$0xff] }
 0xe45   :  { %9438 = vmatprep.mubr.bf16.mxu0 %v16087_v49  ;;  %9571 = vmatpush1.bf16.msra.mxu1 %v19048_v7  ;;  %v19085_v7 = vld [vmem:[#allocation326_spill] sm:$0xff] }
 0xe46   :  { %9602 = vmatprep.mubr.bf16.mxu1 %v16087_v49  ;;  %9408 = vmatprep.subr.bf16.mxu0 %v19049_v19  ;;  %v19086_v19 = vld [vmem:[#allocation327_spill] sm:$0xff] }
 0xe47   :  { %9572 = vmatprep.subr.bf16.mxu1 %v19050_v52  ;;  %v19087_v52 = vld [vmem:[#allocation328_spill] sm:$0xff] }
 0xe48   :  { %9409 = vmatpush1.bf16.msra.mxu0 %v19051_v10  ;;  %v19088_v10 = vld [vmem:[#allocation329_spill] sm:$0xff] }
 0xe49   :  { %9573 = vmatpush1.bf16.msra.mxu1 %v19052_v14  ;;  %9410 = vmatprep.subr.bf16.mxu0 %v19053_v53  ;;  %v19089_v14 = vld [vmem:[#allocation330_spill] sm:$0xff]  ;;  %v19091_v53 = vld [vmem:[#allocation332_spill] sm:$0xff] }
 0xe4a   :  { %9574 = vmatprep.subr.bf16.mxu1 %v19054_v58  ;;  %v19092_v58 = vld [vmem:[#allocation333_spill] sm:$0xff] }
 0xe4c   :  { %9411 = vmatpush1.bf16.msra.mxu0 %v19055_v20  ;;  %v19093_v20 = vld [vmem:[#allocation334_spill] sm:$0xff] }
 0xe4d   :  { %9575 = vmatpush1.bf16.msra.mxu1 %v19056_v60  ;;  %9412 = vmatprep.subr.bf16.mxu0 %v19057_v61  ;;  %v19095_v60 = vld [vmem:[#allocation336_spill] sm:$0xff]  ;;  %v19096_v61 = vld [vmem:[#allocation337_spill] sm:$0xff] }
 0xe4e   :  { %9576 = vmatprep.subr.bf16.mxu1 %v19058_v62  ;;  %v19097_v62 = vld [vmem:[#allocation338_spill] sm:$0xff] }
 0xe50   :  { %9413 = vmatpush1.bf16.msra.mxu0 %v19059_v3  ;;  %v9265_v3 = vadd.f32 %v15962_v17, %v14233_v63  ;;  %v19105_v63 = vld [vmem:[#allocation347_spill] sm:$0xff]  ;;  %v19106_v17 = vld [vmem:[#allocation348_spill] sm:$0xff] }
 0xe51   :  { %9577 = vmatpush1.bf16.msra.mxu1 %v19060_v56  ;;  %9414 = vmatprep.subr.bf16.mxu0 %v19061_v4  ;;  %v19098_v56 = vld [vmem:[#allocation339_spill] sm:$0xff]  ;;  %v19099_v4 = vld [vmem:[#allocation340_spill] sm:$0xff] }
 0xe52   :  { %9578 = vmatprep.subr.bf16.mxu1 %v19062_v5  ;;  %v19100_v5 = vld [vmem:[#allocation342_spill] sm:$0xff] }
 0xe54   :  { %9415 = vmatpush1.bf16.msra.mxu0 %v19063_v23  ;;  %v9273_v23 = vmax.f32 %v9265_v3, 0.0  ;;  %v19138_v3 = vld [vmem:[#allocation380_spill] sm:$0xff] }
 0xe55   :  { %9579 = vmatpush1.bf16.msra.mxu1 %v19064_v54  ;;  %9416 = vmatprep.subr.bf16.mxu0 %v19065_v22  ;;  %v19101_v54 = vld [vmem:[#allocation343_spill] sm:$0xff]  ;;  %v19102_v22 = vld [vmem:[#allocation344_spill] sm:$0xff] }
 0xe56   :  { %9580 = vmatprep.subr.bf16.mxu1 %v19066_v59  ;;  %v19103_v59 = vld [vmem:[#allocation345_spill] sm:$0xff] }
 0xe58   :  { %9417 = vmatpush1.bf16.msra.mxu0 %v19067_v26  ;;  %v19104_v26 = vld [vmem:[#allocation346_spill] sm:$0xff] }
 0xe59   :  { %9581 = vmatpush1.bf16.msra.mxu1 %v19068_v27  ;;  %9418 = vmatprep.subr.bf16.mxu0 %v19069_v9  ;;  %v16156_v27 = vpack.c.bf16 %v9273_v23, %v9273_v23  ;;  %v19107_v9 = vld [vmem:[#allocation349_spill] sm:$0xff]  ;;  %v19142_v23 = vld [vmem:[#allocation384_spill] sm:$0xff] }
 0xe5a   :  { %9582 = vmatprep.subr.bf16.mxu1 %v19070_v28  ;;  %v19109_v28 = vld [vmem:[#allocation351_spill] sm:$0xff] }
 0xe5c   :  { %9419 = vmatpush1.bf16.msra.mxu0 %v19071_v39  ;;  %v19110_v39 = vld [vmem:[#allocation352_spill] sm:$0xff] }
 0xe5d   :  { %9583 = vmatpush1.bf16.msra.mxu1 %v19072_v55  ;;  %9420 = vmatprep.subr.bf16.mxu0 %v19073_v2  ;;  %v19111_v55 = vld [vmem:[#allocation353_spill] sm:$0xff]  ;;  %v19112_v2 = vld [vmem:[#allocation354_spill] sm:$0xff] }
 0xe5e   :  { %9584 = vmatprep.subr.bf16.mxu1 %v19074_v29  ;;  %v19113_v29 = vld [vmem:[#allocation355_spill] sm:$0xff] }
 0xe60   :  { %9421 = vmatpush1.bf16.msra.mxu0 %v19075_v31  ;;  %v19114_v31 = vld [vmem:[#allocation356_spill] sm:$0xff] }
 0xe61   :  { %9585 = vmatpush1.bf16.msra.mxu1 %v19076_v21  ;;  %9422 = vmatprep.subr.bf16.mxu0 %v19077_v44  ;;  %v19115_v21 = vld [vmem:[#allocation357_spill] sm:$0xff]  ;;  %v19116_v44 = vld [vmem:[#allocation358_spill] sm:$0xff] }
 0xe62   :  { %9586 = vmatprep.subr.bf16.mxu1 %v19078_v35  ;;  %v19117_v35 = vld [vmem:[#allocation359_spill] sm:$0xff] }
 0xe64   :  { %9423 = vmatpush1.bf16.msra.mxu0 %v19079_v45  ;;  %v19118_v45 = vld [vmem:[#allocation360_spill] sm:$0xff] }
 0xe65   :  { %9587 = vmatpush1.bf16.msra.mxu1 %v19080_v34  ;;  %9424 = vmatprep.subr.bf16.mxu0 %v18532_v25  ;;  %v19090_v25 = vld [vmem:[#allocation331_spill] sm:$0xff]  ;;  %v19119_v34 = vld [vmem:[#allocation361_spill] sm:$0xff] }
 0xe66   :  { %9588 = vmatprep.subr.bf16.mxu1 %v19081_v37  ;;  %v19121_v37 = vld [vmem:[#allocation363_spill] sm:$0xff] }
 0xe68   :  { %9425 = vmatpush1.bf16.msra.mxu0 %v19082_v50  ;;  %v19122_v50 = vld [vmem:[#allocation364_spill] sm:$0xff] }
 0xe69   :  { %9589 = vmatpush1.bf16.msra.mxu1 %v19083_v51  ;;  %9426 = vmatprep.subr.bf16.mxu0 %v18536_v57  ;;  %v19094_v57 = vld [vmem:[#allocation335_spill] sm:$0xff]  ;;  %v19123_v51 = vld [vmem:[#allocation365_spill] sm:$0xff] }
 0xe6a   :  { %9590 = vmatprep.subr.bf16.mxu1 %v19084_v12  ;;  %v19124_v12 = vld [vmem:[#allocation366_spill] sm:$0xff] }
 0xe6c   :  { %9427 = vmatpush1.bf16.msra.mxu0 %v19085_v7  ;;  %v19125_v7 = vld [vmem:[#allocation367_spill] sm:$0xff] }
 0xe6d   :  { %9591 = vmatpush1.bf16.msra.mxu1 %v19086_v19  ;;  %9428 = vmatprep.subr.bf16.mxu0 %v19087_v52  ;;  %v19126_v19 = vld [vmem:[#allocation368_spill] sm:$0xff]  ;;  %v19127_v52 = vld [vmem:[#allocation369_spill] sm:$0xff] }
 0xe6e   :  { %9592 = vmatprep.subr.bf16.mxu1 %v19088_v10  ;;  %v19128_v10 = vld [vmem:[#allocation370_spill] sm:$0xff] }
 0xe70   :  { %9429 = vmatpush1.bf16.msra.mxu0 %v19089_v14  ;;  %v19129_v14 = vld [vmem:[#allocation371_spill] sm:$0xff] }
 0xe71   :  { %9593 = vmatpush1.bf16.msra.mxu1 %v19090_v25  ;;  %9430 = vmatprep.subr.bf16.mxu0 %v19091_v53  ;;  %v19130_v25 = vld [vmem:[#allocation372_spill] sm:$0xff]  ;;  %v19131_v53 = vld [vmem:[#allocation373_spill] sm:$0xff] }
 0xe72   :  { %9594 = vmatprep.subr.bf16.mxu1 %v19092_v58  ;;  %v19132_v58 = vld [vmem:[#allocation374_spill] sm:$0xff] }
 0xe74   :  { %9431 = vmatpush1.bf16.msra.mxu0 %v19093_v20  ;;  %v19133_v20 = vld [vmem:[#allocation375_spill] sm:$0xff] }
 0xe75   :  { %9595 = vmatpush1.bf16.msra.mxu1 %v19094_v57  ;;  %9432 = vmatprep.subr.bf16.mxu0 %v19095_v60  ;;  %v19134_v57 = vld [vmem:[#allocation376_spill] sm:$0xff]  ;;  %v19135_v60 = vld [vmem:[#allocation377_spill] sm:$0xff] }
 0xe76   :  { %9596 = vmatprep.subr.bf16.mxu1 %v19096_v61  ;;  %v19136_v61 = vld [vmem:[#allocation378_spill] sm:$0xff] }
 0xe78   :  { %9433 = vmatpush1.bf16.msra.mxu0 %v19097_v62  ;;  %v19137_v62 = vld [vmem:[#allocation379_spill] sm:$0xff] }
 0xe79   :  { %9597 = vmatpush1.bf16.msra.mxu1 %v19098_v56  ;;  %9434 = vmatprep.subr.bf16.mxu0 %v19099_v4  ;;  %v19139_v56 = vld [vmem:[#allocation381_spill] sm:$0xff]  ;;  %v19140_v4 = vld [vmem:[#allocation382_spill] sm:$0xff] }
 0xe7a   :  { %9598 = vmatprep.subr.bf16.mxu1 %v18551_v1  ;;  %v19108_v1 = vld [vmem:[#allocation350_spill] sm:$0xff] }
 0xe7c   :  { %9435 = vmatpush1.bf16.msra.mxu0 %v19100_v5  ;;  %v19141_v5 = vld [vmem:[#allocation383_spill] sm:$0xff] }
 0xe7d   :  { %9599 = vmatpush1.bf16.msra.mxu1 %v19101_v54  ;;  %9436 = vmatprep.subr.bf16.mxu0 %v19102_v22  ;;  %v19143_v54 = vld [vmem:[#allocation385_spill] sm:$0xff]  ;;  %v19144_v22 = vld [vmem:[#allocation386_spill] sm:$0xff] }
 0xe7e   :  { %9600 = vmatprep.subr.bf16.mxu1 %v19103_v59  ;;  %v19145_v59 = vld [vmem:[#allocation387_spill] sm:$0xff] }
 0xe80   :  { %9437 = vmatpush1.bf16.msra.mxu0 %v19104_v26  ;;  %v19146_v26 = vld [vmem:[#allocation388_spill] sm:$0xff] }
 0xe81   :  { %9601 = vmatpush1.bf16.msra.mxu1 %v19105_v63  ;;  %9611 = vmatprep.subr.bf16.mxu0 %v19106_v17  ;;  %v19147_v63 = vld [vmem:[#allocation389_spill] sm:$0xff]  ;;  %v19148_v17 = vld [vmem:[#allocation390_spill] sm:$0xff] }
 0xe82   :  { %9775 = vmatprep.subr.bf16.mxu1 %v19107_v9  ;;  %v19149_v9 = vld [vmem:[#allocation392_spill] sm:$0xff] }
 0xe83   :  { %9439 = vmatmul.mubr.bf16.vlgmr.msra.gmra.mrb[76].mxu0 %v16156_v27 }
 0xe84   :  { %9603 = vmatmul.mubr.bf16.vlgmr.msra.gmra.mrb[76].mxu1 %v16156_v27  ;;  %9612 = vmatpush1.bf16.msra.mxu0 %v19108_v1  ;;  %v19150_v1 = vld [vmem:[#allocation393_spill] sm:$0xff] }
 0xe85   :  { %9643 = vmatprep.mubr.bf16.mxu0 %v15924_v18  ;;  %9776 = vmatpush1.bf16.msra.mxu1 %v19109_v28  ;;  %v19151_v28 = vld [vmem:[#allocation394_spill] sm:$0xff] }
 0xe86   :  { %9807 = vmatprep.mubr.bf16.mxu1 %v15924_v18  ;;  %9613 = vmatprep.subr.bf16.mxu0 %v19110_v39  ;;  %v19120_v18 = vld [vmem:[#allocation362_spill] sm:$0xff]  ;;  %v19152_v39 = vld [vmem:[#allocation395_spill] sm:$0xff] }
 0xe87   :  { %9777 = vmatprep.subr.bf16.mxu1 %v19111_v55  ;;  %v19153_v55 = vld [vmem:[#allocation396_spill] sm:$0xff] }
 0xe88   :  { %9614 = vmatpush1.bf16.msra.mxu0 %v19112_v2  ;;  %v19154_v2 = vld [vmem:[#allocation397_spill] sm:$0xff] }
 0xe89   :  { %9778 = vmatpush1.bf16.msra.mxu1 %v19113_v29  ;;  %9615 = vmatprep.subr.bf16.mxu0 %v19114_v31  ;;  %v19155_v29 = vld [vmem:[#allocation398_spill] sm:$0xff]  ;;  %v19156_v31 = vld [vmem:[#allocation399_spill] sm:$0xff] }
 0xe8a   :  { %9779 = vmatprep.subr.bf16.mxu1 %v19115_v21  ;;  %v19157_v21 = vld [vmem:[#allocation400_spill] sm:$0xff] }
 0xe8c   :  { %9616 = vmatpush1.bf16.msra.mxu0 %v19116_v44  ;;  %v19158_v44 = vld [vmem:[#allocation401_spill] sm:$0xff] }
 0xe8d   :  { %9780 = vmatpush1.bf16.msra.mxu1 %v19117_v35  ;;  %9617 = vmatprep.subr.bf16.mxu0 %v19118_v45  ;;  %v19160_v35 = vld [vmem:[#allocation404_spill] sm:$0xff]  ;;  %v19161_v45 = vld [vmem:[#allocation405_spill] sm:$0xff] }
 0xe8e   :  { %9781 = vmatprep.subr.bf16.mxu1 %v19119_v34  ;;  %v19162_v34 = vld [vmem:[#allocation406_spill] sm:$0xff] }
 0xe90   :  { %9618 = vmatpush1.bf16.msra.mxu0 %v19120_v18  ;;  %v19163_v18 = vld [vmem:[#allocation407_spill] sm:$0xff] }
 0xe91   :  { %9782 = vmatpush1.bf16.msra.mxu1 %v19121_v37  ;;  %9619 = vmatprep.subr.bf16.mxu0 %v19122_v50  ;;  %v19164_v37 = vld [vmem:[#allocation408_spill] sm:$0xff]  ;;  %v19165_v50 = vld [vmem:[#allocation409_spill] sm:$0xff] }
 0xe92   :  { %9783 = vmatprep.subr.bf16.mxu1 %v19123_v51  ;;  %v19166_v51 = vld [vmem:[#allocation410_spill] sm:$0xff] }
 0xe94   :  { %9620 = vmatpush1.bf16.msra.mxu0 %v19124_v12  ;;  %v19167_v12 = vld [vmem:[#allocation411_spill] sm:$0xff] }
 0xe95   :  { %9784 = vmatpush1.bf16.msra.mxu1 %v19125_v7  ;;  %9621 = vmatprep.subr.bf16.mxu0 %v19126_v19  ;;  %v19168_v7 = vld [vmem:[#allocation412_spill] sm:$0xff]  ;;  %v19169_v19 = vld [vmem:[#allocation413_spill] sm:$0xff] }
 0xe96   :  { %9785 = vmatprep.subr.bf16.mxu1 %v19127_v52  ;;  %v19171_v52 = vld [vmem:[#allocation415_spill] sm:$0xff] }
 0xe98   :  { %9622 = vmatpush1.bf16.msra.mxu0 %v19128_v10  ;;  %v19172_v10 = vld [vmem:[#allocation416_spill] sm:$0xff] }
 0xe99   :  { %9786 = vmatpush1.bf16.msra.mxu1 %v19129_v14  ;;  %9623 = vmatprep.subr.bf16.mxu0 %v19130_v25  ;;  %v19173_v14 = vld [vmem:[#allocation417_spill] sm:$0xff]  ;;  %v19174_v25 = vld [vmem:[#allocation418_spill] sm:$0xff] }
 0xe9a   :  { %9787 = vmatprep.subr.bf16.mxu1 %v19131_v53  ;;  %v19175_v53 = vld [vmem:[#allocation419_spill] sm:$0xff] }
 0xe9c   :  { %9624 = vmatpush1.bf16.msra.mxu0 %v19132_v58  ;;  %v19176_v58 = vld [vmem:[#allocation420_spill] sm:$0xff] }
 0xe9d   :  { %9788 = vmatpush1.bf16.msra.mxu1 %v19133_v20  ;;  %9625 = vmatprep.subr.bf16.mxu0 %v19134_v57  ;;  %v19177_v20 = vld [vmem:[#allocation421_spill] sm:$0xff]  ;;  %v19179_v57 = vld [vmem:[#allocation423_spill] sm:$0xff] }
 0xe9e   :  { %9789 = vmatprep.subr.bf16.mxu1 %v19135_v60  ;;  %v19180_v60 = vld [vmem:[#allocation424_spill] sm:$0xff] }
 0xea0   :  { %9626 = vmatpush1.bf16.msra.mxu0 %v19136_v61  ;;  %v19181_v61 = vld [vmem:[#allocation425_spill] sm:$0xff] }
 0xea1   :  { %9790 = vmatpush1.bf16.msra.mxu1 %v19137_v62  ;;  %9627 = vmatprep.subr.bf16.mxu0 %v19138_v3  ;;  %v19183_v62 = vld [vmem:[#allocation427_spill] sm:$0xff]  ;;  %v19184_v3 = vld [vmem:[#allocation428_spill] sm:$0xff] }
 0xea2   :  { %9791 = vmatprep.subr.bf16.mxu1 %v19139_v56  ;;  %v19185_v56 = vld [vmem:[#allocation429_spill] sm:$0xff] }
 0xea4   :  { %9628 = vmatpush1.bf16.msra.mxu0 %v19140_v4  ;;  %v19186_v4 = vld [vmem:[#allocation430_spill] sm:$0xff] }
 0xea5   :  { %9792 = vmatpush1.bf16.msra.mxu1 %v19141_v5  ;;  %9629 = vmatprep.subr.bf16.mxu0 %v19142_v23  ;;  %v19187_v5 = vld [vmem:[#allocation431_spill] sm:$0xff]  ;;  %v19188_v23 = vld [vmem:[#allocation432_spill] sm:$0xff] }
 0xea6   :  { %9793 = vmatprep.subr.bf16.mxu1 %v19143_v54  ;;  %v19189_v54 = vld [vmem:[#allocation433_spill] sm:$0xff] }
 0xea8   :  { %9630 = vmatpush1.bf16.msra.mxu0 %v19144_v22  ;;  %v19190_v22 = vld [vmem:[#allocation434_spill] sm:$0xff] }
 0xea9   :  { %9794 = vmatpush1.bf16.msra.mxu1 %v19145_v59  ;;  %9631 = vmatprep.subr.bf16.mxu0 %v19146_v26  ;;  %v19191_v59 = vld [vmem:[#allocation435_spill] sm:$0xff]  ;;  %v19192_v26 = vld [vmem:[#allocation436_spill] sm:$0xff] }
 0xeaa   :  { %9795 = vmatprep.subr.bf16.mxu1 %v19147_v63  ;;  %v19193_v63 = vld [vmem:[#allocation437_spill] sm:$0xff] }
 0xeac   :  { %9632 = vmatpush1.bf16.msra.mxu0 %v19148_v17  ;;  %v19194_v17 = vld [vmem:[#allocation438_spill] sm:$0xff] }
 0xead   :  { %9796 = vmatpush1.bf16.msra.mxu1 %v18601_v33  ;;  %9633 = vmatprep.subr.bf16.mxu0 %v19149_v9  ;;  %v19159_v33 = vld [vmem:[#allocation402_spill] sm:$0xff]  ;;  %v19195_v9 = vld [vmem:[#allocation439_spill] sm:$0xff] }
 0xeae   :  { %9797 = vmatprep.subr.bf16.mxu1 %v19150_v1  ;;  %v19196_v1 = vld [vmem:[#allocation440_spill] sm:$0xff] }
 0xeb0   :  { %9634 = vmatpush1.bf16.msra.mxu0 %v19151_v28  ;;  %v19197_v28 = vld [vmem:[#allocation441_spill] sm:$0xff] }
 0xeb1   :  { %9798 = vmatpush1.bf16.msra.mxu1 %v19152_v39  ;;  %9635 = vmatprep.subr.bf16.mxu0 %v19153_v55  ;;  %v19198_v39 = vld [vmem:[#allocation442_spill] sm:$0xff]  ;;  %v19199_v55 = vld [vmem:[#allocation443_spill] sm:$0xff] }
 0xeb2   :  { %9799 = vmatprep.subr.bf16.mxu1 %v19154_v2  ;;  %v19200_v2 = vld [vmem:[#allocation444_spill] sm:$0xff] }
 0xeb4   :  { %9636 = vmatpush1.bf16.msra.mxu0 %v19155_v29  ;;  %v19201_v29 = vld [vmem:[#allocation445_spill] sm:$0xff] }
 0xeb5   :  { %9800 = vmatpush1.bf16.msra.mxu1 %v19156_v31  ;;  %9637 = vmatprep.subr.bf16.mxu0 %v19157_v21  ;;  %v19202_v31 = vld [vmem:[#allocation446_spill] sm:$0xff]  ;;  %v19203_v21 = vld [vmem:[#allocation447_spill] sm:$0xff] }
 0xeb6   :  { %9801 = vmatprep.subr.bf16.mxu1 %v19158_v44  ;;  %v19204_v44 = vld [vmem:[#allocation448_spill] sm:$0xff] }
 0xeb8   :  { %9638 = vmatpush1.bf16.msra.mxu0 %v19159_v33  ;;  %v19205_v33 = vld [vmem:[#allocation449_spill] sm:$0xff] }
 0xeb9   :  { %9802 = vmatpush1.bf16.msra.mxu1 %v18612_v6  ;;  %9639 = vmatprep.subr.bf16.mxu0 %v19160_v35  ;;  %v19170_v6 = vld [vmem:[#allocation414_spill] sm:$0xff] }
 0xeba   :  { %9803 = vmatprep.subr.bf16.mxu1 %v19161_v45  ;;  %v19206_v35 = vld [vmem:[#allocation450_spill] sm:$0xff]  ;;  %v19207_v45 = vld [vmem:[#allocation451_spill] sm:$0xff] }
 0xebc   :  { %9640 = vmatpush1.bf16.msra.mxu0 %v19162_v34  ;;  %v19208_v34 = vld [vmem:[#allocation452_spill] sm:$0xff] }
 0xebd   :  { %9804 = vmatpush1.bf16.msra.mxu1 %v19163_v18  ;;  %9641 = vmatprep.subr.bf16.mxu0 %v19164_v37  ;;  %v19209_v18 = vld [vmem:[#allocation453_spill] sm:$0xff]  ;;  %v19210_v37 = vld [vmem:[#allocation454_spill] sm:$0xff] }
 0xebe   :  { %9805 = vmatprep.subr.bf16.mxu1 %v19165_v50  ;;  %v19211_v50 = vld [vmem:[#allocation455_spill] sm:$0xff] }
 0xec0   :  { %9642 = vmatpush1.bf16.msra.mxu0 %v19166_v51  ;;  %v19212_v51 = vld [vmem:[#allocation456_spill] sm:$0xff] }
 0xec1   :  { %9806 = vmatpush1.bf16.msra.mxu1 %v19167_v12  ;;  %9652 = vmatprep.subr.bf16.mxu0 %v19168_v7  ;;  %v19213_v12 = vld [vmem:[#allocation457_spill] sm:$0xff]  ;;  %v19214_v7 = vld [vmem:[#allocation458_spill] sm:$0xff] }
 0xec2   :  { %9816 = vmatprep.subr.bf16.mxu1 %v19169_v19  ;;  %v19215_v19 = vld [vmem:[#allocation459_spill] sm:$0xff] }
 0xec3   :  { %9644 = vmatmul.mubr.bf16.vlgmr.msra.gmra.mrb[80].mxu0 %v15926_v43 }
 0xec4   :  { %9808 = vmatmul.mubr.bf16.vlgmr.msra.gmra.mrb[80].mxu1 %v15926_v43  ;;  %9653 = vmatpush1.bf16.msra.mxu0 %v19170_v6  ;;  %v19178_v43 = vld [vmem:[#allocation422_spill] sm:$0xff]  ;;  %v19216_v6 = vld [vmem:[#allocation460_spill] sm:$0xff] }
 0xec5   :  { %9684 = vmatprep.mubr.bf16.mxu0 %v15930_v11  ;;  %9817 = vmatpush1.bf16.msra.mxu1 %v19171_v52  ;;  %v19217_v52 = vld [vmem:[#allocation461_spill] sm:$0xff] }
 0xec6   :  { %9848 = vmatprep.mubr.bf16.mxu1 %v15930_v11  ;;  %9654 = vmatprep.subr.bf16.mxu0 %v19172_v10  ;;  %v19182_v11 = vld [vmem:[#allocation426_spill] sm:$0xff] }
 0xec7   :  { %9818 = vmatprep.subr.bf16.mxu1 %v19173_v14  ;;  %v19218_v10 = vld [vmem:[#allocation462_spill] sm:$0xff]  ;;  %v19219_v14 = vld [vmem:[#allocation463_spill] sm:$0xff] }
 0xec8   :  { %9655 = vmatpush1.bf16.msra.mxu0 %v19174_v25  ;;  %v19220_v25 = vld [vmem:[#allocation464_spill] sm:$0xff] }
 0xec9   :  { %9819 = vmatpush1.bf16.msra.mxu1 %v19175_v53  ;;  %9656 = vmatprep.subr.bf16.mxu0 %v19176_v58  ;;  %v19221_v53 = vld [vmem:[#allocation465_spill] sm:$0xff]  ;;  %v19222_v58 = vld [vmem:[#allocation466_spill] sm:$0xff] }
 0xeca   :  { %9820 = vmatprep.subr.bf16.mxu1 %v19177_v20  ;;  %v19223_v20 = vld [vmem:[#allocation467_spill] sm:$0xff] }
 0xecc   :  { %9657 = vmatpush1.bf16.msra.mxu0 %v19178_v43  ;;  %v19224_v43 = vld [vmem:[#allocation468_spill] sm:$0xff] }
 0xecd   :  { %9821 = vmatpush1.bf16.msra.mxu1 %v19179_v57  ;;  %9658 = vmatprep.subr.bf16.mxu0 %v19180_v60  ;;  %v19225_v57 = vld [vmem:[#allocation469_spill] sm:$0xff]  ;;  %v19226_v60 = vld [vmem:[#allocation470_spill] sm:$0xff] }
 0xece   :  { %9822 = vmatprep.subr.bf16.mxu1 %v19181_v61  ;;  %v19227_v61 = vld [vmem:[#allocation471_spill] sm:$0xff] }
 0xed0   :  { %9659 = vmatpush1.bf16.msra.mxu0 %v19182_v11  ;;  %v19228_v11 = vld [vmem:[#allocation472_spill] sm:$0xff] }
 0xed1   :  { %9823 = vmatpush1.bf16.msra.mxu1 %v19183_v62  ;;  %9660 = vmatprep.subr.bf16.mxu0 %v19184_v3  ;;  %v19229_v62 = vld [vmem:[#allocation473_spill] sm:$0xff]  ;;  %v19230_v3 = vld [vmem:[#allocation474_spill] sm:$0xff] }
 0xed2   :  { %9824 = vmatprep.subr.bf16.mxu1 %v19185_v56  ;;  %v19231_v56 = vld [vmem:[#allocation475_spill] sm:$0xff] }
 0xed4   :  { %9661 = vmatpush1.bf16.msra.mxu0 %v19186_v4  ;;  %v19232_v4 = vld [vmem:[#allocation476_spill] sm:$0xff] }
 0xed5   :  { %9825 = vmatpush1.bf16.msra.mxu1 %v19187_v5  ;;  %9662 = vmatprep.subr.bf16.mxu0 %v19188_v23  ;;  %v19233_v5 = vld [vmem:[#allocation477_spill] sm:$0xff]  ;;  %v19234_v23 = vld [vmem:[#allocation478_spill] sm:$0xff] }
 0xed6   :  { %9826 = vmatprep.subr.bf16.mxu1 %v19189_v54  ;;  %v19235_v54 = vld [vmem:[#allocation479_spill] sm:$0xff] }
 0xed8   :  { %9663 = vmatpush1.bf16.msra.mxu0 %v19190_v22  ;;  %v19236_v22 = vld [vmem:[#allocation480_spill] sm:$0xff] }
 0xed9   :  { %9827 = vmatpush1.bf16.msra.mxu1 %v19191_v59  ;;  %9664 = vmatprep.subr.bf16.mxu0 %v19192_v26  ;;  %v19237_v59 = vld [vmem:[#allocation481_spill] sm:$0xff]  ;;  %v19238_v26 = vld [vmem:[#allocation482_spill] sm:$0xff] }
 0xeda   :  { %9828 = vmatprep.subr.bf16.mxu1 %v19193_v63  ;;  %v19239_v63 = vld [vmem:[#allocation483_spill] sm:$0xff] }
 0xedc   :  { %9665 = vmatpush1.bf16.msra.mxu0 %v19194_v17  ;;  %v19240_v17 = vld [vmem:[#allocation484_spill] sm:$0xff] }
 0xedd   :  { %9829 = vmatpush1.bf16.msra.mxu1 %v19195_v9  ;;  %9666 = vmatprep.subr.bf16.mxu0 %v19196_v1  ;;  %v19241_v9 = vld [vmem:[#allocation485_spill] sm:$0xff]  ;;  %v19243_v1 = vld [vmem:[#allocation487_spill] sm:$0xff] }
 0xede   :  { %9830 = vmatprep.subr.bf16.mxu1 %v19197_v28  ;;  %v19244_v28 = vld [vmem:[#allocation488_spill] sm:$0xff] }
 0xee0   :  { %9667 = vmatpush1.bf16.msra.mxu0 %v19198_v39  ;;  %v19245_v39 = vld [vmem:[#allocation489_spill] sm:$0xff] }
 0xee1   :  { %9831 = vmatpush1.bf16.msra.mxu1 %v19199_v55  ;;  %9668 = vmatprep.subr.bf16.mxu0 %v19200_v2  ;;  %v19247_v55 = vld [vmem:[#allocation491_spill] sm:$0xff]  ;;  %v19248_v2 = vld [vmem:[#allocation492_spill] sm:$0xff] }
 0xee2   :  { %9832 = vmatprep.subr.bf16.mxu1 %v19201_v29  ;;  %v19249_v29 = vld [vmem:[#allocation493_spill] sm:$0xff] }
 0xee4   :  { %9669 = vmatpush1.bf16.msra.mxu0 %v19202_v31  ;;  %v19250_v31 = vld [vmem:[#allocation494_spill] sm:$0xff] }
 0xee5   :  { %9833 = vmatpush1.bf16.msra.mxu1 %v19203_v21  ;;  %9670 = vmatprep.subr.bf16.mxu0 %v19204_v44  ;;  %v19251_v21 = vld [vmem:[#allocation495_spill] sm:$0xff]  ;;  %v19252_v44 = vld [vmem:[#allocation496_spill] sm:$0xff] }
 0xee6   :  { %9834 = vmatprep.subr.bf16.mxu1 %v19205_v33  ;;  %v19253_v33 = vld [vmem:[#allocation497_spill] sm:$0xff] }
 0xee8   :  { %9671 = vmatpush1.bf16.msra.mxu0 %v19206_v35  ;;  %v19254_v35 = vld [vmem:[#allocation498_spill] sm:$0xff] }
 0xee9   :  { %9835 = vmatpush1.bf16.msra.mxu1 %v19207_v45  ;;  %9672 = vmatprep.subr.bf16.mxu0 %v19208_v34  ;;  %v19255_v45 = vld [vmem:[#allocation499_spill] sm:$0xff]  ;;  %v19256_v34 = vld [vmem:[#allocation500_spill] sm:$0xff] }
 0xeea   :  { %9836 = vmatprep.subr.bf16.mxu1 %v19209_v18  ;;  %v19257_v18 = vld [vmem:[#allocation501_spill] sm:$0xff] }
 0xeec   :  { %9673 = vmatpush1.bf16.msra.mxu0 %v19210_v37  ;;  %v19258_v37 = vld [vmem:[#allocation502_spill] sm:$0xff] }
 0xeed   :  { %9837 = vmatpush1.bf16.msra.mxu1 %v19211_v50  ;;  %9674 = vmatprep.subr.bf16.mxu0 %v19212_v51  ;;  %v19259_v50 = vld [vmem:[#allocation503_spill] sm:$0xff]  ;;  %v19260_v51 = vld [vmem:[#allocation504_spill] sm:$0xff] }
 0xeee   :  { %9838 = vmatprep.subr.bf16.mxu1 %v19213_v12  ;;  %v19261_v12 = vld [vmem:[#allocation505_spill] sm:$0xff] }
 0xef0   :  { %9675 = vmatpush1.bf16.msra.mxu0 %v19214_v7  ;;  %v19262_v7 = vld [vmem:[#allocation506_spill] sm:$0xff] }
 0xef1   :  { %9839 = vmatpush1.bf16.msra.mxu1 %v19215_v19  ;;  %9676 = vmatprep.subr.bf16.mxu0 %v19216_v6  ;;  %v19263_v19 = vld [vmem:[#allocation507_spill] sm:$0xff]  ;;  %v19264_v6 = vld [vmem:[#allocation508_spill] sm:$0xff] }
 0xef2   :  { %9840 = vmatprep.subr.bf16.mxu1 %v19217_v52  ;;  %v19265_v52 = vld [vmem:[#allocation509_spill] sm:$0xff] }
 0xef4   :  { %9677 = vmatpush1.bf16.msra.mxu0 %v19218_v10  ;;  %v19266_v10 = vld [vmem:[#allocation510_spill] sm:$0xff] }
 0xef5   :  { %9841 = vmatpush1.bf16.msra.mxu1 %v19219_v14  ;;  %9678 = vmatprep.subr.bf16.mxu0 %v19220_v25  ;;  %v19267_v14 = vld [vmem:[#allocation511_spill] sm:$0xff]  ;;  %v19268_v25 = vld [vmem:[#allocation512_spill] sm:$0xff] }
 0xef6   :  { %9842 = vmatprep.subr.bf16.mxu1 %v19221_v53  ;;  %v19269_v53 = vld [vmem:[#allocation513_spill] sm:$0xff] }
 0xef8   :  { %9679 = vmatpush1.bf16.msra.mxu0 %v19222_v58  ;;  %v19270_v58 = vld [vmem:[#allocation514_spill] sm:$0xff] }
 0xef9   :  { %9843 = vmatpush1.bf16.msra.mxu1 %v19223_v20  ;;  %9680 = vmatprep.subr.bf16.mxu0 %v19224_v43  ;;  %v19271_v20 = vld [vmem:[#allocation515_spill] sm:$0xff]  ;;  %v19272_v43 = vld [vmem:[#allocation516_spill] sm:$0xff] }
 0xefa   :  { %9844 = vmatprep.subr.bf16.mxu1 %v19225_v57  ;;  %v19273_v57 = vld [vmem:[#allocation517_spill] sm:$0xff] }
 0xefc   :  { %9681 = vmatpush1.bf16.msra.mxu0 %v19226_v60  ;;  %v19274_v60 = vld [vmem:[#allocation518_spill] sm:$0xff] }
 0xefd   :  { %9845 = vmatpush1.bf16.msra.mxu1 %v19227_v61  ;;  %9682 = vmatprep.subr.bf16.mxu0 %v19228_v11  ;;  %v19275_v61 = vld [vmem:[#allocation519_spill] sm:$0xff]  ;;  %v19276_v11 = vld [vmem:[#allocation520_spill] sm:$0xff] }
 0xefe   :  { %9846 = vmatprep.subr.bf16.mxu1 %v19229_v62  ;;  %v19277_v62 = vld [vmem:[#allocation521_spill] sm:$0xff] }
 0xf00   :  { %9683 = vmatpush1.bf16.msra.mxu0 %v19230_v3  ;;  %v19278_v3 = vld [vmem:[#allocation522_spill] sm:$0xff] }
 0xf01   :  { %9847 = vmatpush1.bf16.msra.mxu1 %v19231_v56  ;;  %9693 = vmatprep.subr.bf16.mxu0 %v19232_v4  ;;  %v19279_v56 = vld [vmem:[#allocation523_spill] sm:$0xff]  ;;  %v19280_v4 = vld [vmem:[#allocation524_spill] sm:$0xff] }
 0xf02   :  { %9857 = vmatprep.subr.bf16.mxu1 %v19233_v5  ;;  %v19281_v5 = vld [vmem:[#allocation525_spill] sm:$0xff] }
 0xf03   :  { %9685 = vmatmul.mubr.bf16.vlgmr.msra.gmra.mrb[80].mxu0 %v16007_v30 }
 0xf04   :  { %9849 = vmatmul.mubr.bf16.vlgmr.msra.gmra.mrb[80].mxu1 %v16007_v30  ;;  %9694 = vmatpush1.bf16.msra.mxu0 %v19234_v23  ;;  %v19242_v30 = vld [vmem:[#allocation486_spill] sm:$0xff] }
 0xf05   :  { %9725 = vmatprep.mubr.bf16.mxu0 %v16011_v8  ;;  %9858 = vmatpush1.bf16.msra.mxu1 %v19235_v54  ;;  %v19282_v23 = vld [vmem:[#allocation526_spill] sm:$0xff]  ;;  %v19283_v54 = vld [vmem:[#allocation527_spill] sm:$0xff] }
 0xf06   :  { %9889 = vmatprep.mubr.bf16.mxu1 %v16011_v8  ;;  %9695 = vmatprep.subr.bf16.mxu0 %v19236_v22  ;;  %v19246_v8 = vld [vmem:[#allocation490_spill] sm:$0xff]  ;;  %v19284_v22 = vld [vmem:[#allocation528_spill] sm:$0xff] }
 0xf07   :  { %9859 = vmatprep.subr.bf16.mxu1 %v19237_v59  ;;  %v19285_v59 = vld [vmem:[#allocation529_spill] sm:$0xff] }
 0xf08   :  { %9696 = vmatpush1.bf16.msra.mxu0 %v19238_v26  ;;  %v19286_v26 = vld [vmem:[#allocation530_spill] sm:$0xff] }
 0xf09   :  { %9860 = vmatpush1.bf16.msra.mxu1 %v19239_v63  ;;  %9697 = vmatprep.subr.bf16.mxu0 %v19240_v17  ;;  %v19287_v63 = vld [vmem:[#allocation531_spill] sm:$0xff]  ;;  %v19288_v17 = vld [vmem:[#allocation532_spill] sm:$0xff] }
 0xf0a   :  { %9861 = vmatprep.subr.bf16.mxu1 %v19241_v9  ;;  %v19289_v9 = vld [vmem:[#allocation533_spill] sm:$0xff] }
 0xf0c   :  { %9698 = vmatpush1.bf16.msra.mxu0 %v19242_v30  ;;  %v19290_v30 = vld [vmem:[#allocation534_spill] sm:$0xff] }
 0xf0d   :  { %9862 = vmatpush1.bf16.msra.mxu1 %v19243_v1  ;;  %9699 = vmatprep.subr.bf16.mxu0 %v19244_v28  ;;  %v19291_v1 = vld [vmem:[#allocation535_spill] sm:$0xff]  ;;  %v19292_v28 = vld [vmem:[#allocation536_spill] sm:$0xff] }
 0xf0e   :  { %9863 = vmatprep.subr.bf16.mxu1 %v19245_v39  ;;  %v19293_v39 = vld [vmem:[#allocation537_spill] sm:$0xff] }
 0xf10   :  { %9700 = vmatpush1.bf16.msra.mxu0 %v19246_v8  ;;  %v19294_v8 = vld [vmem:[#allocation538_spill] sm:$0xff] }
 0xf11   :  { %9864 = vmatpush1.bf16.msra.mxu1 %v19247_v55  ;;  %9701 = vmatprep.subr.bf16.mxu0 %v19248_v2  ;;  %v19295_v55 = vld [vmem:[#allocation539_spill] sm:$0xff]  ;;  %v19296_v2 = vld [vmem:[#allocation540_spill] sm:$0xff] }
 0xf12   :  { %9865 = vmatprep.subr.bf16.mxu1 %v19249_v29  ;;  %v19297_v29 = vld [vmem:[#allocation541_spill] sm:$0xff] }
 0xf14   :  { %9702 = vmatpush1.bf16.msra.mxu0 %v19250_v31  ;;  %v19298_v31 = vld [vmem:[#allocation542_spill] sm:$0xff] }
 0xf15   :  { %9866 = vmatpush1.bf16.msra.mxu1 %v19251_v21  ;;  %9703 = vmatprep.subr.bf16.mxu0 %v19252_v44  ;;  %v19299_v21 = vld [vmem:[#allocation543_spill] sm:$0xff]  ;;  %v19300_v44 = vld [vmem:[#allocation544_spill] sm:$0xff] }
 0xf16   :  { %9867 = vmatprep.subr.bf16.mxu1 %v19253_v33  ;;  %v19301_v33 = vld [vmem:[#allocation545_spill] sm:$0xff] }
 0xf18   :  { %9704 = vmatpush1.bf16.msra.mxu0 %v19254_v35  ;;  %v19302_v35 = vld [vmem:[#allocation546_spill] sm:$0xff] }
 0xf19   :  { %9868 = vmatpush1.bf16.msra.mxu1 %v19255_v45  ;;  %9705 = vmatprep.subr.bf16.mxu0 %v19256_v34  ;;  %v19303_v45 = vld [vmem:[#allocation547_spill] sm:$0xff]  ;;  %v19304_v34 = vld [vmem:[#allocation548_spill] sm:$0xff] }
 0xf1a   :  { %9869 = vmatprep.subr.bf16.mxu1 %v19257_v18  ;;  %v19305_v18 = vld [vmem:[#allocation549_spill] sm:$0xff] }
 0xf1c   :  { %9706 = vmatpush1.bf16.msra.mxu0 %v19258_v37  ;;  %v19307_v37 = vld [vmem:[#allocation551_spill] sm:$0xff] }
 0xf1d   :  { %9870 = vmatpush1.bf16.msra.mxu1 %v19259_v50  ;;  %9707 = vmatprep.subr.bf16.mxu0 %v19260_v51  ;;  %v19308_v50 = vld [vmem:[#allocation552_spill] sm:$0xff]  ;;  %v19309_v51 = vld [vmem:[#allocation553_spill] sm:$0xff] }
 0xf1e   :  { %9871 = vmatprep.subr.bf16.mxu1 %v19261_v12  ;;  %v19311_v12 = vld [vmem:[#allocation555_spill] sm:$0xff] }
 0xf20   :  { %9708 = vmatpush1.bf16.msra.mxu0 %v19262_v7  ;;  %v19312_v7 = vld [vmem:[#allocation556_spill] sm:$0xff] }
 0xf21   :  { %9872 = vmatpush1.bf16.msra.mxu1 %v19263_v19  ;;  %9709 = vmatprep.subr.bf16.mxu0 %v19264_v6  ;;  %v19313_v19 = vld [vmem:[#allocation557_spill] sm:$0xff]  ;;  %v19314_v6 = vld [vmem:[#allocation558_spill] sm:$0xff] }
 0xf22   :  { %9873 = vmatprep.subr.bf16.mxu1 %v19265_v52  ;;  %v19315_v52 = vld [vmem:[#allocation559_spill] sm:$0xff] }
 0xf24   :  { %9710 = vmatpush1.bf16.msra.mxu0 %v19266_v10  ;;  %v19316_v10 = vld [vmem:[#allocation560_spill] sm:$0xff] }
 0xf25   :  { %9874 = vmatpush1.bf16.msra.mxu1 %v19267_v14  ;;  %9711 = vmatprep.subr.bf16.mxu0 %v19268_v25  ;;  %v19317_v25 = vld [vmem:[#allocation561_spill] sm:$0xff] }
 0xf26   :  { %9875 = vmatprep.subr.bf16.mxu1 %v19269_v53 }
 0xf28   :  { %9712 = vmatpush1.bf16.msra.mxu0 %v19270_v58 }
 0xf29   :  { %9876 = vmatpush1.bf16.msra.mxu1 %v19271_v20  ;;  %9713 = vmatprep.subr.bf16.mxu0 %v19272_v43 }
 0xf2a   :  { %9877 = vmatprep.subr.bf16.mxu1 %v19273_v57  ;;  %v19318_v57 = vld [vmem:[#allocation562_spill] sm:$0xff] }
 0xf2c   :  { %9714 = vmatpush1.bf16.msra.mxu0 %v19274_v60 }
 0xf2d   :  { %9878 = vmatpush1.bf16.msra.mxu1 %v19275_v61  ;;  %9715 = vmatprep.subr.bf16.mxu0 %v19276_v11  ;;  %v19319_v11 = vld [vmem:[#allocation564_spill] sm:$0xff] }
 0xf2e   :  { %9879 = vmatprep.subr.bf16.mxu1 %v19277_v62 }
 0xf30   :  { %9716 = vmatpush1.bf16.msra.mxu0 %v19278_v3  ;;  %v19320_v3 = vld [vmem:[#allocation565_spill] sm:$0xff] }
 0xf31   :  { %9880 = vmatpush1.bf16.msra.mxu1 %v19279_v56  ;;  %9717 = vmatprep.subr.bf16.mxu0 %v19280_v4  ;;  %v19321_v56 = vld [vmem:[#allocation566_spill] sm:$0xff]  ;;  %v19322_v4 = vld [vmem:[#allocation567_spill] sm:$0xff] }
 0xf32   :  { %9881 = vmatprep.subr.bf16.mxu1 %v19281_v5  ;;  %v19323_v5 = vld [vmem:[#allocation568_spill] sm:$0xff] }
 0xf34   :  { %9718 = vmatpush1.bf16.msra.mxu0 %v19282_v23  ;;  %v19324_v23 = vld [vmem:[#allocation569_spill] sm:$0xff] }
 0xf35   :  { %9882 = vmatpush1.bf16.msra.mxu1 %v19283_v54  ;;  %9719 = vmatprep.subr.bf16.mxu0 %v19284_v22  ;;  %v19325_v54 = vld [vmem:[#allocation570_spill] sm:$0xff]  ;;  %v19326_v22 = vld [vmem:[#allocation571_spill] sm:$0xff] }
 0xf36   :  { %9883 = vmatprep.subr.bf16.mxu1 %v19285_v59  ;;  %v19327_v59 = vld [vmem:[#allocation572_spill] sm:$0xff] }
 0xf38   :  { %9720 = vmatpush1.bf16.msra.mxu0 %v19286_v26  ;;  %v19329_v26 = vld [vmem:[#allocation574_spill] sm:$0xff] }
 0xf39   :  { %9884 = vmatpush1.bf16.msra.mxu1 %v19287_v63  ;;  %9721 = vmatprep.subr.bf16.mxu0 %v19288_v17  ;;  %v19330_v63 = vld [vmem:[#allocation576_spill] sm:$0xff]  ;;  %v19331_v17 = vld [vmem:[#allocation577_spill] sm:$0xff] }
 0xf3a   :  { %9885 = vmatprep.subr.bf16.mxu1 %v19289_v9  ;;  %v19332_v9 = vld [vmem:[#allocation578_spill] sm:$0xff] }
 0xf3c   :  { %9722 = vmatpush1.bf16.msra.mxu0 %v19290_v30  ;;  %v19333_v30 = vld [vmem:[#allocation580_spill] sm:$0xff] }
 0xf3d   :  { %9886 = vmatpush1.bf16.msra.mxu1 %v19291_v1  ;;  %9723 = vmatprep.subr.bf16.mxu0 %v19292_v28  ;;  %v19334_v1 = vld [vmem:[#allocation582_spill] sm:$0xff]  ;;  %v19335_v28 = vld [vmem:[#allocation583_spill] sm:$0xff] }
 0xf3e   :  { %9887 = vmatprep.subr.bf16.mxu1 %v19293_v39  ;;  %v19336_v39 = vld [vmem:[#allocation585_spill] sm:$0xff] }
 0xf40   :  { %9724 = vmatpush1.bf16.msra.mxu0 %v19294_v8  ;;  %v19338_v8 = vld [vmem:[#allocation588_spill] sm:$0xff] }
 0xf41   :  { %9888 = vmatpush1.bf16.msra.mxu1 %v19295_v55  ;;  %9734 = vmatprep.subr.bf16.mxu0 %v19296_v2  ;;  %v19339_v55 = vld [vmem:[#allocation589_spill] sm:$0xff] }
 0xf42   :  { %9898 = vmatprep.subr.bf16.mxu1 %v19297_v29  ;;  %v19342_v2 = vld [vmem:[#allocation593_spill] sm:$0xff]  ;;  %v19344_v29 = vld [vmem:[#allocation595_spill] sm:$0xff] }
 0xf43   :  { %9726 = vmatmul.mubr.bf16.vlgmr.msra.gmra.mrb[80].mxu0 %v16082_v46 }
 0xf44   :  { %9890 = vmatmul.mubr.bf16.vlgmr.msra.gmra.mrb[80].mxu1 %v16082_v46  ;;  %9735 = vmatpush1.bf16.msra.mxu0 %v19298_v31  ;;  %v19306_v46 = vld [vmem:[#allocation550_spill] sm:$0xff]  ;;  %v19345_v31 = vld [vmem:[#allocation596_spill] sm:$0xff] }
 0xf45   :  { %9766 = vmatprep.mubr.bf16.mxu0 %v16087_v49  ;;  %9899 = vmatpush1.bf16.msra.mxu1 %v19299_v21  ;;  %v19346_v21 = vld [vmem:[#allocation597_spill] sm:$0xff] }
 0xf46   :  { %9930 = vmatprep.mubr.bf16.mxu1 %v16087_v49  ;;  %9736 = vmatprep.subr.bf16.mxu0 %v19300_v44  ;;  %v19310_v49 = vld [vmem:[#allocation554_spill] sm:$0xff] }
 0xf47   :  { %9900 = vmatprep.subr.bf16.mxu1 %v19301_v33  ;;  %v19347_v33 = vld [vmem:[#allocation598_spill] sm:$0xff] }
 0xf48   :  { %9737 = vmatpush1.bf16.msra.mxu0 %v19302_v35  ;;  %v19350_v35 = vld [vmem:[#allocation601_spill] sm:$0xff] }
 0xf49   :  { %9901 = vmatpush1.bf16.msra.mxu1 %v19303_v45  ;;  %9738 = vmatprep.subr.bf16.mxu0 %v19304_v34 }
 0xf4a   :  { %9902 = vmatprep.subr.bf16.mxu1 %v19305_v18  ;;  %v19351_v18 = vld [vmem:[#allocation602_spill] sm:$0xff] }
 0xf4c   :  { %9739 = vmatpush1.bf16.msra.mxu0 %v19306_v46  ;;  %v19352_v46 = vld [vmem:[#allocation603_spill] sm:$0xff] }
 0xf4d   :  { %9903 = vmatpush1.bf16.msra.mxu1 %v19307_v37  ;;  %9740 = vmatprep.subr.bf16.mxu0 %v19308_v50  ;;  %v12314_v37 = vld [vmem:[#allocation23 + $0x40] sm:$0xff]  }
 0xf4e   :  { %9904 = vmatprep.subr.bf16.mxu1 %v19309_v51  ;;  %v12315_v50 = vld [vmem:[#allocation23 + $0xc0] sm:$0xff]  }
 0xf50   :  { %9741 = vmatpush1.bf16.msra.mxu0 %v19310_v49  ;;  %v12316_v49 = vld [vmem:[#allocation23] sm:$0xff]  }
 0xf51   :  { %9905 = vmatpush1.bf16.msra.mxu1 %v19311_v12  ;;  %9742 = vmatprep.subr.bf16.mxu0 %v19312_v7  ;;  %v12317_v12 = vld [vmem:[#allocation23 + $0x80] sm:$0xff]   ;;  %v12318_v7 = vld [vmem:[#allocation23 + $0x48] sm:$0xff]  }
 0xf52   :  { %9906 = vmatprep.subr.bf16.mxu1 %v19313_v19  ;;  %v12319_v19 = vld [vmem:[#allocation23 + $0xc8] sm:$0xff]  }
 0xf54   :  { %9743 = vmatpush1.bf16.msra.mxu0 %v19314_v6  ;;  %v12320_v6 = vld [vmem:[#allocation23 + $0x8] sm:$0xff]  }
 0xf55   :  { %9907 = vmatpush1.bf16.msra.mxu1 %v19315_v52  ;;  %9744 = vmatprep.subr.bf16.mxu0 %v19316_v10  ;;  %v12321_v52 = vld [vmem:[#allocation23 + $0x88] sm:$0xff]   ;;  %v12322_v10 = vld [vmem:[#allocation23 + $0x50] sm:$0xff]  }
 0xf56   :  { %v16388_v14 = vpop.f32.mrb[76].mxu0  ;;  %9908 = vmatprep.subr.bf16.mxu1 %v19317_v25  ;;  %v12323_v25 = vld [vmem:[#allocation23 + $0xd0] sm:$0xff]  }
 0xf57   :  { %v16391_v53 = vpop.f32.mrb[76].mxu1  ;;  %v9442_v58 = vpop.f32.mrb[77].mxu0 }
 0xf58   :  { %v9606_v20 = vpop.f32.mrb[77].mxu1  ;;  %v9444_v43 = vpop.f32.mrb[78].mxu0  ;;  %9745 = vmatpush1.bf16.msra.mxu0 %v19318_v57  ;;  %v12328_v57 = vld [vmem:[#allocation23 + $0x18] sm:$0xff]  }
 0xf59   :  { %v9608_v60 = vpop.f32.mrb[78].mxu1  ;;  %9909 = vmatpush1.bf16.msra.mxu1 %v18772_v16  ;;  %v9445_v61 = vpop.f32.mrb[79].mxu0  ;;  %9746 = vmatprep.subr.bf16.mxu0 %v19319_v11  ;;  %v19328_v16 = vld [vmem:[#allocation573_spill] sm:$0xff]  ;;  %v11668_v44 = vadd.f32 %v9606_v20, %v19346_v21  ;;  %v12326_v20 = vld [vmem:[#allocation23 + $0x58] sm:$0xff]   ;;  %v12331_v11 = vld [vmem:[#allocation23 + $0xe0] sm:$0xff]  }
 0xf5a   :  { %v9609_v62 = vpop.f32.mrb[79].mxu1  ;;  %9910 = vmatprep.subr.bf16.mxu1 %v19320_v3  ;;  %v12327_v43 = vld [vmem:[#allocation23 + $0xd8] sm:$0xff]   ;;  %v12330_v61 = vld [vmem:[#allocation23 + $0x60] sm:$0xff]   ;;  %v12354_v21 = vld [vmem:[#allocation23 + $0x150] sm:$0xff]  }
 0xf5b   :  { %v9942_v34 = vmax.f32 %v11668_v44, 0.0  ;;  %v12329_v60 = vld [vmem:[#allocation23 + $0x98] sm:$0xff]   ;;  %v12332_v62 = vld [vmem:[#allocation23 + $0x20] sm:$0xff]   ;;  %v12355_v44 = vld [vmem:[#allocation23 + $0x1d0] sm:$0xff]  }
 0xf5c   :  { %9747 = vmatpush1.bf16.msra.mxu0 %v19321_v56  ;;  %v12333_v3 = vld [vmem:[#allocation23 + $0xa0] sm:$0xff]   ;;  %v12334_v56 = vld [vmem:[#allocation23 + $0x68] sm:$0xff]  }
 0xf5d   :  { %9911 = vmatpush1.bf16.msra.mxu1 %v19322_v4  ;;  %9748 = vmatprep.subr.bf16.mxu0 %v19323_v5  ;;  %v9950_v51 = vpack.c.bf16 %v9942_v34, %v9942_v34  ;;  %v12335_v4 = vld [vmem:[#allocation23 + $0xe8] sm:$0xff]   ;;  %v12361_v34 = vld [vmem:[#allocation23 + $0x198] sm:$0xff]  }
 0xf5e   :  { %9912 = vmatprep.subr.bf16.mxu1 %v19324_v23  ;;  %v12336_v5 = vld [vmem:[#allocation23 + $0x28] sm:$0xff]  }
 0xf5f   :  { %v19353_v23 = vld [vmem:[#allocation604_spill] sm:$0xff] }
 0xf60   :  { %9749 = vmatpush1.bf16.msra.mxu0 %v19325_v54  ;;  %v11665_v54 = vadd.f32 %v16388_v14, %v19353_v23  ;;  %v12344_v14 = vld [vmem:[#allocation23 + $0x38] sm:$0xff]  }
 0xf61   :  { %9913 = vmatpush1.bf16.msra.mxu1 %v19326_v22  ;;  %9750 = vmatprep.subr.bf16.mxu0 %v19327_v59  ;;  %v12337_v22 = vld [vmem:[#allocation23 + $0xa8] sm:$0xff]   ;;  %v12338_v59 = vld [vmem:[#allocation23 + $0x70] sm:$0xff]  }
 0xf62   :  { %9914 = vmatprep.subr.bf16.mxu1 %v19328_v16  ;;  %v19354_v16 = vld [vmem:[#allocation605_spill] sm:$0xff] }
 0xf64   :  { %9751 = vmatpush1.bf16.msra.mxu0 %v19329_v26  ;;  %v11667_v26 = vadd.f32 %v16391_v53, %v19354_v16 }
 0xf65   :  { %9915 = vmatpush1.bf16.msra.mxu1 %v18784_v0  ;;  %9752 = vmatprep.subr.bf16.mxu0 %v19330_v63  ;;  %v19337_v0 = vld [vmem:[#allocation586_spill] sm:$0xff] }
 0xf66   :  { %9916 = vmatprep.subr.bf16.mxu1 %v19331_v17  ;;  %v12339_v63 = vld [vmem:[#allocation23 + $0xf0] sm:$0xff]  }
 0xf67   :  { %v12340_v17 = vld [vmem:[#allocation23 + $0x30] sm:$0xff]  }
 0xf68   :  { %9753 = vmatpush1.bf16.msra.mxu0 %v19332_v9  ;;  %v9939_v9 = vmax.f32 %v11665_v54, 0.0 }
 0xf69   :  { %9917 = vmatpush1.bf16.msra.mxu1 %v18788_v15  ;;  %9754 = vmatprep.subr.bf16.mxu0 %v19333_v30  ;;  %v19340_v15 = vld [vmem:[#allocation591_spill] sm:$0xff]  ;;  %v12341_v30 = vld [vmem:[#allocation23 + $0xb0] sm:$0xff]  }
 0xf6a   :  { %9918 = vmatprep.subr.bf16.mxu1 %v18790_v47  ;;  %v19341_v47 = vld [vmem:[#allocation592_spill] sm:$0xff] }
 0xf6c   :  { %9755 = vmatpush1.bf16.msra.mxu0 %v19334_v1  ;;  %v12342_v1 = vld [vmem:[#allocation23 + $0x78] sm:$0xff]  }
 0xf6d   :  { %9919 = vmatpush1.bf16.msra.mxu1 %v19335_v28  ;;  %9756 = vmatprep.subr.bf16.mxu0 %v18793_v38  ;;  %v19343_v38 = vld [vmem:[#allocation594_spill] sm:$0xff]  ;;  %v9941_v28 = vmax.f32 %v11667_v26, 0.0 }
 0xf6e   :  { %9920 = vmatprep.subr.bf16.mxu1 %v19336_v39  ;;  %v12343_v39 = vld [vmem:[#allocation23 + $0xf8] sm:$0xff]  }
 0xf6f   :  { %v9949_v53 = vpack.c.bf16 %v9941_v28, %v9941_v28 }
 0xf70   :  { %9757 = vmatpush1.bf16.msra.mxu0 %v19337_v0  ;;  %v9947_v0 = vpack.c.bf16 %v9939_v9, %v9939_v9 }
 0xf71   :  { %9921 = vmatpush1.bf16.msra.mxu1 %v18795_v13  ;;  %9758 = vmatprep.subr.bf16.mxu0 %v19338_v8  ;;  %v11666_v13 = vadd.f32 %v9442_v58, %v15044_v42  ;;  %v12324_v58 = vld [vmem:[#allocation23 + $0x10] sm:$0xff]   ;;  %v12345_v8 = vld [vmem:[#allocation23 + $0xb8] sm:$0xff]  }
 0xf72   :  { %9922 = vmatprep.subr.bf16.mxu1 %v19339_v55  ;;  %v12346_v55 = vld [vmem:[#allocation23 + $0x140] sm:$0xff]  }
 0xf73   :  { %v9940_v45 = vmax.f32 %v11666_v13, 0.0  ;;  %v12353_v13 = vld [vmem:[#allocation23 + $0x188] sm:$0xff]  }
 0xf74   :  { %9759 = vmatpush1.bf16.msra.mxu0 %v15017_v32  ;;  %v19348_v32 = vld [vmem:[#allocation599_spill] sm:$0xff] }
 0xf75   :  { %9923 = vmatpush1.bf16.msra.mxu1 %v18798_v48  ;;  %9760 = vmatprep.subr.bf16.mxu0 %v19340_v15  ;;  %v19349_v48 = vld [vmem:[#allocation600_spill] sm:$0xff]  ;;  %v9948_v42 = vpack.c.bf16 %v9940_v45, %v9940_v45  ;;  %v12360_v45 = vld [vmem:[#allocation23 + $0x118] sm:$0xff]  }
 0xf76   :  { %9924 = vmatprep.subr.bf16.mxu1 %v19341_v47  ;;  %v12347_v15 = vld [vmem:[#allocation23 + $0x1c0] sm:$0xff]  }
 0xf77   :  { %v12348_v47 = vld [vmem:[#allocation23 + $0x100] sm:$0xff]  }
 0xf78   :  { %9761 = vmatpush1.bf16.msra.mxu0 %v19342_v2  ;;  %v12349_v2 = vld [vmem:[#allocation23 + $0x180] sm:$0xff]  }
 0xf79   :  { %9925 = vmatpush1.bf16.msra.mxu1 %v19343_v38  ;;  %9762 = vmatprep.subr.bf16.mxu0 %v19344_v29  ;;  %v12350_v38 = vld [vmem:[#allocation23 + $0x148] sm:$0xff]  }
 0xf7a   :  { %9926 = vmatprep.subr.bf16.mxu1 %v19345_v31  ;;  %v12351_v29 = vld [vmem:[#allocation23 + $0x1c8] sm:$0xff]  }
 0xf7b   :  { %v12352_v31 = vld [vmem:[#allocation23 + $0x108] sm:$0xff]  }
 0xf7c   :  { %9763 = vmatpush1.bf16.msra.mxu0 %v19347_v33  ;;  %v12356_v33 = vld [vmem:[#allocation23 + $0x110] sm:$0xff]  }
 0xf7d   :  { %9927 = vmatpush1.bf16.msra.mxu1 %v19348_v32  ;;  %9764 = vmatprep.subr.bf16.mxu0 %v19349_v48  ;;  %v12357_v32 = vld [vmem:[#allocation23 + $0x190] sm:$0xff]   ;;  %v12358_v48 = vld [vmem:[#allocation23 + $0x158] sm:$0xff]  }
 0xf7e   :  { %9928 = vmatprep.subr.bf16.mxu1 %v19350_v35  ;;  %v12359_v35 = vld [vmem:[#allocation23 + $0x1d8] sm:$0xff]  }
 0xf80   :  { %9765 = vmatpush1.bf16.msra.mxu0 %v19351_v18  ;;  %v12362_v18 = vld [vmem:[#allocation23 + $0x160] sm:$0xff]  }
 0xf81   :  { %9929 = vmatpush1.bf16.msra.mxu1 %v19352_v46  ;;  %11557 = vmatprep.subr.bf16.mxu0 %v12314_v37  ;;  %v12363_v46 = vld [vmem:[#allocation23 + $0x1e0] sm:$0xff]  }
 0xf82   :  { %11579 = vmatprep.subr.bf16.mxu1 %v12315_v50  ;;  %v12364_v37 = vld [vmem:[#allocation23 + $0x120] sm:$0xff]  }
 0xf83   :  { %9767 = vmatmul.mubr.bf16.vlgmr.msra.gmra.mrb[80].mxu0 %v16156_v27  ;;  %v12365_v50 = vld [vmem:[#allocation23 + $0x1a0] sm:$0xff]  }
 0xf84   :  { %9931 = vmatmul.mubr.bf16.vlgmr.msra.gmra.mrb[80].mxu1 %v16156_v27  ;;  %11558 = vmatpush3.bf16.msra.mxu0 %v12316_v49  ;;  %v12325_v27 = vld [vmem:[#allocation23 + $0x90] sm:$0xff]   ;;  %v12368_v49 = vld [vmem:[#allocation23 + $0x128] sm:$0xff]  }
 0xf85   :  { %9987 = vmatprep.mubr.bf16.mxu0 %v9948_v42  ;;  %11580 = vmatpush3.bf16.msra.mxu1 %v12317_v12  ;;  %v12366_v42 = vld [vmem:[#allocation23 + $0x168] sm:$0xff]  }
 0xf86   :  { %10027 = vmatprep.mubr.bf16.mxu1 %v9950_v51  ;;  %11559 = vmatprep.subr.bf16.mxu0 %v12318_v7  ;;  %v12367_v51 = vld [vmem:[#allocation23 + $0x1e8] sm:$0xff]   ;;  %v12370_v7 = vld [vmem:[#allocation23 + $0x170] sm:$0xff]  }
 0xf87   :  { %11581 = vmatprep.subr.bf16.mxu1 %v12319_v19  ;;  %v12369_v12 = vld [vmem:[#allocation23 + $0x1a8] sm:$0xff]   ;;  %v12371_v19 = vld [vmem:[#allocation23 + $0x1f0] sm:$0xff]  }
 0xf88   :  { %11560 = vmatpush3.bf16.msra.mxu0 %v12320_v6  ;;  %v12372_v6 = vld [vmem:[#allocation23 + $0x130] sm:$0xff]  }
 0xf89   :  { %11582 = vmatpush3.bf16.msra.mxu1 %v12321_v52  ;;  %11561 = vmatprep.subr.bf16.mxu0 %v12322_v10  ;;  %v12373_v52 = vld [vmem:[#allocation23 + $0x1b0] sm:$0xff]   ;;  %v12374_v10 = vld [vmem:[#allocation23 + $0x178] sm:$0xff]  }
 0xf8a   :  { %11583 = vmatprep.subr.bf16.mxu1 %v12323_v25  ;;  %v12375_v25 = vld [vmem:[#allocation23 + $0x1f8] sm:$0xff]  }
 0xf8c   :  { %11562 = vmatpush3.bf16.msra.mxu0 %v12324_v58  ;;  %v12376_v58 = vld [vmem:[#allocation23 + $0x138] sm:$0xff]  }
 0xf8d   :  { %11584 = vmatpush3.bf16.msra.mxu1 %v12325_v27  ;;  %11563 = vmatprep.subr.bf16.mxu0 %v12326_v20  ;;  %v12377_v27 = vld [vmem:[#allocation23 + $0x1b8] sm:$0xff]  }
 0xf8e   :  { %11585 = vmatprep.subr.bf16.mxu1 %v12327_v43  ;;  %v19355_v43 = vld [vmem:[#allocation606_spill] sm:$0xff] }
 0xf90   :  { %11564 = vmatpush3.bf16.msra.mxu0 %v12328_v57 }
 0xf91   :  { %11586 = vmatpush3.bf16.msra.mxu1 %v12329_v60  ;;  %11565 = vmatprep.subr.bf16.mxu0 %v12330_v61 }
 0xf92   :  { %11587 = vmatprep.subr.bf16.mxu1 %v12331_v11 }
 0xf94   :  { %11566 = vmatpush3.bf16.msra.mxu0 %v12332_v62 }
 0xf95   :  { %11588 = vmatpush3.bf16.msra.mxu1 %v12333_v3  ;;  %11567 = vmatprep.subr.bf16.mxu0 %v12334_v56 }
 0xf96   :  { %11589 = vmatprep.subr.bf16.mxu1 %v12335_v4 }
 0xf98   :  { %11568 = vmatpush3.bf16.msra.mxu0 %v12336_v5 }
 0xf99   :  { %11590 = vmatpush3.bf16.msra.mxu1 %v12337_v22  ;;  %11569 = vmatprep.subr.bf16.mxu0 %v12338_v59 }
 0xf9a   :  { %11591 = vmatprep.subr.bf16.mxu1 %v12339_v63 }
 0xf9c   :  { %11570 = vmatpush3.bf16.msra.mxu0 %v12340_v17 }
 0xf9d   :  { %11592 = vmatpush3.bf16.msra.mxu1 %v12341_v30  ;;  %11571 = vmatprep.subr.bf16.mxu0 %v12342_v1 }
 0xf9e   :  { %11593 = vmatprep.subr.bf16.mxu1 %v12343_v39 }
 0xfa0   :  { %11572 = vmatpush3.bf16.msra.mxu0 %v12344_v14 }
 0xfa1   :  { %11594 = vmatpush3.bf16.msra.mxu1 %v12345_v8  ;;  %11601 = vmatprep.subr.bf16.mxu0 %v12346_v55 }
 0xfa2   :  { %11623 = vmatprep.subr.bf16.mxu1 %v12347_v15 }
 0xfa3   :  { %9988 = vmatmul.mubr.bf16.vlgmr.msra.gmra.mrb[84].mxu0 %v9947_v0 }
 0xfa4   :  { %10028 = vmatmul.mubr.bf16.vlgmr.msra.gmra.mrb[84].mxu1 %v9949_v53  ;;  %11602 = vmatpush3.bf16.msra.mxu0 %v12348_v47 }
 0xfa5   :  { %11624 = vmatpush3.bf16.msra.mxu1 %v12349_v2  ;;  %11603 = vmatprep.subr.bf16.mxu0 %v12350_v38 }
 0xfa6   :  { %11625 = vmatprep.subr.bf16.mxu1 %v12351_v29 }
 0xfa8   :  { %11604 = vmatpush3.bf16.msra.mxu0 %v12352_v31 }
 0xfa9   :  { %11626 = vmatpush3.bf16.msra.mxu1 %v12353_v13  ;;  %11605 = vmatprep.subr.bf16.mxu0 %v12354_v21 }
 0xfaa   :  { %11627 = vmatprep.subr.bf16.mxu1 %v12355_v44 }
 0xfac   :  { %11606 = vmatpush3.bf16.msra.mxu0 %v12356_v33 }
 0xfad   :  { %11628 = vmatpush3.bf16.msra.mxu1 %v12357_v32  ;;  %11607 = vmatprep.subr.bf16.mxu0 %v12358_v48 }
 0xfae   :  { %11629 = vmatprep.subr.bf16.mxu1 %v12359_v35 }
 0xfb0   :  { %11608 = vmatpush3.bf16.msra.mxu0 %v12360_v45  ;;  %v12378_v45 = vld [vmem:[#allocation25] ss:$0 sm:$0xff] }
 0xfb1   :  { %11630 = vmatpush3.bf16.msra.mxu1 %v12361_v34  ;;  %11609 = vmatprep.subr.bf16.mxu0 %v12362_v18 }
 0xfb2   :  { %11631 = vmatprep.subr.bf16.mxu1 %v12363_v46  ;;  %v12820_v46 = vmov 0.0  }
 0xfb3   :  { %10266 = vst [vmem:[#allocation29] sm:$0xff] %v12820_v46  ;;  %10267 = vst [vmem:[#allocation29 + $0x8] sm:$0xff] %v12820_v46 }
 0xfb4   :  { %11610 = vmatpush3.bf16.msra.mxu0 %v12364_v37 }
 0xfb5   :  { %11632 = vmatpush3.bf16.msra.mxu1 %v12365_v50  ;;  %11611 = vmatprep.subr.bf16.mxu0 %v12366_v42 }
 0xfb6   :  { %11633 = vmatprep.subr.bf16.mxu1 %v12367_v51 }
 0xfb8   :  { %11612 = vmatpush3.bf16.msra.mxu0 %v12368_v49 }
 0xfb9   :  { %11634 = vmatpush3.bf16.msra.mxu1 %v12369_v12  ;;  %11613 = vmatprep.subr.bf16.mxu0 %v12370_v7 }
 0xfba   :  { %11635 = vmatprep.subr.bf16.mxu1 %v12371_v19 }
 0xfbc   :  { %11614 = vmatpush3.bf16.msra.mxu0 %v12372_v6 }
 0xfbd   :  { %11636 = vmatpush3.bf16.msra.mxu1 %v12373_v52  ;;  %11615 = vmatprep.subr.bf16.mxu0 %v12374_v10 }
 0xfbe   :  { %11637 = vmatprep.subr.bf16.mxu1 %v12375_v25 }
 0xfc0   :  { %11616 = vmatpush3.bf16.msra.mxu0 %v12376_v58 }
 0xfc1   :  { %11638 = vmatpush3.bf16.msra.mxu1 %v12377_v27 }
0x1056   :  { %v9768_v20 = vpop.f32.mrb[80].mxu0 }
0x1057   :  { %v11669_v57 = vadd.f32 %v9768_v20, %v19355_v43  ;;  %v9932_v60 = vpop.f32.mrb[80].mxu1  ;;  %v9770_v61 = vpop.f32.mrb[81].mxu0 }
0x1058   :  { %v11671_v11 = vadd.f32 %v9932_v60, %v15100_v24  ;;  %v11670_v62 = vadd.f32 %v9770_v61, %v15105_v41  ;;  %v9934_v3 = vpop.f32.mrb[81].mxu1  ;;  %v9772_v56 = vpop.f32.mrb[82].mxu0 }
0x1059   :  { %v9943_v4 = vmax.f32 %v11669_v57, 0.0  ;;  %v11672_v5 = vadd.f32 %v9934_v3, %v15110_v40  ;;  %v9936_v23 = vpop.f32.mrb[82].mxu1  ;;  %v9773_v54 = vpop.f32.mrb[83].mxu0 }
0x105a   :  { %v9945_v22 = vmax.f32 %v11671_v11, 0.0  ;;  %v9944_v59 = vmax.f32 %v11670_v62, 0.0  ;;  %v9937_v16 = vpop.f32.mrb[83].mxu1 }
0x105b   :  { %v9946_v26 = vmax.f32 %v11672_v5, 0.0  ;;  %v9951_v17 = vpack.c.bf16 %v9943_v4, %v9943_v4 }
0x105c   :  { %v9952_v63 = vpack.c.bf16 %v9944_v59, %v9944_v59  ;;  %v9953_v30 = vpack.c.bf16 %v9945_v22, %v9945_v22 }
0x105d   :  { %v9954_v9 = vpack.c.bf16 %v9946_v26, %v9946_v26 }
0x105e   :  { %10067 = vmatprep.mubr.bf16.mxu0 %v9952_v63 }
0x105f   :  { %10107 = vmatprep.mubr.bf16.mxu1 %v9954_v9  ;;  %10068 = vmatmul.mubr.bf16.vlgmr.msra.gmra.mrb[88].mxu0 %v9951_v17 }
0x1060   :  { %10108 = vmatmul.mubr.bf16.vlgmr.msra.gmra.mrb[88].mxu1 %v9953_v30 }
0x1076   :  { %v11573_v24 = vpop.f32.mrb[84].mxu0 }
0x1077   :  { %v11595_v41 = vpop.f32.mrb[84].mxu1  ;;  %v11574_v1 = vpop.f32.mrb[85].mxu0 }
0x1078   :  { %v11575_v28 = vadd.f32 %v11574_v1, %v11573_v24  ;;  %v11596_v39 = vpop.f32.mrb[85].mxu1  ;;  %v11576_v40 = vpop.f32.mrb[86].mxu0 }
0x1079   :  { %v11597_v14 = vadd.f32 %v11596_v39, %v11595_v41  ;;  %v11598_v0 = vpop.f32.mrb[86].mxu1  ;;  %v11577_v8 = vpop.f32.mrb[87].mxu0 }
0x107a   :  { %v11599_v55 = vpop.f32.mrb[87].mxu1 }
0x107b   :  { %v10030_v53 = vadd.f32 %v11597_v14, %v11575_v28 }
0x1132   :  { %v11617_v15 = vpop.f32.mrb[88].mxu0 }
0x1133   :  { %v11639_v47 = vpop.f32.mrb[88].mxu1  ;;  %v11618_v2 = vpop.f32.mrb[89].mxu0 }
0x1134   :  { %v11619_v38 = vadd.f32 %v11618_v2, %v11617_v15  ;;  %v11640_v29 = vpop.f32.mrb[89].mxu1  ;;  %v11620_v31 = vpop.f32.mrb[90].mxu0 }
0x1135   :  { %v11641_v13 = vadd.f32 %v11640_v29, %v11639_v47  ;;  %v11642_v21 = vpop.f32.mrb[90].mxu1  ;;  %v11621_v44 = vpop.f32.mrb[91].mxu0 }
0x1136   :  { %v10070_v33 = vadd.f32 %v11619_v38, %v10030_v53  ;;  %v11643_v32 = vpop.f32.mrb[91].mxu1 }
0x1138   :  { %v10110_v48 = vadd.f32 %v11641_v13, %v10070_v33 }
0x113a   :  { %v10115_v35 = vadd.f32 %v10110_v48, %v15817_v36 }
0x113c   :  { %v16448_v34 = vadd.f32 %v12378_v45, %v10115_v35 }
0x113e   :  { %10117 = vst [vmem:[#allocation27] sm:$0xff] %v16448_v34  ;;  %v10118_v18 = vmul.f32 %v16448_v34, %v16448_v34 }
0x1140   :  { %10120 = vrot.lane.b32.xlu0 %v10118_v18, %s12817_s14 }
0x1144   :  { %10124 = vrot.lane.b32.xlu0 %v10118_v18, %s12818_s2 }
0x1148   :  { %10149 = vrot.lane.b32.xlu0 %v16448_v34, %s12819_s20 }
0x11b2   :  { %v10121_v36 = vpop.permute.xlu0 %10120 }
0x11b3   :  { %v10123_v37 = vadd.f32 %v10121_v36, %v10118_v18 }
0x11b6   :  { %v10125_v50 = vpop.permute.xlu0 %10124 }
0x11b7   :  { %v10127_v42 = vadd.f32 %v10125_v50, %v10123_v37 }
0x11b9   :  { %12239 = vrsqrt.f32 %v10127_v42  ;;  %vm10130_vm0 = vcmp.eq.f32.partialorder %v10127_v42, inf  ;;  %v10133_v12 = vand.u32 2147483648, %v10127_v42  ;;  %vm10132_vm1 = vcmp.eq.f32.partialorder %v10127_v42, 0.0 }
0x11ba   :  { %v10150_v27 = vpop.permute.xlu0 %10149 }
0x11c3   :  { %v12240_v51 = vpop.eup %12239 }
0x11c4   :  { %v10129_v49 = vmul.f32 %v12240_v51, %v10127_v42 }
0x11c6   :  { %v10131_v7 = vsel %vm10130_vm0, %v10127_v42, %v10129_v49 }
0x11c7   :  { %v10134_v19 = vsel %vm10132_vm1, %v10133_v12, %v10131_v7 }
0x11c8   :  { %v10135_v6 = vmax.f32 %v10134_v19, 1e-12 }
0x11ca   :  { %12241 = vrcp.f32 %v10135_v6 }
0x11d4   :  { %v12242_v52 = vpop.eup %12241 }
0x11d5   :  { %10140 = vrot.lane.b32.xlu1 %v12242_v52, %s12809_s23  ;;  %v16459_v10 = vmul.f32 %v12242_v52, %v16448_v34 }
0x11d7   :  { %10269 = vst.msk [vmem:[#allocation29] sm:$0xff] %vm10268_vm2, %v16459_v10  ;;  %v10152_v11 = vmul.f32 %v10150_v27, %v16459_v10 }
0x11d9   :  { %10144 = vrot.lane.b32.xlu1 %v12242_v52, %s12802_s29 }
0x1247   :  { %v10141_v25 = vpop.permute.xlu1 %10140 }
0x1248   :  { %v16465_v58 = vmul.f32 %v10141_v25, %v16448_v34 }
0x124a   :  { %v10153_v20 = vmul.f32 %v10150_v27, %v16465_v58  ;;  %10271 = vst.msk [vmem:[#allocation29] sm:$0xff] %vm10270_vm3, %v16465_v58 }
0x124b   :  { %v10145_v43 = vpop.permute.xlu1 %10144 }
0x124c   :  { %v16470_v57 = vmul.f32 %v10145_v43, %v16448_v34  ;;  %10155 = vrot.lane.b32.xlu1 %v10153_v20, %s12817_s14 }
0x124e   :  { %v10159_v60 = vmul.f32 %v10150_v27, %v16470_v57  ;;  %10273 = vst.msk [vmem:[#allocation29] sm:$0xff] %vm10272_vm4, %v16470_v57 }
0x1250   :  { %10161 = vrot.lane.b32.xlu0 %v10159_v60, %s12818_s2  ;;  %10172 = vrot.lane.b32.xlu1 %v16465_v58, %s12817_s14 }
0x1254   :  { %10182 = vrot.lane.b32.xlu0 %v16470_v57, %s12818_s2 }
0x12be   :  { %v10156_v61 = vpop.permute.xlu1 %10155 }
0x12bf   :  { %v10158_v62 = vadd.f32 %v10156_v61, %v10152_v11 }
0x12c2   :  { %v10162_v3 = vpop.permute.xlu0 %10161  ;;  %v10173_v4 = vpop.permute.xlu1 %10172 }
0x12c3   :  { %v10164_v56 = vadd.f32 %v10162_v3, %v10158_v62 }
0x12c5   :  { %v10175_v5 = vmul.f32 %v10173_v4, %v10164_v56  ;;  %v10165_v22 = vmul.f32 %v10164_v56, %v16459_v10 }
0x12c6   :  { %v10183_v23 = vpop.permute.xlu0 %10182 }
0x12c7   :  { %v10185_v54 = vmul.f32 %v10183_v23, %v10164_v56  ;;  %10177 = vrot.lane.b32.xlu1 %v10175_v5, %s12805_s27 }
0x12c9   :  { %10187 = vrot.lane.b32.xlu0 %v10185_v54, %s12819_s20 }
0x12cb   :  { %10167 = vrot.lane.b32.xlu1 %v10165_v22, %s12821_s30 }
0x1339   :  { %v10178_v59 = vpop.permute.xlu1 %10177 }
0x133a   :  { %v10180_v16 = vsub.f32 %v16448_v34, %v10178_v59 }
0x133b   :  { %v10188_v26 = vpop.permute.xlu0 %10187 }
0x133c   :  { %v10192_v63 = vmul.f32 %v10180_v16, %v10180_v16  ;;  %v10190_v17 = vsub.f32 %v16448_v34, %v10188_v26 }
0x133d   :  { %v10168_v30 = vpop.permute.xlu1 %10167 }
0x133e   :  { %v10198_v9 = vmul.f32 %v10190_v17, %v10190_v17  ;;  %10194 = vrot.lane.b32.xlu0 %v10192_v63, %s12817_s14  ;;  %v10170_v24 = vsub.f32 %v16448_v34, %v10168_v30 }
0x1340   :  { %10200 = vrot.lane.b32.xlu1 %v10198_v9, %s12818_s2  ;;  %v10191_v41 = vmul.f32 %v10170_v24, %v10170_v24 }
0x13b0   :  { %v10195_v1 = vpop.permute.xlu0 %10194 }
0x13b1   :  { %v10197_v28 = vadd.f32 %v10195_v1, %v10191_v41 }
0x13b2   :  { %v10201_v39 = vpop.permute.xlu1 %10200 }
0x13b3   :  { %v10203_v40 = vadd.f32 %v10201_v39, %v10197_v28 }
0x13b5   :  { %12243 = vrsqrt.f32 %v10203_v40  ;;  %vm10206_vm5 = vcmp.eq.f32.partialorder %v10203_v40, inf  ;;  %v10209_v8 = vand.u32 2147483648, %v10203_v40  ;;  %vm10208_vm6 = vcmp.eq.f32.partialorder %v10203_v40, 0.0 }
0x13bf   :  { %v12244_v14 = vpop.eup %12243 }
0x13c0   :  { %v10205_v0 = vmul.f32 %v12244_v14, %v10203_v40 }
0x13c2   :  { %v10207_v55 = vsel %vm10206_vm5, %v10203_v40, %v10205_v0 }
0x13c3   :  { %v10210_v53 = vsel %vm10208_vm6, %v10209_v8, %v10207_v55 }
0x13c4   :  { %v10211_v15 = vmax.f32 %v10210_v53, 1e-12 }
0x13c6   :  { %12245 = vrcp.f32 %v10211_v15 }
0x13d0   :  { %v12246_v47 = vpop.eup %12245 }
0x13d1   :  { %10220 = vrot.lane.b32.xlu1 %v12246_v47, %s12802_s29  ;;  %10216 = vrot.lane.b32.xlu0 %v12246_v47, %s12809_s23  ;;  %v10214_v2 = vmul.f32 %v12246_v47, %v10170_v24  ;;  %s12822_s23 = smov [#allocation27]  }
0x13d2   :  { %s10309_s5 = sshll.u32 %s12822_s23, 4  ;;  %s10310_s5 = int_to_ptr.vmem [resolvable:$true] %s10309_s5 }
0x13d3   :  { %10275 = vst.msk [vmem:[#allocation29] sm:$0xff] %vm10274_vm7, %v10214_v2  ;;  %s12709_s26 = scalar_lea.vmem %s10310_s5, 128  ;;  %p12714_p9 = scmp.lt.s32.totalorder %s10310_s5, %s10310_s5 }
0x13d4   :  { %p12710_p8 = scmp.ne.s32.totalorder %s10310_s5, %s12709_s26  ;;  %p12715_p10 = scmp.lt.s32.totalorder %s12709_s26, %s12709_s26 }
0x13d6   :  { %p12716_p11 = por %p12715_p10, %p12714_p9 }
0x13d8   :  { %p12717_p12 = pnand %p12716_p11, %p12710_p8 }
0x1443   :  { %v10221_v38 = vpop.permute.xlu1 %10220  ;;  %v10217_v29 = vpop.permute.xlu0 %10216 }
0x1444   :  { %v10223_v31 = vmul.f32 %v10221_v38, %v10190_v17  ;;  %v10219_v13 = vmul.f32 %v10217_v29, %v10180_v16 }
0x1446   :  { %10244 = vrot.lane.b32.xlu1 %v10223_v31, %s12821_s30  ;;  %10230 = vrot.lane.b32.xlu0 %v10219_v13, %s12818_s2  ;;  %10277 = vst.msk [vmem:[#allocation29] sm:$0xff] %vm10276_vm8, %v10219_v13 }
0x1447   :  { %10279 = vst.msk [vmem:[#allocation29] sm:$0xff] %vm10278_vm9, %v10223_v31 }
0x144a   :  { %10257 = vrot.lane.b32.xlu0 %v10214_v2, %s12818_s2  ;;  %10240 = vrot.lane.b32.xlu1 %v10214_v2, %s12817_s14 }
0x144e   :  { %10225 = vrot.lane.b32.xlu0 %v10223_v31, %s12805_s27 }
0x14b8   :  { %v10245_v21 = vpop.permute.xlu1 %10244  ;;  %v10231_v44 = vpop.permute.xlu0 %10230 }
0x14b9   :  { %v10247_v33 = vmul.f32 %v10245_v21, %v16459_v10  ;;  %v10233_v32 = vmul.f32 %v10231_v44, %v16470_v57 }
0x14bb   :  { %10249 = vrot.lane.b32.xlu0 %v10247_v33, %s12802_s29  ;;  %10235 = vrot.lane.b32.xlu1 %v10233_v32, %s12817_s14 }
0x14bc   :  { %v10258_v48 = vpop.permute.xlu0 %10257 }
0x14bd   :  { %v10260_v35 = vmul.f32 %v10258_v48, %v16465_v58 }
0x14bf   :  { %10262 = vrot.lane.b32.xlu0 %v10260_v35, %s12817_s14  ;;  %10253 = vrot.lane.b32.xlu1 %v10219_v13, %s12805_s27 }
0x14c0   :  { %12720 = shalt.err (!%p12717_p12)
}
0x14c1   :  { %s12721_s25 = scalar_lea.hbm %s16562_s16, 128 }
0x14c2   :  { %p12722_p13 = scmp.ne.s32.totalorder %s16562_s16, %s12721_s25  ;;  %p12725_p0 = scmp.lt.u32.totalorder %s12721_s25, %s16562_s16 }
0x14c4   :  { %p12727_p1 = pnand %p12725_p0, %p12722_p13 }
0x14c6   :  { %12730 = shalt.err (!%p12727_p1)
}
0x14c7   :  { %10312 = dma.vmem_to_hbm [thread:$0]  %s10310_s5, 128, %s16562_s16, [#allocation28]  }
0x14c8   :  { %s12731_s21 = scalar_lea.vmem %s10300_s19, 128  ;;  %p12736_p3 = scmp.lt.s32.totalorder %s10300_s19, %s10300_s19 }
0x14c9   :  { %p12732_p2 = scmp.ne.s32.totalorder %s10300_s19, %s12731_s21  ;;  %p12737_p4 = scmp.lt.s32.totalorder %s12731_s21, %s12731_s21 }
0x14cb   :  { %p12738_p5 = por %p12737_p4, %p12736_p3 }
0x14cd   :  { %p12739_p6 = pnand %p12738_p5, %p12732_p2 }
0x14cf   :  { %12742 = shalt.err (!%p12739_p6)
}
0x14d0   :  { %s12743_s7 = scalar_lea.hbm %s16561_s15, 128 }
0x14d1   :  { %p12744_p7 = scmp.ne.s32.totalorder %s16561_s15, %s12743_s7  ;;  %p12747_p8 = scmp.lt.u32.totalorder %s12743_s7, %s16561_s15 }
0x14d3   :  { %p12749_p9 = pnand %p12747_p8, %p12744_p7 }
0x14d5   :  { %12752 = shalt.err (!%p12749_p9)
}
0x14d6   :  { %10302 = dma.vmem_to_hbm [thread:$0]  %s10300_s19, 128, %s16561_s15, [#allocation4]   ;;  %v10241_v45 = vpop.permute.xlu1 %10240  ;;  %v10226_v34 = vpop.permute.xlu0 %10225  ;;  %vm10284_vm10 = vcmask 917248   ;;  %vm10290_vm11 = vcmask 1048448  }
0x14d7   :  { %v10243_v18 = vmul.f32 %v10241_v45, %v16470_v57  ;;  %v10228_v46 = vmul.f32 %v10226_v34, %v16465_v58  ;;  %s12824_s15 = smov [#allocation29]  }
0x14d8   :  { %s10319_s1 = sshll.u32 %s12824_s15, 4  ;;  %s10320_s1 = int_to_ptr.vmem [resolvable:$true] %s10319_s1 }
0x14d9   :  { %s12753_s14 = scalar_lea.vmem %s10320_s1, 256  ;;  %p12758_p11 = scmp.lt.s32.totalorder %s10320_s1, %s10320_s1 }
0x14da   :  { %p12754_p10 = scmp.ne.s32.totalorder %s10320_s1, %s12753_s14  ;;  %p12759_p12 = scmp.lt.s32.totalorder %s12753_s14, %s12753_s14 }
0x14dc   :  { %p12760_p13 = por %p12759_p12, %p12758_p11 }
0x14de   :  { %p12761_p0 = pnand %p12760_p13, %p12754_p10 }
0x152d   :  { %v10250_v36 = vpop.permute.xlu0 %10249  ;;  %v10236_v37 = vpop.permute.xlu1 %10235 }
0x152e   :  { %v10252_v50 = vsub.f32 %v10243_v18, %v10250_v36  ;;  %v10238_v42 = vsub.f32 %v10228_v46, %v10236_v37 }
0x1530   :  { %10287 = vrot.lane.b32.xlu0 %v10252_v50, %s12819_s20  ;;  %10281 = vrot.lane.b32.xlu1 %v10238_v42, %s12819_s20 }
0x1531   :  { %v10254_v51 = vpop.permute.xlu1 %10253  ;;  %v10263_v12 = vpop.permute.xlu0 %10262 }
0x1532   :  { %v10256_v49 = vmul.f32 %v10254_v51, %v16459_v10 }
0x1534   :  { %v10265_v7 = vsub.f32 %v10256_v49, %v10263_v12 }
0x1536   :  { %10292 = vst.msk [vmem:[#allocation29 + $0x8] sm:$0xff] %vm10268_vm2, %v10265_v7 }
0x15a2   :  { %v10288_v19 = vpop.permute.xlu0 %10287  ;;  %v10282_v6 = vpop.permute.xlu1 %10281 }
0x15a3   :  { %10285 = vst.msk [vmem:[#allocation29] sm:$0xff] %vm10284_vm10, %v10282_v6 }
0x15a4   :  { %10291 = vst.msk [vmem:[#allocation29] sm:$0xff] %vm10290_vm11, %v10288_v19 }
0x15a5   :  { %12764 = shalt.err (!%p12761_p0)
}
0x15a6   :  { %s12765_s30 = scalar_lea.hbm %s16563_s17, 256 }
0x15a7   :  { %p12766_p1 = scmp.ne.s32.totalorder %s16563_s17, %s12765_s30  ;;  %p12769_p2 = scmp.lt.u32.totalorder %s12765_s30, %s16563_s17 }
0x15a9   :  { %p12771_p3 = pnand %p12769_p2, %p12766_p1 }
0x15ab   :  { %12774 = shalt.err (!%p12771_p3)
}
0x15ac   :  { %10322 = dma.vmem_to_hbm [thread:$0]  %s10320_s1, 256, %s16563_s17, [#allocation28]  }
0x15ad   :  { %12791 = dma.done.wait [#allocation4], 128  }
0x15ae   :  { %12792 = vsyncadd [#allocation4], 4294967168 }
0x15af   :  { %12793 = dma.done.wait [#allocation28], 384  }
0x15b0   :  { %12794 = vsyncadd [#allocation28], 4294966912 }
0x15b1   :  { %10332 = vsyncpa [#allocation3], 1 }
0x15b2   :  { %10333 = vsyncpa [#allocation6], 1 }
0x15b3   :  { %10334 = vsyncpa [#allocation9], 1 }
0x15b4   :  { %10335 = vsyncpa [#allocation12], 1 }
0x15b5   :  { %10336 = vsyncpa [#allocation15], 1 }
0x15b6   :  { %10337 = vsyncpa [#allocation18], 1 }
0x15b7   :  { %10338 = vsyncpa [#allocation21], 1 }
0x15b8   :  { %10339 = vsyncpa [#allocation24], 1 }
0x15b9   :  { %10340 = vsyncpa [#allocation4], 1 }
0x15ba   :  { %10341 = vsyncpa [#allocation28], 1 }

</bundles_post_ra>
